<compile_context>
chip_gen: v7x
topology: tpu7x:2x2x1
jax: 0.10.0
libtpu: 0.0.40
codegen_flags: <defaults>
</compile_context>

<pallas_src>
import functools

import jax
import jax.numpy as jnp
from jax.experimental import pallas as pl
from jax.experimental.pallas import tpu as pltpu


def _round_up(x, m):
    return ((x + m - 1) // m) * m


# ----------------------------------------------------------------------------
# Fused Pallas kernel: conv1(k8,s4)+ReLU -> conv2(k4,s2)+ReLU for B_TILE images.
# ----------------------------------------------------------------------------
def _fused_impala_kernel(x_ref, w1_ref, b1_ref, w2_ref, b2_ref, o_ref,
                         *, wbp, r_mid, r_out):
    """One grid step = B_TILE images.

    x_ref : (4, 1, r_in, blk)  flattened parity grids; row b*s_img + i*wbp + j along
            axis 2 holds the 4x4xC input block of image b at parity-grid coords (i,j)
            for parity k = 2*rp + cp (axis 0).  blk = 64, values in (dh, dw, c) order.
    w1_ref: (4*blk, 16)  conv1 weight, rows (bh, bw, dh, dw, c); 1/255 folded in.
    b1_ref: (1, 16)
    w2_ref: (256, 32)    conv2 weight, rows (kh, kw, c).
    b2_ref: (1, 32)
    o_ref : (r_out, 32)  conv2 output; row b*s_img + r*wbp + c = output pixel (r, c)
            of image b (rows past the valid (r, c) range are garbage).
    """
    w1 = w1_ref[...]
    b1 = b1_ref[...]
    w2 = w2_ref[...]
    b2 = b2_ref[...]

    # ---- conv1 (k=8, s=4) + bias + ReLU ---------------------------------------
    # For output parity (ph, pw), the 4 kernel 4x4 blocks of every patch come from
    # 4 whole-window contiguous slices of the flat parity grids (offsets 0/1/wbp/wbp+1),
    # so im2col is 4 big ref slices + one lane concat per parity.
    y1 = []                                    # index par = 2*ph + pw, each (r_mid, 16)
    for ph in range(2):
        for pw in range(2):
            q0 = x_ref[2 * ph + pw, 0, 0:r_mid, :]
            q1 = x_ref[2 * ph + (1 - pw), 0, pw:pw + r_mid, :]
            q2 = x_ref[2 * (1 - ph) + pw, 0, ph * wbp:ph * wbp + r_mid, :]
            q3 = x_ref[2 * (1 - ph) + (1 - pw), 0,
                       ph * wbp + pw:ph * wbp + pw + r_mid, :]
            patches = jnp.concatenate([q0, q1, q2, q3], axis=-1)   # (r_mid, 4*blk)
            y = jnp.dot(patches, w1, preferred_element_type=jnp.float32) + b1
            y1.append(jnp.maximum(y, 0.0))

    # ---- conv2 (k=4, s=2) + bias + ReLU ---------------------------------------
    # y1 at spatial (2r+kh, 2c+kw) lives in parity (kh%2, kw%2) at flat row
    # (r + kh//2)*wbp + (c + kw//2)  ->  16 whole-window contiguous slices.
    pieces = []
    for kh in range(4):
        for kw in range(4):
            par = 2 * (kh % 2) + (kw % 2)
            off = (kh // 2) * wbp + (kw // 2)
            pieces.append(y1[par][off:off + r_out, :])              # (r_out, 16)
    p2 = jnp.concatenate(pieces, axis=-1)                           # (r_out, 256)
    y2 = jnp.dot(p2, w2, preferred_element_type=jnp.float32) + b2
    o_ref[...] = jnp.maximum(y2, 0.0)


# ----------------------------------------------------------------------------
# Wrapper-side (XLA) layout prep: cheap transposes/pads only, no im2col expansion.
# ----------------------------------------------------------------------------
def _prep_input(x_nhwc, b_tile, hbp, wbp, s_img, pad_in):
    """(N,H,W,C) -> (4, num_steps, b_tile*s_img + pad_in, 16*C) flat parity grids."""
    N, H, W, C = x_nhwc.shape
    nbh, nbw = H // 4, W // 4
    blk = 16 * C
    # space-to-depth(4); within-block order (dh, dw, c)
    s2d = x_nhwc.reshape(N, nbh, 4, nbw, 4, C)
    s2d = jnp.transpose(s2d, (0, 1, 3, 2, 4, 5)).reshape(N, nbh, nbw, blk)
    # pad the block grid to even extents (padded row/col never read for valid outputs)
    s2d = jnp.pad(s2d, ((0, 0), (0, 2 * hbp - nbh), (0, 2 * wbp - nbw), (0, 0)))
    # parity split: leading dim k = 2*rp + cp, per-image flat row i*wbp + j
    P = s2d.reshape(N, hbp, 2, wbp, 2, blk)
    P = jnp.transpose(P, (2, 4, 0, 1, 3, 5)).reshape(4, N, hbp * wbp, blk)
    # pad per-image flat rows to s_img, batch to a multiple of b_tile
    n_pad = _round_up(N, b_tile)
    P = jnp.pad(P, ((0, 0), (0, n_pad - N), (0, s_img - hbp * wbp), (0, 0)))
    # group b_tile images per step and append the tail rows read by garbage patch rows
    num_steps = n_pad // b_tile
    P = P.reshape(4, num_steps, b_tile * s_img, blk)
    P = jnp.pad(P, ((0, 0), (0, 0), (0, pad_in), (0, 0)))
    return P, num_steps


def _prep_w1(w1_oihw):
    """PyTorch (16,4,8,8) OIHW -> (256,16), rows (bh,bw,dh,dw,c); 1/255 folded in."""
    co, ci, kh, kw = w1_oihw.shape
    w = jnp.transpose(w1_oihw, (2, 3, 1, 0))                       # (kh, kw, c, co)
    w = w.reshape(2, kh // 2, 2, kw // 2, ci, co)                  # (bh, dh, bw, dw, c, co)
    w = jnp.transpose(w, (0, 2, 1, 3, 4, 5))                       # (bh, bw, dh, dw, c, co)
    return w.reshape(kh * kw * ci, co) * jnp.float32(1.0 / 255.0)


def _prep_w2(w2_oihw):
    """PyTorch (32,16,4,4) OIHW -> (256,32), rows (kh,kw,c)."""
    co, ci, kh, kw = w2_oihw.shape
    return jnp.transpose(w2_oihw, (2, 3, 1, 0)).reshape(kh * kw * ci, co)


# ----------------------------------------------------------------------------
# Full forward (matches PyTorch CnnImpalaShallowBody: NHWC in, NCHW out)
# ----------------------------------------------------------------------------
def cnn_impala_shallow_body(x_nhwc, params, *, b_tile=8):
    """x_nhwc: (N, H, W, 4) float32 in [0,255].  Returns NCHW output (N, 32, 9, 9)."""
    w1, b1, w2, b2 = params
    N, H, W, C = x_nhwc.shape
    assert H % 4 == 0 and W % 4 == 0, "H and W must be multiples of 4"
    ho1, wo1 = H // 4 - 1, W // 4 - 1           # conv1 output extent (20, 20)
    assert ho1 % 2 == 0 and wo1 % 2 == 0, \
        "conv1 output extent must be even (H % 8 == 4) for the parity decomposition"
    hh, hw = ho1 // 2, wo1 // 2                 # parity-grid extent   (10, 10)
    ho2, wo2 = hh - 1, hw - 1                   # conv2 output extent  (9, 9)
    co1, co2 = w1.shape[0], w2.shape[0]
    blk = 16 * C

    hbp, wbp = (H // 4 + 1) // 2, (W // 4 + 1) // 2     # padded block grid (11, 11)
    s_img = _round_up(hbp * wbp, 8)                     # per-image flat stride (128)
    pad_mid = _round_up(wbp + 1, 8)                     # conv2 reads y1 up to +wbp+1
    pad_in = _round_up(pad_mid + wbp + 1, 8)            # conv1 reads input up to +wbp+1

    b_tile = max(1, min(b_tile, N))                     # cap ~8: fits v5e's 16 MiB too
    r_out = b_tile * s_img
    r_mid = r_out + pad_mid
    r_in = r_out + pad_in

    xp, num_steps = _prep_input(x_nhwc.astype(jnp.float32),
                                b_tile, hbp, wbp, s_img, pad_in)
    w1m = _prep_w1(w1.astype(jnp.float32))
    w2m = _prep_w2(w2.astype(jnp.float32))
    b1m = b1.reshape(1, co1).astype(jnp.float32)
    b2m = b2.reshape(1, co2).astype(jnp.float32)

    kernel = functools.partial(_fused_impala_kernel,
                               wbp=wbp, r_mid=r_mid, r_out=r_out)
    y = pl.pallas_call(
        kernel,
        out_shape=jax.ShapeDtypeStruct((num_steps * r_out, co2), jnp.float32),
        grid_spec=pltpu.PrefetchScalarGridSpec(
            num_scalar_prefetch=0,
            grid=(num_steps,),
            in_specs=[
                pl.BlockSpec((4, 1, r_in, blk), lambda n: (0, n, 0, 0)),
                pl.BlockSpec((4 * blk, co1), lambda n: (0, 0)),
                pl.BlockSpec((1, co1), lambda n: (0, 0)),
                pl.BlockSpec((16 * co1, co2), lambda n: (0, 0)),
                pl.BlockSpec((1, co2), lambda n: (0, 0)),
            ],
            out_specs=pl.BlockSpec((r_out, co2), lambda n: (n, 0)),
        ),
        compiler_params=pltpu.CompilerParams(
            dimension_semantics=("parallel",),
            vmem_limit_bytes=32 * 1024 * 1024),
    )(xp, w1m, b1m, w2m, b2m)

    # Strip garbage rows (flat stride wbp) and match the PyTorch NCHW output layout.
    y = y.reshape(num_steps * b_tile, s_img, co2)[:N, :ho2 * wbp, :]
    y = y.reshape(N, ho2, wbp, co2)[:, :, :wo2, :]
    return jnp.transpose(y, (0, 3, 1, 2))


# ----------------------------------------------------------------------------
# Pure-JAX reference (correctness check only)
# ----------------------------------------------------------------------------
def _reference(x_nhwc, params):
    w1, b1, w2, b2 = params
    x = x_nhwc / 255.0
    x = jnp.transpose(x, (0, 3, 1, 2))  # NCHW
    dn = jax.lax.conv_dimension_numbers(x.shape, w1.shape, ("NCHW", "OIHW", "NCHW"))
    y = jax.lax.conv_general_dilated(x, w1, (4, 4), "VALID", dimension_numbers=dn)
    y = jnp.maximum(y + b1[None, :, None, None], 0.0)
    dn2 = jax.lax.conv_dimension_numbers(y.shape, w2.shape, ("NCHW", "OIHW", "NCHW"))
    y = jax.lax.conv_general_dilated(y, w2, (2, 2), "VALID", dimension_numbers=dn2)
    y = jnp.maximum(y + b2[None, :, None, None], 0.0)
    return y


if __name__ == "__main__":
    key = jax.random.PRNGKey(0)
    k_x, k_w1, k_b1, k_w2, k_b2 = jax.random.split(key, 5)

    # Input: batch=2, HWC = (84, 84, 4), the module's default input_shape.
    x = jax.random.uniform(k_x, (2, 84, 84, 4), dtype=jnp.float32,
                           minval=0.0, maxval=255.0)

    # Deterministic synthetic parameters, PyTorch shapes:
    #   conv1.weight: (16, 4, 8, 8),  conv1.bias: (16,)
    #   conv2.weight: (32, 16, 4, 4), conv2.bias: (32,)
    w1 = 0.05 * jax.random.normal(k_w1, (16, 4, 8, 8), dtype=jnp.float32)
    b1 = 0.05 * jax.random.normal(k_b1, (16,), dtype=jnp.float32)
    w2 = 0.05 * jax.random.normal(k_w2, (32, 16, 4, 4), dtype=jnp.float32)
    b2 = 0.05 * jax.random.normal(k_b2, (32,), dtype=jnp.float32)
    params = (w1, b1, w2, b2)

    out = jax.block_until_ready(jax.jit(cnn_impala_shallow_body)(x, params))
    assert out.shape == (2, 32, 9, 9), out.shape  # matches torch test_output_shape per batch

    ref = jax.block_until_ready(_reference(x, params))
    max_err = float(jnp.max(jnp.abs(out - ref)))
    assert jnp.allclose(out, ref, atol=5e-4, rtol=5e-4), max_err

    print("KERNEL_OK")
</pallas_src>

<mosaic_0001>
module attributes {stable_mosaic.version = 11 : i64} {
  func.func @_fused_impala_kernel(%arg0: i32, %arg1: memref<4x1x288x64xf32, #tpu.memory_space<vmem>>, %arg2: memref<256x16xf32, #tpu.memory_space<vmem>>, %arg3: memref<1x16xf32, #tpu.memory_space<vmem>>, %arg4: memref<256x32xf32, #tpu.memory_space<vmem>>, %arg5: memref<1x32xf32, #tpu.memory_space<vmem>>, %arg6: memref<256x32xf32, #tpu.memory_space<vmem>>) attributes {dimension_semantics = [#tpu.dimension_semantics<parallel>], iteration_bounds = array<i64: 1>, scalar_prefetch = 0 : i64, scratch_operands = 0 : i64, tpu.core_type = #tpu.core_type<tc>, window_params = [{transform_indices = @transform_0, window_bounds = array<i64: 4, 1, 288, 64>}, {pipeline_mode = #tpu.pipeline_mode<synchronous>, transform_indices = @transform_1, window_bounds = array<i64: 256, 16>}, {pipeline_mode = #tpu.pipeline_mode<synchronous>, transform_indices = @transform_2, window_bounds = array<i64: 1, 16>}, {pipeline_mode = #tpu.pipeline_mode<synchronous>, transform_indices = @transform_3, window_bounds = array<i64: 256, 32>}, {pipeline_mode = #tpu.pipeline_mode<synchronous>, transform_indices = @transform_4, window_bounds = array<i64: 1, 32>}, {transform_indices = @transform_5, window_bounds = array<i64: 256, 32>}]} {
    %c0 = arith.constant 0 : index
    %c0_0 = arith.constant 0 : index
    %0 = vector.load %arg2[%c0, %c0_0] : memref<256x16xf32, #tpu.memory_space<vmem>>, vector<256x16xf32>
    %c0_1 = arith.constant 0 : index
    %c0_2 = arith.constant 0 : index
    %1 = vector.load %arg3[%c0_1, %c0_2] : memref<1x16xf32, #tpu.memory_space<vmem>>, vector<1x16xf32>
    %c0_3 = arith.constant 0 : index
    %c0_4 = arith.constant 0 : index
    %2 = vector.load %arg4[%c0_3, %c0_4] : memref<256x32xf32, #tpu.memory_space<vmem>>, vector<256x32xf32>
    %c0_5 = arith.constant 0 : index
    %c0_6 = arith.constant 0 : index
    %3 = vector.load %arg5[%c0_5, %c0_6] : memref<1x32xf32, #tpu.memory_space<vmem>>, vector<1x32xf32>
    %c0_7 = arith.constant 0 : index
    %c0_8 = arith.constant 0 : index
    %c0_9 = arith.constant 0 : index
    %c0_10 = arith.constant 0 : index
    %4 = vector.load %arg1[%c0_7, %c0_8, %c0_9, %c0_10] : memref<4x1x288x64xf32, #tpu.memory_space<vmem>>, vector<1x1x272x64xf32>
    %5 = vector.shape_cast %4 : vector<1x1x272x64xf32> to vector<272x64xf32>
    %c1 = arith.constant 1 : index
    %c0_11 = arith.constant 0 : index
    %c0_12 = arith.constant 0 : index
    %c0_13 = arith.constant 0 : index
    %6 = vector.load %arg1[%c1, %c0_11, %c0_12, %c0_13] : memref<4x1x288x64xf32, #tpu.memory_space<vmem>>, vector<1x1x272x64xf32>
    %7 = vector.shape_cast %6 : vector<1x1x272x64xf32> to vector<272x64xf32>
    %c2 = arith.constant 2 : index
    %c0_14 = arith.constant 0 : index
    %c0_15 = arith.constant 0 : index
    %c0_16 = arith.constant 0 : index
    %8 = vector.load %arg1[%c2, %c0_14, %c0_15, %c0_16] : memref<4x1x288x64xf32, #tpu.memory_space<vmem>>, vector<1x1x272x64xf32>
    %9 = vector.shape_cast %8 : vector<1x1x272x64xf32> to vector<272x64xf32>
    %c3 = arith.constant 3 : index
    %c0_17 = arith.constant 0 : index
    %c0_18 = arith.constant 0 : index
    %c0_19 = arith.constant 0 : index
    %10 = vector.load %arg1[%c3, %c0_17, %c0_18, %c0_19] : memref<4x1x288x64xf32, #tpu.memory_space<vmem>>, vector<1x1x272x64xf32>
    %11 = vector.shape_cast %10 : vector<1x1x272x64xf32> to vector<272x64xf32>
    %12 = tpu.concatenate %5, %7, %9, %11 in 1 : vector<272x64xf32>, vector<272x64xf32>, vector<272x64xf32>, vector<272x64xf32> -> vector<272x256xf32>
    %cst = arith.constant dense<0.000000e+00> : vector<272x16xf32>
    %13 = tpu.matmul %12, %0, %cst {dimension_numbers = #tpu.dot_dimension_numbers<[1], [0], [0], [1], [0, 0, 1, 1], [], []>} : vector<272x256xf32>, vector<256x16xf32>, vector<272x16xf32> -> vector<272x16xf32>
    %14 = vector.broadcast %1 : vector<1x16xf32> to vector<272x16xf32>
    %15 = arith.addf %13, %14 : vector<272x16xf32>
    %cst_20 = arith.constant 0.000000e+00 : f32
    %16 = vector.broadcast %cst_20 : f32 to vector<272x16xf32>
    %17 = arith.maximumf %15, %16 : vector<272x16xf32>
    %c1_21 = arith.constant 1 : index
    %c0_22 = arith.constant 0 : index
    %c0_23 = arith.constant 0 : index
    %c0_24 = arith.constant 0 : index
    %18 = vector.load %arg1[%c1_21, %c0_22, %c0_23, %c0_24] : memref<4x1x288x64xf32, #tpu.memory_space<vmem>>, vector<1x1x272x64xf32>
    %19 = vector.shape_cast %18 : vector<1x1x272x64xf32> to vector<272x64xf32>
    %c0_25 = arith.constant 0 : index
    %c0_26 = arith.constant 0 : index
    %c1_27 = arith.constant 1 : index
    %c0_28 = arith.constant 0 : index
    %20 = vector.load %arg1[%c0_25, %c0_26, %c1_27, %c0_28] : memref<4x1x288x64xf32, #tpu.memory_space<vmem>>, vector<1x1x272x64xf32>
    %21 = vector.shape_cast %20 : vector<1x1x272x64xf32> to vector<272x64xf32>
    %c3_29 = arith.constant 3 : index
    %c0_30 = arith.constant 0 : index
    %c0_31 = arith.constant 0 : index
    %c0_32 = arith.constant 0 : index
    %22 = vector.load %arg1[%c3_29, %c0_30, %c0_31, %c0_32] : memref<4x1x288x64xf32, #tpu.memory_space<vmem>>, vector<1x1x272x64xf32>
    %23 = vector.shape_cast %22 : vector<1x1x272x64xf32> to vector<272x64xf32>
    %c2_33 = arith.constant 2 : index
    %c0_34 = arith.constant 0 : index
    %c1_35 = arith.constant 1 : index
    %c0_36 = arith.constant 0 : index
    %24 = vector.load %arg1[%c2_33, %c0_34, %c1_35, %c0_36] : memref<4x1x288x64xf32, #tpu.memory_space<vmem>>, vector<1x1x272x64xf32>
    %25 = vector.shape_cast %24 : vector<1x1x272x64xf32> to vector<272x64xf32>
    %26 = tpu.concatenate %19, %21, %23, %25 in 1 : vector<272x64xf32>, vector<272x64xf32>, vector<272x64xf32>, vector<272x64xf32> -> vector<272x256xf32>
    %cst_37 = arith.constant dense<0.000000e+00> : vector<272x16xf32>
    %27 = tpu.matmul %26, %0, %cst_37 {dimension_numbers = #tpu.dot_dimension_numbers<[1], [0], [0], [1], [0, 0, 1, 1], [], []>} : vector<272x256xf32>, vector<256x16xf32>, vector<272x16xf32> -> vector<272x16xf32>
    %28 = vector.broadcast %1 : vector<1x16xf32> to vector<272x16xf32>
    %29 = arith.addf %27, %28 : vector<272x16xf32>
    %cst_38 = arith.constant 0.000000e+00 : f32
    %30 = vector.broadcast %cst_38 : f32 to vector<272x16xf32>
    %31 = arith.maximumf %29, %30 : vector<272x16xf32>
    %c2_39 = arith.constant 2 : index
    %c0_40 = arith.constant 0 : index
    %c0_41 = arith.constant 0 : index
    %c0_42 = arith.constant 0 : index
    %32 = vector.load %arg1[%c2_39, %c0_40, %c0_41, %c0_42] : memref<4x1x288x64xf32, #tpu.memory_space<vmem>>, vector<1x1x272x64xf32>
    %33 = vector.shape_cast %32 : vector<1x1x272x64xf32> to vector<272x64xf32>
    %c3_43 = arith.constant 3 : index
    %c0_44 = arith.constant 0 : index
    %c0_45 = arith.constant 0 : index
    %c0_46 = arith.constant 0 : index
    %34 = vector.load %arg1[%c3_43, %c0_44, %c0_45, %c0_46] : memref<4x1x288x64xf32, #tpu.memory_space<vmem>>, vector<1x1x272x64xf32>
    %35 = vector.shape_cast %34 : vector<1x1x272x64xf32> to vector<272x64xf32>
    %c0_47 = arith.constant 0 : index
    %c0_48 = arith.constant 0 : index
    %c11 = arith.constant 11 : index
    %c0_49 = arith.constant 0 : index
    %36 = vector.load %arg1[%c0_47, %c0_48, %c11, %c0_49] : memref<4x1x288x64xf32, #tpu.memory_space<vmem>>, vector<1x1x272x64xf32>
    %37 = vector.shape_cast %36 : vector<1x1x272x64xf32> to vector<272x64xf32>
    %c1_50 = arith.constant 1 : index
    %c0_51 = arith.constant 0 : index
    %c11_52 = arith.constant 11 : index
    %c0_53 = arith.constant 0 : index
    %38 = vector.load %arg1[%c1_50, %c0_51, %c11_52, %c0_53] : memref<4x1x288x64xf32, #tpu.memory_space<vmem>>, vector<1x1x272x64xf32>
    %39 = vector.shape_cast %38 : vector<1x1x272x64xf32> to vector<272x64xf32>
    %40 = tpu.concatenate %33, %35, %37, %39 in 1 : vector<272x64xf32>, vector<272x64xf32>, vector<272x64xf32>, vector<272x64xf32> -> vector<272x256xf32>
    %cst_54 = arith.constant dense<0.000000e+00> : vector<272x16xf32>
    %41 = tpu.matmul %40, %0, %cst_54 {dimension_numbers = #tpu.dot_dimension_numbers<[1], [0], [0], [1], [0, 0, 1, 1], [], []>} : vector<272x256xf32>, vector<256x16xf32>, vector<272x16xf32> -> vector<272x16xf32>
    %42 = vector.broadcast %1 : vector<1x16xf32> to vector<272x16xf32>
    %43 = arith.addf %41, %42 : vector<272x16xf32>
    %cst_55 = arith.constant 0.000000e+00 : f32
    %44 = vector.broadcast %cst_55 : f32 to vector<272x16xf32>
    %45 = arith.maximumf %43, %44 : vector<272x16xf32>
    %c3_56 = arith.constant 3 : index
    %c0_57 = arith.constant 0 : index
    %c0_58 = arith.constant 0 : index
    %c0_59 = arith.constant 0 : index
    %46 = vector.load %arg1[%c3_56, %c0_57, %c0_58, %c0_59] : memref<4x1x288x64xf32, #tpu.memory_space<vmem>>, vector<1x1x272x64xf32>
    %47 = vector.shape_cast %46 : vector<1x1x272x64xf32> to vector<272x64xf32>
    %c2_60 = arith.constant 2 : index
    %c0_61 = arith.constant 0 : index
    %c1_62 = arith.constant 1 : index
    %c0_63 = arith.constant 0 : index
    %48 = vector.load %arg1[%c2_60, %c0_61, %c1_62, %c0_63] : memref<4x1x288x64xf32, #tpu.memory_space<vmem>>, vector<1x1x272x64xf32>
    %49 = vector.shape_cast %48 : vector<1x1x272x64xf32> to vector<272x64xf32>
    %c1_64 = arith.constant 1 : index
    %c0_65 = arith.constant 0 : index
    %c11_66 = arith.constant 11 : index
    %c0_67 = arith.constant 0 : index
    %50 = vector.load %arg1[%c1_64, %c0_65, %c11_66, %c0_67] : memref<4x1x288x64xf32, #tpu.memory_space<vmem>>, vector<1x1x272x64xf32>
    %51 = vector.shape_cast %50 : vector<1x1x272x64xf32> to vector<272x64xf32>
    %c0_68 = arith.constant 0 : index
    %c0_69 = arith.constant 0 : index
    %c12 = arith.constant 12 : index
    %c0_70 = arith.constant 0 : index
    %52 = vector.load %arg1[%c0_68, %c0_69, %c12, %c0_70] : memref<4x1x288x64xf32, #tpu.memory_space<vmem>>, vector<1x1x272x64xf32>
    %53 = vector.shape_cast %52 : vector<1x1x272x64xf32> to vector<272x64xf32>
    %54 = tpu.concatenate %47, %49, %51, %53 in 1 : vector<272x64xf32>, vector<272x64xf32>, vector<272x64xf32>, vector<272x64xf32> -> vector<272x256xf32>
    %cst_71 = arith.constant dense<0.000000e+00> : vector<272x16xf32>
    %55 = tpu.matmul %54, %0, %cst_71 {dimension_numbers = #tpu.dot_dimension_numbers<[1], [0], [0], [1], [0, 0, 1, 1], [], []>} : vector<272x256xf32>, vector<256x16xf32>, vector<272x16xf32> -> vector<272x16xf32>
    %56 = vector.broadcast %1 : vector<1x16xf32> to vector<272x16xf32>
    %57 = arith.addf %55, %56 : vector<272x16xf32>
    %cst_72 = arith.constant 0.000000e+00 : f32
    %58 = vector.broadcast %cst_72 : f32 to vector<272x16xf32>
    %59 = arith.maximumf %57, %58 : vector<272x16xf32>
    %60 = vector.extract_strided_slice %17 {offsets = [0, 0], sizes = [256, 16], strides = [1, 1]} : vector<272x16xf32> to vector<256x16xf32>
    %61 = vector.extract_strided_slice %31 {offsets = [0, 0], sizes = [256, 16], strides = [1, 1]} : vector<272x16xf32> to vector<256x16xf32>
    %62 = vector.extract_strided_slice %17 {offsets = [1, 0], sizes = [256, 16], strides = [1, 1]} : vector<272x16xf32> to vector<256x16xf32>
    %63 = vector.extract_strided_slice %31 {offsets = [1, 0], sizes = [256, 16], strides = [1, 1]} : vector<272x16xf32> to vector<256x16xf32>
    %64 = vector.extract_strided_slice %45 {offsets = [0, 0], sizes = [256, 16], strides = [1, 1]} : vector<272x16xf32> to vector<256x16xf32>
    %65 = vector.extract_strided_slice %59 {offsets = [0, 0], sizes = [256, 16], strides = [1, 1]} : vector<272x16xf32> to vector<256x16xf32>
    %66 = vector.extract_strided_slice %45 {offsets = [1, 0], sizes = [256, 16], strides = [1, 1]} : vector<272x16xf32> to vector<256x16xf32>
    %67 = vector.extract_strided_slice %59 {offsets = [1, 0], sizes = [256, 16], strides = [1, 1]} : vector<272x16xf32> to vector<256x16xf32>
    %68 = vector.extract_strided_slice %17 {offsets = [11, 0], sizes = [256, 16], strides = [1, 1]} : vector<272x16xf32> to vector<256x16xf32>
    %69 = vector.extract_strided_slice %31 {offsets = [11, 0], sizes = [256, 16], strides = [1, 1]} : vector<272x16xf32> to vector<256x16xf32>
    %70 = vector.extract_strided_slice %17 {offsets = [12, 0], sizes = [256, 16], strides = [1, 1]} : vector<272x16xf32> to vector<256x16xf32>
    %71 = vector.extract_strided_slice %31 {offsets = [12, 0], sizes = [256, 16], strides = [1, 1]} : vector<272x16xf32> to vector<256x16xf32>
    %72 = vector.extract_strided_slice %45 {offsets = [11, 0], sizes = [256, 16], strides = [1, 1]} : vector<272x16xf32> to vector<256x16xf32>
    %73 = vector.extract_strided_slice %59 {offsets = [11, 0], sizes = [256, 16], strides = [1, 1]} : vector<272x16xf32> to vector<256x16xf32>
    %74 = vector.extract_strided_slice %45 {offsets = [12, 0], sizes = [256, 16], strides = [1, 1]} : vector<272x16xf32> to vector<256x16xf32>
    %75 = vector.extract_strided_slice %59 {offsets = [12, 0], sizes = [256, 16], strides = [1, 1]} : vector<272x16xf32> to vector<256x16xf32>
    %76 = tpu.concatenate %60, %61, %62, %63, %64, %65, %66, %67, %68, %69, %70, %71, %72, %73, %74, %75 in 1 : vector<256x16xf32>, vector<256x16xf32>, vector<256x16xf32>, vector<256x16xf32>, vector<256x16xf32>, vector<256x16xf32>, vector<256x16xf32>, vector<256x16xf32>, vector<256x16xf32>, vector<256x16xf32>, vector<256x16xf32>, vector<256x16xf32>, vector<256x16xf32>, vector<256x16xf32>, vector<256x16xf32>, vector<256x16xf32> -> vector<256x256xf32>
    %cst_73 = arith.constant dense<0.000000e+00> : vector<256x32xf32>
    %77 = tpu.matmul %76, %2, %cst_73 {dimension_numbers = #tpu.dot_dimension_numbers<[1], [0], [0], [1], [0, 0, 1, 1], [], []>} : vector<256x256xf32>, vector<256x32xf32>, vector<256x32xf32> -> vector<256x32xf32>
    %78 = vector.broadcast %3 : vector<1x32xf32> to vector<256x32xf32>
    %79 = arith.addf %77, %78 : vector<256x32xf32>
    %cst_74 = arith.constant 0.000000e+00 : f32
    %80 = vector.broadcast %cst_74 : f32 to vector<256x32xf32>
    %81 = arith.maximumf %79, %80 : vector<256x32xf32>
    %c0_75 = arith.constant 0 : index
    %c0_76 = arith.constant 0 : index
    %82 = vector.load %arg6[%c0_75, %c0_76] : memref<256x32xf32, #tpu.memory_space<vmem>>, vector<256x32xf32>
    tpu.vector_store %arg6[%c0_75, %c0_76], %81 {strides = array<i32>} : memref<256x32xf32, #tpu.memory_space<vmem>>, vector<256x32xf32>,
    return
  }
  func.func @transform_0(%arg0: i32) -> (i32, i32, i32, i32) {
    %c0_i32 = arith.constant 0 : i32
    %c0_i32_0 = arith.constant 0 : i32
    %c0_i32_1 = arith.constant 0 : i32
    %c0_i32_2 = arith.constant 0 : i32
    return %c0_i32, %arg0, %c0_i32_0, %c0_i32_1 : i32, i32, i32, i32
  }
  func.func @transform_1(%arg0: i32) -> (i32, i32) {
    %c0_i32 = arith.constant 0 : i32
    %c0_i32_0 = arith.constant 0 : i32
    %c0_i32_1 = arith.constant 0 : i32
    return %c0_i32, %c0_i32_0 : i32, i32
  }
  func.func @transform_2(%arg0: i32) -> (i32, i32) {
    %c0_i32 = arith.constant 0 : i32
    %c0_i32_0 = arith.constant 0 : i32
    %c0_i32_1 = arith.constant 0 : i32
    return %c0_i32, %c0_i32_0 : i32, i32
  }
  func.func @transform_3(%arg0: i32) -> (i32, i32) {
    %c0_i32 = arith.constant 0 : i32
    %c0_i32_0 = arith.constant 0 : i32
    %c0_i32_1 = arith.constant 0 : i32
    return %c0_i32, %c0_i32_0 : i32, i32
  }
  func.func @transform_4(%arg0: i32) -> (i32, i32) {
    %c0_i32 = arith.constant 0 : i32
    %c0_i32_0 = arith.constant 0 : i32
    %c0_i32_1 = arith.constant 0 : i32
    return %c0_i32, %c0_i32_0 : i32, i32
  }
  func.func @transform_5(%arg0: i32) -> (i32, i32) {
    %c0_i32 = arith.constant 0 : i32
    %c0_i32_0 = arith.constant 0 : i32
    return %arg0, %c0_i32 : i32, i32
  }
}

</mosaic_0001>

<bundles_post_ra>
// kernel: cnn_impala_shallow_body.1
= control target key start
LH: loop header
LB: loop body
LE: loop exit
PB: predicated region body
PF: predicated region fallthrough
CT: control target
= control target key end

     0   :  { %v15474_v3 = vmov 0.0|0.0   ;;  %s7720_s9 = smov 64   ;;  %vm497_vm0 = vcmask 523264   ;;  %vm2659_vm1 = vcmask 1046528   ;;  %s7721_s25 = smov 32   ;;  %vm3824_vm2 = vcmask 1043456   ;;  %s15449_s0 = inlined_call_operand.vmem [shape: f32[4,1,288,64], index: 0, kind: input, shape index: {}]   ;;  %s15450_s1 = inlined_call_operand.vmem [shape: f32[256,16], index: 1, kind: input, shape index: {}]   ;;  %s15451_s2 = inlined_call_operand.vmem [shape: f32[1,16], index: 2, kind: input, shape index: {}]   ;;  %s15452_s3 = inlined_call_operand.vmem [shape: f32[256,32], index: 3, kind: input, shape index: {}]   ;;  %s15453_s4 = inlined_call_operand.vmem [shape: f32[1,32], index: 4, kind: input, shape index: {}]   ;;  %s15454_s5 = inlined_call_operand.vmem [shape: f32[256,32], index: 5, kind: output, shape index: {}]  }
   0x1   :  { %v5550_v0 = vld [vmem:[%s15449_s0 + $0x140] sm:$0xff]  ;;  %v5551_v1 = vld [vmem:[%s15449_s0 + $0x148] sm:$0xff]  ;;  %5718 = vmatprep.subr.bf16.mxu0 %v15474_v3  ;;  %5958 = vmatprep.subr.bf16.mxu1 %v15474_v3  ;;  %v5552_v6 = vld [vmem:[%s15449_s0 + $0x150] sm:$0xff]  ;;  %vm3564_vm3 = vcmask 1044480   ;;  %s7723_s28 = smov 48   ;;  %s7724_s13 = smov 96  }
   0x2   :  { %v5546_v2 = vld [vmem:[%s15449_s0 + $0x120] sm:$0xff]  ;;  %v6008_v4 = vpack.i.bf16 %v5551_v1, %v5550_v0  ;;  %v5547_v5 = vld [vmem:[%s15449_s0 + $0x128] sm:$0xff]  ;;  %v5553_v7 = vld [vmem:[%s15449_s0 + $0x158] sm:$0xff]  ;;  %vm4793_vm4 = vcmask 130048   ;;  %vm4826_vm5 = vcmask 261120   ;;  %vm4859_vm6 = vcmask 392192  }
   0x3   :  { %v5998_v8 = vpack.i.bf16 %v5547_v5, %v5546_v2  ;;  %v5548_v9 = vld [vmem:[%s15449_s0 + $0x130] sm:$0xff]  ;;  %v5549_v10 = vld [vmem:[%s15449_s0 + $0x138] sm:$0xff]  ;;  %v6013_v11 = vpack.i.bf16 %v5553_v7, %v5552_v6  ;;  %v5554_v15 = vld [vmem:[%s15449_s0 + $0x160] sm:$0xff]  ;;  %s7725_s21 = smov 80   ;;  %s7726_s22 = smov 112   ;;  %vm4924_vm7 = vcmask 654336  }
   0x4   :  { %6009 = vrot.lane.b32.xlu1 %v6008_v4, %s7720_s9  ;;  %v6003_v12 = vpack.i.bf16 %v5549_v10, %v5548_v9  ;;  %v5556_v13 = vld [vmem:[%s15449_s0 + $0x170] sm:$0xff]  ;;  %v5557_v14 = vld [vmem:[%s15449_s0 + $0x178] sm:$0xff]  ;;  %v5555_v16 = vld [vmem:[%s15449_s0 + $0x168] sm:$0xff]  ;;  %vm4957_vm8 = vcmask 785408   ;;  %vm4990_vm9 = vcmask 916480  }
   0x5   :  { %5999 = vrot.lane.b32.xlu0 %v5998_v8, %s7720_s9  ;;  %v6023_v17 = vpack.i.bf16 %v5557_v14, %v5556_v13  ;;  %v6018_v18 = vpack.i.bf16 %v5555_v16, %v5554_v15  ;;  %v5560_v19 = vld [vmem:[%s15449_s0 + $0x190] sm:$0xff]  ;;  %v5561_v20 = vld [vmem:[%s15449_s0 + $0x198] sm:$0xff]  ;;  %v5558_v21 = vld [vmem:[%s15449_s0 + $0x180] sm:$0xff] }
   0x6   :  { %v5559_v22 = vld [vmem:[%s15449_s0 + $0x188] sm:$0xff]  ;;  %v6033_v23 = vpack.i.bf16 %v5561_v20, %v5560_v19  ;;  %v5564_v25 = vld [vmem:[%s15449_s0 + $0x1b0] sm:$0xff]  ;;  %v5565_v26 = vld [vmem:[%s15449_s0 + $0x1b8] sm:$0xff] }
   0x7   :  { %v6028_v24 = vpack.i.bf16 %v5559_v22, %v5558_v21  ;;  %v5562_v27 = vld [vmem:[%s15449_s0 + $0x1a0] sm:$0xff]  ;;  %v5563_v28 = vld [vmem:[%s15449_s0 + $0x1a8] sm:$0xff]  ;;  %v6043_v29 = vpack.i.bf16 %v5565_v26, %v5564_v25  ;;  %v5568_v31 = vld [vmem:[%s15449_s0 + $0x1d0] sm:$0xff] }
   0x8   :  { %6014 = vrot.lane.b32.xlu1 %v6013_v11, %s7720_s9  ;;  %v6038_v30 = vpack.i.bf16 %v5563_v28, %v5562_v27  ;;  %v5569_v32 = vld [vmem:[%s15449_s0 + $0x1d8] sm:$0xff]  ;;  %v5566_v33 = vld [vmem:[%s15449_s0 + $0x1c0] sm:$0xff]  ;;  %v5567_v34 = vld [vmem:[%s15449_s0 + $0x1c8] sm:$0xff] }
   0x9   :  { %6004 = vrot.lane.b32.xlu0 %v6003_v12, %s7720_s9  ;;  %v6053_v35 = vpack.i.bf16 %v5569_v32, %v5568_v31  ;;  %v6048_v36 = vpack.i.bf16 %v5567_v34, %v5566_v33  ;;  %v5572_v37 = vld [vmem:[%s15449_s0 + $0x1f0] sm:$0xff]  ;;  %v5573_v38 = vld [vmem:[%s15449_s0 + $0x1f8] sm:$0xff]  ;;  %v5570_v39 = vld [vmem:[%s15449_s0 + $0x1e0] sm:$0xff] }
   0xa   :  { %v5571_v40 = vld [vmem:[%s15449_s0 + $0x1e8] sm:$0xff]  ;;  %v6063_v41 = vpack.i.bf16 %v5573_v38, %v5572_v37  ;;  %v5576_v43 = vld [vmem:[%s15449_s0 + $0x210] sm:$0xff]  ;;  %v5577_v44 = vld [vmem:[%s15449_s0 + $0x218] sm:$0xff] }
   0xb   :  { %v6058_v42 = vpack.i.bf16 %v5571_v40, %v5570_v39  ;;  %v5574_v45 = vld [vmem:[%s15449_s0 + $0x200] sm:$0xff]  ;;  %v5575_v46 = vld [vmem:[%s15449_s0 + $0x208] sm:$0xff]  ;;  %v6073_v47 = vpack.i.bf16 %v5577_v44, %v5576_v43  ;;  %v22_v56 = vld [vmem:[%s15450_s1 + $0x10] sm:$0xff] }
   0xc   :  { %6024 = vrot.lane.b32.xlu1 %v6023_v17, %s7720_s9  ;;  %v5614_v48 = vld [vmem:[%s15449_s0 + $0x360] sm:$0xff]  ;;  %v6068_v49 = vpack.i.bf16 %v5575_v46, %v5574_v45  ;;  %v5615_v50 = vld [vmem:[%s15449_s0 + $0x368] sm:$0xff]  ;;  %v23_v57 = vld [vmem:[%s15450_s1 + $0x18] sm:$0xff] }
   0xd   :  { %6019 = vrot.lane.b32.xlu0 %v6018_v18, %s7720_s9  ;;  %v20_v51 = vld [vmem:[%s15450_s1] sm:$0xff]  ;;  %v21_v52 = vld [vmem:[%s15450_s1 + $0x8] sm:$0xff]  ;;  %v6083_v58 = vpack.i.bf16 %v5615_v50, %v5614_v48  ;;  %v7900_v60 = vpack.c.bf16 %v23_v57, %v22_v56  ;;  %v5616_v1 = vld [vmem:[%s15449_s0 + $0x370] sm:$0xff] }
   0xe   :  { %v5578_v53 = vld [vmem:[%s15449_s0 + $0x220] sm:$0xff]  ;;  %v5579_v54 = vld [vmem:[%s15449_s0 + $0x228] sm:$0xff]  ;;  %v7887_v55 = vpack.c.bf16 %v21_v52, %v20_v51  ;;  %v5617_v2 = vld [vmem:[%s15449_s0 + $0x378] sm:$0xff] }
   0xf   :  { %v5618_v59 = vld [vmem:[%s15449_s0 + $0x380] sm:$0xff]  ;;  %v6078_v61 = vpack.i.bf16 %v5579_v54, %v5578_v53  ;;  %v5619_v62 = vld [vmem:[%s15449_s0 + $0x388] sm:$0xff]  ;;  %v6088_v7 = vpack.i.bf16 %v5617_v2, %v5616_v1  ;;  %v26_v9 = vld [vmem:[%s15450_s1 + $0x30] sm:$0xff] }
  0x10   :  { %6034 = vrot.lane.b32.xlu1 %v6033_v23, %s7720_s9  ;;  %5720 = vmatpush1.bf16.msra.mxu0 %v7887_v55  ;;  %v24_v63 = vld [vmem:[%s15450_s1 + $0x20] sm:$0xff]  ;;  %v25_v0 = vld [vmem:[%s15450_s1 + $0x28] sm:$0xff]  ;;  %v6093_v4 = vpack.i.bf16 %v5619_v62, %v5618_v59  ;;  %v27_v10 = vld [vmem:[%s15450_s1 + $0x38] sm:$0xff] }
  0x11   :  { %6029 = vrot.lane.b32.xlu0 %v6028_v24, %s7720_s9  ;;  %5721 = vmatprep.subr.bf16.mxu0 %v15474_v3  ;;  %v5622_v5 = vld [vmem:[%s15449_s0 + $0x3a0] sm:$0xff]  ;;  %v7926_v6 = vpack.c.bf16 %v25_v0, %v24_v63  ;;  %v5623_v8 = vld [vmem:[%s15449_s0 + $0x3a8] sm:$0xff]  ;;  %v5620_v11 = vld [vmem:[%s15449_s0 + $0x390] sm:$0xff]  ;;  %v7952_v15 = vpack.c.bf16 %v27_v10, %v26_v9 }
  0x12   :  { %5974 = vmatpush1.bf16.msra.mxu1 %v7887_v55  ;;  %v5621_v12 = vld [vmem:[%s15449_s0 + $0x398] sm:$0xff]  ;;  %v6103_v13 = vpack.i.bf16 %v5623_v8, %v5622_v5  ;;  %v5626_v14 = vld [vmem:[%s15449_s0 + $0x3c0] sm:$0xff]  ;;  %v5627_v17 = vld [vmem:[%s15449_s0 + $0x3c8] sm:$0xff] }
  0x13   :  { %5959 = vmatprep.subr.bf16.mxu1 %v15474_v3  ;;  %v6098_v16 = vpack.i.bf16 %v5621_v12, %v5620_v11  ;;  %v28_v18 = vld [vmem:[%s15450_s1 + $0x40] sm:$0xff]  ;;  %v29_v19 = vld [vmem:[%s15450_s1 + $0x48] sm:$0xff]  ;;  %v5624_v20 = vld [vmem:[%s15449_s0 + $0x3b0] sm:$0xff]  ;;  %v6113_v22 = vpack.i.bf16 %v5627_v17, %v5626_v14 }
  0x14   :  { %6044 = vrot.lane.b32.xlu1 %v6043_v29, %s7720_s9  ;;  %5723 = vmatpush1.bf16.msra.mxu0 %v7900_v60  ;;  %v5625_v21 = vld [vmem:[%s15449_s0 + $0x3b8] sm:$0xff]  ;;  %v5630_v23 = vld [vmem:[%s15449_s0 + $0x3e0] sm:$0xff]  ;;  %v7978_v24 = vpack.c.bf16 %v29_v19, %v28_v18  ;;  %v5631_v26 = vld [vmem:[%s15449_s0 + $0x3e8] sm:$0xff] }
  0x15   :  { %6039 = vrot.lane.b32.xlu0 %v6038_v30, %s7720_s9  ;;  %5724 = vmatprep.subr.bf16.mxu0 %v15474_v3  ;;  %v6108_v25 = vpack.i.bf16 %v5625_v21, %v5624_v20  ;;  %v30_v27 = vld [vmem:[%s15450_s1 + $0x50] sm:$0xff]  ;;  %v31_v28 = vld [vmem:[%s15450_s1 + $0x58] sm:$0xff]  ;;  %v6123_v31 = vpack.i.bf16 %v5631_v26, %v5630_v23  ;;  %v5634_v32 = vld [vmem:[%s15449_s0 + $0x400] sm:$0xff] }
  0x16   :  { %5975 = vmatpush1.bf16.msra.mxu1 %v7900_v60  ;;  %v5628_v29 = vld [vmem:[%s15449_s0 + $0x3d0] sm:$0xff]  ;;  %v5629_v30 = vld [vmem:[%s15449_s0 + $0x3d8] sm:$0xff]  ;;  %v8004_v33 = vpack.c.bf16 %v31_v28, %v30_v27  ;;  %v33_v37 = vld [vmem:[%s15450_s1 + $0x68] sm:$0xff] }
  0x17   :  { %5960 = vmatprep.subr.bf16.mxu1 %v15474_v3  ;;  %v6118_v34 = vpack.i.bf16 %v5629_v30, %v5628_v29  ;;  %v5632_v38 = vld [vmem:[%s15449_s0 + $0x3f0] sm:$0xff]  ;;  %v5633_v39 = vld [vmem:[%s15449_s0 + $0x3f8] sm:$0xff]  ;;  %v5639_v44 = vld [vmem:[%s15449_s0 + $0x428] sm:$0xff] }
  0x18   :  { %6054 = vrot.lane.b32.xlu1 %v6053_v35, %s7720_s9  ;;  %5726 = vmatpush1.bf16.msra.mxu0 %v7926_v6  ;;  %v5635_v35 = vld [vmem:[%s15449_s0 + $0x408] sm:$0xff]  ;;  %v6128_v43 = vpack.i.bf16 %v5633_v39, %v5632_v38  ;;  %v34_v45 = vld [vmem:[%s15450_s1 + $0x70] sm:$0xff]  ;;  %v35_v46 = vld [vmem:[%s15450_s1 + $0x78] sm:$0xff] }
  0x19   :  { %6049 = vrot.lane.b32.xlu0 %v6048_v36, %s7720_s9  ;;  %5727 = vmatprep.subr.bf16.mxu0 %v15474_v3  ;;  %v32_v36 = vld [vmem:[%s15450_s1 + $0x60] sm:$0xff]  ;;  %v6133_v40 = vpack.i.bf16 %v5635_v35, %v5634_v32  ;;  %v5637_v48 = vld [vmem:[%s15449_s0 + $0x418] sm:$0xff]  ;;  %v8056_v51 = vpack.c.bf16 %v35_v46, %v34_v45  ;;  %v5643_v53 = vld [vmem:[%s15449_s0 + $0x448] sm:$0xff] }
  0x1a   :  { %5976 = vmatpush1.bf16.msra.mxu1 %v7926_v6  ;;  %v5642_v50 = vld [vmem:[%s15449_s0 + $0x440] sm:$0xff]  ;;  %v37_v56 = vld [vmem:[%s15450_s1 + $0x88] sm:$0xff]  ;;  %v5640_v57 = vld [vmem:[%s15449_s0 + $0x430] sm:$0xff] }
  0x1b   :  { %5961 = vmatprep.subr.bf16.mxu1 %v15474_v3  ;;  %v36_v54 = vld [vmem:[%s15450_s1 + $0x80] sm:$0xff]  ;;  %v6153_v59 = vpack.i.bf16 %v5643_v53, %v5642_v50  ;;  %v5647_v0 = vld [vmem:[%s15449_s0 + $0x468] sm:$0xff]  ;;  %v38_v1 = vld [vmem:[%s15450_s1 + $0x90] sm:$0xff] }
  0x1c   :  { %6064 = vrot.lane.b32.xlu1 %v6063_v41, %s7720_s9  ;;  %5729 = vmatpush1.bf16.msra.mxu0 %v7952_v15  ;;  %v5638_v41 = vld [vmem:[%s15449_s0 + $0x420] sm:$0xff]  ;;  %v8082_v62 = vpack.c.bf16 %v37_v56, %v36_v54  ;;  %v39_v2 = vld [vmem:[%s15450_s1 + $0x98] sm:$0xff]  ;;  %v846_v26 = vld [vmem:[%s15449_s0 + $0x29] sm:$0xff] }
  0x1d   :  { %6059 = vrot.lane.b32.xlu0 %v6058_v42, %s7720_s9  ;;  %5730 = vmatprep.subr.bf16.mxu0 %v15474_v3  ;;  %v8030_v42 = vpack.c.bf16 %v33_v37, %v32_v36  ;;  %v5645_v5 = vld [vmem:[%s15449_s0 + $0x458] sm:$0xff]  ;;  %v8108_v9 = vpack.c.bf16 %v39_v2, %v38_v1  ;;  %v40_v12 = vld [vmem:[%s15450_s1 + $0xa0] sm:$0xff]  ;;  %v850_v36 = vld [vmem:[%s15449_s0 + $0x49] sm:$0xff] }
  0x1e   :  { %5977 = vmatpush1.bf16.msra.mxu1 %v7952_v15  ;;  %v843_v8 = vld [vmem:[%s15449_s0 + $0x11] sm:$0xff]  ;;  %v844_v11 = vld [vmem:[%s15449_s0 + $0x19] sm:$0xff]  ;;  %v841_v14 = vld [vmem:[%s15449_s0 + $0x1] sm:$0xff] }
  0x1f   :  { %5962 = vmatprep.subr.bf16.mxu1 %v15474_v3  ;;  %v6173_v17 = vpack.i.bf16 %v844_v11, %v843_v8  ;;  %v847_v18 = vld [vmem:[%s15449_s0 + $0x31] sm:$0xff]  ;;  %v848_v21 = vld [vmem:[%s15449_s0 + $0x39] sm:$0xff]  ;;  %v849_v35 = vld [vmem:[%s15449_s0 + $0x41] sm:$0xff] }
  0x20   :  { %6074 = vrot.lane.b32.xlu1 %v6073_v47, %s7720_s9  ;;  %5732 = vmatpush1.bf16.msra.mxu0 %v7978_v24  ;;  %v5636_v47 = vld [vmem:[%s15449_s0 + $0x410] sm:$0xff]  ;;  %v43_v23 = vld [vmem:[%s15450_s1 + $0xb8] sm:$0xff]  ;;  %v6183_v27 = vpack.i.bf16 %v848_v21, %v847_v18  ;;  %v44_v32 = vld [vmem:[%s15450_s1 + $0xc0] sm:$0xff] }
  0x21   :  { %6069 = vrot.lane.b32.xlu0 %v6068_v49, %s7720_s9  ;;  %5733 = vmatprep.subr.bf16.mxu0 %v15474_v3  ;;  %v6143_v49 = vpack.i.bf16 %v5639_v44, %v5638_v41  ;;  %v6138_v52 = vpack.i.bf16 %v5637_v48, %v5636_v47  ;;  %v851_v28 = vld [vmem:[%s15449_s0 + $0x51] sm:$0xff]  ;;  %v856_v41 = vld [vmem:[%s15449_s0 + $0x79] sm:$0xff]  ;;  %v853_v45 = vld [vmem:[%s15449_s0 + $0x61] sm:$0xff] }
  0x22   :  { %5978 = vmatpush1.bf16.msra.mxu1 %v7978_v24  ;;  %v855_v38 = vld [vmem:[%s15449_s0 + $0x71] sm:$0xff]  ;;  %v854_v46 = vld [vmem:[%s15449_s0 + $0x69] sm:$0xff]  ;;  %v48_v53 = vld [vmem:[%s15450_s1 + $0xe0] sm:$0xff] }
  0x23   :  { %5963 = vmatprep.subr.bf16.mxu1 %v15474_v3  ;;  %v47_v44 = vld [vmem:[%s15450_s1 + $0xd8] sm:$0xff]  ;;  %v6203_v47 = vpack.i.bf16 %v856_v41, %v855_v38  ;;  %v6198_v50 = vpack.i.bf16 %v854_v46, %v853_v45  ;;  %v49_v54 = vld [vmem:[%s15450_s1 + $0xe8] sm:$0xff]  ;;  %v50_v1 = vld [vmem:[%s15450_s1 + $0xf0] sm:$0xff] }
  0x24   :  { %6084 = vrot.lane.b32.xlu1 %v6083_v58, %s7720_s9  ;;  %5735 = vmatpush1.bf16.msra.mxu0 %v8004_v33  ;;  %v5641_v58 = vld [vmem:[%s15449_s0 + $0x438] sm:$0xff]  ;;  %v857_v56 = vld [vmem:[%s15449_s0 + $0x81] sm:$0xff] }
  0x25   :  { %6079 = vrot.lane.b32.xlu0 %v6078_v61, %s7720_s9  ;;  %5736 = vmatprep.subr.bf16.mxu0 %v15474_v3  ;;  %v5646_v61 = vld [vmem:[%s15449_s0 + $0x460] sm:$0xff]  ;;  %v6148_v63 = vpack.i.bf16 %v5641_v58, %v5640_v57  ;;  %v859_v48 = vld [vmem:[%s15449_s0 + $0x91] sm:$0xff]  ;;  %v858_v57 = vld [vmem:[%s15449_s0 + $0x89] sm:$0xff] }
  0x26   :  { %5979 = vmatpush1.bf16.msra.mxu1 %v8004_v33  ;;  %v51_v2 = vld [vmem:[%s15450_s1 + $0xf8] sm:$0xff]  ;;  %v869_v21 = vld [vmem:[%s15449_s0 + $0xe1] sm:$0xff] }
  0x27   :  { %5964 = vmatprep.subr.bf16.mxu1 %v15474_v3  ;;  %v8261_v8 = vpack.c.bf16 %v51_v2, %v50_v1  ;;  %v867_v11 = vld [vmem:[%s15449_s0 + $0xd1] sm:$0xff]  ;;  %v5657_v41 = vld [vmem:[%s15449_s0 + $0x281] sm:$0xff]  ;;  %v5656_v45 = vld [vmem:[%s15449_s0 + $0x279] sm:$0xff] }
  0x28   :  { %6094 = vrot.lane.b32.xlu1 %v6093_v4, %s7720_s9  ;;  %5738 = vmatpush1.bf16.msra.mxu0 %v8030_v42  ;;  %v5644_v4 = vld [vmem:[%s15449_s0 + $0x450] sm:$0xff]  ;;  %v5669_v2 = vld [vmem:[%s15449_s0 + $0x2e1] sm:$0xff] }
  0x29   :  { %6089 = vrot.lane.b32.xlu0 %v6088_v7, %s7720_s9  ;;  %5739 = vmatprep.subr.bf16.mxu0 %v15474_v3  ;;  %v6163_v7 = vpack.i.bf16 %v5647_v0, %v5646_v61  ;;  %v6158_v10 = vpack.i.bf16 %v5645_v5, %v5644_v4  ;;  %v8238_v61 = vpack.c.bf16 %v49_v54, %v48_v53  ;;  %v864_v0 = vld [vmem:[%s15449_s0 + $0xb9] sm:$0xff]  ;;  %v861_v4 = vld [vmem:[%s15449_s0 + $0xa1] sm:$0xff]  ;;  %v862_v5 = vld [vmem:[%s15449_s0 + $0xa9] sm:$0xff] }
  0x2a   :  { %5980 = vmatpush1.bf16.msra.mxu1 %v8030_v42  ;;  %v871_v18 = vld [vmem:[%s15449_s0 + $0xf1] sm:$0xff]  ;;  %v5660_v53 = vld [vmem:[%s15449_s0 + $0x299] sm:$0xff] }
  0x2b   :  { %5965 = vmatprep.subr.bf16.mxu1 %v15474_v3 }
  0x2c   :  { %6104 = vrot.lane.b32.xlu1 %v6103_v13, %s7720_s9  ;;  %5741 = vmatpush1.bf16.msra.mxu0 %v8056_v51  ;;  %v41_v13 = vld [vmem:[%s15450_s1 + $0xa8] sm:$0xff] }
  0x2d   :  { %6099 = vrot.lane.b32.xlu0 %v6098_v16, %s7720_s9  ;;  %5742 = vmatprep.subr.bf16.mxu0 %v15474_v3  ;;  %v842_v16 = vld [vmem:[%s15449_s0 + $0x9] sm:$0xff]  ;;  %v8134_v19 = vpack.c.bf16 %v41_v13, %v40_v12  ;;  %v868_v12 = vld [vmem:[%s15449_s0 + $0xd9] sm:$0xff]  ;;  %v865_v13 = vld [vmem:[%s15449_s0 + $0xc1] sm:$0xff] }
  0x2e   :  { %5981 = vmatpush1.bf16.msra.mxu1 %v8056_v51  ;;  %v6168_v20 = vpack.i.bf16 %v842_v16, %v841_v14  ;;  %v866_v14 = vld [vmem:[%s15449_s0 + $0xc9] sm:$0xff]  ;;  %v6233_v16 = vpack.i.bf16 %v868_v12, %v867_v11 }
  0x2f   :  { %5966 = vmatprep.subr.bf16.mxu1 %v15474_v3 }
  0x30   :  { %6114 = vrot.lane.b32.xlu1 %v6113_v22, %s7720_s9  ;;  %5744 = vmatpush1.bf16.msra.mxu0 %v8082_v62  ;;  %v42_v22 = vld [vmem:[%s15450_s1 + $0xb0] sm:$0xff] }
  0x31   :  { %6109 = vrot.lane.b32.xlu0 %v6108_v25, %s7720_s9  ;;  %5745 = vmatprep.subr.bf16.mxu0 %v15474_v3  ;;  %v845_v25 = vld [vmem:[%s15449_s0 + $0x21] sm:$0xff]  ;;  %v8160_v29 = vpack.c.bf16 %v43_v23, %v42_v22  ;;  %v870_v22 = vld [vmem:[%s15449_s0 + $0xe9] sm:$0xff] }
  0x32   :  { %5982 = vmatpush1.bf16.msra.mxu1 %v8082_v62  ;;  %v6178_v30 = vpack.i.bf16 %v846_v26, %v845_v25  ;;  %v6238_v25 = vpack.i.bf16 %v870_v22, %v869_v21  ;;  %v5649_v26 = vld [vmem:[%s15449_s0 + $0x241] sm:$0xff] }
  0x33   :  { %5967 = vmatprep.subr.bf16.mxu1 %v15474_v3 }
  0x34   :  { %6124 = vrot.lane.b32.xlu1 %v6123_v31, %s7720_s9  ;;  %5747 = vmatpush1.bf16.msra.mxu0 %v8108_v9  ;;  %v852_v31 = vld [vmem:[%s15449_s0 + $0x59] sm:$0xff] }
  0x35   :  { %6119 = vrot.lane.b32.xlu0 %v6118_v34, %s7720_s9  ;;  %5748 = vmatprep.subr.bf16.mxu0 %v15474_v3  ;;  %v45_v34 = vld [vmem:[%s15450_s1 + $0xc8] sm:$0xff]  ;;  %v6193_v37 = vpack.i.bf16 %v852_v31, %v851_v28 }
  0x36   :  { %5983 = vmatpush1.bf16.msra.mxu1 %v8108_v9  ;;  %v8186_v39 = vpack.c.bf16 %v45_v34, %v44_v32  ;;  %v873_v28 = vld [vmem:[%s15449_s0 + $0x101] sm:$0xff] }
  0x37   :  { %5968 = vmatprep.subr.bf16.mxu1 %v15474_v3  ;;  %v5653_v34 = vld [vmem:[%s15449_s0 + $0x261] sm:$0xff] }
  0x38   :  { %6134 = vrot.lane.b32.xlu1 %v6133_v40, %s7720_s9  ;;  %5750 = vmatpush1.bf16.msra.mxu0 %v8134_v19  ;;  %v6188_v40 = vpack.i.bf16 %v850_v36, %v849_v35  ;;  %v5654_v35 = vld [vmem:[%s15449_s0 + $0x269] sm:$0xff]  ;;  %v5651_v36 = vld [vmem:[%s15449_s0 + $0x251] sm:$0xff] }
  0x39   :  { %6129 = vrot.lane.b32.xlu0 %v6128_v43, %s7720_s9  ;;  %5751 = vmatprep.subr.bf16.mxu0 %v15474_v3  ;;  %v46_v43 = vld [vmem:[%s15450_s1 + $0xd0] sm:$0xff]  ;;  %v6263_v38 = vpack.i.bf16 %v5654_v35, %v5653_v34  ;;  %v5681_v35 = vld [vmem:[%s15449_s0 + $0x341] sm:$0xff]  ;;  %s7722_s1 = smov 16  }
  0x3a   :  { %5984 = vmatpush1.bf16.msra.mxu1 %v8134_v19 }
  0x3b   :  { %5969 = vmatprep.subr.bf16.mxu1 %v15474_v3 }
  0x3c   :  { %6144 = vrot.lane.b32.xlu1 %v6143_v49, %s7720_s9  ;;  %5753 = vmatpush1.bf16.msra.mxu0 %v8160_v29  ;;  %v8212_v49 = vpack.c.bf16 %v47_v44, %v46_v43  ;;  %v5658_v43 = vld [vmem:[%s15449_s0 + $0x289] sm:$0xff]  ;;  %v5655_v44 = vld [vmem:[%s15449_s0 + $0x271] sm:$0xff] }
  0x3d   :  { %6139 = vrot.lane.b32.xlu0 %v6138_v52, %s7720_s9  ;;  %5754 = vmatprep.subr.bf16.mxu0 %v15474_v3  ;;  %v860_v52 = vld [vmem:[%s15449_s0 + $0x99] sm:$0xff]  ;;  %v6273_v46 = vpack.i.bf16 %v5658_v43, %v5657_v41 }
  0x3e   :  { %5985 = vmatpush1.bf16.msra.mxu1 %v8160_v29  ;;  %v6213_v58 = vpack.i.bf16 %v860_v52, %v859_v48  ;;  %v5661_v48 = vld [vmem:[%s15449_s0 + $0x2a1] sm:$0xff]  ;;  %v5659_v52 = vld [vmem:[%s15449_s0 + $0x291] sm:$0xff] }
  0x3f   :  { %5970 = vmatprep.subr.bf16.mxu1 %v15474_v3 }
  0x40   :  { %6154 = vrot.lane.b32.xlu1 %v6153_v59, %s7720_s9  ;;  %5756 = vmatpush1.bf16.msra.mxu0 %v8186_v39  ;;  %v863_v59 = vld [vmem:[%s15449_s0 + $0xb1] sm:$0xff] }
  0x41   :  { %6149 = vrot.lane.b32.xlu0 %v6148_v63, %s7720_s9  ;;  %5757 = vmatprep.subr.bf16.mxu0 %v15474_v3  ;;  %v6208_v63 = vpack.i.bf16 %v858_v57, %v857_v56  ;;  %v6278_v56 = vpack.i.bf16 %v5660_v53, %v5659_v52  ;;  %v5665_v57 = vld [vmem:[%s15449_s0 + $0x2c1] sm:$0xff] }
  0x42   :  { %5986 = vmatpush1.bf16.msra.mxu1 %v8186_v39 }
  0x43   :  { %5971 = vmatprep.subr.bf16.mxu1 %v15474_v3 }
  0x44   :  { %6164 = vrot.lane.b32.xlu1 %v6163_v7, %s7720_s9  ;;  %5759 = vmatpush1.bf16.msra.mxu0 %v8212_v49  ;;  %v6223_v7 = vpack.i.bf16 %v864_v0, %v863_v59  ;;  %v5663_v59 = vld [vmem:[%s15449_s0 + $0x2b1] sm:$0xff] }
  0x45   :  { %6159 = vrot.lane.b32.xlu0 %v6158_v10, %s7720_s9  ;;  %5760 = vmatprep.subr.bf16.mxu0 %v15474_v3  ;;  %v6218_v10 = vpack.i.bf16 %v862_v5, %v861_v4  ;;  %v5670_v4 = vld [vmem:[%s15449_s0 + $0x2e9] sm:$0xff] }
  0x46   :  { %5987 = vmatpush1.bf16.msra.mxu1 %v8212_v49  ;;  %v6303_v12 = vpack.i.bf16 %v5670_v4, %v5669_v2  ;;  %v5693_v4 = vld [vmem:[%s15449_s0 + $0x17b] sm:$0xff] }
  0x47   :  { %5972 = vmatprep.subr.bf16.mxu1 %v15474_v3 }
  0x48   :  { %6174 = vrot.lane.b32.xlu1 %v6173_v17, %s7720_s9  ;;  %5762 = vmatpush1.bf16.msra.mxu0 %v8238_v61  ;;  %v6228_v17 = vpack.i.bf16 %v866_v14, %v865_v13  ;;  %v5673_v14 = vld [vmem:[%s15449_s0 + $0x301] sm:$0xff] }
  0x49   :  { %6169 = vrot.lane.b32.xlu0 %v6168_v20, %s7720_s9  ;;  %5763 = vmatprep.subr.bf16.mxu0 %v15474_v3  ;;  %v872_v20 = vld [vmem:[%s15449_s0 + $0xf9] sm:$0xff] }
  0x4a   :  { %5988 = vmatpush1.bf16.msra.mxu1 %v8238_v61  ;;  %v6243_v23 = vpack.i.bf16 %v872_v20, %v871_v18  ;;  %v5671_v18 = vld [vmem:[%s15449_s0 + $0x2f1] sm:$0xff]  ;;  %v5672_v20 = vld [vmem:[%s15449_s0 + $0x2f9] sm:$0xff] }
  0x4b   :  { %5973 = vmatprep.subr.bf16.mxu1 %v15474_v3 }
  0x4c   :  { %6184 = vrot.lane.b32.xlu1 %v6183_v27, %s7720_s9  ;;  %5765 = vmatpush1.bf16.msra.mxu0 %v8261_v8  ;;  %v5650_v27 = vld [vmem:[%s15449_s0 + $0x249] sm:$0xff] }
  0x4d   :  { %6179 = vrot.lane.b32.xlu0 %v6178_v30, %s7720_s9  ;;  %5814 = vmatprep.subr.bf16.mxu0 %v15474_v3  ;;  %v874_v30 = vld [vmem:[%s15449_s0 + $0x109] sm:$0xff]  ;;  %v6253_v31 = vpack.i.bf16 %v5650_v27, %v5649_v26 }
  0x4e   :  { %5989 = vmatpush1.bf16.msra.mxu1 %v8261_v8  ;;  %v6248_v32 = vpack.i.bf16 %v874_v30, %v873_v28  ;;  %v5678_v26 = vld [vmem:[%s15449_s0 + $0x329] sm:$0xff]  ;;  %v5675_v28 = vld [vmem:[%s15449_s0 + $0x311] sm:$0xff]  ;;  %v5676_v30 = vld [vmem:[%s15449_s0 + $0x319] sm:$0xff] }
  0x4f   :  { %5766 = vmatprep.subr.bf16.mxu1 %v15474_v3  ;;  %v6318_v34 = vpack.i.bf16 %v5676_v30, %v5675_v28 }
  0x50   :  { %6194 = vrot.lane.b32.xlu1 %v6193_v37, %s7720_s9  ;;  %v5652_v37 = vld [vmem:[%s15449_s0 + $0x259] sm:$0xff] }
  0x51   :  { %6189 = vrot.lane.b32.xlu0 %v6188_v40, %s7720_s9  ;;  %v6258_v40 = vpack.i.bf16 %v5652_v37, %v5651_v36  ;;  %v5682_v36 = vld [vmem:[%s15449_s0 + $0x349] sm:$0xff] }
  0x52   :  { %v6333_v43 = vpack.i.bf16 %v5682_v36, %v5681_v35 }
  0x54   :  { %6204 = vrot.lane.b32.xlu1 %v6203_v47, %s7720_s9  ;;  %v6268_v47 = vpack.i.bf16 %v5656_v45, %v5655_v44  ;;  %v5685_v45 = vld [vmem:[%s15449_s0 + $0x13b] sm:$0xff] }
  0x55   :  { %6199 = vrot.lane.b32.xlu0 %v6198_v50, %s7720_s9  ;;  %v5662_v50 = vld [vmem:[%s15449_s0 + $0x2a9] sm:$0xff] }
  0x56   :  { %v6283_v54 = vpack.i.bf16 %v5662_v50, %v5661_v48  ;;  %v5683_v48 = vld [vmem:[%s15449_s0 + $0x12b] sm:$0xff]  ;;  %v5684_v50 = vld [vmem:[%s15449_s0 + $0x133] sm:$0xff] }
  0x58   :  { %6214 = vrot.lane.b32.xlu1 %v6213_v58, %s7720_s9  ;;  %v5666_v58 = vld [vmem:[%s15449_s0 + $0x2c9] sm:$0xff] }
  0x59   :  { %6209 = vrot.lane.b32.xlu0 %v6208_v63, %s7720_s9  ;;  %v5664_v63 = vld [vmem:[%s15449_s0 + $0x2b9] sm:$0xff]  ;;  %v6293_v0 = vpack.i.bf16 %v5666_v58, %v5665_v57  ;;  %v5690_v57 = vld [vmem:[%s15449_s0 + $0x163] sm:$0xff] }
  0x5a   :  { %v6288_v1 = vpack.i.bf16 %v5664_v63, %v5663_v59  ;;  %v5687_v59 = vld [vmem:[%s15449_s0 + $0x14b] sm:$0xff]  ;;  %v5688_v63 = vld [vmem:[%s15449_s0 + $0x153] sm:$0xff] }
  0x5b   :  { %v6348_v2 = vpack.i.bf16 %v5688_v63, %v5687_v59 }
  0x5c   :  { %6224 = vrot.lane.b32.xlu1 %v6223_v7, %s7720_s9  ;;  %v5667_v7 = vld [vmem:[%s15449_s0 + $0x2d1] sm:$0xff] }
  0x5d   :  { %6219 = vrot.lane.b32.xlu0 %v6218_v10, %s7720_s9  ;;  %v5668_v10 = vld [vmem:[%s15449_s0 + $0x2d9] sm:$0xff] }
  0x5e   :  { %v6298_v13 = vpack.i.bf16 %v5668_v10, %v5667_v7  ;;  %v5694_v7 = vld [vmem:[%s15449_s0 + $0x183] sm:$0xff] }
  0x60   :  { %6234 = vrot.lane.b32.xlu1 %v6233_v16, %s7720_s9  ;;  %v5674_v16 = vld [vmem:[%s15449_s0 + $0x309] sm:$0xff] }
  0x61   :  { %6229 = vrot.lane.b32.xlu0 %v6228_v17, %s7720_s9  ;;  %v6313_v22 = vpack.i.bf16 %v5674_v16, %v5673_v14  ;;  %v6363_v16 = vpack.i.bf16 %v5694_v7, %v5693_v4  ;;  %v5703_v4 = vld [vmem:[%s15449_s0 + $0x1cb] sm:$0xff]  ;;  %v5704_v7 = vld [vmem:[%s15449_s0 + $0x1d3] sm:$0xff] }
  0x64   :  { %6244 = vrot.lane.b32.xlu1 %v6243_v23, %s7720_s9  ;;  %v6308_v23 = vpack.i.bf16 %v5672_v20, %v5671_v18  ;;  %v5697_v20 = vld [vmem:[%s15449_s0 + $0x19b] sm:$0xff] }
  0x65   :  { %6239 = vrot.lane.b32.xlu0 %v6238_v25, %s7720_s9  ;;  %v5677_v25 = vld [vmem:[%s15449_s0 + $0x321] sm:$0xff] }
  0x68   :  { %6254 = vrot.lane.b32.xlu1 %v6253_v31, %s7720_s9 }
  0x69   :  { %6249 = vrot.lane.b32.xlu0 %v6248_v32, %s7720_s9  ;;  %v6323_v32 = vpack.i.bf16 %v5678_v26, %v5677_v25  ;;  %v5695_v25 = vld [vmem:[%s15449_s0 + $0x18b] sm:$0xff]  ;;  %v5696_v26 = vld [vmem:[%s15449_s0 + $0x193] sm:$0xff] }
  0x6c   :  { %6264 = vrot.lane.b32.xlu1 %v6263_v38, %s7720_s9  ;;  %v5679_v38 = vld [vmem:[%s15449_s0 + $0x331] sm:$0xff] }
  0x6d   :  { %6259 = vrot.lane.b32.xlu0 %v6258_v40, %s7720_s9  ;;  %v5680_v40 = vld [vmem:[%s15449_s0 + $0x339] sm:$0xff] }
  0x6e   :  { %v6328_v44 = vpack.i.bf16 %v5680_v40, %v5679_v38  ;;  %v5581_v38 = vld [vmem:[%s15449_s0 + $0x248] sm:$0xff] }
  0x6f   :  { %v5699_v40 = vld [vmem:[%s15449_s0 + $0x1ab] sm:$0xff] }
  0x70   :  { %6274 = vrot.lane.b32.xlu1 %v6273_v46, %s7720_s9  ;;  %v5686_v46 = vld [vmem:[%s15449_s0 + $0x143] sm:$0xff] }
  0x71   :  { %6269 = vrot.lane.b32.xlu0 %v6268_v47, %s7720_s9  ;;  %v6343_v53 = vpack.i.bf16 %v5686_v46, %v5685_v45 }
  0x74   :  { %6284 = vrot.lane.b32.xlu1 %v6283_v54, %s7720_s9  ;;  %v6338_v54 = vpack.i.bf16 %v5684_v50, %v5683_v48  ;;  %v86_v48 = vld [vmem:[%s15449_s0] sm:$0xff] }
  0x75   :  { %6279 = vrot.lane.b32.xlu0 %v6278_v56, %s7720_s9  ;;  %v5689_v56 = vld [vmem:[%s15449_s0 + $0x15b] sm:$0xff] }
  0x76   :  { %v8375_v5 = vpop.permute.xlu1 %6009  ;;  %v5701_v50 = vld [vmem:[%s15449_s0 + $0x1bb] sm:$0xff] }
  0x77   :  { %v8383_v11 = vpop.permute.xlu0 %5999 }
  0x78   :  { %6294 = vrot.lane.b32.xlu1 %v6293_v0, %s7720_s9  ;;  %v6001_v35 = vunpack.i.l.bf16 %v8383_v11  ;;  %v6002_v59 = vunpack.i.h.bf16 %v8383_v11  ;;  %v87_v11 = vld [vmem:[%s15449_s0 + $0x8] sm:$0xff] }
  0x79   :  { %6289 = vrot.lane.b32.xlu0 %v6288_v1, %s7720_s9  ;;  %v6353_v1 = vpack.i.bf16 %v5690_v57, %v5689_v56 }
  0x7a   :  { %v8393_v17 = vpop.permute.xlu1 %6014  ;;  %v498_v63 = vsel %vm497_vm0, %v86_v48, %v6001_v35  ;;  %v5708_v35 = vld [vmem:[%s15449_s0 + $0x1f3] sm:$0xff] }
  0x7b   :  { %v8401_v21 = vpop.permute.xlu0 %6004  ;;  %v5583_v48 = vld [vmem:[%s15449_s0 + $0x258] sm:$0xff] }
  0x7c   :  { %6304 = vrot.lane.b32.xlu1 %v6303_v12, %s7720_s9  ;;  %v5691_v12 = vld [vmem:[%s15449_s0 + $0x16b] sm:$0xff] }
  0x7d   :  { %6299 = vrot.lane.b32.xlu0 %v6298_v13, %s7720_s9  ;;  %v5692_v13 = vld [vmem:[%s15449_s0 + $0x173] sm:$0xff] }
  0x7e   :  { %v8411_v27 = vpop.permute.xlu1 %6024  ;;  %v6358_v18 = vpack.i.bf16 %v5692_v13, %v5691_v12  ;;  %v5705_v13 = vld [vmem:[%s15449_s0 + $0x1db] sm:$0xff] }
  0x7f   :  { %v8419_v31 = vpop.permute.xlu0 %6019 }
  0x80   :  { %6314 = vrot.lane.b32.xlu1 %v6313_v22, %s7720_s9  ;;  %v5698_v22 = vld [vmem:[%s15449_s0 + $0x1a3] sm:$0xff] }
  0x81   :  { %6309 = vrot.lane.b32.xlu0 %v6308_v23, %s7720_s9  ;;  %v6373_v30 = vpack.i.bf16 %v5698_v22, %v5697_v20  ;;  %v5582_v20 = vld [vmem:[%s15449_s0 + $0x250] sm:$0xff]  ;;  %v6388_v22 = vpack.i.bf16 %v5704_v7, %v5703_v4 }
  0x82   :  { %v8429_v37 = vpop.permute.xlu1 %6034  ;;  %v5711_v7 = vld [vmem:[%s15449_s0 + $0x20b] sm:$0xff] }
  0x83   :  { %v8437_v41 = vpop.permute.xlu0 %6029 }
  0x84   :  { %6324 = vrot.lane.b32.xlu1 %v6323_v32, %s7720_s9  ;;  %v5580_v32 = vld [vmem:[%s15449_s0 + $0x240] sm:$0xff] }
  0x85   :  { %6319 = vrot.lane.b32.xlu0 %v6318_v34, %s7720_s9  ;;  %v6368_v34 = vpack.i.bf16 %v5696_v26, %v5695_v25  ;;  %v6006_v25 = vunpack.i.l.bf16 %v8401_v21  ;;  %v499_v26 = vsel %vm497_vm0, %v87_v11, %v6002_v59 }
  0x86   :  { %v8447_v47 = vpop.permute.xlu1 %6044 }
  0x87   :  { %v8455_v52 = vpop.permute.xlu0 %6039 }
  0x88   :  { %6334 = vrot.lane.b32.xlu1 %v6333_v43, %s7720_s9  ;;  %v5700_v43 = vld [vmem:[%s15449_s0 + $0x1b3] sm:$0xff] }
  0x89   :  { %6329 = vrot.lane.b32.xlu0 %v6328_v44, %s7720_s9  ;;  %v6378_v57 = vpack.i.bf16 %v5700_v43, %v5699_v40  ;;  %v88_v43 = vld [vmem:[%s15449_s0 + $0x10] sm:$0xff] }
  0x8a   :  { %v8465_v58 = vpop.permute.xlu1 %6054  ;;  %v500_v59 = vsel %vm497_vm0, %v88_v43, %v6006_v25  ;;  %v5716_v43 = vld [vmem:[%s15449_s0 + $0x233] sm:$0xff] }
  0x8b   :  { %v8473_v0 = vpop.permute.xlu0 %6049 }
  0x8c   :  { %6344 = vrot.lane.b32.xlu1 %v6343_v53, %s7720_s9  ;;  %v5702_v53 = vld [vmem:[%s15449_s0 + $0x1c3] sm:$0xff] }
  0x8d   :  { %6339 = vrot.lane.b32.xlu0 %v6338_v54, %s7720_s9 }
  0x8e   :  { %v8483_v10 = vpop.permute.xlu1 %6064 }
  0x8f   :  { %v8491_v14 = vpop.permute.xlu0 %6059 }
  0x90   :  { %6354 = vrot.lane.b32.xlu1 %v6353_v1, %s7720_s9 }
  0x91   :  { %6349 = vrot.lane.b32.xlu0 %v6348_v2, %s7720_s9  ;;  %v6383_v2 = vpack.i.bf16 %v5702_v53, %v5701_v50 }
  0x92   :  { %v8501_v23 = vpop.permute.xlu1 %6074 }
  0x93   :  { %v8509_v28 = vpop.permute.xlu0 %6069 }
  0x94   :  { %6364 = vrot.lane.b32.xlu1 %v6363_v16, %s7720_s9  ;;  %v5706_v16 = vld [vmem:[%s15449_s0 + $0x1e3] sm:$0xff] }
  0x95   :  { %6359 = vrot.lane.b32.xlu0 %v6358_v18, %s7720_s9 }
  0x96   :  { %v6085_v36 = vpop.permute.xlu1 %6084 }
  0x97   :  { %v6087_v44 = vunpack.i.h.bf16 %v6085_v36  ;;  %v6086_v45 = vunpack.i.l.bf16 %v6085_v36  ;;  %v8526_v46 = vpop.permute.xlu0 %6079 }
  0x98   :  { %6374 = vrot.lane.b32.xlu1 %v6373_v30, %s7720_s9 }
  0x99   :  { %v8539_v54 = vsel %vm497_vm0, %v5580_v32, %v6086_v45  ;;  %v8542_v56 = vsel %vm497_vm0, %v5581_v38, %v6087_v44  ;;  %6369 = vrot.lane.b32.xlu0 %v6368_v34, %s7720_s9  ;;  %v6393_v32 = vpack.i.bf16 %v5706_v16, %v5705_v13  ;;  %v5707_v34 = vld [vmem:[%s15449_s0 + $0x1eb] sm:$0xff]  ;;  %v5709_v44 = vld [vmem:[%s15449_s0 + $0x1fb] sm:$0xff]  ;;  %v5710_v45 = vld [vmem:[%s15449_s0 + $0x203] sm:$0xff] }
  0x9a   :  { %636 = vmatprep.mubr.f32.mxu0 %v8539_v54  ;;  %v8548_v1 = vpop.permute.xlu1 %6094  ;;  %v6398_v53 = vpack.i.bf16 %v5708_v35, %v5707_v34  ;;  %v6403_v4 = vpack.i.bf16 %v5710_v45, %v5709_v44  ;;  %v89_v13 = vld [vmem:[%s15449_s0 + $0x18] sm:$0xff]  ;;  %v5585_v34 = vld [vmem:[%s15449_s0 + $0x268] sm:$0xff]  ;;  %v90_v45 = vld [vmem:[%s15449_s0 + $0x20] sm:$0xff] }
  0x9b   :  { %v6090_v12 = vpop.permute.xlu0 %6089  ;;  %637 = vmatmul.mubr.f32.vlgmr.msra.gmra.mrb[0].mxu0 %v498_v63  ;;  %v6096_v50 = vunpack.i.l.bf16 %v8548_v1  ;;  %v5713_v16 = vld [vmem:[%s15449_s0 + $0x21b] sm:$0xff] }
  0x9c   :  { %v6091_v18 = vunpack.i.l.bf16 %v6090_v12  ;;  %641 = vmatprep.mubr.f32.mxu0 %v8542_v56  ;;  %5816 = vmatpush1.bf16.msra.mxu0 %v7887_v55  ;;  %v6092_v36 = vunpack.i.h.bf16 %v6090_v12  ;;  %v5712_v12 = vld [vmem:[%s15449_s0 + $0x213] sm:$0xff] }
  0x9d   :  { %5817 = vmatprep.subr.bf16.mxu0 %v15474_v3  ;;  %6379 = vrot.lane.b32.xlu0 %v6378_v57, %s7720_s9  ;;  %v6007_v57 = vunpack.i.h.bf16 %v8401_v21  ;;  %v6408_v25 = vpack.i.bf16 %v5712_v12, %v5711_v7  ;;  %v6046_v12 = vunpack.i.l.bf16 %v8447_v47 }
  0x9e   :  { %v8574_v30 = vpop.permute.xlu1 %6104  ;;  %6384 = vrot.lane.b32.xlu1 %v6383_v2, %s7720_s9  ;;  %v8586_v40 = vsel %vm497_vm0, %v5582_v20, %v6091_v18  ;;  %v5584_v2 = vld [vmem:[%s15449_s0 + $0x260] sm:$0xff]  ;;  %v8622_v11 = vsel %vm497_vm0, %v5583_v48, %v6092_v36  ;;  %v6097_v20 = vunpack.i.h.bf16 %v8548_v1  ;;  %v5715_v36 = vld [vmem:[%s15449_s0 + $0x22b] sm:$0xff] }
  0x9f   :  { %v8583_v38 = vpop.permute.xlu0 %6099  ;;  %642 = vmatmul.mubr.f32.gmra.mrb[2].mxu0 %v499_v26  ;;  %v5714_v18 = vld [vmem:[%s15449_s0 + $0x223] sm:$0xff]  ;;  %v6011_v26 = vunpack.i.l.bf16 %v8375_v5  ;;  %v2025_v48 = vld [vmem:[%s15449_s0 + $0xc] sm:$0xff] }
  0xa0   :  { %646 = vmatprep.mubr.f32.mxu0 %v8586_v40  ;;  %5819 = vmatpush1.bf16.msra.mxu0 %v7900_v60  ;;  %v6413_v1 = vpack.i.bf16 %v5714_v18, %v5713_v16  ;;  %v5598_v18 = vld [vmem:[%s15449_s0 + $0x2d0] sm:$0xff] }
  0xa1   :  { %5820 = vmatprep.subr.bf16.mxu0 %v15474_v3  ;;  %6389 = vrot.lane.b32.xlu0 %v6388_v22, %s7720_s9  ;;  %v8637_v22 = vsel %vm497_vm0, %v5584_v2, %v6096_v50  ;;  %v2026_v50 = vld [vmem:[%s15449_s0 + $0x14] sm:$0xff]  ;;  %v502_v2 = vsel %vm497_vm0, %v90_v45, %v6011_v26 }
  0xa2   :  { %v8607_v63 = vpop.permute.xlu1 %6114  ;;  %6394 = vrot.lane.b32.xlu1 %v6393_v32, %s7720_s9  ;;  %v501_v32 = vsel %vm497_vm0, %v89_v13, %v6007_v57  ;;  %v6418_v57 = vpack.i.bf16 %v5716_v43, %v5715_v36  ;;  %v6423_v7 = vpack.i.bf16 %v2026_v50, %v2025_v48  ;;  %v6101_v13 = vunpack.i.l.bf16 %v8583_v38  ;;  %v104_v26 = vld [vmem:[%s15449_s0 + $0x90] sm:$0xff] }
  0xa3   :  { %v8619_v21 = vpop.permute.xlu0 %6109  ;;  %647 = vmatmul.mubr.f32.gmra.mrb[4].mxu0 %v500_v59  ;;  %v6012_v59 = vunpack.i.h.bf16 %v8375_v5  ;;  %v91_v5 = vld [vmem:[%s15449_s0 + $0x28] sm:$0xff]  ;;  %v6047_v50 = vunpack.i.h.bf16 %v8447_v47  ;;  %v5600_v47 = vld [vmem:[%s15449_s0 + $0x2e0] sm:$0xff] }
  0xa4   :  { %651 = vmatprep.mubr.f32.mxu0 %v8622_v11  ;;  %5822 = vmatpush1.bf16.msra.mxu0 %v7926_v6 }
  0xa5   :  { %5823 = vmatprep.subr.bf16.mxu0 %v15474_v3  ;;  %6399 = vrot.lane.b32.xlu0 %v6398_v53, %s7720_s9  ;;  %v8669_v53 = vsel %vm497_vm0, %v5585_v34, %v6097_v20  ;;  %v5599_v34 = vld [vmem:[%s15449_s0 + $0x2d8] sm:$0xff]  ;;  %v503_v43 = vsel %vm497_vm0, %v91_v5, %v6012_v59  ;;  %v92_v59 = vld [vmem:[%s15449_s0 + $0x30] sm:$0xff] }
  0xa6   :  { %v8646_v35 = vpop.permute.xlu1 %6124  ;;  %6404 = vrot.lane.b32.xlu1 %v6403_v4, %s7720_s9 }
  0xa7   :  { %v8655_v44 = vpop.permute.xlu0 %6119  ;;  %652 = vmatmul.mubr.f32.gmra.mrb[6].mxu0 %v501_v32  ;;  %v5586_v32 = vld [vmem:[%s15449_s0 + $0x270] sm:$0xff] }
  0xa8   :  { %656 = vmatprep.mubr.f32.mxu0 %v8637_v22  ;;  %5825 = vmatpush1.bf16.msra.mxu0 %v7952_v15 }
  0xa9   :  { %5826 = vmatprep.subr.bf16.mxu0 %v15474_v3  ;;  %6409 = vrot.lane.b32.xlu0 %v6408_v25, %s7720_s9 }
  0xaa   :  { %v8675_v4 = vpop.permute.xlu1 %6134  ;;  %6414 = vrot.lane.b32.xlu1 %v6413_v1, %s7720_s9  ;;  %v6016_v1 = vunpack.i.l.bf16 %v8393_v17 }
  0xab   :  { %v6130_v16 = vpop.permute.xlu0 %6129  ;;  %657 = vmatmul.mubr.f32.gmra.mrb[8].mxu0 %v502_v2  ;;  %v6136_v45 = vunpack.i.l.bf16 %v8675_v4  ;;  %v6102_v2 = vunpack.i.h.bf16 %v8583_v38  ;;  %v6137_v5 = vunpack.i.h.bf16 %v8675_v4 }
  0xac   :  { %v6132_v20 = vunpack.i.h.bf16 %v6130_v16  ;;  %v6131_v25 = vunpack.i.l.bf16 %v6130_v16  ;;  %661 = vmatprep.mubr.f32.mxu0 %v8669_v53  ;;  %5828 = vmatpush1.bf16.msra.mxu0 %v7978_v24 }
  0xad   :  { %5829 = vmatprep.subr.bf16.mxu0 %v15474_v3  ;;  %6419 = vrot.lane.b32.xlu0 %v6418_v57, %s7720_s9  ;;  %v516_v57 = vsel %vm497_vm0, %v104_v26, %v6046_v12  ;;  %v5587_v12 = vld [vmem:[%s15449_s0 + $0x278] sm:$0xff] }
  0xae   :  { %v8701_v36 = vsel %vm497_vm0, %v5598_v18, %v6131_v25  ;;  %v8705_v48 = vpop.permute.xlu1 %6144  ;;  %6424 = vrot.lane.b32.xlu1 %v6423_v7, %s7720_s9  ;;  %v8715_v18 = vsel %vm497_vm0, %v5586_v32, %v6101_v13  ;;  %v8725_v38 = vsel %vm497_vm0, %v5599_v34, %v6132_v20  ;;  %v105_v7 = vld [vmem:[%s15449_s0 + $0x98] sm:$0xff]  ;;  %v6017_v13 = vunpack.i.h.bf16 %v8393_v17 }
  0xaf   :  { %15772 = vst [vmem:[#allocation2_spill] sm:$0xff] %v8701_v36  ;;  %v8710_v16 = vpop.permute.xlu0 %6139  ;;  %726 = vmatprep.mubr.f32.mxu1 %v8701_v36  ;;  %662 = vmatmul.mubr.f32.gmra.mrb[10].mxu0 %v503_v43  ;;  %15773 = vst [vmem:[#allocation3_spill] sm:$0xff] %v8725_v38  ;;  %v504_v25 = vsel %vm497_vm0, %v92_v59, %v6016_v1  ;;  %v8740_v20 = vsel %vm497_vm0, %v5600_v47, %v6136_v45  ;;  %v6051_v32 = vunpack.i.l.bf16 %v8473_v0  ;;  %v93_v1 = vld [vmem:[%s15449_s0 + $0x38] sm:$0xff]  ;;  %v5601_v45 = vld [vmem:[%s15449_s0 + $0x2e8] sm:$0xff] }
  0xb0   :  { %727 = vmatmul.mubr.f32.vlgmr.msra.gmra.mrb[0].mxu1 %v516_v57  ;;  %666 = vmatprep.mubr.f32.mxu0 %v8715_v18  ;;  %15774 = vst [vmem:[#allocation4_spill] sm:$0xff] %v8740_v20  ;;  %v6106_v34 = vunpack.i.l.bf16 %v8574_v30  ;;  %v517_v17 = vsel %vm497_vm0, %v105_v7, %v6047_v50  ;;  %v8751_v4 = vsel %vm497_vm0, %v5587_v12, %v6102_v2  ;;  %v106_v50 = vld [vmem:[%s15449_s0 + $0xa0] sm:$0xff]  ;;  %v6021_v57 = vunpack.i.l.bf16 %v8419_v31 }
  0xb1   :  { %731 = vmatprep.mubr.f32.mxu1 %v8725_v38  ;;  %5768 = vmatpush1.bf16.msra.mxu1 %v7887_v55  ;;  %v5588_v2 = vld [vmem:[%s15449_s0 + $0x280] sm:$0xff]  ;;  %v505_v59 = vsel %vm497_vm0, %v93_v1, %v6017_v13  ;;  %v8773_v47 = vsel %vm497_vm0, %v5601_v45, %v6137_v5  ;;  %v6052_v12 = vunpack.i.h.bf16 %v8473_v0  ;;  %v6141_v1 = vunpack.i.l.bf16 %v8710_v16  ;;  %v107_v0 = vld [vmem:[%s15449_s0 + $0xa8] sm:$0xff] }
  0xb2   :  { %5769 = vmatprep.subr.bf16.mxu1 %v15474_v3  ;;  %v8742_v26 = vpop.permute.xlu1 %6154  ;;  %5831 = vmatpush1.bf16.msra.mxu0 %v8004_v33  ;;  %15775 = vst [vmem:[#allocation5_spill] sm:$0xff] %v8773_v47  ;;  %v8784_v13 = vsel %vm497_vm0, %v5588_v2, %v6106_v34  ;;  %v94_v5 = vld [vmem:[%s15449_s0 + $0x40] sm:$0xff]  ;;  %v6111_v2 = vunpack.i.l.bf16 %v8619_v21 }
  0xb3   :  { %v8747_v43 = vpop.permute.xlu0 %6149  ;;  %667 = vmatmul.mubr.f32.gmra.mrb[12].mxu0 %v504_v25  ;;  %5832 = vmatprep.subr.bf16.mxu0 %v15474_v3  ;;  %v6107_v25 = vunpack.i.h.bf16 %v8574_v30  ;;  %v5589_v30 = vld [vmem:[%s15449_s0 + $0x288] sm:$0xff]  ;;  %v506_v34 = vsel %vm497_vm0, %v94_v5, %v6021_v57  ;;  %v6142_v57 = vunpack.i.h.bf16 %v8710_v16  ;;  %v5603_v16 = vld [vmem:[%s15449_s0 + $0x2f8] sm:$0xff] }
  0xb4   :  { %732 = vmatmul.mubr.f32.gmra.mrb[2].mxu1 %v517_v17  ;;  %671 = vmatprep.mubr.f32.mxu0 %v8751_v4 }
  0xb5   :  { %5771 = vmatpush1.bf16.msra.mxu1 %v7900_v60  ;;  %736 = vmatprep.mubr.f32.mxu1 %v8740_v20  ;;  %v518_v20 = vsel %vm497_vm0, %v106_v50, %v6051_v32  ;;  %v5602_v32 = vld [vmem:[%s15449_s0 + $0x2f0] sm:$0xff]  ;;  %v6056_v50 = vunpack.i.l.bf16 %v8465_v58  ;;  %v8815_v38 = vsel %vm497_vm0, %v5589_v30, %v6107_v25  ;;  %v6057_v30 = vunpack.i.h.bf16 %v8465_v58 }
  0xb6   :  { %5772 = vmatprep.subr.bf16.mxu1 %v15474_v3  ;;  %v8775_v7 = vpop.permute.xlu1 %6164  ;;  %5834 = vmatpush1.bf16.msra.mxu0 %v8030_v42  ;;  %v8824_v5 = vsel %vm497_vm0, %v5602_v32, %v6141_v1  ;;  %v5590_v25 = vld [vmem:[%s15449_s0 + $0x290] sm:$0xff]  ;;  %v6112_v32 = vunpack.i.h.bf16 %v8619_v21  ;;  %v8858_v58 = vsel %vm497_vm0, %v5603_v16, %v6142_v57  ;;  %v109_v21 = vld [vmem:[%s15449_s0 + $0xb8] sm:$0xff]  ;;  %v6116_v16 = vunpack.i.l.bf16 %v8607_v63 }
  0xb7   :  { %v8780_v17 = vpop.permute.xlu0 %6159  ;;  %672 = vmatmul.mubr.f32.gmra.mrb[14].mxu0 %v505_v59  ;;  %5835 = vmatprep.subr.bf16.mxu0 %v15474_v3  ;;  %15776 = vst [vmem:[#allocation6_spill] sm:$0xff] %v8824_v5  ;;  %v8849_v36 = vsel %vm497_vm0, %v5590_v25, %v6111_v2  ;;  %15778 = vst [vmem:[#allocation8_spill] sm:$0xff] %v8858_v58  ;;  %v5604_v2 = vld [vmem:[%s15449_s0 + $0x300] sm:$0xff]  ;;  %v6061_v25 = vunpack.i.l.bf16 %v8491_v14 }
  0xb8   :  { %737 = vmatmul.mubr.f32.gmra.mrb[4].mxu1 %v518_v20  ;;  %676 = vmatprep.mubr.f32.mxu0 %v8784_v13  ;;  %v6022_v20 = vunpack.i.h.bf16 %v8419_v31  ;;  %v95_v31 = vld [vmem:[%s15449_s0 + $0x48] sm:$0xff]  ;;  %15777 = vst [vmem:[#allocation7_spill] sm:$0xff] %v8849_v36 }
  0xb9   :  { %5774 = vmatpush1.bf16.msra.mxu1 %v7926_v6  ;;  %741 = vmatprep.mubr.f32.mxu1 %v8773_v47  ;;  %v519_v47 = vsel %vm497_vm0, %v107_v0, %v6052_v12  ;;  %v108_v12 = vld [vmem:[%s15449_s0 + $0xb0] sm:$0xff] }
  0xba   :  { %5775 = vmatprep.subr.bf16.mxu1 %v15474_v3  ;;  %v8806_v45 = vpop.permute.xlu1 %6174  ;;  %5837 = vmatpush1.bf16.msra.mxu0 %v8056_v51  ;;  %v507_v1 = vsel %vm497_vm0, %v95_v31, %v6022_v20  ;;  %v96_v20 = vld [vmem:[%s15449_s0 + $0x50] sm:$0xff]  ;;  %v6146_v31 = vunpack.i.l.bf16 %v8705_v48 }
  0xbb   :  { %v8811_v59 = vpop.permute.xlu0 %6169  ;;  %677 = vmatmul.mubr.f32.gmra.mrb[16].mxu0 %v506_v34  ;;  %5838 = vmatprep.subr.bf16.mxu0 %v15474_v3 }
  0xbc   :  { %742 = vmatmul.mubr.f32.gmra.mrb[6].mxu1 %v519_v47  ;;  %681 = vmatprep.mubr.f32.mxu0 %v8815_v38  ;;  %v6026_v47 = vunpack.i.l.bf16 %v8411_v27 }
  0xbd   :  { %746 = vmatprep.mubr.f32.mxu1 %v8824_v5  ;;  %5777 = vmatpush1.bf16.msra.mxu1 %v7952_v15  ;;  %v520_v5 = vsel %vm497_vm0, %v108_v12, %v6056_v50  ;;  %v5591_v50 = vld [vmem:[%s15449_s0 + $0x298] sm:$0xff] }
  0xbe   :  { %5778 = vmatprep.subr.bf16.mxu1 %v15474_v3  ;;  %v8840_v0 = vpop.permute.xlu1 %6184  ;;  %5840 = vmatpush1.bf16.msra.mxu0 %v8082_v62  ;;  %v508_v57 = vsel %vm497_vm0, %v96_v20, %v6026_v47  ;;  %v6147_v47 = vunpack.i.h.bf16 %v8705_v48  ;;  %v8892_v20 = vsel %vm497_vm0, %v5604_v2, %v6146_v31  ;;  %v5605_v48 = vld [vmem:[%s15449_s0 + $0x308] sm:$0xff]  ;;  %v6117_v2 = vunpack.i.h.bf16 %v8607_v63 }
  0xbf   :  { %v8845_v34 = vpop.permute.xlu0 %6179  ;;  %682 = vmatmul.mubr.f32.gmra.mrb[18].mxu0 %v507_v1  ;;  %5841 = vmatprep.subr.bf16.mxu0 %v15474_v3  ;;  %15780 = vst [vmem:[#allocation10_spill] sm:$0xff] %v8892_v20  ;;  %v111_v63 = vld [vmem:[%s15449_s0 + $0xc8] sm:$0xff] }
  0xc0   :  { %747 = vmatmul.mubr.f32.gmra.mrb[8].mxu1 %v520_v5  ;;  %686 = vmatprep.mubr.f32.mxu0 %v8849_v36  ;;  %v6027_v5 = vunpack.i.h.bf16 %v8411_v27  ;;  %v8883_v36 = vsel %vm497_vm0, %v5591_v50, %v6112_v32  ;;  %v97_v27 = vld [vmem:[%s15449_s0 + $0x58] sm:$0xff]  ;;  %v5592_v32 = vld [vmem:[%s15449_s0 + $0x2a0] sm:$0xff]  ;;  %v6062_v50 = vunpack.i.h.bf16 %v8491_v14  ;;  %v8926_v14 = vsel %vm497_vm0, %v5605_v48, %v6147_v47 }
  0xc1   :  { %751 = vmatprep.mubr.f32.mxu1 %v8858_v58  ;;  %5780 = vmatpush1.bf16.msra.mxu1 %v7978_v24  ;;  %v521_v58 = vsel %vm497_vm0, %v109_v21, %v6057_v30  ;;  %15779 = vst [vmem:[#allocation9_spill] sm:$0xff] %v8883_v36  ;;  %v110_v30 = vld [vmem:[%s15449_s0 + $0xc0] sm:$0xff]  ;;  %15782 = vst [vmem:[#allocation12_spill] sm:$0xff] %v8926_v14  ;;  %v6121_v48 = vunpack.i.l.bf16 %v8655_v44 }
  0xc2   :  { %5781 = vmatprep.subr.bf16.mxu1 %v15474_v3  ;;  %v8874_v12 = vpop.permute.xlu1 %6194  ;;  %5843 = vmatpush1.bf16.msra.mxu0 %v8108_v9  ;;  %v509_v31 = vsel %vm497_vm0, %v97_v27, %v6027_v5  ;;  %v98_v5 = vld [vmem:[%s15449_s0 + $0x60] sm:$0xff]  ;;  %v6151_v27 = vunpack.i.l.bf16 %v8747_v43 }
  0xc3   :  { %v8879_v1 = vpop.permute.xlu0 %6189  ;;  %687 = vmatmul.mubr.f32.gmra.mrb[20].mxu0 %v508_v57  ;;  %5844 = vmatprep.subr.bf16.mxu0 %v15474_v3 }
  0xc4   :  { %752 = vmatmul.mubr.f32.gmra.mrb[10].mxu1 %v521_v58  ;;  %691 = vmatprep.mubr.f32.mxu0 %v8883_v36  ;;  %v6031_v58 = vunpack.i.l.bf16 %v8437_v41  ;;  %v8917_v36 = vsel %vm497_vm0, %v5592_v32, %v6116_v16  ;;  %v5606_v16 = vld [vmem:[%s15449_s0 + $0x310] sm:$0xff]  ;;  %v6066_v32 = vunpack.i.l.bf16 %v8483_v10 }
  0xc5   :  { %756 = vmatprep.mubr.f32.mxu1 %v8892_v20  ;;  %5783 = vmatpush1.bf16.msra.mxu1 %v8004_v33  ;;  %v522_v20 = vsel %vm497_vm0, %v110_v30, %v6061_v25  ;;  %15781 = vst [vmem:[#allocation11_spill] sm:$0xff] %v8917_v36  ;;  %v5593_v25 = vld [vmem:[%s15449_s0 + $0x2a8] sm:$0xff] }
  0xc6   :  { %5784 = vmatprep.subr.bf16.mxu1 %v15474_v3  ;;  %v8908_v21 = vpop.permute.xlu1 %6204  ;;  %5846 = vmatpush1.bf16.msra.mxu0 %v8134_v19  ;;  %v510_v47 = vsel %vm497_vm0, %v98_v5, %v6031_v58  ;;  %v6152_v58 = vunpack.i.h.bf16 %v8747_v43  ;;  %v8960_v5 = vsel %vm497_vm0, %v5606_v16, %v6151_v27  ;;  %v5607_v43 = vld [vmem:[%s15449_s0 + $0x318] sm:$0xff]  ;;  %v6122_v16 = vunpack.i.h.bf16 %v8655_v44 }
  0xc7   :  { %v8913_v57 = vpop.permute.xlu0 %6199  ;;  %692 = vmatmul.mubr.f32.gmra.mrb[22].mxu0 %v509_v31  ;;  %5847 = vmatprep.subr.bf16.mxu0 %v15474_v3  ;;  %15784 = vst [vmem:[#allocation14_spill] sm:$0xff] %v8960_v5  ;;  %v113_v44 = vld [vmem:[%s15449_s0 + $0xd8] sm:$0xff] }
  0xc8   :  { %757 = vmatmul.mubr.f32.gmra.mrb[12].mxu1 %v522_v20  ;;  %696 = vmatprep.mubr.f32.mxu0 %v8917_v36  ;;  %v6032_v20 = vunpack.i.h.bf16 %v8437_v41  ;;  %v8951_v36 = vsel %vm497_vm0, %v5593_v25, %v6117_v2  ;;  %v99_v41 = vld [vmem:[%s15449_s0 + $0x68] sm:$0xff]  ;;  %v5594_v2 = vld [vmem:[%s15449_s0 + $0x2b0] sm:$0xff]  ;;  %v6067_v25 = vunpack.i.h.bf16 %v8483_v10  ;;  %v8994_v10 = vsel %vm497_vm0, %v5607_v43, %v6152_v58 }
  0xc9   :  { %761 = vmatprep.mubr.f32.mxu1 %v8926_v14  ;;  %5786 = vmatpush1.bf16.msra.mxu1 %v8030_v42  ;;  %v523_v14 = vsel %vm497_vm0, %v111_v63, %v6062_v50  ;;  %15783 = vst [vmem:[#allocation13_spill] sm:$0xff] %v8951_v36  ;;  %v112_v50 = vld [vmem:[%s15449_s0 + $0xd0] sm:$0xff]  ;;  %15787 = vst [vmem:[#allocation17_spill] sm:$0xff] %v8994_v10  ;;  %v6126_v43 = vunpack.i.l.bf16 %v8646_v35 }
  0xca   :  { %5787 = vmatprep.subr.bf16.mxu1 %v15474_v3  ;;  %v8942_v30 = vpop.permute.xlu1 %6214  ;;  %5849 = vmatpush1.bf16.msra.mxu0 %v8160_v29  ;;  %v511_v27 = vsel %vm497_vm0, %v99_v41, %v6032_v20  ;;  %v100_v20 = vld [vmem:[%s15449_s0 + $0x70] sm:$0xff]  ;;  %v6156_v41 = vunpack.i.l.bf16 %v8742_v26 }
  0xcb   :  { %v8947_v31 = vpop.permute.xlu0 %6209  ;;  %697 = vmatmul.mubr.f32.gmra.mrb[24].mxu0 %v510_v47  ;;  %5850 = vmatprep.subr.bf16.mxu0 %v15474_v3 }
  0xcc   :  { %762 = vmatmul.mubr.f32.gmra.mrb[14].mxu1 %v523_v14  ;;  %701 = vmatprep.mubr.f32.mxu0 %v8951_v36  ;;  %v6036_v14 = vunpack.i.l.bf16 %v8429_v37  ;;  %v8985_v36 = vsel %vm497_vm0, %v5594_v2, %v6121_v48  ;;  %v5608_v48 = vld [vmem:[%s15449_s0 + $0x320] sm:$0xff]  ;;  %v6071_v2 = vunpack.i.l.bf16 %v8509_v28 }
  0xcd   :  { %766 = vmatprep.mubr.f32.mxu1 %v8960_v5  ;;  %5789 = vmatpush1.bf16.msra.mxu1 %v8056_v51  ;;  %v524_v5 = vsel %vm497_vm0, %v112_v50, %v6066_v32  ;;  %15786 = vst [vmem:[#allocation16_spill] sm:$0xff] %v8985_v36  ;;  %v5595_v32 = vld [vmem:[%s15449_s0 + $0x2b8] sm:$0xff] }
  0xce   :  { %5790 = vmatprep.subr.bf16.mxu1 %v15474_v3  ;;  %v8976_v63 = vpop.permute.xlu1 %6224  ;;  %5852 = vmatpush1.bf16.msra.mxu0 %v8186_v39  ;;  %v512_v58 = vsel %vm497_vm0, %v100_v20, %v6036_v14  ;;  %v2027_v14 = vld [vmem:[%s15449_s0 + $0x1c] sm:$0xff]  ;;  %v2028_v20 = vld [vmem:[%s15449_s0 + $0x24] sm:$0xff] }
  0xcf   :  { %15785 = vst [vmem:[#allocation15_spill] sm:$0xff] %v8976_v63  ;;  %v8981_v47 = vpop.permute.xlu0 %6219  ;;  %702 = vmatmul.mubr.f32.gmra.mrb[26].mxu0 %v511_v27  ;;  %5853 = vmatprep.subr.bf16.mxu0 %v15474_v3  ;;  %v9019_v63 = vsel %vm497_vm0, %v5595_v32, %v6122_v16  ;;  %v114_v16 = vld [vmem:[%s15449_s0 + $0xe0] sm:$0xff] }
  0xd0   :  { %767 = vmatmul.mubr.f32.gmra.mrb[16].mxu1 %v524_v5  ;;  %706 = vmatprep.mubr.f32.mxu0 %v8985_v36  ;;  %v6037_v5 = vunpack.i.h.bf16 %v8429_v37  ;;  %15790 = vst [vmem:[#allocation20_spill] sm:$0xff] %v9019_v63  ;;  %v101_v37 = vld [vmem:[%s15449_s0 + $0x78] sm:$0xff]  ;;  %v102_v32 = vld [vmem:[%s15449_s0 + $0x80] sm:$0xff] }
  0xd1   :  { %771 = vmatprep.mubr.f32.mxu1 %v8994_v10  ;;  %5792 = vmatpush1.bf16.msra.mxu1 %v8082_v62  ;;  %v525_v10 = vsel %vm497_vm0, %v113_v44, %v6067_v25  ;;  %v9034_v25 = vsel %vm497_vm0, %v5608_v48, %v6156_v41  ;;  %v5596_v44 = vld [vmem:[%s15449_s0 + $0x2c0] sm:$0xff] }
  0xd2   :  { %5793 = vmatprep.subr.bf16.mxu1 %v15474_v3  ;;  %v9010_v50 = vpop.permute.xlu1 %6234  ;;  %5855 = vmatpush1.bf16.msra.mxu0 %v8212_v49  ;;  %15791 = vst [vmem:[#allocation21_spill] sm:$0xff] %v9034_v25  ;;  %v513_v41 = vsel %vm497_vm0, %v101_v37, %v6037_v5  ;;  %v526_v5 = vsel %vm497_vm0, %v114_v16, %v6071_v2  ;;  %v2032_v16 = vld [vmem:[%s15449_s0 + $0x44] sm:$0xff] }
  0xd3   :  { %15788 = vst [vmem:[#allocation18_spill] sm:$0xff] %v9010_v50  ;;  %v9015_v27 = vpop.permute.xlu0 %6229  ;;  %707 = vmatmul.mubr.f32.gmra.mrb[28].mxu0 %v512_v58  ;;  %5856 = vmatprep.subr.bf16.mxu0 %v15474_v3  ;;  %v6157_v58 = vunpack.i.h.bf16 %v8742_v26  ;;  %v5609_v26 = vld [vmem:[%s15449_s0 + $0x328] sm:$0xff]  ;;  %v6072_v50 = vunpack.i.h.bf16 %v8509_v28  ;;  %v9062_v37 = vsel %vm497_vm0, %v5596_v44, %v6126_v43  ;;  %v6042_v44 = vunpack.i.h.bf16 %v8455_v52 }
  0xd4   :  { %15789 = vst [vmem:[#allocation19_spill] sm:$0xff] %v9015_v27  ;;  %772 = vmatmul.mubr.f32.gmra.mrb[18].mxu1 %v525_v10  ;;  %711 = vmatprep.mubr.f32.mxu0 %v9019_v63  ;;  %v6041_v10 = vunpack.i.l.bf16 %v8455_v52  ;;  %v6127_v27 = vunpack.i.h.bf16 %v8646_v35  ;;  %15794 = vst [vmem:[#allocation24_spill] sm:$0xff] %v9062_v37  ;;  %v2029_v28 = vld [vmem:[%s15449_s0 + $0x2c] sm:$0xff]  ;;  %v2030_v35 = vld [vmem:[%s15449_s0 + $0x34] sm:$0xff] }
  0xd5   :  { %776 = vmatprep.mubr.f32.mxu1 %v9034_v25  ;;  %5795 = vmatpush1.bf16.msra.mxu1 %v8108_v9  ;;  %v6428_v25 = vpack.i.bf16 %v2028_v20, %v2027_v14  ;;  %v6161_v14 = vunpack.i.l.bf16 %v8780_v17  ;;  %v9077_v2 = vsel %vm497_vm0, %v5609_v26, %v6157_v58  ;;  %v5597_v43 = vld [vmem:[%s15449_s0 + $0x2c8] sm:$0xff]  ;;  %v2031_v20 = vld [vmem:[%s15449_s0 + $0x3c] sm:$0xff]  ;;  %v5610_v58 = vld [vmem:[%s15449_s0 + $0x330] sm:$0xff] }
  0xd6   :  { %5796 = vmatprep.subr.bf16.mxu1 %v15474_v3  ;;  %v9053_v48 = vpop.permute.xlu1 %6244  ;;  %5858 = vmatpush1.bf16.msra.mxu0 %v8238_v61  ;;  %v115_v3 = vld [vmem:[%s15449_s0 + $0xe8] sm:$0xff]  ;;  %15796 = vst [vmem:[#allocation25_spill] sm:$0xff] %v9077_v2  ;;  %v514_v26 = vsel %vm497_vm0, %v102_v32, %v6041_v10  ;;  %v9104_v36 = vsel %vm497_vm0, %v5597_v43, %v6127_v27  ;;  %v116_v27 = vld [vmem:[%s15449_s0 + $0xf0] sm:$0xff] }
  0xd7   :  { %15792 = vst [vmem:[#allocation22_spill] sm:$0xff] %v9053_v48  ;;  %v9058_v63 = vpop.permute.xlu0 %6239  ;;  %712 = vmatmul.mubr.f32.gmra.mrb[30].mxu0 %v513_v41  ;;  %v15795_v48 = vmov 0.0|0.0   ;;  %v103_v52 = vld [vmem:[%s15449_s0 + $0x88] sm:$0xff]  ;;  %6429 = vrot.lane.b32.xlu0 %v6428_v25, %s7720_s9  ;;  %v6438_v10 = vpack.i.bf16 %v2032_v16, %v2031_v20  ;;  %v2035_v25 = vld [vmem:[%s15449_s0 + $0x5c] sm:$0xff]  ;;  %v6077_v20 = vunpack.i.h.bf16 %v8501_v23 }
  0xd8   :  { %15793 = vst [vmem:[#allocation23_spill] sm:$0xff] %v9058_v63  ;;  %5859 = vmatprep.subr.bf16.mxu0 %v15795_v48  ;;  %777 = vmatmul.mubr.f32.gmra.mrb[20].mxu1 %v526_v5  ;;  %v6433_v5 = vpack.i.bf16 %v2030_v35, %v2029_v28  ;;  %v6076_v63 = vunpack.i.l.bf16 %v8501_v23  ;;  %v2033_v32 = vld [vmem:[%s15449_s0 + $0x4c] sm:$0xff]  ;;  %v2034_v28 = vld [vmem:[%s15449_s0 + $0x54] sm:$0xff]  ;;  %v2036_v35 = vld [vmem:[%s15449_s0 + $0x64] sm:$0xff] }
  0xd9   :  { %716 = vmatprep.mubr.f32.mxu0 %v9062_v37  ;;  %781 = vmatprep.mubr.f32.mxu1 %v9077_v2  ;;  %v527_v37 = vsel %vm497_vm0, %v115_v3, %v6072_v50  ;;  %v6162_v3 = vunpack.i.h.bf16 %v8780_v17  ;;  %v9119_v50 = vsel %vm497_vm0, %v5610_v58, %v6161_v14  ;;  %v5611_v17 = vld [vmem:[%s15449_s0 + $0x338] sm:$0xff]  ;;  %v6443_v43 = vpack.i.bf16 %v2034_v28, %v2033_v32  ;;  %v2040_v32 = vld [vmem:[%s15449_s0 + $0x84] sm:$0xff] }
  0xda   :  { %5798 = vmatpush1.bf16.msra.mxu1 %v8134_v19  ;;  %v9096_v41 = vpop.permute.xlu1 %6254  ;;  %5861 = vmatpush1.bf16.msra.mxu0 %v8261_v8  ;;  %15798 = vst [vmem:[#allocation27_spill] sm:$0xff] %v9119_v50  ;;  %v528_v58 = vsel %vm497_vm0, %v116_v27, %v6076_v63  ;;  %v117_v63 = vld [vmem:[%s15449_s0 + $0xf8] sm:$0xff]  ;;  %v5612_v28 = vld [vmem:[%s15449_s0 + $0x340] sm:$0xff] }
  0xdb   :  { %5799 = vmatprep.subr.bf16.mxu1 %v15795_v48  ;;  %v9100_v2 = vpop.permute.xlu0 %6249  ;;  %717 = vmatmul.mubr.f32.gmra.mrb[32].mxu0 %v514_v26  ;;  %v6448_v26 = vpack.i.bf16 %v2036_v35, %v2035_v25  ;;  %v9153_v23 = vsel %vm497_vm0, %v5611_v17, %v6162_v3  ;;  %v6081_v25 = vunpack.i.l.bf16 %v8526_v46  ;;  %v529_v17 = vsel %vm497_vm0, %v117_v63, %v6077_v20  ;;  %v118_v20 = vld [vmem:[%s15449_s0 + $0x100] sm:$0xff] }
  0xdc   :  { %15797 = vst [vmem:[#allocation26_spill] sm:$0xff] %v9100_v2  ;;  %782 = vmatmul.mubr.f32.gmra.mrb[22].mxu1 %v527_v37  ;;  %721 = vmatprep.mubr.f32.mxu0 %v9104_v36  ;;  %v515_v37 = vsel %vm497_vm0, %v103_v52, %v6042_v44  ;;  %v2037_v44 = vld [vmem:[%s15449_s0 + $0x6c] sm:$0xff]  ;;  %v2038_v52 = vld [vmem:[%s15449_s0 + $0x74] sm:$0xff]  ;;  %15799 = vst [vmem:[#allocation28_spill] sm:$0xff] %v9153_v23 }
  0xdd   :  { %786 = vmatprep.mubr.f32.mxu1 %v9119_v50  ;;  %6434 = vrot.lane.b32.xlu1 %v6433_v5, %s7720_s9  ;;  %v6166_v5 = vunpack.i.l.bf16 %v8775_v7  ;;  %v6453_v27 = vpack.i.bf16 %v2038_v52, %v2037_v44  ;;  %v2044_v52 = vld [vmem:[%s15449_s0 + $0xa4] sm:$0xff]  ;;  %v2045_v50 = vld [vmem:[%s15449_s0 + $0xac] sm:$0xff]  ;;  %v2046_v2 = vld [vmem:[%s15449_s0 + $0xb4] sm:$0xff] }
  0xde   :  { %5801 = vmatpush1.bf16.msra.mxu1 %v8160_v29  ;;  %v9137_v14 = vpop.permute.xlu1 %6264  ;;  %6439 = vrot.lane.b32.xlu0 %v6438_v10, %s7720_s9  ;;  %v2039_v10 = vld [vmem:[%s15449_s0 + $0x7c] sm:$0xff] }
  0xdf   :  { %5802 = vmatprep.subr.bf16.mxu1 %v15795_v48  ;;  %v9141_v16 = vpop.permute.xlu0 %6259  ;;  %722 = vmatmul.mubr.f32.gmra.mrb[34].mxu0 %v515_v37  ;;  %v6458_v37 = vpack.i.bf16 %v2040_v32, %v2039_v10  ;;  %v9187_v44 = vsel %vm497_vm0, %v5612_v28, %v6166_v5  ;;  %v6256_v5 = vunpack.i.l.bf16 %v9096_v41  ;;  %v6082_v32 = vunpack.i.h.bf16 %v8526_v46  ;;  %v119_v46 = vld [vmem:[%s15449_s0 + $0x108] sm:$0xff] }
  0xe0   :  { %787 = vmatmul.mubr.f32.gmra.mrb[24].mxu1 %v528_v58  ;;  %5910 = vmatprep.subr.bf16.mxu0 %v15795_v48  ;;  %v2041_v58 = vld [vmem:[%s15449_s0 + $0x8c] sm:$0xff]  ;;  %15800 = vst [vmem:[#allocation29_spill] sm:$0xff] %v9187_v44 }
  0xe1   :  { %791 = vmatprep.mubr.f32.mxu1 %v9153_v23  ;;  %6444 = vrot.lane.b32.xlu1 %v6443_v43, %s7720_s9  ;;  %v2042_v23 = vld [vmem:[%s15449_s0 + $0x94] sm:$0xff]  ;;  %v6167_v43 = vunpack.i.h.bf16 %v8775_v7  ;;  %v5613_v7 = vld [vmem:[%s15449_s0 + $0x348] sm:$0xff] }
  0xe2   :  { %5804 = vmatpush1.bf16.msra.mxu1 %v8186_v39  ;;  %v9171_v3 = vpop.permute.xlu1 %6274  ;;  %6449 = vrot.lane.b32.xlu0 %v6448_v26, %s7720_s9  ;;  %v2043_v26 = vld [vmem:[%s15449_s0 + $0x9c] sm:$0xff]  ;;  %v6463_v10 = vpack.i.bf16 %v2042_v23, %v2041_v58 }
  0xe3   :  { %5805 = vmatprep.subr.bf16.mxu1 %v15795_v48  ;;  %v9175_v35 = vpop.permute.xlu0 %6269  ;;  %v9220_v23 = vsel %vm497_vm0, %v5613_v7, %v6167_v43  ;;  %v531_v7 = vsel %vm497_vm0, %v119_v46, %v6082_v32  ;;  %v6172_v32 = vunpack.i.h.bf16 %v8811_v59 }
  0xe4   :  { %792 = vmatmul.mubr.f32.gmra.mrb[26].mxu1 %v529_v17  ;;  %v530_v17 = vsel %vm497_vm0, %v118_v20, %v6081_v25  ;;  %15801 = vst [vmem:[#allocation30_spill] sm:$0xff] %v9220_v23  ;;  %v2048_v25 = vld [vmem:[%s15449_s0 + $0xc4] sm:$0xff]  ;;  %v6473_v20 = vpack.i.bf16 %v2046_v2, %v2045_v50  ;;  %v2051_v2 = vld [vmem:[%s15449_s0 + $0xdc] sm:$0xff] }
  0xe5   :  { %796 = vmatprep.mubr.f32.mxu1 %v9187_v44  ;;  %6454 = vrot.lane.b32.xlu1 %v6453_v27, %s7720_s9  ;;  %v6468_v44 = vpack.i.bf16 %v2044_v52, %v2043_v26  ;;  %v2047_v27 = vld [vmem:[%s15449_s0 + $0xbc] sm:$0xff]  ;;  %v6171_v26 = vunpack.i.l.bf16 %v8811_v59  ;;  %v2052_v50 = vld [vmem:[%s15449_s0 + $0xe4] sm:$0xff]  ;;  %v6261_v59 = vunpack.i.l.bf16 %v9141_v16 }
  0xe6   :  { %5807 = vmatpush1.bf16.msra.mxu1 %v8212_v49  ;;  %v9205_v63 = vpop.permute.xlu1 %6284  ;;  %6459 = vrot.lane.b32.xlu0 %v6458_v37, %s7720_s9  ;;  %v7613_v37 = vld [vmem:[%s15449_s0 + $0x360] sm:$0xff] }
  0xe7   :  { %5808 = vmatprep.subr.bf16.mxu1 %v15795_v48  ;;  %v9209_v28 = vpop.permute.xlu0 %6279  ;;  %v9238_v58 = vsel %vm497_vm0, %v7613_v37, %v6256_v5  ;;  %v2050_v5 = vld [vmem:[%s15449_s0 + $0xd4] sm:$0xff]  ;;  %v6488_v37 = vpack.i.bf16 %v2052_v50, %v2051_v2  ;;  %v6176_v2 = vunpack.i.l.bf16 %v8806_v45 }
  0xe8   :  { %797 = vmatmul.mubr.f32.gmra.mrb[28].mxu1 %v530_v17  ;;  %v6478_v17 = vpack.i.bf16 %v2048_v25, %v2047_v27  ;;  %v7614_v27 = vld [vmem:[%s15449_s0 + $0x120] sm:$0xff] }
  0xe9   :  { %801 = vmatprep.mubr.f32.mxu1 %v9220_v23  ;;  %6464 = vrot.lane.b32.xlu1 %v6463_v10, %s7720_s9  ;;  %v2049_v23 = vld [vmem:[%s15449_s0 + $0xcc] sm:$0xff]  ;;  %v6257_v10 = vunpack.i.h.bf16 %v9096_v41  ;;  %v1181_v25 = vsel %vm497_vm0, %v7614_v27, %v6171_v26 }
  0xea   :  { %5810 = vmatpush1.bf16.msra.mxu1 %v8238_v61  ;;  %v9240_v43 = vpop.permute.xlu1 %6294  ;;  %6469 = vrot.lane.b32.xlu0 %v6468_v44, %s7720_s9  ;;  %v6483_v41 = vpack.i.bf16 %v2050_v5, %v2049_v23  ;;  %v2054_v23 = vld [vmem:[%s15449_s0 + $0xf4] sm:$0xff] }
  0xeb   :  { %5811 = vmatprep.subr.bf16.mxu1 %v15795_v48  ;;  %v9244_v52 = vpop.permute.xlu0 %6289 }
  0xec   :  { %802 = vmatmul.mubr.f32.gmra.mrb[30].mxu1 %v531_v7  ;;  %v2053_v7 = vld [vmem:[%s15449_s0 + $0xec] sm:$0xff] }
  0xed   :  { %1313 = vmatprep.mubr.f32.mxu1 %v9238_v58  ;;  %6474 = vrot.lane.b32.xlu1 %v6473_v20, %s7720_s9  ;;  %v7615_v20 = vld [vmem:[%s15449_s0 + $0x368] sm:$0xff]  ;;  %v6493_v5 = vpack.i.bf16 %v2054_v23, %v2053_v7 }
  0xee   :  { %5813 = vmatpush1.bf16.msra.mxu1 %v8261_v8  ;;  %v9263_v44 = vpop.permute.xlu1 %6304  ;;  %6479 = vrot.lane.b32.xlu0 %v6478_v17, %s7720_s9  ;;  %v9286_v26 = vsel %vm497_vm0, %v7615_v20, %v6257_v10  ;;  %v7616_v10 = vld [vmem:[%s15449_s0 + $0x128] sm:$0xff] }
  0xef   :  { %5862 = vmatprep.subr.bf16.mxu1 %v15795_v48  ;;  %v9268_v46 = vpop.permute.xlu0 %6299  ;;  %v1182_v27 = vsel %vm497_vm0, %v7616_v10, %v6172_v32  ;;  %v2056_v32 = vld [vmem:[%s15449_s0 + $0x104] sm:$0xff]  ;;  %v7619_v10 = vld [vmem:[%s15449_s0 + $0x378] sm:$0xff] }
  0xf1   :  { %1314 = vmatmul.mubr.f32.vlgmr.msra.gmra.mrb[32].mxu1 %v1181_v25  ;;  %6484 = vrot.lane.b32.xlu1 %v6483_v41, %s7720_s9  ;;  %v7617_v41 = vld [vmem:[%s15449_s0 + $0x370] sm:$0xff] }
  0xf2   :  { %1318 = vmatprep.mubr.f32.mxu1 %v9286_v26  ;;  %5864 = vmatpush1.bf16.msra.mxu1 %v7887_v55  ;;  %v9290_v17 = vpop.permute.xlu1 %6314  ;;  %v6262_v55 = vunpack.i.h.bf16 %v9141_v16  ;;  %v9307_v25 = vsel %vm497_vm0, %v7617_v41, %v6261_v59  ;;  %v2055_v16 = vld [vmem:[%s15449_s0 + $0xfc] sm:$0xff] }
  0xf3   :  { %5865 = vmatprep.subr.bf16.mxu1 %v15795_v48  ;;  %v9295_v50 = vpop.permute.xlu0 %6309  ;;  %6489 = vrot.lane.b32.xlu0 %v6488_v37, %s7720_s9  ;;  %15802 = vst [vmem:[#allocation31_spill] sm:$0xff] %v9307_v25  ;;  %v6177_v37 = vunpack.i.h.bf16 %v8806_v45  ;;  %v6498_v20 = vpack.i.bf16 %v2056_v32, %v2055_v16  ;;  %v7620_v16 = vld [vmem:[%s15449_s0 + $0x138] sm:$0xff]  ;;  %v6267_v32 = vunpack.i.h.bf16 %v9137_v14 }
  0xf5   :  { %1319 = vmatmul.mubr.f32.gmra.mrb[34].mxu1 %v1182_v27  ;;  %6494 = vrot.lane.b32.xlu1 %v6493_v5, %s7720_s9  ;;  %v6266_v5 = vunpack.i.l.bf16 %v9137_v14  ;;  %v9333_v27 = vsel %vm497_vm0, %v7619_v10, %v6262_v55  ;;  %v1184_v55 = vsel %vm497_vm0, %v7620_v16, %v6177_v37  ;;  %v2057_v37 = vld [vmem:[%s15449_s0 + $0x10c] sm:$0xff]  ;;  %v2058_v14 = vld [vmem:[%s15449_s0 + $0x114] sm:$0xff] }
  0xf6   :  { %1323 = vmatprep.mubr.f32.mxu1 %v9307_v25  ;;  %5867 = vmatpush1.bf16.msra.mxu1 %v7900_v60  ;;  %v9311_v7 = vpop.permute.xlu1 %6324  ;;  %v7618_v60 = vld [vmem:[%s15449_s0 + $0x130] sm:$0xff]  ;;  %15803 = vst [vmem:[#allocation32_spill] sm:$0xff] %v9333_v27 }
  0xf7   :  { %5868 = vmatprep.subr.bf16.mxu1 %v15795_v48  ;;  %v9322_v23 = vpop.permute.xlu0 %6319  ;;  %v1183_v59 = vsel %vm497_vm0, %v7618_v60, %v6176_v2  ;;  %6499 = vrot.lane.b32.xlu0 %v6498_v20, %s7720_s9  ;;  %v6181_v2 = vunpack.i.l.bf16 %v8845_v34 }
  0xf9   :  { %1324 = vmatmul.mubr.f32.gmra.mrb[36].mxu1 %v1183_v59  ;;  %v6182_v59 = vunpack.i.h.bf16 %v8845_v34  ;;  %v7623_v34 = vld [vmem:[%s15449_s0 + $0x388] sm:$0xff] }
  0xfa   :  { %1328 = vmatprep.mubr.f32.mxu1 %v9333_v27  ;;  %5870 = vmatpush1.bf16.msra.mxu1 %v7926_v6  ;;  %v9337_v45 = vpop.permute.xlu1 %6334  ;;  %v7621_v6 = vld [vmem:[%s15449_s0 + $0x380] sm:$0xff]  ;;  %v9377_v25 = vsel %vm497_vm0, %v7623_v34, %v6267_v32  ;;  %v7624_v32 = vld [vmem:[%s15449_s0 + $0x148] sm:$0xff] }
  0xfb   :  { %5871 = vmatprep.subr.bf16.mxu1 %v15795_v48  ;;  %v9342_v41 = vpop.permute.xlu0 %6329  ;;  %v9353_v60 = vsel %vm497_vm0, %v7621_v6, %v6266_v5  ;;  %v7622_v5 = vld [vmem:[%s15449_s0 + $0x140] sm:$0xff]  ;;  %v6271_v6 = vunpack.i.l.bf16 %v9175_v35 }
  0xfc   :  { %15804 = vst [vmem:[#allocation33_spill] sm:$0xff] %v9353_v60  ;;  %v1185_v10 = vsel %vm497_vm0, %v7622_v5, %v6181_v2  ;;  %v1519_v2 = vld [vmem:[%s15449_s0 + $0x13] sm:$0xff]  ;;  %v1186_v5 = vsel %vm497_vm0, %v7624_v32, %v6182_v59 }
  0xfd   :  { %1329 = vmatmul.mubr.f32.gmra.mrb[38].mxu1 %v1184_v55  ;;  %v6503_v55 = vpack.i.bf16 %v2058_v14, %v2057_v37 }
  0xfe   :  { %1333 = vmatprep.mubr.f32.mxu1 %v9353_v60  ;;  %5873 = vmatpush1.bf16.msra.mxu1 %v7952_v15  ;;  %v1518_v15 = vld [vmem:[%s15449_s0 + $0xb] sm:$0xff]  ;;  %v6345_v16 = vpop.permute.xlu1 %6344 }
  0xff   :  { %5874 = vmatprep.subr.bf16.mxu1 %v15795_v48  ;;  %v6340_v20 = vpop.permute.xlu0 %6339  ;;  %v6346_v14 = vunpack.i.l.bf16 %v6345_v16  ;;  %6504 = vrot.lane.b32.xlu1 %v6503_v55, %s7720_s9  ;;  %v6347_v59 = vunpack.i.h.bf16 %v6345_v16  ;;  %v6276_v16 = vunpack.i.l.bf16 %v9171_v3 }
 0x100   :  { %v6342_v60 = vunpack.i.h.bf16 %v6340_v20  ;;  %v6341_v27 = vunpack.i.l.bf16 %v6340_v20  ;;  %v6186_v20 = vunpack.i.l.bf16 %v8840_v0 }
 0x101   :  { %1334 = vmatmul.mubr.f32.gmra.mrb[40].mxu1 %v1185_v10  ;;  %v7625_v10 = vld [vmem:[%s15449_s0 + $0x390] sm:$0xff] }
 0x102   :  { %1338 = vmatprep.mubr.f32.mxu1 %v9377_v25  ;;  %5876 = vmatpush1.bf16.msra.mxu1 %v7978_v24  ;;  %v1722_v37 = vsel %vm497_vm0, %v1518_v15, %v6341_v27  ;;  %v1520_v24 = vld [vmem:[%s15449_s0 + $0x1b] sm:$0xff]  ;;  %v6272_v27 = vunpack.i.h.bf16 %v9175_v35  ;;  %v9401_v15 = vsel %vm497_vm0, %v7625_v10, %v6271_v6  ;;  %v1723_v55 = vsel %vm497_vm0, %v1519_v2, %v6342_v60  ;;  %v1521_v60 = vld [vmem:[%s15449_s0 + $0x23] sm:$0xff] }
 0x103   :  { %5877 = vmatprep.subr.bf16.mxu1 %v15795_v48  ;;  %1820 = vmatprep.mubr.f32.mxu0 %v1722_v37  ;;  %v1724_v34 = vsel %vm497_vm0, %v1520_v24, %v6346_v14  ;;  %v6187_v35 = vunpack.i.h.bf16 %v8840_v0  ;;  %v6350_v6 = vpop.permute.xlu0 %6349  ;;  %v1725_v14 = vsel %vm497_vm0, %v1521_v60, %v6347_v59  ;;  %v6277_v24 = vunpack.i.h.bf16 %v9171_v3 }
 0x104   :  { %1821 = vmatmul.mubr.f32.vlgmr.msra.gmra.mrb[36].mxu0 %v8539_v54  ;;  %v7626_v54 = vld [vmem:[%s15449_s0 + $0x150] sm:$0xff]  ;;  %v6351_v2 = vunpack.i.l.bf16 %v6350_v6  ;;  %v6352_v10 = vunpack.i.h.bf16 %v6350_v6  ;;  %v6192_v3 = vunpack.i.h.bf16 %v8879_v1  ;;  %v6196_v60 = vunpack.i.l.bf16 %v8874_v12 }
 0x105   :  { %1339 = vmatmul.mubr.f32.gmra.mrb[42].mxu1 %v1186_v5  ;;  %1825 = vmatprep.mubr.f32.mxu0 %v1723_v55  ;;  %v1187_v37 = vsel %vm497_vm0, %v7626_v54, %v6186_v20  ;;  %v6191_v20 = vunpack.i.l.bf16 %v8879_v1  ;;  %v1522_v5 = vld [vmem:[%s15449_s0 + $0x2b] sm:$0xff]  ;;  %v6281_v54 = vunpack.i.l.bf16 %v9209_v28 }
 0x106   :  { %1343 = vmatprep.mubr.f32.mxu1 %v9401_v15  ;;  %5879 = vmatpush1.bf16.msra.mxu1 %v8004_v33  ;;  %v7627_v33 = vld [vmem:[%s15449_s0 + $0x398] sm:$0xff]  ;;  %v1726_v55 = vsel %vm497_vm0, %v1522_v5, %v6351_v2  ;;  %v6282_v2 = vunpack.i.h.bf16 %v9209_v28  ;;  %v6197_v28 = vunpack.i.h.bf16 %v8874_v12 }
 0x107   :  { %5880 = vmatprep.subr.bf16.mxu1 %v15795_v48  ;;  %v9422_v0 = vsel %vm497_vm0, %v7627_v33, %v6272_v27  ;;  %v1524_v33 = vld [vmem:[%s15449_s0 + $0x3b] sm:$0xff]  ;;  %v6360_v5 = vpop.permute.xlu0 %6359 }
 0x108   :  { %1826 = vmatmul.mubr.f32.gmra.mrb[38].mxu0 %v8542_v56  ;;  %v7628_v56 = vld [vmem:[%s15449_s0 + $0x158] sm:$0xff] }
 0x109   :  { %1344 = vmatmul.mubr.f32.gmra.mrb[44].mxu1 %v1187_v37  ;;  %1830 = vmatprep.mubr.f32.mxu0 %v1724_v34  ;;  %v1188_v32 = vsel %vm497_vm0, %v7628_v56, %v6187_v35  ;;  %v6355_v34 = vpop.permute.xlu1 %6354  ;;  %v1523_v35 = vld [vmem:[%s15449_s0 + $0x33] sm:$0xff] }
 0x10a   :  { %1348 = vmatprep.mubr.f32.mxu1 %v9422_v0  ;;  %5882 = vmatpush1.bf16.msra.mxu1 %v8030_v42  ;;  %v7629_v42 = vld [vmem:[%s15449_s0 + $0x3a0] sm:$0xff]  ;;  %v6356_v37 = vunpack.i.l.bf16 %v6355_v34  ;;  %v1727_v6 = vsel %vm497_vm0, %v1523_v35, %v6352_v10  ;;  %v6361_v10 = vunpack.i.l.bf16 %v6360_v5 }
 0x10b   :  { %5883 = vmatprep.subr.bf16.mxu1 %v15795_v48  ;;  %v9442_v27 = vsel %vm497_vm0, %v7629_v42, %v6276_v16  ;;  %v6286_v42 = vunpack.i.l.bf16 %v9205_v63 }
 0x10c   :  { %1831 = vmatmul.mubr.f32.gmra.mrb[40].mxu0 %v8586_v40  ;;  %v7630_v40 = vld [vmem:[%s15449_s0 + $0x160] sm:$0xff]  ;;  %v1728_v56 = vsel %vm497_vm0, %v1524_v33, %v6356_v37 }
 0x10d   :  { %1349 = vmatmul.mubr.f32.gmra.mrb[46].mxu1 %v1188_v32  ;;  %1835 = vmatprep.mubr.f32.mxu0 %v1725_v14  ;;  %v1189_v59 = vsel %vm497_vm0, %v7630_v40, %v6191_v20  ;;  %v6357_v20 = vunpack.i.h.bf16 %v6355_v34  ;;  %v6287_v34 = vunpack.i.h.bf16 %v9205_v63  ;;  %v6202_v63 = vunpack.i.h.bf16 %v8913_v57 }
 0x10e   :  { %1353 = vmatprep.mubr.f32.mxu1 %v9442_v27  ;;  %5885 = vmatpush1.bf16.msra.mxu1 %v8056_v51  ;;  %v7631_v51 = vld [vmem:[%s15449_s0 + $0x3a8] sm:$0xff] }
 0x10f   :  { %5886 = vmatprep.subr.bf16.mxu1 %v15795_v48  ;;  %v9462_v1 = vsel %vm497_vm0, %v7631_v51, %v6277_v24  ;;  %v1525_v24 = vld [vmem:[%s15449_s0 + $0x43] sm:$0xff] }
 0x110   :  { %1836 = vmatmul.mubr.f32.gmra.mrb[42].mxu0 %v8622_v11  ;;  %v7632_v11 = vld [vmem:[%s15449_s0 + $0x168] sm:$0xff] }
 0x111   :  { %1354 = vmatmul.mubr.f32.gmra.mrb[48].mxu1 %v1189_v59  ;;  %1840 = vmatprep.mubr.f32.mxu0 %v1726_v55  ;;  %v1190_v16 = vsel %vm497_vm0, %v7632_v11, %v6192_v3  ;;  %v1729_v55 = vsel %vm497_vm0, %v1525_v24, %v6357_v20  ;;  %v6201_v3 = vunpack.i.l.bf16 %v8913_v57  ;;  %v1526_v59 = vld [vmem:[%s15449_s0 + $0x4b] sm:$0xff]  ;;  %v6291_v11 = vunpack.i.l.bf16 %v9244_v52  ;;  %v1528_v20 = vld [vmem:[%s15449_s0 + $0x5b] sm:$0xff]  ;;  %v6370_v24 = vpop.permute.xlu0 %6369 }
 0x112   :  { %1358 = vmatprep.mubr.f32.mxu1 %v9462_v1  ;;  %5888 = vmatpush1.bf16.msra.mxu1 %v8082_v62  ;;  %v7633_v62 = vld [vmem:[%s15449_s0 + $0x3b0] sm:$0xff]  ;;  %v1730_v51 = vsel %vm497_vm0, %v1526_v59, %v6361_v10  ;;  %v6371_v10 = vunpack.i.l.bf16 %v6370_v24  ;;  %v6297_v59 = vunpack.i.h.bf16 %v9240_v43 }
 0x113   :  { %5889 = vmatprep.subr.bf16.mxu1 %v15795_v48  ;;  %v9482_v14 = vsel %vm497_vm0, %v7633_v62, %v6281_v54  ;;  %v6362_v54 = vunpack.i.h.bf16 %v6360_v5 }
 0x114   :  { %1841 = vmatmul.mubr.f32.gmra.mrb[44].mxu0 %v8637_v22  ;;  %v7634_v22 = vld [vmem:[%s15449_s0 + $0x170] sm:$0xff] }
 0x115   :  { %1359 = vmatmul.mubr.f32.gmra.mrb[50].mxu1 %v1190_v16  ;;  %1845 = vmatprep.mubr.f32.mxu0 %v1727_v6  ;;  %v1191_v32 = vsel %vm497_vm0, %v7634_v22, %v6196_v60  ;;  %v6365_v6 = vpop.permute.xlu1 %6364  ;;  %v1527_v60 = vld [vmem:[%s15449_s0 + $0x53] sm:$0xff] }
 0x116   :  { %1363 = vmatprep.mubr.f32.mxu1 %v9482_v14  ;;  %5891 = vmatpush1.bf16.msra.mxu1 %v8108_v9  ;;  %v7635_v9 = vld [vmem:[%s15449_s0 + $0x3b8] sm:$0xff]  ;;  %v6366_v16 = vunpack.i.l.bf16 %v6365_v6  ;;  %v1731_v33 = vsel %vm497_vm0, %v1527_v60, %v6362_v54  ;;  %v6367_v22 = vunpack.i.h.bf16 %v6365_v6  ;;  %v6372_v54 = vunpack.i.h.bf16 %v6370_v24  ;;  %v6380_v24 = vpop.permute.xlu0 %6379 }
 0x117   :  { %5892 = vmatprep.subr.bf16.mxu1 %v15795_v48  ;;  %v9502_v12 = vsel %vm497_vm0, %v7635_v9, %v6282_v2  ;;  %v6206_v2 = vunpack.i.l.bf16 %v8908_v21  ;;  %v6296_v9 = vunpack.i.l.bf16 %v9240_v43  ;;  %v6212_v43 = vunpack.i.h.bf16 %v8947_v31  ;;  %v1531_v6 = vld [vmem:[%s15449_s0 + $0x73] sm:$0xff] }
 0x118   :  { %1846 = vmatmul.mubr.f32.gmra.mrb[46].mxu0 %v8669_v53  ;;  %v7636_v53 = vld [vmem:[%s15449_s0 + $0x178] sm:$0xff]  ;;  %v6301_v60 = vunpack.i.l.bf16 %v9268_v46 }
 0x119   :  { %1364 = vmatmul.mubr.f32.gmra.mrb[52].mxu1 %v1191_v32  ;;  %1850 = vmatprep.mubr.f32.mxu0 %v1728_v56  ;;  %v1192_v40 = vsel %vm497_vm0, %v7636_v53, %v6197_v28  ;;  %v6292_v56 = vunpack.i.h.bf16 %v9244_v52  ;;  %v1732_v32 = vsel %vm497_vm0, %v1528_v20, %v6366_v16  ;;  %v6207_v52 = vunpack.i.h.bf16 %v8908_v21 }
 0x11a   :  { %1368 = vmatprep.mubr.f32.mxu1 %v9502_v12  ;;  %5894 = vmatpush1.bf16.msra.mxu1 %v8134_v19  ;;  %v7637_v19 = vld [vmem:[%s15449_s0 + $0x3c0] sm:$0xff]  ;;  %v1735_v16 = vsel %vm497_vm0, %v1531_v6, %v6372_v54  ;;  %v6302_v20 = vunpack.i.h.bf16 %v9268_v46  ;;  %v7650_v46 = vld [vmem:[%s15449_s0 + $0x1b0] sm:$0xff] }
 0x11b   :  { %5895 = vmatprep.subr.bf16.mxu1 %v15795_v48  ;;  %v9522_v35 = vsel %vm497_vm0, %v7637_v19, %v6286_v42  ;;  %v1529_v42 = vld [vmem:[%s15449_s0 + $0x63] sm:$0xff] }
 0x11c   :  { %1851 = vmatmul.mubr.f32.gmra.mrb[48].mxu0 %v8715_v18  ;;  %v7638_v18 = vld [vmem:[%s15449_s0 + $0x180] sm:$0xff] }
 0x11d   :  { %1369 = vmatmul.mubr.f32.gmra.mrb[54].mxu1 %v1192_v40  ;;  %1855 = vmatprep.mubr.f32.mxu0 %v1729_v55  ;;  %v1193_v37 = vsel %vm497_vm0, %v7638_v18, %v6201_v3  ;;  %v1733_v55 = vsel %vm497_vm0, %v1529_v42, %v6367_v22  ;;  %v6211_v3 = vunpack.i.l.bf16 %v8947_v31  ;;  %v1530_v40 = vld [vmem:[%s15449_s0 + $0x6b] sm:$0xff]  ;;  %v1533_v42 = vld [vmem:[%s15449_s0 + $0x83] sm:$0xff] }
 0x11e   :  { %1373 = vmatprep.mubr.f32.mxu1 %v9522_v35  ;;  %5897 = vmatpush1.bf16.msra.mxu1 %v8160_v29  ;;  %v7639_v29 = vld [vmem:[%s15449_s0 + $0x3c8] sm:$0xff]  ;;  %v7653_v54 = vld [vmem:[%s15449_s0 + $0x400] sm:$0xff] }
 0x11f   :  { %5898 = vmatprep.subr.bf16.mxu1 %v15795_v48  ;;  %v9542_v57 = vsel %vm497_vm0, %v7639_v29, %v6287_v34  ;;  %v15805_v34 = vld [vmem:[#allocation7_spill] sm:$0xff] }
 0x120   :  { %1856 = vmatmul.mubr.f32.gmra.mrb[50].mxu0 %v8751_v4  ;;  %v7640_v4 = vld [vmem:[%s15449_s0 + $0x188] sm:$0xff] }
 0x121   :  { %1374 = vmatmul.mubr.f32.gmra.mrb[56].mxu1 %v1193_v37  ;;  %1860 = vmatprep.mubr.f32.mxu0 %v1730_v51  ;;  %v1194_v62 = vsel %vm497_vm0, %v7640_v4, %v6202_v63  ;;  %v1734_v51 = vsel %vm497_vm0, %v1530_v40, %v6371_v10  ;;  %v7646_v63 = vld [vmem:[%s15449_s0 + $0x1a0] sm:$0xff]  ;;  %v6375_v37 = vpop.permute.xlu1 %6374 }
 0x122   :  { %1378 = vmatprep.mubr.f32.mxu1 %v9542_v57  ;;  %5900 = vmatpush1.bf16.msra.mxu1 %v8186_v39  ;;  %v7641_v39 = vld [vmem:[%s15449_s0 + $0x3d0] sm:$0xff]  ;;  %v1197_v18 = vsel %vm497_vm0, %v7646_v63, %v6211_v3  ;;  %v6376_v29 = vunpack.i.l.bf16 %v6375_v37 }
 0x123   :  { %5901 = vmatprep.subr.bf16.mxu1 %v15795_v48  ;;  %v9562_v28 = vsel %vm497_vm0, %v7641_v39, %v6291_v11  ;;  %v15806_v11 = vld [vmem:[#allocation9_spill] sm:$0xff]  ;;  %v7649_v39 = vld [vmem:[%s15449_s0 + $0x3f0] sm:$0xff] }
 0x124   :  { %1861 = vmatmul.mubr.f32.gmra.mrb[52].mxu0 %v8784_v13  ;;  %v7642_v13 = vld [vmem:[%s15449_s0 + $0x190] sm:$0xff]  ;;  %v9639_v22 = vsel %vm497_vm0, %v7649_v39, %v6301_v60  ;;  %v6312_v39 = vunpack.i.h.bf16 %v9295_v50 }
 0x125   :  { %1379 = vmatmul.mubr.f32.gmra.mrb[58].mxu1 %v1194_v62  ;;  %1865 = vmatprep.mubr.f32.mxu0 %v1731_v33  ;;  %v1195_v5 = vsel %vm497_vm0, %v7642_v13, %v6206_v2  ;;  %v6216_v33 = vunpack.i.l.bf16 %v8942_v30  ;;  %v7648_v2 = vld [vmem:[%s15449_s0 + $0x1a8] sm:$0xff]  ;;  %v1532_v62 = vld [vmem:[%s15449_s0 + $0x7b] sm:$0xff]  ;;  %v6217_v13 = vunpack.i.h.bf16 %v8942_v30  ;;  %v6385_v6 = vpop.permute.xlu1 %6384  ;;  %v1535_v60 = vld [vmem:[%s15449_s0 + $0x93] sm:$0xff] }
 0x126   :  { %1383 = vmatprep.mubr.f32.mxu1 %v9562_v28  ;;  %5903 = vmatpush1.bf16.msra.mxu1 %v8212_v49  ;;  %v7643_v49 = vld [vmem:[%s15449_s0 + $0x3d8] sm:$0xff]  ;;  %v1198_v4 = vsel %vm497_vm0, %v7648_v2, %v6212_v43  ;;  %v6382_v43 = vunpack.i.h.bf16 %v6380_v24  ;;  %v15811_v2 = vld [vmem:[#allocation15_spill] sm:$0xff] }
 0x127   :  { %5904 = vmatprep.subr.bf16.mxu1 %v15795_v48  ;;  %v9582_v21 = vsel %vm497_vm0, %v7643_v49, %v6292_v56  ;;  %v15807_v56 = vld [vmem:[#allocation11_spill] sm:$0xff]  ;;  %v15808_v49 = vld [vmem:[#allocation13_spill] sm:$0xff] }
 0x128   :  { %1866 = vmatmul.mubr.f32.gmra.mrb[54].mxu0 %v8815_v38  ;;  %v7644_v38 = vld [vmem:[%s15449_s0 + $0x198] sm:$0xff] }
 0x129   :  { %1384 = vmatmul.mubr.f32.gmra.mrb[60].mxu1 %v1195_v5  ;;  %1870 = vmatprep.mubr.f32.mxu0 %v1732_v32  ;;  %v1196_v53 = vsel %vm497_vm0, %v7644_v38, %v6207_v52  ;;  %v6377_v32 = vunpack.i.h.bf16 %v6375_v37  ;;  %v1736_v52 = vsel %vm497_vm0, %v1532_v62, %v6376_v29  ;;  %v1199_v5 = vsel %vm497_vm0, %v7650_v46, %v6216_v33  ;;  %v7651_v30 = vld [vmem:[%s15449_s0 + $0x3f8] sm:$0xff]  ;;  %v7656_v62 = vld [vmem:[%s15449_s0 + $0x1c8] sm:$0xff] }
 0x12a   :  { %1388 = vmatprep.mubr.f32.mxu1 %v9582_v21  ;;  %5906 = vmatpush1.bf16.msra.mxu1 %v8238_v61  ;;  %v7645_v61 = vld [vmem:[%s15449_s0 + $0x3e0] sm:$0xff]  ;;  %v9657_v10 = vsel %vm497_vm0, %v7651_v30, %v6302_v20  ;;  %v6221_v38 = vunpack.i.l.bf16 %v8981_v47  ;;  %v1739_v33 = vsel %vm497_vm0, %v1535_v60, %v6382_v43  ;;  %v6387_v46 = vunpack.i.h.bf16 %v6385_v6 }
 0x12b   :  { %5907 = vmatprep.subr.bf16.mxu1 %v15795_v48  ;;  %v9602_v19 = vsel %vm497_vm0, %v7645_v61, %v6296_v9  ;;  %v6306_v9 = vunpack.i.l.bf16 %v9263_v44  ;;  %v1737_v3 = vsel %vm497_vm0, %v1533_v42, %v6377_v32  ;;  %v15809_v61 = vld [vmem:[#allocation16_spill] sm:$0xff]  ;;  %v6316_v30 = vunpack.i.l.bf16 %v9290_v17  ;;  %v15814_v43 = vld [vmem:[#allocation2_spill] sm:$0xff] }
 0x12c   :  { %1871 = vmatmul.mubr.f32.gmra.mrb[56].mxu0 %v15805_v34  ;;  %v6307_v34 = vunpack.i.h.bf16 %v9263_v44  ;;  %v7654_v44 = vld [vmem:[%s15449_s0 + $0x1c0] sm:$0xff]  ;;  %v15812_v32 = vld [vmem:[#allocation24_spill] sm:$0xff] }
 0x12d   :  { %1389 = vmatmul.mubr.f32.gmra.mrb[62].mxu1 %v1196_v53  ;;  %1875 = vmatprep.mubr.f32.mxu0 %v1733_v55  ;;  %v6381_v55 = vunpack.i.l.bf16 %v6380_v24  ;;  %v7652_v53 = vld [vmem:[%s15449_s0 + $0x1b8] sm:$0xff]  ;;  %v1201_v37 = vsel %vm497_vm0, %v7654_v44, %v6221_v38  ;;  %v6227_v24 = vunpack.i.h.bf16 %v15811_v2 }
 0x12e   :  { %1393 = vmatprep.mubr.f32.mxu1 %v9602_v19  ;;  %5909 = vmatpush1.bf16.msra.mxu1 %v8261_v8  ;;  %v7647_v8 = vld [vmem:[%s15449_s0 + $0x3e8] sm:$0xff]  ;;  %v1200_v40 = vsel %vm497_vm0, %v7652_v53, %v6217_v13 }
 0x12f   :  { %v9621_v31 = vsel %vm497_vm0, %v7647_v8, %v6297_v59  ;;  %v1534_v59 = vld [vmem:[%s15449_s0 + $0x8b] sm:$0xff] }
 0x130   :  { %1876 = vmatmul.mubr.f32.gmra.mrb[58].mxu0 %v15806_v11  ;;  %v1738_v63 = vsel %vm497_vm0, %v1534_v59, %v6381_v55  ;;  %v6311_v11 = vunpack.i.l.bf16 %v9295_v50  ;;  %v15810_v8 = vld [vmem:[#allocation20_spill] sm:$0xff]  ;;  %v7659_v55 = vld [vmem:[%s15449_s0 + $0x418] sm:$0xff] }
 0x131   :  { %1394 = vmatmul.mubr.f32.gmra.mrb[64].mxu1 %v1197_v18  ;;  %1880 = vmatprep.mubr.f32.mxu0 %v1734_v51  ;;  %v9675_v51 = vsel %vm497_vm0, %v7653_v54, %v6306_v9  ;;  %v6222_v18 = vunpack.i.h.bf16 %v8981_v47  ;;  %v7655_v47 = vld [vmem:[%s15449_s0 + $0x408] sm:$0xff]  ;;  %v7658_v50 = vld [vmem:[%s15449_s0 + $0x1d0] sm:$0xff]  ;;  %v6390_v9 = vpop.permute.xlu0 %6389  ;;  %v6317_v54 = vunpack.i.h.bf16 %v9290_v17  ;;  %v7662_v17 = vld [vmem:[%s15449_s0 + $0x1e0] sm:$0xff] }
 0x132   :  { %1398 = vmatprep.mubr.f32.mxu1 %v9621_v31  ;;  %v9693_v29 = vsel %vm497_vm0, %v7655_v47, %v6307_v34  ;;  %v6391_v38 = vunpack.i.l.bf16 %v6390_v9  ;;  %v7660_v34 = vld [vmem:[%s15449_s0 + $0x1d8] sm:$0xff]  ;;  %v6392_v44 = vunpack.i.h.bf16 %v6390_v9  ;;  %v6321_v47 = vunpack.i.l.bf16 %v9322_v23 }
 0x133   :  { %v1202_v20 = vsel %vm497_vm0, %v7656_v62, %v6222_v18 }
 0x134   :  { %1881 = vmatmul.mubr.f32.gmra.mrb[60].mxu0 %v15807_v56  ;;  %v1536_v56 = vld [vmem:[%s15449_s0 + $0x9b] sm:$0xff] }
 0x135   :  { %1399 = vmatmul.mubr.f32.gmra.mrb[66].mxu1 %v1198_v4  ;;  %1885 = vmatprep.mubr.f32.mxu0 %v1735_v16  ;;  %v6386_v16 = vunpack.i.l.bf16 %v6385_v6  ;;  %v6226_v4 = vunpack.i.l.bf16 %v15811_v2 }
 0x136   :  { %1403 = vmatprep.mubr.f32.mxu1 %v9639_v22 }
 0x137   :  { %v1203_v42 = vsel %vm497_vm0, %v7658_v50, %v6226_v4 }
 0x138   :  { %1886 = vmatmul.mubr.f32.gmra.mrb[62].mxu0 %v15808_v49  ;;  %v1537_v49 = vld [vmem:[%s15449_s0 + $0xa3] sm:$0xff] }
 0x139   :  { %1404 = vmatmul.mubr.f32.gmra.mrb[68].mxu1 %v1199_v5  ;;  %1890 = vmatprep.mubr.f32.mxu0 %v1736_v52  ;;  %v7657_v52 = vld [vmem:[%s15449_s0 + $0x410] sm:$0xff]  ;;  %v1740_v5 = vsel %vm497_vm0, %v1536_v56, %v6386_v16  ;;  %v1741_v53 = vsel %vm497_vm0, %v1537_v49, %v6387_v46  ;;  %v15815_v16 = vld [vmem:[#allocation3_spill] sm:$0xff]  ;;  %v6322_v46 = vunpack.i.h.bf16 %v9322_v23 }
 0x13a   :  { %1408 = vmatprep.mubr.f32.mxu1 %v9657_v10  ;;  %v9711_v13 = vsel %vm497_vm0, %v7657_v52, %v6311_v11  ;;  %v6395_v11 = vpop.permute.xlu1 %6394  ;;  %v1540_v52 = vld [vmem:[%s15449_s0 + $0xbb] sm:$0xff]  ;;  %v7666_v23 = vld [vmem:[%s15449_s0 + $0x1f0] sm:$0xff] }
 0x13b   :  { %v6396_v4 = vunpack.i.l.bf16 %v6395_v11 }
 0x13c   :  { %1891 = vmatmul.mubr.f32.gmra.mrb[64].mxu0 %v15809_v61  ;;  %v1538_v61 = vld [vmem:[%s15449_s0 + $0xab] sm:$0xff] }
 0x13d   :  { %1409 = vmatmul.mubr.f32.gmra.mrb[70].mxu1 %v1200_v40  ;;  %1895 = vmatprep.mubr.f32.mxu0 %v1737_v3  ;;  %v9729_v3 = vsel %vm497_vm0, %v7659_v55, %v6312_v39  ;;  %v15813_v40 = vld [vmem:[#allocation19_spill] sm:$0xff]  ;;  %v1744_v9 = vsel %vm497_vm0, %v1540_v52, %v6396_v4  ;;  %v6400_v55 = vpop.permute.xlu0 %6399 }
 0x13e   :  { %1413 = vmatprep.mubr.f32.mxu1 %v9675_v51  ;;  %v6231_v59 = vunpack.i.l.bf16 %v15813_v40  ;;  %v6232_v6 = vunpack.i.h.bf16 %v15813_v40  ;;  %v7664_v39 = vld [vmem:[%s15449_s0 + $0x1e8] sm:$0xff]  ;;  %v15818_v40 = vld [vmem:[#allocation5_spill] sm:$0xff]  ;;  %v6405_v4 = vpop.permute.xlu1 %6404 }
 0x13f   :  { %v6406_v52 = vunpack.i.l.bf16 %v6405_v4 }
 0x140   :  { %1896 = vmatmul.mubr.f32.gmra.mrb[66].mxu0 %v15810_v8  ;;  %v1205_v60 = vsel %vm497_vm0, %v7662_v17, %v6231_v59  ;;  %v1539_v8 = vld [vmem:[%s15449_s0 + $0xb3] sm:$0xff]  ;;  %v15820_v17 = vld [vmem:[#allocation6_spill] sm:$0xff] }
 0x141   :  { %1414 = vmatmul.mubr.f32.gmra.mrb[72].mxu1 %v1201_v37  ;;  %1900 = vmatprep.mubr.f32.mxu0 %v1738_v63  ;;  %v7661_v63 = vld [vmem:[%s15449_s0 + $0x420] sm:$0xff]  ;;  %v1742_v37 = vsel %vm497_vm0, %v1538_v61, %v6391_v38  ;;  %v1743_v62 = vsel %vm497_vm0, %v1539_v8, %v6392_v44  ;;  %v7667_v59 = vld [vmem:[%s15449_s0 + $0x438] sm:$0xff]  ;;  %v6402_v8 = vunpack.i.h.bf16 %v6400_v55 }
 0x142   :  { %1418 = vmatprep.mubr.f32.mxu1 %v9693_v29  ;;  %v9747_v18 = vsel %vm497_vm0, %v7661_v63, %v6316_v30  ;;  %v1541_v38 = vld [vmem:[%s15449_s0 + $0xc3] sm:$0xff]  ;;  %v7668_v63 = vld [vmem:[%s15449_s0 + $0x1f8] sm:$0xff] }
 0x144   :  { %1901 = vmatmul.mubr.f32.gmra.mrb[68].mxu0 %v15812_v32  ;;  %v1206_v32 = vsel %vm497_vm0, %v7664_v39, %v6232_v6  ;;  %v6327_v6 = vunpack.i.h.bf16 %v9311_v7  ;;  %v7671_v39 = vld [vmem:[%s15449_s0 + $0x448] sm:$0xff] }
 0x145   :  { %1419 = vmatmul.mubr.f32.gmra.mrb[74].mxu1 %v1202_v20  ;;  %1905 = vmatprep.mubr.f32.mxu0 %v1739_v33  ;;  %v7663_v33 = vld [vmem:[%s15449_s0 + $0x428] sm:$0xff]  ;;  %v15816_v20 = vld [vmem:[#allocation18_spill] sm:$0xff] }
 0x146   :  { %1423 = vmatprep.mubr.f32.mxu1 %v9711_v13  ;;  %v9765_v2 = vsel %vm497_vm0, %v7663_v33, %v6317_v54  ;;  %v6236_v56 = vunpack.i.l.bf16 %v15816_v20  ;;  %v6237_v49 = vunpack.i.h.bf16 %v15816_v20  ;;  %v15819_v54 = vld [vmem:[#allocation23_spill] sm:$0xff]  ;;  %v6331_v20 = vunpack.i.l.bf16 %v9342_v41 }
 0x148   :  { %1906 = vmatmul.mubr.f32.gmra.mrb[70].mxu0 %v9104_v36  ;;  %v1204_v36 = vsel %vm497_vm0, %v7660_v34, %v6227_v24  ;;  %v7665_v24 = vld [vmem:[%s15449_s0 + $0x430] sm:$0xff]  ;;  %v1207_v30 = vsel %vm497_vm0, %v7666_v23, %v6236_v56  ;;  %v9801_v34 = vsel %vm497_vm0, %v7667_v59, %v6322_v46  ;;  %v1208_v44 = vsel %vm497_vm0, %v7668_v63, %v6237_v49  ;;  %v1544_v49 = vld [vmem:[%s15449_s0 + $0xdb] sm:$0xff] }
 0x149   :  { %1424 = vmatmul.mubr.f32.gmra.mrb[76].mxu1 %v1203_v42  ;;  %1910 = vmatprep.mubr.f32.mxu0 %v1740_v5  ;;  %v15817_v5 = vld [vmem:[#allocation4_spill] sm:$0xff]  ;;  %v9783_v50 = vsel %vm497_vm0, %v7665_v24, %v6321_v47  ;;  %v6397_v42 = vunpack.i.h.bf16 %v6395_v11  ;;  %v6332_v23 = vunpack.i.h.bf16 %v9342_v41  ;;  %v1748_v59 = vsel %vm497_vm0, %v1544_v49, %v6406_v52  ;;  %v7678_v49 = vld [vmem:[%s15449_s0 + $0x220] sm:$0xff] }
 0x14a   :  { %1428 = vmatprep.mubr.f32.mxu1 %v9729_v3  ;;  %v15821_v56 = vld [vmem:[#allocation8_spill] sm:$0xff]  ;;  %v6336_v63 = vunpack.i.l.bf16 %v9337_v45 }
 0x14b   :  { %v1745_v61 = vsel %vm497_vm0, %v1541_v38, %v6397_v42  ;;  %v7672_v42 = vld [vmem:[%s15449_s0 + $0x208] sm:$0xff] }
 0x14c   :  { %1911 = vmatmul.mubr.f32.gmra.mrb[72].mxu0 %v15814_v43  ;;  %v6241_v43 = vunpack.i.l.bf16 %v15819_v54 }
 0x14d   :  { %1429 = vmatmul.mubr.f32.gmra.mrb[78].mxu1 %v1204_v36  ;;  %1915 = vmatprep.mubr.f32.mxu0 %v1741_v53  ;;  %v6326_v53 = vunpack.i.l.bf16 %v9311_v7  ;;  %v6401_v36 = vunpack.i.l.bf16 %v6400_v55  ;;  %v7670_v7 = vld [vmem:[%s15449_s0 + $0x200] sm:$0xff]  ;;  %v7673_v55 = vld [vmem:[%s15449_s0 + $0x450] sm:$0xff] }
 0x14e   :  { %1433 = vmatprep.mubr.f32.mxu1 %v9747_v18  ;;  %v1209_v33 = vsel %vm497_vm0, %v7670_v7, %v6241_v43  ;;  %v9855_v38 = vsel %vm497_vm0, %v7673_v55, %v6331_v20  ;;  %v1545_v43 = vld [vmem:[%s15449_s0 + $0xe3] sm:$0xff]  ;;  %v9910_v55 = vld [vmem:[%s15451_s2] ss:$0 sm:$0xff] }
 0x14f   :  { %v15826_v20 = vld [vmem:[#allocation14_spill] sm:$0xff] }
 0x150   :  { %1916 = vmatmul.mubr.f32.gmra.mrb[74].mxu0 %v15815_v16  ;;  %v6242_v16 = vunpack.i.h.bf16 %v15819_v54  ;;  %v6410_v54 = vpop.permute.xlu0 %6409 }
 0x151   :  { %1434 = vmatmul.mubr.f32.gmra.mrb[80].mxu1 %v1205_v60  ;;  %1920 = vmatprep.mubr.f32.mxu0 %v1742_v37  ;;  %v1542_v37 = vld [vmem:[%s15449_s0 + $0xcb] sm:$0xff]  ;;  %v7669_v60 = vld [vmem:[%s15449_s0 + $0x440] sm:$0xff] }
 0x152   :  { %1438 = vmatprep.mubr.f32.mxu1 %v9765_v2  ;;  %v9819_v11 = vsel %vm497_vm0, %v7669_v60, %v6326_v53  ;;  %v1746_v47 = vsel %vm497_vm0, %v1542_v37, %v6401_v36  ;;  %v9858_v53 = vpop.permute.xlu1 %6414  ;;  %v7674_v36 = vld [vmem:[%s15449_s0 + $0x210] sm:$0xff]  ;;  %v7675_v37 = vld [vmem:[%s15449_s0 + $0x458] sm:$0xff] }
 0x154   :  { %1921 = vmatmul.mubr.f32.gmra.mrb[76].mxu0 %v15817_v5  ;;  %v15822_v5 = vld [vmem:[#allocation22_spill] sm:$0xff]  ;;  %v9896_v52 = vpop.permute.xlu0 %6419 }
 0x155   :  { %1439 = vmatmul.mubr.f32.gmra.mrb[82].mxu1 %v1206_v32  ;;  %1925 = vmatprep.mubr.f32.mxu0 %v1743_v62  ;;  %v1543_v62 = vld [vmem:[%s15449_s0 + $0xd3] sm:$0xff]  ;;  %v9837_v32 = vsel %vm497_vm0, %v7671_v39, %v6327_v6  ;;  %v6246_v24 = vunpack.i.l.bf16 %v15822_v5  ;;  %v6247_v41 = vunpack.i.h.bf16 %v15822_v5  ;;  %v9875_v6 = vsel %vm497_vm0, %v7675_v37, %v6332_v23 }
 0x156   :  { %1443 = vmatprep.mubr.f32.mxu1 %v9783_v50  ;;  %v1747_v46 = vsel %vm497_vm0, %v1543_v62, %v6402_v8  ;;  %v15825_v8 = vld [vmem:[#allocation26_spill] sm:$0xff]  ;;  %v6337_v62 = vunpack.i.h.bf16 %v9337_v45 }
 0x158   :  { %1926 = vmatmul.mubr.f32.gmra.mrb[78].mxu0 %v15818_v40  ;;  %v6407_v40 = vunpack.i.h.bf16 %v6405_v4  ;;  %v1546_v4 = vld [vmem:[%s15449_s0 + $0xeb] sm:$0xff] }
 0x159   :  { %1444 = vmatmul.mubr.f32.gmra.mrb[84].mxu1 %v1207_v30  ;;  %1930 = vmatprep.mubr.f32.mxu0 %v1744_v9  ;;  %v1210_v9 = vsel %vm497_vm0, %v7672_v42, %v6242_v16  ;;  %v15823_v30 = vld [vmem:[#allocation10_spill] sm:$0xff]  ;;  %v7676_v16 = vld [vmem:[%s15449_s0 + $0x218] sm:$0xff]  ;;  %v6252_v42 = vunpack.i.h.bf16 %v15825_v8 }
 0x15a   :  { %1448 = vmatprep.mubr.f32.mxu1 %v9801_v34  ;;  %v1749_v60 = vsel %vm497_vm0, %v1545_v43, %v6407_v40  ;;  %v1212_v7 = vsel %vm497_vm0, %v7676_v16, %v6247_v41  ;;  %v15827_v40 = vld [vmem:[#allocation17_spill] sm:$0xff]  ;;  %v6430_v16 = vpop.permute.xlu0 %6429 }
 0x15c   :  { %1931 = vmatmul.mubr.f32.gmra.mrb[80].mxu0 %v15820_v17  ;;  %v6411_v17 = vunpack.i.l.bf16 %v6410_v54 }
 0x15d   :  { %1449 = vmatmul.mubr.f32.gmra.mrb[86].mxu1 %v1208_v44  ;;  %1935 = vmatprep.mubr.f32.mxu0 %v1745_v61  ;;  %v1211_v61 = vsel %vm497_vm0, %v7674_v36, %v6246_v24  ;;  %v15824_v44 = vld [vmem:[#allocation12_spill] sm:$0xff]  ;;  %v6416_v36 = vunpack.i.l.bf16 %v9858_v53 }
 0x15e   :  { %1453 = vmatprep.mubr.f32.mxu1 %v9819_v11  ;;  %v1750_v45 = vsel %vm497_vm0, %v1546_v4, %v6411_v17 }
 0x160   :  { %1936 = vmatmul.mubr.f32.gmra.mrb[82].mxu0 %v15821_v56  ;;  %v7677_v56 = vld [vmem:[%s15449_s0 + $0x460] sm:$0xff] }
 0x161   :  { %1454 = vmatmul.mubr.f32.gmra.mrb[88].mxu1 %v1209_v33  ;;  %1940 = vmatprep.mubr.f32.mxu0 %v1746_v47  ;;  %v6251_v47 = vunpack.i.l.bf16 %v15825_v8  ;;  %v6425_v33 = vpop.permute.xlu1 %6424  ;;  %v9893_v39 = vsel %vm497_vm0, %v7677_v56, %v6336_v63  ;;  %v7680_v63 = vld [vmem:[%s15449_s0 + $0x12b] sm:$0xff]  ;;  %v6431_v56 = vunpack.i.l.bf16 %v6430_v16 }
 0x162   :  { %1458 = vmatprep.mubr.f32.mxu1 %v9837_v32  ;;  %v6426_v24 = vunpack.i.l.bf16 %v6425_v33  ;;  %v7681_v8 = vld [vmem:[%s15449_s0 + $0x228] sm:$0xff] }
 0x163   :  { %v1213_v23 = vsel %vm497_vm0, %v7678_v49, %v6251_v47  ;;  %v1214_v47 = vsel %vm497_vm0, %v7681_v8, %v6252_v42  ;;  %v1549_v49 = vld [vmem:[%s15449_s0 + $0x103] sm:$0xff] }
 0x164   :  { %1941 = vmatmul.mubr.f32.gmra.mrb[84].mxu0 %v15823_v30  ;;  %v1547_v30 = vld [vmem:[%s15449_s0 + $0xf3] sm:$0xff]  ;;  %v15832_v8 = vld [vmem:[#allocation27_spill] sm:$0xff] }
 0x165   :  { %1459 = vmatmul.mubr.f32.gmra.mrb[90].mxu1 %v1210_v9  ;;  %1945 = vmatprep.mubr.f32.mxu0 %v1747_v46  ;;  %v6412_v46 = vunpack.i.h.bf16 %v6410_v54 }
 0x166   :  { %1463 = vmatprep.mubr.f32.mxu1 %v9855_v38 }
 0x167   :  { %v1751_v43 = vsel %vm497_vm0, %v1547_v30, %v6412_v46 }
 0x168   :  { %1946 = vmatmul.mubr.f32.gmra.mrb[86].mxu0 %v15824_v44  ;;  %v2195_v44 = vsel %vm497_vm0, %v7680_v63, %v6426_v24  ;;  %v6432_v63 = vunpack.i.h.bf16 %v6430_v16  ;;  %v6422_v16 = vunpack.i.h.bf16 %v9896_v52 }
 0x169   :  { %1464 = vmatmul.mubr.f32.gmra.mrb[92].mxu1 %v1211_v61  ;;  %1950 = vmatprep.mubr.f32.mxu0 %v1748_v59  ;;  %v7679_v59 = vld [vmem:[%s15449_s0 + $0x468] sm:$0xff]  ;;  %v6427_v61 = vunpack.i.h.bf16 %v6425_v33  ;;  %v15829_v33 = vld [vmem:[#allocation21_spill] sm:$0xff] }
 0x16a   :  { %1468 = vmatprep.mubr.f32.mxu1 %v9875_v6  ;;  %v9917_v41 = vsel %vm497_vm0, %v7679_v59, %v6337_v62  ;;  %v6417_v62 = vunpack.i.h.bf16 %v9858_v53  ;;  %v15831_v53 = vld [vmem:[#allocation25_spill] sm:$0xff] }
 0x16c   :  { %1951 = vmatmul.mubr.f32.gmra.mrb[88].mxu0 %v15826_v20 }
 0x16d   :  { %1469 = vmatmul.mubr.f32.gmra.mrb[94].mxu1 %v1212_v7  ;;  %1955 = vmatprep.mubr.f32.mxu0 %v1749_v60  ;;  %v1548_v7 = vld [vmem:[%s15449_s0 + $0xfb] sm:$0xff] }
 0x16e   :  { %1473 = vmatprep.mubr.f32.mxu1 %v9893_v39  ;;  %v638_v5 = vpop.f32.mrb[0].mxu0  ;;  %v1752_v46 = vsel %vm497_vm0, %v1548_v7, %v6416_v36  ;;  %v1753_v36 = vsel %vm497_vm0, %v1549_v49, %v6417_v62 }
 0x16f   :  { %v640_v9 = vpop.f32.mrb[1].mxu0  ;;  %v9927_v37 = vadd.f32 %v9910_v55, %v638_v5  ;;  %v7682_v5 = vld [vmem:[%s15449_s0 + $0x133] sm:$0xff] }
 0x170   :  { %1956 = vmatmul.mubr.f32.gmra.mrb[90].mxu0 %v15827_v40  ;;  %v2196_v24 = vsel %vm497_vm0, %v7682_v5, %v6427_v61  ;;  %v6421_v40 = vunpack.i.l.bf16 %v9896_v52  ;;  %v7683_v61 = vld [vmem:[%s15449_s0 + $0x13b] sm:$0xff]  ;;  %v15834_v52 = vld [vmem:[#allocation31_spill] sm:$0xff] }
 0x171   :  { %1474 = vmatmul.mubr.f32.gmra.mrb[96].mxu1 %v1213_v23  ;;  %1960 = vmatprep.mubr.f32.mxu0 %v1750_v45  ;;  %15828 = vst [vmem:[#allocation7_spill] sm:$0xff] %v9927_v37  ;;  %v15489_v45 = vmax.f32 %v9927_v37, 0.0 }
 0x172   :  { %1478 = vmatprep.mubr.f32.mxu1 %v9917_v41  ;;  %v643_v54 = vpop.f32.mrb[2].mxu0 }
 0x173   :  { %v644_v17 = vadd.f32 %v9910_v55, %v643_v54  ;;  %v645_v60 = vpop.f32.mrb[3].mxu0  ;;  %v2197_v54 = vsel %vm497_vm0, %v7683_v61, %v6431_v56 }
 0x174   :  { %1961 = vmatmul.mubr.f32.gmra.mrb[92].mxu0 %v15829_v33  ;;  %v1550_v60 = vld [vmem:[%s15449_s0 + $0x10b] sm:$0xff] }
 0x175   :  { %1479 = vmatmul.mubr.f32.gmra.mrb[98].mxu1 %v1214_v47  ;;  %v9938_v4 = vmax.f32 %v644_v17, 0.0  ;;  %1965 = vmatprep.mubr.f32.mxu0 %v1751_v43  ;;  %v6435_v17 = vpop.permute.xlu1 %6434  ;;  %v1754_v56 = vsel %vm497_vm0, %v1550_v60, %v6421_v40 }
 0x176   :  { %2293 = vmatprep.mubr.f32.mxu1 %v2195_v44  ;;  %v648_v20 = vpop.f32.mrb[4].mxu0 }
 0x177   :  { %15830 = vst [vmem:[#allocation9_spill] sm:$0xff] %v9938_v4  ;;  %v649_v42 = vadd.f32 %v9910_v55, %v648_v20  ;;  %v650_v9 = vpop.f32.mrb[5].mxu0  ;;  %v2661_v23 = vrot.slane %v9938_v4, 1  ;;  %v6436_v20 = vunpack.i.l.bf16 %v6435_v17 }
 0x178   :  { %1966 = vmatmul.mubr.f32.gmra.mrb[94].mxu0 %v15831_v53  ;;  %v6437_v9 = vunpack.i.h.bf16 %v6435_v17 }
 0x179   :  { %2294 = vmatmul.mubr.f32.vlgmr.msra.gmra.mrb[100].mxu1 %v9238_v58  ;;  %v9954_v30 = vmax.f32 %v649_v42, 0.0  ;;  %1970 = vmatprep.mubr.f32.mxu0 %v1752_v46  ;;  %v2660_v58 = vrot.slane %v15489_v45, 1  ;;  %v15833_v42 = vld [vmem:[#allocation28_spill] sm:$0xff] }
 0x17a   :  { %2298 = vmatprep.mubr.f32.mxu1 %v2196_v24  ;;  %v653_v59 = vpop.f32.mrb[6].mxu0  ;;  %v1551_v24 = vld [vmem:[%s15449_s0 + $0x113] sm:$0xff] }
 0x17b   :  { %v15492_v43 = vrot.slane %v9954_v30, 1  ;;  %v655_v44 = vpop.f32.mrb[7].mxu0  ;;  %v2662_v47 = vsel %vm2659_vm1, %v2660_v58, %v2661_v23  ;;  %v1755_v53 = vsel %vm497_vm0, %v1551_v24, %v6422_v16 }
 0x17c   :  { %1971 = vmatmul.mubr.f32.gmra.mrb[96].mxu0 %v15832_v8  ;;  %v15836_v44 = vld [vmem:[#allocation32_spill] sm:$0xff] }
 0x17d   :  { %2299 = vmatmul.mubr.f32.gmra.mrb[102].mxu1 %v9286_v26  ;;  %1975 = vmatprep.mubr.f32.mxu0 %v1753_v36  ;;  %v2664_v7 = vsel %vm2659_vm1, %v2661_v23, %v15492_v43  ;;  %v7684_v26 = vld [vmem:[%s15449_s0 + $0x143] sm:$0xff]  ;;  %v7685_v23 = vld [vmem:[%s15449_s0 + $0x14b] sm:$0xff]  ;;  %v6440_v36 = vpop.permute.xlu0 %6439  ;;  %v7686_v8 = vld [vmem:[%s15449_s0 + $0x153] sm:$0xff] }
 0x17e   :  { %2303 = vmatprep.mubr.f32.mxu1 %v2197_v54  ;;  %v9975_v33 = vpop.f32.mrb[8].mxu0  ;;  %v6508_v62 = vpack.i.bf16 %v2664_v7, %v2662_v47  ;;  %v2198_v5 = vsel %vm497_vm0, %v7684_v26, %v6432_v63  ;;  %v2199_v40 = vsel %vm497_vm0, %v7685_v23, %v6436_v20  ;;  %v15835_v63 = vld [vmem:[#allocation29_spill] sm:$0xff]  ;;  %v6441_v60 = vunpack.i.l.bf16 %v6440_v36 }
 0x17f   :  { %v660_v46 = vpop.f32.mrb[9].mxu0  ;;  %v2200_v47 = vsel %vm497_vm0, %v7686_v8, %v6437_v9  ;;  %v654_v26 = vadd.f32 %v9910_v55, %v653_v59  ;;  %v6442_v24 = vunpack.i.h.bf16 %v6440_v36 }
 0x180   :  { %1976 = vmatmul.mubr.f32.gmra.mrb[98].mxu0 %v15833_v42  ;;  %6509 = vrot.lane.b32.xlu0 %v6508_v62, %s7721_s25  ;;  %v15838_v46 = vld [vmem:[#allocation33_spill] sm:$0xff] }
 0x181   :  { %2304 = vmatmul.mubr.f32.gmra.mrb[104].mxu1 %v15834_v52  ;;  %1980 = vmatprep.mubr.f32.mxu0 %v1754_v56  ;;  %v15837_v56 = vld [vmem:[#allocation30_spill] sm:$0xff]  ;;  %v10016_v36 = vmax.f32 %v654_v26, 0.0 }
 0x182   :  { %v9988_v49 = vpop.f32.mrb[10].mxu0  ;;  %2308 = vmatprep.mubr.f32.mxu1 %v2198_v5  ;;  %v7687_v52 = vld [vmem:[%s15449_s0 + $0x15b] sm:$0xff] }
 0x183   :  { %v728_v61 = vpop.f32.mrb[0].mxu1  ;;  %v665_v54 = vpop.f32.mrb[11].mxu0  ;;  %v2201_v9 = vsel %vm497_vm0, %v7687_v52, %v6441_v60  ;;  %15840 = vst [vmem:[#allocation13_spill] sm:$0xff] %v10016_v36  ;;  %v7688_v60 = vld [vmem:[%s15449_s0 + $0x163] sm:$0xff] }
 0x184   :  { %v730_v58 = vpop.f32.mrb[1].mxu1  ;;  %1981 = vmatmul.mubr.f32.gmra.mrb[100].mxu0 %v15835_v63  ;;  %v729_v5 = vadd.f32 %v9910_v55, %v728_v61 }
 0x185   :  { %2309 = vmatmul.mubr.f32.gmra.mrb[106].mxu1 %v15836_v44  ;;  %1985 = vmatprep.mubr.f32.mxu0 %v1755_v53  ;;  %v6445_v53 = vpop.permute.xlu1 %6444 }
 0x186   :  { %2313 = vmatprep.mubr.f32.mxu1 %v2199_v40  ;;  %v668_v17 = vpop.f32.mrb[12].mxu0  ;;  %v6446_v59 = vunpack.i.l.bf16 %v6445_v53  ;;  %v10018_v61 = vmax.f32 %v729_v5, 0.0  ;;  %v6447_v5 = vunpack.i.h.bf16 %v6445_v53 }
 0x187   :  { %v733_v7 = vpop.f32.mrb[2].mxu1  ;;  %v670_v16 = vpop.f32.mrb[13].mxu0  ;;  %v669_v26 = vadd.f32 %v9910_v55, %v668_v17  ;;  %v3826_v17 = vrot.slane %v9954_v30, 4 }
 0x188   :  { %v734_v62 = vadd.f32 %v9910_v55, %v733_v7  ;;  %v735_v20 = vpop.f32.mrb[3].mxu1  ;;  %1986 = vmatmul.mubr.f32.gmra.mrb[102].mxu0 %v15837_v56  ;;  %15841 = vst [vmem:[#allocation16_spill] sm:$0xff] %v10018_v61 }
 0x189   :  { %2314 = vmatmul.mubr.f32.gmra.mrb[108].mxu1 %v15838_v46  ;;  %v659_v46 = vadd.f32 %v9910_v55, %v9975_v33 }
 0x18a   :  { %2318 = vmatprep.mubr.f32.mxu1 %v2200_v47  ;;  %v10006_v42 = vpop.f32.mrb[14].mxu0  ;;  %v10012_v54 = vmax.f32 %v734_v62, 0.0  ;;  %v2202_v47 = vsel %vm497_vm0, %v7688_v60, %v6442_v24  ;;  %v7689_v24 = vld [vmem:[%s15449_s0 + $0x16b] sm:$0xff] }
 0x18b   :  { %v738_v23 = vpop.f32.mrb[4].mxu1  ;;  %v675_v40 = vpop.f32.mrb[15].mxu0  ;;  %v2203_v52 = vsel %vm497_vm0, %v7689_v24, %v6446_v59  ;;  %v664_v59 = vadd.f32 %v9910_v55, %v9988_v49  ;;  %v10062_v24 = vmax.f32 %v669_v26, 0.0 }
 0x18c   :  { %15839 = vst [vmem:[#allocation11_spill] sm:$0xff] %v10012_v54  ;;  %v739_v58 = vadd.f32 %v9910_v55, %v738_v23  ;;  %v740_v63 = vpop.f32.mrb[5].mxu1  ;;  %v15491_v23 = vrot.slane %v10016_v36, 4  ;;  %v15490_v40 = vrot.slane %v10018_v61, 1 }
 0x18d   :  { %2319 = vmatmul.mubr.f32.gmra.mrb[110].mxu1 %v9377_v25  ;;  %v2697_v25 = vrot.slane %v10012_v54, 1  ;;  %15845 = vst [vmem:[#allocation19_spill] sm:$0xff] %v10062_v24 }
 0x18e   :  { %2323 = vmatprep.mubr.f32.mxu1 %v2201_v9  ;;  %v10020_v44 = vmax.f32 %v739_v58, 0.0  ;;  %v10022_v8 = vpop.f32.mrb[16].mxu0  ;;  %v10039_v9 = vpop.permute.xlu0 %6449 }
 0x18f   :  { %v743_v7 = vpop.f32.mrb[6].mxu1  ;;  %v680_v16 = vpop.f32.mrb[17].mxu0 }
 0x190   :  { %15842 = vst [vmem:[#allocation20_spill] sm:$0xff] %v10020_v44  ;;  %v2699_v62 = vrot.slane %v10020_v44, 1  ;;  %v744_v20 = vadd.f32 %v9910_v55, %v743_v7  ;;  %v745_v56 = vpop.f32.mrb[7].mxu1  ;;  %v2698_v7 = vsel %vm2659_vm1, %v15490_v40, %v2697_v25  ;;  %v6451_v16 = vunpack.i.l.bf16 %v10039_v9 }
 0x191   :  { %2324 = vmatmul.mubr.f32.gmra.mrb[112].mxu1 %v9401_v15  ;;  %v10060_v56 = vmax.f32 %v659_v46, 0.0  ;;  %v3862_v45 = vrot.slane %v10020_v44, 4 }
 0x192   :  { %2328 = vmatprep.mubr.f32.mxu1 %v2202_v47  ;;  %v10043_v15 = vmax.f32 %v744_v20, 0.0  ;;  %v10045_v58 = vpop.f32.mrb[18].mxu0  ;;  %v2700_v33 = vsel %vm2659_vm1, %v2697_v25, %v2699_v62  ;;  %v3825_v20 = vrot.slane %v9938_v4, 4  ;;  %v7690_v25 = vld [vmem:[%s15449_s0 + $0x173] sm:$0xff] }
 0x193   :  { %v748_v53 = vpop.f32.mrb[8].mxu1  ;;  %v685_v63 = vpop.f32.mrb[19].mxu0  ;;  %15844 = vst [vmem:[#allocation24_spill] sm:$0xff] %v10060_v56  ;;  %v2204_v46 = vsel %vm497_vm0, %v7690_v25, %v6447_v5  ;;  %v2667_v5 = vrot.slane %v10060_v56, 1 }
 0x194   :  { %15843 = vst [vmem:[#allocation15_spill] sm:$0xff] %v10043_v15  ;;  %v749_v60 = vadd.f32 %v9910_v55, %v748_v53  ;;  %v750_v47 = vpop.f32.mrb[9].mxu1  ;;  %v6513_v63 = vpack.i.bf16 %v2700_v33, %v2698_v7  ;;  %v15493_v49 = vrot.slane %v10043_v15, 4  ;;  %v10077_v7 = vmax.f32 %v664_v59, 0.0 }
 0x195   :  { %2329 = vmatmul.mubr.f32.gmra.mrb[114].mxu1 %v9422_v0  ;;  %v3829_v0 = vsel %vm3824_vm2, %v3826_v17, %v15491_v23  ;;  %v2701_v40 = vrot.slane %v10043_v15, 1  ;;  %v15499_v59 = vrot.slane %v10012_v54, 4 }
 0x196   :  { %2333 = vmatprep.mubr.f32.mxu1 %v2203_v52  ;;  %v10065_v53 = vmax.f32 %v749_v60, 0.0  ;;  %v688_v47 = vpop.f32.mrb[20].mxu0  ;;  %6514 = vrot.lane.b32.xlu1 %v6513_v63, %s7721_s25  ;;  %v3827_v52 = vsel %vm3824_vm2, %v3825_v20, %v3826_v17  ;;  %v6452_v60 = vunpack.i.h.bf16 %v10039_v9  ;;  %15847 = vst [vmem:[#allocation3_spill] sm:$0xff] %v10077_v7  ;;  %v7691_v9 = vld [vmem:[%s15449_s0 + $0x17b] sm:$0xff] }
 0x197   :  { %v753_v26 = vpop.f32.mrb[10].mxu1  ;;  %v690_v33 = vpop.f32.mrb[21].mxu0  ;;  %v6518_v25 = vpack.i.bf16 %v3829_v0, %v3827_v52  ;;  %v2205_v17 = vsel %vm497_vm0, %v7691_v9, %v6451_v16  ;;  %v2669_v9 = vrot.slane %v10077_v7, 1 }
 0x198   :  { %15846 = vst [vmem:[#allocation2_spill] sm:$0xff] %v10065_v53  ;;  %v15494_v23 = vrot.slane %v10065_v53, 1  ;;  %v755_v43 = vpop.f32.mrb[11].mxu1  ;;  %v754_v20 = vadd.f32 %v9910_v55, %v753_v26  ;;  %v6455_v0 = vpop.permute.xlu1 %6454 }
 0x199   :  { %2334 = vmatmul.mubr.f32.gmra.mrb[116].mxu1 %v9442_v27  ;;  %v3865_v27 = vsel %vm3824_vm2, %v3862_v45, %v15493_v49  ;;  %v3863_v49 = vsel %vm3824_vm2, %v15499_v59, %v3862_v45 }
 0x19a   :  { %2338 = vmatprep.mubr.f32.mxu1 %v2204_v46  ;;  %v10091_v33 = vpop.f32.mrb[22].mxu0  ;;  %v2704_v43 = vsel %vm2659_vm1, %v2701_v40, %v15494_v23  ;;  %v2665_v46 = vrot.slane %v10016_v36, 1  ;;  %6519 = vrot.lane.b32.xlu1 %v6518_v25, %s7721_s25  ;;  %v2702_v23 = vsel %vm2659_vm1, %v2699_v62, %v2701_v40  ;;  %v6523_v48 = vpack.i.bf16 %v3865_v27, %v3863_v49 }
 0x19b   :  { %v758_v16 = vpop.f32.mrb[12].mxu1  ;;  %v695_v52 = vpop.f32.mrb[23].mxu0  ;;  %v6533_v37 = vpack.i.bf16 %v2704_v43, %v2702_v23  ;;  %v6456_v25 = vunpack.i.l.bf16 %v6455_v0  ;;  %v15849_v62 = vrot.slane %v10062_v24, 1  ;;  %v3830_v27 = vrot.slane %v10060_v56, 4 }
 0x19c   :  { %v759_v26 = vadd.f32 %v9910_v55, %v758_v16  ;;  %v760_v63 = vpop.f32.mrb[13].mxu1  ;;  %v7692_v52 = vld [vmem:[%s15449_s0 + $0x183] sm:$0xff]  ;;  %v10115_v16 = vmax.f32 %v754_v20, 0.0  ;;  %v2668_v45 = vsel %vm2659_vm1, %v2665_v46, %v2667_v5  ;;  %v6457_v20 = vunpack.i.h.bf16 %v6455_v0 }
 0x19d   :  { %2339 = vmatmul.mubr.f32.gmra.mrb[118].mxu1 %v9462_v1  ;;  %v2206_v63 = vsel %vm497_vm0, %v7692_v52, %v6452_v60  ;;  %v15500_v1 = vrot.slane %v10077_v7, 4  ;;  %v2672_v23 = vsel %vm2659_vm1, %v2669_v9, %v15849_v62  ;;  %6534 = vrot.lane.b32.xlu0 %v6533_v37, %s7721_s25  ;;  %v15850_v60 = vrot.slane %v9954_v30, 1  ;;  %v10134_v62 = vpop.permute.xlu0 %6459 }
 0x19e   :  { %2343 = vmatprep.mubr.f32.mxu1 %v2205_v17  ;;  %15848 = vst [vmem:[#allocation18_spill] sm:$0xff] %v10115_v16  ;;  %v10117_v4 = vpop.f32.mrb[24].mxu0  ;;  %6524 = vrot.lane.b32.xlu1 %v6523_v48, %s7721_s25  ;;  %v10129_v43 = vmax.f32 %v759_v26, 0.0  ;;  %v2670_v48 = vsel %vm2659_vm1, %v2667_v5, %v2669_v9  ;;  %v674_v37 = vadd.f32 %v9910_v55, %v10006_v42  ;;  %v3868_v26 = vrot.slane %v10115_v16, 4  ;;  %v7693_v5 = vld [vmem:[%s15449_s0 + $0x18b] sm:$0xff] }
 0x19f   :  { %v763_v40 = vpop.f32.mrb[14].mxu1  ;;  %v700_v49 = vpop.f32.mrb[25].mxu0  ;;  %v2666_v17 = vsel %vm2659_vm1, %v15850_v60, %v2665_v46  ;;  %v6548_v0 = vpack.i.bf16 %v2672_v23, %v2670_v48  ;;  %v2207_v42 = vsel %vm497_vm0, %v7693_v5, %v6456_v25  ;;  %v7694_v23 = vld [vmem:[%s15449_s0 + $0x193] sm:$0xff] }
 0x1a0   :  { %15851 = vst [vmem:[#allocation4_spill] sm:$0xff] %v10129_v43  ;;  %v764_v52 = vadd.f32 %v9910_v55, %v763_v40  ;;  %v765_v59 = vpop.f32.mrb[15].mxu1  ;;  %v689_v49 = vadd.f32 %v9910_v55, %v688_v47  ;;  %v6528_v46 = vpack.i.bf16 %v2668_v45, %v2666_v17  ;;  %v684_v47 = vadd.f32 %v9910_v55, %v10045_v58 }
 0x1a1   :  { %2344 = vmatmul.mubr.f32.gmra.mrb[120].mxu1 %v9482_v14  ;;  %v3833_v14 = vsel %vm3824_vm2, %v3830_v27, %v15500_v1  ;;  %v3866_v59 = vrot.slane %v10065_v53, 4  ;;  %6549 = vrot.lane.b32.xlu0 %v6548_v0, %s7721_s25  ;;  %v6461_v45 = vunpack.i.l.bf16 %v10134_v62  ;;  %v2208_v17 = vsel %vm497_vm0, %v7694_v23, %v6457_v20 }
 0x1a2   :  { %2348 = vmatprep.mubr.f32.mxu1 %v2206_v63  ;;  %v10140_v60 = vmax.f32 %v764_v52, 0.0  ;;  %v10142_v40 = vpop.f32.mrb[26].mxu0  ;;  %6529 = vrot.lane.b32.xlu1 %v6528_v46, %s7721_s25  ;;  %v3870_v25 = vrot.slane %v10129_v43, 4  ;;  %v15853_v46 = vrot.slane %v10016_v36, 4  ;;  %v10168_v5 = vmax.f32 %v674_v37, 0.0 }
 0x1a3   :  { %v768_v9 = vpop.f32.mrb[16].mxu1  ;;  %v705_v63 = vpop.f32.mrb[27].mxu0  ;;  %v10172_v1 = vmax.f32 %v689_v49, 0.0  ;;  %v2707_v23 = vrot.slane %v10129_v43, 1  ;;  %v10181_v37 = vmax.f32 %v684_v47, 0.0 }
 0x1a4   :  { %15852 = vst [vmem:[#allocation5_spill] sm:$0xff] %v10140_v60  ;;  %v769_v52 = vadd.f32 %v9910_v55, %v768_v9  ;;  %v770_v48 = vpop.f32.mrb[17].mxu1  ;;  %v3831_v0 = vsel %vm3824_vm2, %v15853_v46, %v3830_v27  ;;  %15854 = vst [vmem:[#allocation23_spill] sm:$0xff] %v10168_v5  ;;  %v679_v63 = vadd.f32 %v9910_v55, %v10022_v8  ;;  %v2705_v46 = vrot.slane %v10115_v16, 1 }
 0x1a5   :  { %2349 = vmatmul.mubr.f32.gmra.mrb[122].mxu1 %v9502_v12  ;;  %15855 = vst [vmem:[#allocation6_spill] sm:$0xff] %v10172_v1  ;;  %v6538_v20 = vpack.i.bf16 %v3833_v14, %v3831_v0  ;;  %v3869_v12 = vsel %vm3824_vm2, %v3866_v59, %v3868_v26  ;;  %v15857_v48 = vrot.slane %v10140_v60, 4  ;;  %15858 = vst [vmem:[#allocation22_spill] sm:$0xff] %v10181_v37  ;;  %v15859_v14 = vrot.slane %v10043_v15, 4 }
 0x1a6   :  { %2353 = vmatprep.mubr.f32.mxu1 %v2207_v42  ;;  %v10175_v58 = vmax.f32 %v769_v52, 0.0  ;;  %v708_v9 = vpop.f32.mrb[28].mxu0  ;;  %v6462_v52 = vunpack.i.h.bf16 %v10134_v62  ;;  %v2709_v0 = vrot.slane %v10140_v60, 1  ;;  %v3871_v47 = vsel %vm3824_vm2, %v3868_v26, %v3870_v25  ;;  %v7695_v62 = vld [vmem:[%s15449_s0 + $0x19b] sm:$0xff] }
 0x1a7   :  { %v3873_v27 = vsel %vm3824_vm2, %v3870_v25, %v15857_v48  ;;  %6539 = vrot.lane.b32.xlu1 %v6538_v20, %s7721_s25  ;;  %v773_v8 = vpop.f32.mrb[18].mxu1  ;;  %v710_v49 = vpop.f32.mrb[29].mxu0  ;;  %v3867_v42 = vsel %vm3824_vm2, %v15859_v14, %v3866_v59  ;;  %v2209_v59 = vsel %vm497_vm0, %v7695_v62, %v6461_v45  ;;  %v10198_v14 = vmax.f32 %v679_v63, 0.0 }
 0x1a8   :  { %15856 = vst [vmem:[#allocation8_spill] sm:$0xff] %v10175_v58  ;;  %v775_v44 = vpop.f32.mrb[19].mxu1  ;;  %v6543_v48 = vpack.i.bf16 %v3869_v12, %v3867_v42  ;;  %v6563_v49 = vpack.i.bf16 %v3873_v27, %v3871_v47  ;;  %v15861_v26 = vrot.slane %v10175_v58, 1  ;;  %v10207_v12 = vpop.permute.xlu1 %6464  ;;  %v2677_v27 = vrot.slane %v10181_v37, 1 }
 0x1a9   :  { %2354 = vmatmul.mubr.f32.gmra.mrb[124].mxu1 %v9522_v35  ;;  %15860 = vst [vmem:[#allocation10_spill] sm:$0xff] %v10198_v14  ;;  %v2708_v35 = vsel %vm2659_vm1, %v2705_v46, %v2707_v23  ;;  %v15862_v47 = vrot.slane %v10065_v53, 1 }
 0x1aa   :  { %2358 = vmatprep.mubr.f32.mxu1 %v2208_v17  ;;  %v10201_v44 = vpop.f32.mrb[30].mxu0  ;;  %v2712_v25 = vsel %vm2659_vm1, %v2709_v0, %v15861_v26  ;;  %v3834_v17 = vrot.slane %v10062_v24, 4  ;;  %6564 = vrot.lane.b32.xlu0 %v6563_v49, %s7721_s25  ;;  %v2710_v26 = vsel %vm2659_vm1, %v2707_v23, %v2709_v0  ;;  %v7696_v49 = vld [vmem:[%s15449_s0 + $0x1a3] sm:$0xff]  ;;  %v15864_v0 = vrot.slane %v10172_v1, 1 }
 0x1ab   :  { %6544 = vrot.lane.b32.xlu1 %v6543_v48, %s7721_s25  ;;  %v778_v45 = vpop.f32.mrb[20].mxu1  ;;  %v715_v63 = vpop.f32.mrb[31].mxu0  ;;  %v2706_v62 = vsel %vm2659_vm1, %v15862_v47, %v2705_v46  ;;  %v6573_v20 = vpack.i.bf16 %v2712_v25, %v2710_v26  ;;  %v6466_v48 = vunpack.i.l.bf16 %v10207_v12  ;;  %v15863_v46 = vrot.slane %v10168_v5, 4 }
 0x1ac   :  { %v780_v42 = vpop.f32.mrb[21].mxu1  ;;  %v6553_v43 = vpack.i.bf16 %v2708_v35, %v2706_v62  ;;  %v2210_v63 = vsel %vm497_vm0, %v7696_v49, %v6462_v52  ;;  %v2673_v35 = vrot.slane %v10168_v5, 1  ;;  %v6467_v62 = vunpack.i.h.bf16 %v10207_v12 }
 0x1ad   :  { %2359 = vmatmul.mubr.f32.gmra.mrb[126].mxu1 %v9542_v57  ;;  %v2675_v42 = vrot.slane %v10198_v14, 1  ;;  %v774_v57 = vadd.f32 %v9910_v55, %v773_v8  ;;  %v3837_v23 = vsel %vm3824_vm2, %v3834_v17, %v15863_v46  ;;  %v15865_v8 = vrot.slane %v10077_v7, 4 }
 0x1ae   :  { %2363 = vmatprep.mubr.f32.mxu1 %v2209_v59  ;;  %v10225_v16 = vpop.f32.mrb[32].mxu0  ;;  %v2680_v59 = vsel %vm2659_vm1, %v2677_v27, %v15864_v0  ;;  %6574 = vrot.lane.b32.xlu0 %v6573_v20, %s7721_s25  ;;  %v709_v26 = vadd.f32 %v9910_v55, %v708_v9  ;;  %v779_v49 = vadd.f32 %v9910_v55, %v778_v45  ;;  %v10245_v20 = vpop.permute.xlu0 %6469  ;;  %v7697_v9 = vld [vmem:[%s15449_s0 + $0x1ab] sm:$0xff] }
 0x1af   :  { %6554 = vrot.lane.b32.xlu1 %v6553_v43, %s7721_s25  ;;  %v783_v52 = vpop.f32.mrb[22].mxu1  ;;  %v720_v25 = vpop.f32.mrb[33].mxu0  ;;  %v3835_v47 = vsel %vm3824_vm2, %v15865_v8, %v3834_v17  ;;  %v2678_v43 = vsel %vm2659_vm1, %v2675_v42, %v2677_v27  ;;  %v2211_v12 = vsel %vm497_vm0, %v7697_v9, %v6466_v48  ;;  %v704_v17 = vadd.f32 %v9910_v55, %v10142_v40 }
 0x1b0   :  { %v784_v46 = vadd.f32 %v9910_v55, %v783_v52  ;;  %v785_v0 = vpop.f32.mrb[23].mxu1  ;;  %v15511_v25 = vrot.slane %v10181_v37, 4  ;;  %v6558_v53 = vpack.i.bf16 %v3837_v23, %v3835_v47  ;;  %v6588_v15 = vpack.i.bf16 %v2680_v59, %v2678_v43 }
 0x1b1   :  { %2364 = vmatmul.mubr.f32.gmra.mrb[128].mxu1 %v9562_v28  ;;  %v10254_v45 = vmax.f32 %v774_v57, 0.0  ;;  %v2676_v52 = vsel %vm2659_vm1, %v2673_v35, %v2675_v42  ;;  %v3838_v23 = vrot.slane %v10198_v14, 4  ;;  %v6471_v40 = vunpack.i.l.bf16 %v10245_v20 }
 0x1b2   :  { %2368 = vmatprep.mubr.f32.mxu1 %v2210_v63  ;;  %v10256_v28 = vmax.f32 %v784_v46, 0.0  ;;  %v10258_v27 = vpop.f32.mrb[34].mxu0  ;;  %v699_v63 = vadd.f32 %v9910_v55, %v10117_v4  ;;  %6589 = vrot.lane.b32.xlu0 %v6588_v15, %s7721_s25  ;;  %v10267_v57 = vmax.f32 %v709_v26, 0.0  ;;  %v10269_v8 = vmax.f32 %v779_v49, 0.0  ;;  %v7698_v49 = vld [vmem:[%s15449_s0 + $0x1b3] sm:$0xff] }
 0x1b3   :  { %15866 = vst [vmem:[#allocation12_spill] sm:$0xff] %v10254_v45  ;;  %6559 = vrot.lane.b32.xlu1 %v6558_v53, %s7721_s25  ;;  %v788_v48 = vpop.f32.mrb[24].mxu1  ;;  %v725_v59 = vpop.f32.mrb[35].mxu0  ;;  %v15870_v46 = vrot.slane %v10062_v24, 1  ;;  %v694_v15 = vadd.f32 %v9910_v55, %v10091_v33  ;;  %v3841_v26 = vsel %vm3824_vm2, %v3838_v23, %v15511_v25  ;;  %v2212_v0 = vsel %vm497_vm0, %v7698_v49, %v6467_v62 }
 0x1b4   :  { %15867 = vst [vmem:[#allocation26_spill] sm:$0xff] %v10256_v28  ;;  %15868 = vst [vmem:[#allocation14_spill] sm:$0xff] %v10267_v57  ;;  %v789_v47 = vadd.f32 %v9910_v55, %v788_v48  ;;  %v790_v42 = vpop.f32.mrb[25].mxu1  ;;  %v15516_v43 = vrot.slane %v10254_v45, 4  ;;  %v10291_v33 = vmax.f32 %v699_v63, 0.0  ;;  %v6472_v62 = vunpack.i.h.bf16 %v10245_v20  ;;  %v7699_v20 = vld [vmem:[%s15449_s0 + $0x1bb] sm:$0xff] }
 0x1b5   :  { %15869 = vst [vmem:[#allocation17_spill] sm:$0xff] %v10269_v8  ;;  %2369 = vmatmul.mubr.f32.gmra.mrb[130].mxu1 %v9582_v21  ;;  %v2674_v4 = vsel %vm2659_vm1, %v15870_v46, %v2673_v35  ;;  %v10285_v21 = vmax.f32 %v704_v17, 0.0  ;;  %v2717_v35 = vrot.slane %v10256_v28, 1  ;;  %v6475_v17 = vpop.permute.xlu1 %6474  ;;  %v3874_v59 = vrot.slane %v10175_v58, 4 }
 0x1b6   :  { %v6568_v53 = vpack.i.bf16 %v2676_v52, %v2674_v4  ;;  %2373 = vmatprep.mubr.f32.mxu1 %v2211_v12  ;;  %v10289_v9 = vmax.f32 %v789_v47, 0.0  ;;  %15873 = vst [vmem:[#allocation27_spill] sm:$0xff] %v10291_v33  ;;  %v15874_v52 = vrot.slane %v10168_v5, 4  ;;  %v2715_v47 = vrot.slane %v10269_v8, 1  ;;  %v6480_v4 = vpop.permute.xlu0 %6479 }
 0x1b7   :  { %15871 = vst [vmem:[#allocation21_spill] sm:$0xff] %v10285_v21  ;;  %v10294_v12 = vpop.f32.mrb[26].mxu1  ;;  %v2685_v25 = vrot.slane %v10285_v21, 1  ;;  %v2713_v42 = vrot.slane %v10254_v45, 1 }
 0x1b8   :  { %15872 = vst [vmem:[#allocation25_spill] sm:$0xff] %v10289_v9  ;;  %6569 = vrot.lane.b32.xlu1 %v6568_v53, %s7721_s25  ;;  %v3839_v48 = vsel %vm3824_vm2, %v15874_v52, %v3838_v23  ;;  %v15519_v63 = vrot.slane %v10289_v9, 1  ;;  %v795_v46 = vpop.f32.mrb[27].mxu1  ;;  %v10305_v53 = vmax.f32 %v694_v15, 0.0  ;;  %v2213_v23 = vsel %vm497_vm0, %v7699_v20, %v6471_v40 }
 0x1b9   :  { %2374 = vmatmul.mubr.f32.gmra.mrb[132].mxu1 %v9602_v19  ;;  %v6578_v49 = vpack.i.bf16 %v3841_v26, %v3839_v48  ;;  %v6477_v52 = vunpack.i.h.bf16 %v6475_v17  ;;  %v3877_v46 = vsel %vm3824_vm2, %v3874_v59, %v15516_v43  ;;  %v2718_v19 = vsel %vm2659_vm1, %v2715_v47, %v2717_v35 }
 0x1ba   :  { %15875 = vst [vmem:[#allocation28_spill] sm:$0xff] %v10305_v53  ;;  %2378 = vmatprep.mubr.f32.mxu1 %v2212_v0  ;;  %v2720_v15 = vsel %vm2659_vm1, %v2717_v35, %v15519_v63  ;;  %v2683_v26 = vrot.slane %v10291_v33, 1  ;;  %v6476_v40 = vunpack.i.l.bf16 %v6475_v17  ;;  %v6481_v20 = vunpack.i.l.bf16 %v6480_v4  ;;  %v7700_v17 = vld [vmem:[%s15449_s0 + $0x1c3] sm:$0xff] }
 0x1bb   :  { %v798_v0 = vpop.f32.mrb[28].mxu1  ;;  %v6608_v48 = vpack.i.bf16 %v2720_v15, %v2718_v19  ;;  %v15876_v43 = vrot.slane %v10140_v60, 4  ;;  %v15877_v35 = vrot.slane %v10267_v57, 1  ;;  %v6482_v19 = vunpack.i.h.bf16 %v6480_v4 }
 0x1bc   :  { %6579 = vrot.lane.b32.xlu1 %v6578_v49, %s7721_s25  ;;  %v799_v28 = vadd.f32 %v9910_v55, %v798_v0  ;;  %v800_v8 = vpop.f32.mrb[29].mxu1  ;;  %v15520_v15 = vrot.slane %v10305_v53, 4  ;;  %v10348_v0 = vpop.permute.xlu1 %6484 }
 0x1bd   :  { %2379 = vmatmul.mubr.f32.gmra.mrb[134].mxu1 %v9621_v31  ;;  %v3875_v14 = vsel %vm3824_vm2, %v15876_v43, %v3874_v59  ;;  %v2688_v63 = vsel %vm2659_vm1, %v2685_v25, %v15877_v35  ;;  %6609 = vrot.lane.b32.xlu0 %v6608_v48, %s7721_s25  ;;  %v2214_v8 = vsel %vm497_vm0, %v7700_v17, %v6472_v62  ;;  %v3842_v31 = vrot.slane %v10172_v1, 4  ;;  %v7701_v62 = vld [vmem:[%s15449_s0 + $0x1cb] sm:$0xff] }
 0x1be   :  { %v6583_v49 = vpack.i.bf16 %v3877_v46, %v3875_v14  ;;  %2383 = vmatprep.mubr.f32.mxu1 %v2213_v23  ;;  %v2716_v43 = vsel %vm2659_vm1, %v2713_v42, %v2715_v47  ;;  %v2686_v14 = vsel %vm2659_vm1, %v2683_v26, %v2685_v25  ;;  %v10341_v59 = vmax.f32 %v799_v28, 0.0 }
 0x1bf   :  { %v803_v23 = vpop.f32.mrb[30].mxu1  ;;  %v6618_v46 = vpack.i.bf16 %v2688_v63, %v2686_v14  ;;  %v2215_v4 = vsel %vm497_vm0, %v7701_v62, %v6476_v40  ;;  %v15879_v25 = vrot.slane %v10175_v58, 1  ;;  %v7702_v63 = vld [vmem:[%s15449_s0 + $0x1d3] sm:$0xff]  ;;  %v7703_v40 = vld [vmem:[%s15449_s0 + $0x1db] sm:$0xff] }
 0x1c0   :  { %15878 = vst [vmem:[#allocation31_spill] sm:$0xff] %v10341_v59  ;;  %6584 = vrot.lane.b32.xlu1 %v6583_v49, %s7721_s25  ;;  %v804_v47 = vadd.f32 %v9910_v55, %v803_v23  ;;  %v805_v48 = vpop.f32.mrb[31].mxu1  ;;  %v2216_v35 = vsel %vm497_vm0, %v7702_v63, %v6477_v52  ;;  %v10363_v49 = vsel %vm497_vm0, %v7703_v40, %v6481_v20  ;;  %v7704_v52 = vld [vmem:[%s15449_s0 + $0x1e3] sm:$0xff]  ;;  %v15880_v20 = vrot.slane %v10181_v37, 4 }
 0x1c1   :  { %2384 = vmatmul.mubr.f32.gmra.mrb[136].mxu1 %v9639_v22  ;;  %v2714_v28 = vsel %vm2659_vm1, %v15879_v25, %v2713_v42  ;;  %v724_v22 = vadd.f32 %v9910_v55, %v10258_v27  ;;  %6619 = vrot.lane.b32.xlu0 %v6618_v46, %s7721_s25  ;;  %v6487_v42 = vunpack.i.h.bf16 %v10348_v0  ;;  %v10373_v14 = vsel %vm497_vm0, %v7704_v52, %v6482_v19 }
 0x1c2   :  { %v6593_v17 = vpack.i.bf16 %v2716_v43, %v2714_v28  ;;  %2388 = vmatprep.mubr.f32.mxu1 %v2214_v8  ;;  %v840_v23 = vmax.f32 %v804_v47, 0.0  ;;  %v3843_v62 = vsel %vm3824_vm2, %v15880_v20, %v3842_v31  ;;  %v3845_v27 = vsel %vm3824_vm2, %v3842_v31, %v15520_v15  ;;  %v6490_v43 = vpop.permute.xlu0 %6489 }
 0x1c3   :  { %v6486_v8 = vunpack.i.l.bf16 %v10348_v0  ;;  %v2681_v46 = vrot.slane %v10305_v53, 1  ;;  %v719_v48 = vadd.f32 %v9910_v55, %v10225_v16  ;;  %v794_v19 = vadd.f32 %v9910_v55, %v10294_v12 }
 0x1c4   :  { %v15521_v47 = vrot.slane %v10341_v59, 3  ;;  %6594 = vrot.lane.b32.xlu1 %v6593_v17, %s7721_s25  ;;  %v1315_v25 = vpop.f32.mrb[32].mxu1  ;;  %v15522_v28 = vrot.slane %v10341_v59, 4  ;;  %v3628_v63 = vrot.slane %v840_v23, 3  ;;  %v3888_v31 = vrot.slane %v840_v23, 4 }
 0x1c5   :  { %v1316_v0 = vadd.f32 %v9910_v55, %v1315_v25  ;;  %v1317_v40 = vpop.f32.mrb[33].mxu1  ;;  %2389 = vmatmul.mubr.f32.gmra.mrb[138].mxu1 %v9657_v10  ;;  %v714_v16 = vadd.f32 %v9910_v55, %v10201_v44  ;;  %v10394_v52 = vmax.f32 %v724_v22, 0.0  ;;  %v6598_v12 = vpack.i.bf16 %v3845_v27, %v3843_v62  ;;  %v7705_v62 = vld [vmem:[%s15449_s0 + $0x1eb] sm:$0xff] }
 0x1c6   :  { %2393 = vmatprep.mubr.f32.mxu1 %v2215_v4  ;;  %v6491_v20 = vunpack.i.l.bf16 %v6490_v43  ;;  %v15523_v17 = vrot.slane %v10285_v21, 4  ;;  %v10400_v15 = vsel %vm3564_vm3, %v15521_v47, %v3628_v63  ;;  %v10405_v23 = vsel %vm3824_vm2, %v15522_v28, %v3888_v31 }
 0x1c7   :  { %15881 = vst [vmem:[#allocation29_spill] sm:$0xff] %v10394_v52  ;;  %15882 = vst [vmem:[#allocation32_spill] sm:$0xff] %v10400_v15  ;;  %v2684_v10 = vsel %vm2659_vm1, %v2681_v46, %v2683_v26  ;;  %v10410_v44 = vmax.f32 %v719_v48, 0.0  ;;  %v10412_v4 = vmax.f32 %v794_v19, 0.0  ;;  %v10419_v27 = vsel %vm497_vm0, %v7705_v62, %v6486_v8 }
 0x1c8   :  { %15883 = vst [vmem:[#allocation30_spill] sm:$0xff] %v10405_v23  ;;  %6599 = vrot.lane.b32.xlu1 %v6598_v12, %s7721_s25  ;;  %v1320_v22 = vpop.f32.mrb[34].mxu1  ;;  %v6492_v25 = vunpack.i.h.bf16 %v6490_v43  ;;  %v3846_v63 = vrot.slane %v10291_v33, 4  ;;  %v1484_v31 = vmax.f32 %v1316_v0, 0.0  ;;  %v15886_v19 = vrot.slane %v10172_v1, 1  ;;  %v10427_v12 = vpop.permute.xlu1 %6494  ;;  %v7706_v43 = vld [vmem:[%s15449_s0 + $0x1f3] sm:$0xff] }
 0x1c9   :  { %15884 = vst [vmem:[#allocation33_spill] sm:$0xff] %v10410_v44  ;;  %15885 = vst [vmem:[#allocation34_spill] sm:$0xff] %v10412_v4  ;;  %v1321_v26 = vadd.f32 %v9910_v55, %v1320_v22  ;;  %v1322_v48 = vpop.f32.mrb[35].mxu1  ;;  %2394 = vmatmul.mubr.f32.gmra.mrb[140].mxu1 %v9675_v51  ;;  %v10429_v47 = vmax.f32 %v714_v16, 0.0  ;;  %v2693_v8 = vrot.slane %v10394_v52, 1  ;;  %v10436_v0 = vsel %vm497_vm0, %v7706_v43, %v6487_v42  ;;  %v7707_v16 = vld [vmem:[%s15449_s0 + $0x1fb] sm:$0xff] }
 0x1ca   :  { %v2682_v40 = vsel %vm2659_vm1, %v15886_v19, %v2681_v46  ;;  %2398 = vmatprep.mubr.f32.mxu1 %v2216_v35  ;;  %v2723_v51 = vrot.slane %v10341_v59, 1  ;;  %v3849_v46 = vsel %vm3824_vm2, %v3846_v63, %v15523_v17  ;;  %v10446_v35 = vsel %vm497_vm0, %v7707_v16, %v6491_v20  ;;  %v7708_v19 = vld [vmem:[%s15449_s0 + $0x203] sm:$0xff] }
 0x1cb   :  { %15887 = vst [vmem:[#allocation35_spill] sm:$0xff] %v10429_v47  ;;  %v6603_v62 = vpack.i.bf16 %v2684_v10, %v2682_v40  ;;  %v1485_v22 = vmax.f32 %v1321_v26, 0.0  ;;  %v2721_v48 = vrot.slane %v10412_v4, 1  ;;  %v6496_v26 = vunpack.i.l.bf16 %v10427_v12 }
 0x1cc   :  { %v1325_v42 = vpop.f32.mrb[36].mxu1  ;;  %v10456_v40 = vsel %vm497_vm0, %v7708_v19, %v6492_v25  ;;  %v2822_v43 = vrot.slane %v1484_v31, 1  ;;  %v15888_v17 = vrot.slane %v10305_v53, 4  ;;  %v15531_v10 = vrot.slane %v10429_v47, 4 }
 0x1cd   :  { %6604 = vrot.lane.b32.xlu1 %v6603_v62, %s7721_s25  ;;  %v2823_v28 = vrot.slane %v1485_v22, 1  ;;  %v1326_v20 = vadd.f32 %v9910_v55, %v1325_v42  ;;  %v1327_v16 = vpop.f32.mrb[37].mxu1  ;;  %2399 = vmatmul.mubr.f32.gmra.mrb[142].mxu1 %v9693_v29  ;;  %v6638_v23 = vpack.i.bf16 %v1485_v22, %v1484_v31  ;;  %v15889_v25 = vrot.slane %v10410_v44, 1 }
 0x1ce   :  { %v3847_v62 = vsel %vm3824_vm2, %v15888_v17, %v3846_v63  ;;  %2403 = vmatprep.mubr.f32.mxu1 %v10363_v49  ;;  %v2724_v42 = vsel %vm2659_vm1, %v2721_v48, %v2723_v51  ;;  %v15890_v29 = vrot.slane %v10018_v61, 1  ;;  %v3850_v63 = vrot.slane %v10267_v57, 4 }
 0x1cf   :  { %v6613_v15 = vpack.i.bf16 %v3849_v46, %v3847_v62  ;;  %v2694_v19 = vsel %vm2659_vm1, %v15889_v25, %v2693_v8  ;;  %v10468_v59 = vmax.f32 %v1326_v20, 0.0  ;;  %v2824_v17 = vsel %vm2659_vm1, %v2822_v43, %v2823_v28  ;;  %6639 = vrot.lane.b32.xlu0 %v6638_v23, %s7722_s1 }
 0x1d0   :  { %v2696_v16 = vsel %vm2659_vm1, %v2693_v8, %v15890_v29  ;;  %v3663_v46 = vrot.slane %v1485_v22, 3  ;;  %v3986_v31 = vrot.slane %v1485_v22, 4  ;;  %v1330_v49 = vpop.f32.mrb[38].mxu1  ;;  %v15891_v20 = vrot.slane %v10289_v9, 1 }
 0x1d1   :  { %6614 = vrot.lane.b32.xlu1 %v6613_v15, %s7721_s25  ;;  %v2825_v62 = vrot.slane %v10468_v59, 1  ;;  %v3664_v8 = vrot.slane %v10468_v59, 3  ;;  %v3987_v43 = vrot.slane %v10468_v59, 4  ;;  %v1331_v25 = vadd.f32 %v9910_v55, %v1330_v49  ;;  %v1332_v29 = vpop.f32.mrb[39].mxu1  ;;  %2404 = vmatmul.mubr.f32.gmra.mrb[144].mxu1 %v9711_v13 }
 0x1d2   :  { %v2722_v51 = vsel %vm2659_vm1, %v15891_v20, %v2721_v48  ;;  %v6643_v22 = vpack.i.bf16 %v2696_v16, %v2694_v19  ;;  %2408 = vmatprep.mubr.f32.mxu1 %v10373_v14  ;;  %v3853_v23 = vsel %vm3824_vm2, %v3850_v63, %v15531_v10  ;;  %v6497_v48 = vunpack.i.h.bf16 %v10427_v12 }
 0x1d3   :  { %v6623_v15 = vpack.i.bf16 %v2724_v42, %v2722_v51  ;;  %v10491_v20 = vmax.f32 %v1331_v25, 0.0  ;;  %v2826_v4 = vsel %vm2659_vm1, %v2823_v28, %v2825_v62  ;;  %v10495_v9 = vsel %vm3564_vm3, %v3663_v46, %v3664_v8  ;;  %v7709_v28 = vld [vmem:[%s15449_s0 + $0x20b] sm:$0xff] }
 0x1d4   :  { %v10498_v49 = vsel %vm3824_vm2, %v3986_v31, %v3987_v43  ;;  %v2689_v13 = vrot.slane %v10429_v47, 1  ;;  %6644 = vrot.lane.b32.xlu0 %v6643_v22, %s7721_s25  ;;  %v1335_v14 = vpop.f32.mrb[40].mxu1  ;;  %v15892_v19 = vrot.slane %v10285_v21, 4  ;;  %v6658_v42 = vpack.i.bf16 %v2826_v4, %v2824_v17 }
 0x1d5   :  { %6624 = vrot.lane.b32.xlu1 %v6623_v15, %s7721_s25  ;;  %v10510_v16 = vsel %vm497_vm0, %v7709_v28, %v6496_v26  ;;  %v2827_v46 = vrot.slane %v10491_v20, 1  ;;  %v3666_v31 = vrot.slane %v10491_v20, 3  ;;  %v3989_v51 = vrot.slane %v10491_v20, 4  ;;  %v1337_v29 = vpop.f32.mrb[41].mxu1  ;;  %2409 = vmatmul.mubr.f32.gmra.mrb[146].mxu1 %v9729_v3 }
 0x1d6   :  { %v3851_v12 = vsel %vm3824_vm2, %v15892_v19, %v3850_v63  ;;  %v1336_v25 = vadd.f32 %v9910_v55, %v1335_v14  ;;  %v3856_v4 = vrot.slane %v10394_v52, 4  ;;  %2413 = vmatprep.mubr.f32.mxu1 %v10419_v27  ;;  %v15893_v63 = vrot.slane %v10410_v44, 1 }
 0x1d7   :  { %v6628_v17 = vpack.i.bf16 %v3853_v23, %v3851_v12  ;;  %v10527_v19 = vsel %vm3564_vm3, %v3664_v8, %v3666_v31  ;;  %v10530_v55 = vsel %vm2659_vm1, %v2825_v62, %v2827_v46  ;;  %v10533_v3 = vsel %vm3824_vm2, %v3987_v43, %v3989_v51  ;;  %v1822_v14 = vpop.f32.mrb[36].mxu0 }
 0x1d8   :  { %v2692_v26 = vsel %vm2659_vm1, %v2689_v13, %v15893_v63  ;;  %v10524_v22 = vmax.f32 %v1336_v25, 0.0  ;;  %v3854_v27 = vrot.slane %v10410_v44, 4  ;;  %6659 = vrot.lane.b32.xlu0 %v6658_v42, %s7723_s28  ;;  %v1340_v23 = vpop.f32.mrb[42].mxu1  ;;  %v15894_v12 = vrot.slane %v10267_v57, 1  ;;  %v10551_v42 = vld [vmem:[%s15451_s2] ss:$0 sm:$0xff]  ;;  %v10620_v57 = vpop.permute.xlu0 %6499 }
 0x1d9   :  { %6629 = vrot.lane.b32.xlu1 %v6628_v17, %s7721_s25  ;;  %v1341_v17 = vadd.f32 %v10551_v42, %v1340_v23  ;;  %v1824_v63 = vpop.f32.mrb[37].mxu0  ;;  %2414 = vmatmul.mubr.f32.gmra.mrb[148].mxu1 %v9747_v18  ;;  %v1823_v43 = vadd.f32 %v10551_v42, %v1822_v14 }
 0x1da   :  { %v2690_v8 = vsel %vm2659_vm1, %v15894_v12, %v2689_v13  ;;  %v2829_v28 = vrot.slane %v10524_v22, 1  ;;  %v3668_v25 = vrot.slane %v10524_v22, 3  ;;  %v3991_v29 = vrot.slane %v10524_v22, 4  ;;  %v1342_v13 = vpop.f32.mrb[43].mxu1  ;;  %2418 = vmatprep.mubr.f32.mxu1 %v10436_v0 }
 0x1db   :  { %v3858_v12 = vrot.slane %v10018_v61, 4  ;;  %v6633_v62 = vpack.i.bf16 %v2692_v26, %v2690_v8  ;;  %v3857_v15 = vsel %vm3824_vm2, %v3854_v27, %v3856_v4  ;;  %v10559_v10 = vmax.f32 %v1341_v17, 0.0  ;;  %v1827_v14 = vpop.f32.mrb[38].mxu0 }
 0x1dc   :  { %v10562_v52 = vsel %vm2659_vm1, %v2827_v46, %v2829_v28  ;;  %v10565_v23 = vsel %vm3564_vm3, %v3666_v31, %v3668_v25  ;;  %v10568_v13 = vsel %vm3824_vm2, %v3989_v51, %v3991_v29  ;;  %v1345_v18 = vpop.f32.mrb[44].mxu1  ;;  %v15895_v26 = vrot.slane %v10429_v47, 4  ;;  %v7711_v31 = vld [vmem:[%s15449_s0 + $0x213] sm:$0xff] }
 0x1dd   :  { %6634 = vrot.lane.b32.xlu1 %v6633_v62, %s7721_s25  ;;  %v3859_v8 = vsel %vm3824_vm2, %v3856_v4, %v3858_v12  ;;  %v10581_v51 = vsel %vm497_vm0, %v7711_v31, %v6497_v48  ;;  %v2831_v62 = vrot.slane %v10559_v10, 1  ;;  %v3670_v17 = vrot.slane %v10559_v10, 3  ;;  %v1829_v4 = vpop.f32.mrb[39].mxu0  ;;  %2419 = vmatmul.mubr.f32.gmra.mrb[150].mxu1 %v9765_v2 }
 0x1de   :  { %v3855_v0 = vsel %vm3824_vm2, %v15895_v26, %v3854_v27  ;;  %v3993_v63 = vrot.slane %v10559_v10, 4  ;;  %v1346_v27 = vadd.f32 %v10551_v42, %v1345_v18  ;;  %v1347_v26 = vpop.f32.mrb[45].mxu1  ;;  %v1991_v46 = vmax.f32 %v1823_v43, 0.0  ;;  %2423 = vmatprep.mubr.f32.mxu1 %v10446_v35 }
 0x1df   :  { %v1828_v44 = vadd.f32 %v10551_v42, %v1827_v14  ;;  %v6648_v47 = vpack.i.bf16 %v3857_v15, %v3855_v0  ;;  %v10595_v45 = vsel %vm3564_vm3, %v3668_v25, %v3670_v17  ;;  %v10601_v26 = vsel %vm2659_vm1, %v2829_v28, %v2831_v62  ;;  %v1832_v43 = vpop.f32.mrb[40].mxu0 }
 0x1e0   :  { %v10592_v31 = vmax.f32 %v1346_v27, 0.0  ;;  %v10598_v18 = vsel %vm3824_vm2, %v3991_v29, %v3993_v63  ;;  %v1350_v15 = vpop.f32.mrb[46].mxu1  ;;  %v15896_v35 = vrot.slane %v10012_v54, 4  ;;  %v1834_v4 = vpop.f32.mrb[41].mxu0  ;;  %v3240_v48 = vrot.slane %v1991_v46, 1 }
 0x1e1   :  { %v1992_v2 = vmax.f32 %v1828_v44, 0.0  ;;  %6649 = vrot.lane.b32.xlu1 %v6648_v47, %s7721_s25  ;;  %v1351_v47 = vadd.f32 %v10551_v42, %v1350_v15  ;;  %v1352_v27 = vpop.f32.mrb[47].mxu1  ;;  %2424 = vmatmul.mubr.f32.gmra.mrb[152].mxu1 %v9783_v50 }
 0x1e2   :  { %v3861_v14 = vsel %vm3824_vm2, %v3858_v12, %v15896_v35  ;;  %v3672_v28 = vrot.slane %v10592_v31, 3  ;;  %v3995_v44 = vrot.slane %v10592_v31, 4  ;;  %v1833_v35 = vadd.f32 %v10551_v42, %v1832_v43  ;;  %2428 = vmatprep.mubr.f32.mxu1 %v10456_v40 }
 0x1e3   :  { %v3241_v12 = vrot.slane %v1992_v2, 1  ;;  %v6653_v0 = vpack.i.bf16 %v3861_v14, %v3859_v8  ;;  %v10618_v25 = vmax.f32 %v1351_v47, 0.0  ;;  %v6668_v29 = vpack.i.bf16 %v1992_v2, %v1991_v46  ;;  %v1837_v43 = vpop.f32.mrb[42].mxu0 }
 0x1e4   :  { %v15897_v58 = vrot.slane %v10592_v31, 1  ;;  %v10628_v27 = vsel %vm3564_vm3, %v3670_v17, %v3672_v28  ;;  %v10630_v50 = vmax.f32 %v1833_v35, 0.0  ;;  %v1355_v8 = vpop.f32.mrb[48].mxu1  ;;  %v10639_v14 = vsel %vm3824_vm2, %v3993_v63, %v3995_v44  ;;  %v1839_v4 = vpop.f32.mrb[43].mxu0 }
 0x1e5   :  { %6654 = vrot.lane.b32.xlu1 %v6653_v0, %s7721_s25  ;;  %v10634_v40 = vsel %vm2659_vm1, %v3240_v48, %v3241_v12  ;;  %v15548_v17 = vrot.slane %v10618_v25, 3  ;;  %6669 = vrot.lane.b32.xlu0 %v6668_v29, %s7720_s9  ;;  %v1357_v0 = vpop.f32.mrb[49].mxu1  ;;  %v1838_v63 = vadd.f32 %v10551_v42, %v1837_v43 }
 0x1e6   :  { %v10625_v15 = vsel %vm2659_vm1, %v2831_v62, %v15897_v58  ;;  %v4148_v58 = vrot.slane %v1992_v2, 3  ;;  %v4471_v62 = vrot.slane %v1992_v2, 4  ;;  %2429 = vmatmul.mubr.f32.gmra.mrb[154].mxu1 %v9801_v34  ;;  %v3243_v48 = vrot.slane %v10630_v50, 1 }
 0x1e7   :  { %v4149_v35 = vrot.slane %v10630_v50, 3  ;;  %v4472_v46 = vrot.slane %v10630_v50, 4  ;;  %2433 = vmatprep.mubr.f32.mxu1 %v10510_v16  ;;  %v6501_v2 = vunpack.i.l.bf16 %v10620_v57  ;;  %v10656_v29 = vsel %vm3564_vm3, %v3672_v28, %v15548_v17  ;;  %v1842_v21 = vpop.f32.mrb[44].mxu0 }
 0x1e8   :  { %v15898_v34 = vrot.slane %v10618_v25, 4  ;;  %v1994_v4 = vmax.f32 %v1838_v63, 0.0  ;;  %v15899_v16 = vpack.i.bf16 %v10491_v20, %v10468_v59  ;;  %v1360_v43 = vpop.f32.mrb[50].mxu1  ;;  %v3244_v47 = vsel %vm2659_vm1, %v3241_v12, %v3243_v48  ;;  %v1844_v59 = vpop.f32.mrb[45].mxu0 }
 0x1e9   :  { %v10669_v60 = vsel %vm3564_vm3, %v4148_v58, %v4149_v35  ;;  %v10672_v28 = vsel %vm3824_vm2, %v4471_v62, %v4472_v46  ;;  %v1356_v17 = vadd.f32 %v10551_v42, %v1355_v8  ;;  %v1362_v63 = vpop.f32.mrb[51].mxu1  ;;  %v6502_v20 = vunpack.i.h.bf16 %v10620_v57  ;;  %v10683_v62 = vpop.permute.xlu1 %6504 }
 0x1ea   :  { %v10661_v0 = vsel %vm3824_vm2, %v3995_v44, %v15898_v34  ;;  %6664 = vrot.lane.b32.xlu1 %v15899_v16, %s7722_s1  ;;  %v15900_v44 = vpack.i.bf16 %v10527_v19, %v10495_v9  ;;  %2434 = vmatmul.mubr.f32.gmra.mrb[156].mxu1 %v9819_v11  ;;  %v3245_v12 = vrot.slane %v1994_v4, 1  ;;  %v4151_v34 = vrot.slane %v1994_v4, 3  ;;  %v7712_v19 = vld [vmem:[%s15449_s0 + $0x21b] sm:$0xff] }
 0x1eb   :  { %v4474_v58 = vrot.slane %v1994_v4, 4  ;;  %v1843_v16 = vadd.f32 %v10551_v42, %v1842_v21  ;;  %2438 = vmatprep.mubr.f32.mxu1 %v10581_v51  ;;  %v6698_v8 = vpack.i.bf16 %v1994_v4, %v10630_v50  ;;  %v6688_v9 = vpack.i.bf16 %v3244_v47, %v10634_v40  ;;  %v1847_v50 = vpop.f32.mrb[46].mxu0 }
 0x1ec   :  { %6674 = vrot.lane.b32.xlu0 %v15900_v44, %s7722_s1  ;;  %v2225_v11 = vsel %vm497_vm0, %v7712_v19, %v6501_v2  ;;  %v15901_v21 = vpack.i.bf16 %v10562_v52, %v10530_v55  ;;  %v1365_v51 = vpop.f32.mrb[52].mxu1  ;;  %v10700_v40 = vsel %vm3564_vm3, %v4149_v35, %v4151_v34  ;;  %v10706_v2 = vsel %vm2659_vm1, %v3243_v48, %v3245_v12  ;;  %v1849_v59 = vpop.f32.mrb[47].mxu0 }
 0x1ed   :  { %v10693_v44 = vmax.f32 %v1843_v16, 0.0  ;;  %v10703_v47 = vsel %vm3824_vm2, %v4472_v46, %v4474_v58  ;;  %v10708_v4 = vmax.f32 %v1356_v17, 0.0  ;;  %v1361_v63 = vadd.f32 %v10551_v42, %v1360_v43  ;;  %v1367_v55 = vpop.f32.mrb[53].mxu1  ;;  %v7713_v46 = vld [vmem:[%s15449_s0 + $0x223] sm:$0xff] }
 0x1ee   :  { %6684 = vrot.lane.b32.xlu1 %v15901_v21, %s7723_s28  ;;  %v15902_v52 = vpack.i.bf16 %v10533_v3, %v10498_v49  ;;  %2439 = vmatmul.mubr.f32.gmra.mrb[158].mxu1 %v9837_v32  ;;  %v6506_v35 = vunpack.i.l.bf16 %v10683_v62  ;;  %v2226_v17 = vsel %vm497_vm0, %v7713_v46, %v6502_v20  ;;  %v1848_v49 = vadd.f32 %v10551_v42, %v1847_v50 }
 0x1ef   :  { %v3247_v48 = vrot.slane %v10693_v44, 1  ;;  %v4153_v43 = vrot.slane %v10693_v44, 3  ;;  %v4476_v16 = vrot.slane %v10693_v44, 4  ;;  %2443 = vmatprep.mubr.f32.mxu1 %v2225_v11  ;;  %v2835_v3 = vrot.slane %v10618_v25, 1  ;;  %v1852_v55 = vpop.f32.mrb[48].mxu0 }
 0x1f0   :  { %6679 = vrot.lane.b32.xlu0 %v15902_v52, %s7723_s28  ;;  %v6708_v32 = vpack.i.bf16 %v10700_v40, %v10669_v60  ;;  %v6713_v19 = vpack.i.bf16 %v10703_v47, %v10672_v28  ;;  %v10732_v21 = vmax.f32 %v1848_v49, 0.0  ;;  %v1370_v52 = vpop.f32.mrb[54].mxu1  ;;  %v2837_v40 = vrot.slane %v10708_v4, 1 }
 0x1f1   :  { %v10736_v50 = vsel %vm2659_vm1, %v3245_v12, %v3247_v48  ;;  %v10739_v11 = vsel %vm3564_vm3, %v4151_v34, %v4153_v43  ;;  %v10742_v60 = vsel %vm3824_vm2, %v4474_v58, %v4476_v16  ;;  %v10745_v59 = vmax.f32 %v1361_v63, 0.0  ;;  %v1372_v46 = vpop.f32.mrb[55].mxu1  ;;  %v7714_v34 = vld [vmem:[%s15449_s0 + $0x22b] sm:$0xff] }
 0x1f2   :  { %6699 = vrot.lane.b32.xlu1 %v6698_v8, %s7720_s9  ;;  %v1854_v8 = vpop.f32.mrb[49].mxu0  ;;  %2444 = vmatmul.mubr.f32.gmra.mrb[160].mxu1 %v9855_v38  ;;  %v6507_v12 = vunpack.i.h.bf16 %v10683_v62  ;;  %v2227_v58 = vsel %vm497_vm0, %v7714_v34, %v6506_v35  ;;  %v3249_v49 = vrot.slane %v10732_v21, 1  ;;  %v15549_v63 = vrot.slane %v10732_v21, 3 }
 0x1f3   :  { %v15550_v20 = vrot.slane %v10732_v21, 4  ;;  %2448 = vmatprep.mubr.f32.mxu1 %v2226_v17  ;;  %v1366_v46 = vadd.f32 %v10551_v42, %v1365_v51  ;;  %v6728_v38 = vpack.i.bf16 %v10736_v50, %v10706_v2  ;;  %v6738_v62 = vpack.i.bf16 %v10732_v21, %v10693_v44  ;;  %v1857_v51 = vpop.f32.mrb[50].mxu0 }
 0x1f4   :  { %6689 = vrot.lane.b32.xlu0 %v6688_v9, %s7724_s13  ;;  %v1853_v9 = vadd.f32 %v10551_v42, %v1852_v55  ;;  %v15903_v8 = vrot.slane %v10592_v31, 1  ;;  %v15904_v55 = vpack.i.bf16 %v10595_v45, %v10565_v23  ;;  %v10774_v17 = vpop.f32.mrb[56].mxu1  ;;  %v10779_v57 = vsel %vm3564_vm3, %v4153_v43, %v15549_v63  ;;  %v1859_v63 = vpop.f32.mrb[51].mxu0 }
 0x1f5   :  { %v15905_v45 = vpack.i.bf16 %v10559_v10, %v10524_v22  ;;  %v1377_v23 = vpop.f32.mrb[57].mxu1  ;;  %v1858_v43 = vadd.f32 %v10551_v42, %v1857_v51  ;;  %v15552_v10 = vrot.slane %v10745_v59, 4  ;;  %v10802_v22 = vmax.f32 %v1366_v46, 0.0 }
 0x1f6   :  { %v10766_v35 = vsel %vm2659_vm1, %v15903_v8, %v2835_v3  ;;  %v10768_v34 = vmax.f32 %v1853_v9, 0.0  ;;  %6704 = vrot.lane.b32.xlu1 %v15904_v55, %s7722_s1  ;;  %v10784_v8 = vsel %vm3824_vm2, %v4476_v16, %v15550_v20  ;;  %v10787_v9 = vsel %vm2659_vm1, %v3247_v48, %v3249_v49  ;;  %2449 = vmatmul.mubr.f32.gmra.mrb[162].mxu1 %v9875_v6  ;;  %v7715_v16 = vld [vmem:[%s15449_s0 + $0x233] sm:$0xff] }
 0x1f7   :  { %2453 = vmatprep.mubr.f32.mxu1 %v2227_v58  ;;  %v2228_v48 = vsel %vm497_vm0, %v7715_v16, %v6507_v12  ;;  %v3999_v20 = vrot.slane %v10708_v4, 4  ;;  %v1862_v63 = vpop.f32.mrb[52].mxu0  ;;  %v10821_v46 = vsel %vm2659_vm1, %v2835_v3, %v2837_v40  ;;  %v1371_v23 = vadd.f32 %v10551_v42, %v1370_v52 }
 0x1f8   :  { %6694 = vrot.lane.b32.xlu0 %v15905_v45, %s7722_s1  ;;  %v15551_v55 = vrot.slane %v10768_v34, 1  ;;  %v10806_v45 = vmax.f32 %v1858_v43, 0.0  ;;  %v10809_v58 = vpop.f32.mrb[58].mxu1  ;;  %v1864_v16 = vpop.f32.mrb[53].mxu0  ;;  %v3676_v51 = vrot.slane %v10708_v4, 3  ;;  %v15908_v28 = vpack.i.bf16 %v10625_v15, %v10601_v26 }
 0x1f9   :  { %v1382_v43 = vpop.f32.mrb[59].mxu1  ;;  %v10857_v52 = vmax.f32 %v1371_v23, 0.0  ;;  %v1863_v3 = vadd.f32 %v10551_v42, %v1862_v63  ;;  %v15909_v26 = vrot.slane %v10618_v25, 3 }
 0x1fa   :  { %6709 = vrot.lane.b32.xlu1 %v6708_v32, %s7720_s9  ;;  %v10816_v12 = vsel %vm2659_vm1, %v3249_v49, %v15551_v55  ;;  %v15906_v32 = vpack.i.bf16 %v10598_v18, %v10568_v13  ;;  %2454 = vmatmul.mubr.f32.gmra.mrb[164].mxu1 %v9893_v39  ;;  %v2839_v49 = vrot.slane %v10745_v59, 1  ;;  %v3678_v55 = vrot.slane %v10745_v59, 3 }
 0x1fb   :  { %2458 = vmatprep.mubr.f32.mxu1 %v2228_v48  ;;  %v15553_v18 = vrot.slane %v10802_v22, 1  ;;  %v1867_v48 = vpop.f32.mrb[54].mxu0  ;;  %v15907_v43 = vrot.slane %v10618_v25, 4  ;;  %v10855_v13 = vsel %vm3824_vm2, %v3999_v20, %v15552_v10  ;;  %v15554_v23 = vrot.slane %v10806_v45, 3 }
 0x1fc   :  { %6719 = vrot.lane.b32.xlu0 %v15906_v32, %s7723_s28  ;;  %v10843_v39 = vpop.f32.mrb[60].mxu1  ;;  %v4157_v32 = vrot.slane %v10768_v34, 3  ;;  %v10874_v15 = vsel %vm3564_vm3, %v15909_v26, %v3676_v51  ;;  %v3253_v26 = vrot.slane %v10806_v45, 1  ;;  %v15557_v6 = vrot.slane %v10857_v52, 4 }
 0x1fd   :  { %v10850_v16 = vsel %vm3824_vm2, %v15907_v43, %v3999_v20  ;;  %v1387_v47 = vpop.f32.mrb[61].mxu1  ;;  %v4480_v43 = vrot.slane %v10768_v34, 4  ;;  %v1868_v20 = vadd.f32 %v10551_v42, %v1867_v48 }
 0x1fe   :  { %6714 = vrot.lane.b32.xlu1 %v6713_v19, %s7724_s13  ;;  %v1869_v19 = vpop.f32.mrb[55].mxu0  ;;  %2459 = vmatmul.mubr.f32.gmra.mrb[166].mxu1 %v9917_v41  ;;  %v10877_v41 = vsel %vm3564_vm3, %v3676_v51, %v3678_v55  ;;  %v10897_v51 = vsel %vm2659_vm1, %v2839_v49, %v15553_v18  ;;  %v15556_v47 = vrot.slane %v10806_v45, 4  ;;  %v15910_v18 = vrot.slane %v10732_v21, 3 }
 0x1ff   :  { %v1872_v48 = vpop.f32.mrb[56].mxu0  ;;  %v10892_v19 = vsel %vm2659_vm1, %v2837_v40, %v2839_v49  ;;  %v10906_v40 = vmax.f32 %v1863_v3, 0.0  ;;  %v15911_v3 = vpack.i.bf16 %v10618_v25, %v10592_v31  ;;  %v15913_v31 = vpack.i.bf16 %v10656_v29, %v10628_v27 }
 0x200   :  { %6724 = vrot.lane.b32.xlu0 %v15908_v28, %s7723_s28  ;;  %v10879_v28 = vmax.f32 %v1868_v20, 0.0  ;;  %v10885_v63 = vpop.f32.mrb[62].mxu1  ;;  %v1874_v50 = vpop.f32.mrb[57].mxu0  ;;  %v15555_v20 = vrot.slane %v10857_v52, 3  ;;  %v10914_v44 = vsel %vm3564_vm3, %v15910_v18, %v4157_v32 }
 0x201   :  { %v1392_v2 = vpop.f32.mrb[63].mxu1  ;;  %v3255_v18 = vrot.slane %v10906_v40, 1 }
 0x202   :  { %6729 = vrot.lane.b32.xlu1 %v6728_v38, %s7724_s13  ;;  %v3680_v38 = vrot.slane %v10802_v22, 3  ;;  %v1873_v2 = vadd.f32 %v10551_v42, %v1872_v48  ;;  %v3257_v10 = vrot.slane %v10879_v28, 1 }
 0x203   :  { %v10928_v49 = vpop.f32.mrb[58].mxu0 }
 0x204   :  { %6739 = vrot.lane.b32.xlu0 %v6738_v62, %s7720_s9  ;;  %v10919_v62 = vsel %vm3564_vm3, %v4157_v32, %v15554_v23  ;;  %v10926_v50 = vpop.f32.mrb[64].mxu1  ;;  %v15912_v32 = vrot.slane %v10732_v21, 4  ;;  %v1879_v48 = vpop.f32.mrb[59].mxu0  ;;  %v10949_v21 = vsel %vm3824_vm2, %v4480_v43, %v15556_v47  ;;  %v10957_v27 = vsel %vm3564_vm3, %v3680_v38, %v15555_v20 }
 0x205   :  { %v1397_v25 = vpop.f32.mrb[65].mxu1  ;;  %v10959_v29 = vmax.f32 %v1873_v2, 0.0 }
 0x206   :  { %6734 = vrot.lane.b32.xlu1 %v15911_v3, %s7722_s1  ;;  %v10937_v23 = vsel %vm3824_vm2, %v15912_v32, %v4480_v43  ;;  %v4003_v3 = vrot.slane %v10802_v22, 4  ;;  %v10952_v32 = vsel %vm3564_vm3, %v3678_v55, %v3680_v38  ;;  %v15915_v38 = vrot.slane %v10768_v34, 1 }
 0x207   :  { %v10967_v48 = vpop.f32.mrb[60].mxu0  ;;  %v10986_v55 = vsel %vm2659_vm1, %v3253_v26, %v3255_v18 }
 0x208   :  { %6744 = vrot.lane.b32.xlu0 %v15913_v31, %s7722_s1  ;;  %v15914_v31 = vpack.i.bf16 %v10779_v57, %v10739_v11  ;;  %v10965_v25 = vpop.f32.mrb[66].mxu1  ;;  %v10976_v2 = vsel %vm2659_vm1, %v15915_v38, %v3253_v26  ;;  %v15916_v57 = vpack.i.bf16 %v10661_v0, %v10639_v14  ;;  %v10982_v20 = vpop.permute.xlu1 %6514  ;;  %v15918_v38 = vpack.i.bf16 %v10784_v8, %v10742_v60 }
 0x209   :  { %v1402_v11 = vpop.f32.mrb[67].mxu1  ;;  %15917 = vst [vmem:[#allocation36_spill] sm:$0xff] %v10982_v20  ;;  %v11007_v26 = vsel %vm3824_vm2, %v4003_v3, %v15557_v6  ;;  %v15920_v60 = vpack.i.bf16 %v10816_v12, %v10787_v9  ;;  %v1376_v0 = vadd.f32 %v10551_v42, %v10774_v17  ;;  %v15922_v9 = vpack.i.bf16 %v10821_v46, %v10766_v35  ;;  %v11048_v17 = vpop.permute.xlu0 %6509 }
 0x20a   :  { %6749 = vrot.lane.b32.xlu1 %v15914_v31, %s7720_s9  ;;  %v1884_v31 = vpop.f32.mrb[61].mxu0  ;;  %v15924_v35 = vpack.i.bf16 %v10745_v59, %v10708_v4 }
 0x20b   :  { %v10995_v14 = vpop.f32.mrb[62].mxu0  ;;  %v11046_v6 = vmax.f32 %v1376_v0, 0.0  ;;  %v15927_v0 = vrot.slane %v10806_v45, 3 }
 0x20c   :  { %6759 = vrot.lane.b32.xlu0 %v15916_v57, %s7723_s28  ;;  %v10993_v47 = vpop.f32.mrb[68].mxu1  ;;  %v15919_v57 = vrot.slane %v10745_v59, 4  ;;  %v1889_v31 = vpop.f32.mrb[63].mxu0  ;;  %v4484_v59 = vrot.slane %v10906_v40, 4 }
 0x20d   :  { %v1407_v8 = vpop.f32.mrb[69].mxu1 }
 0x20e   :  { %6754 = vrot.lane.b32.xlu1 %v15918_v38, %s7724_s13  ;;  %v11002_v11 = vsel %vm3824_vm2, %v15919_v57, %v4003_v3  ;;  %v11013_v38 = vpop.permute.xlu1 %6519  ;;  %v1381_v57 = vadd.f32 %v10551_v42, %v10809_v58  ;;  %v4161_v3 = vrot.slane %v10906_v40, 3  ;;  %v11033_v8 = vsel %vm2659_vm1, %v3255_v18, %v3257_v10 }
 0x20f   :  { %15921 = vst [vmem:[#allocation37_spill] sm:$0xff] %v11013_v38  ;;  %v15923_v58 = vrot.slane %v10959_v29, 1  ;;  %v11075_v38 = vpop.permute.xlu0 %6534 }
 0x210   :  { %6769 = vrot.lane.b32.xlu0 %v15920_v60, %s7724_s13  ;;  %v11026_v12 = vpop.f32.mrb[70].mxu1  ;;  %v11028_v60 = vpop.f32.mrb[64].mxu0  ;;  %v11050_v18 = vmax.f32 %v1381_v57, 0.0  ;;  %v15928_v57 = vpack.i.bf16 %v10855_v13, %v10850_v16  ;;  %15930 = vst [vmem:[#allocation40_spill] sm:$0xff] %v11075_v38  ;;  %v15932_v16 = vrot.slane %v10879_v28, 3 }
 0x211   :  { %v11038_v31 = vsel %vm2659_vm1, %v3257_v10, %v15923_v58  ;;  %v1412_v46 = vpop.f32.mrb[71].mxu1  ;;  %v15926_v10 = vpack.i.bf16 %v10806_v45, %v10768_v34 }
 0x212   :  { %6764 = vrot.lane.b32.xlu1 %v15922_v9, %s7723_s28  ;;  %v1894_v9 = vpop.f32.mrb[65].mxu0  ;;  %v11044_v43 = vpop.permute.xlu1 %6524 }
 0x213   :  { %15925 = vst [vmem:[#allocation38_spill] sm:$0xff] %v11044_v43  ;;  %v11059_v4 = vpop.f32.mrb[66].mxu0 }
 0x214   :  { %6774 = vrot.lane.b32.xlu0 %v15924_v35, %s7722_s1  ;;  %v11057_v58 = vpop.f32.mrb[72].mxu1  ;;  %v11066_v35 = vsel %vm3564_vm3, %v15927_v0, %v4161_v3  ;;  %v1899_v34 = vpop.f32.mrb[67].mxu0  ;;  %v15931_v0 = vpack.i.bf16 %v10877_v41, %v10874_v15 }
 0x215   :  { %v1417_v46 = vpop.f32.mrb[73].mxu1  ;;  %v15933_v34 = vpack.i.bf16 %v10897_v51, %v10892_v19  ;;  %v15936_v19 = vrot.slane %v10806_v45, 4 }
 0x216   :  { %6779 = vrot.lane.b32.xlu1 %v15926_v10, %s7720_s9  ;;  %v11072_v9 = vpop.permute.xlu1 %6529  ;;  %v4007_v10 = vrot.slane %v11046_v6, 4 }
 0x217   :  { %15929 = vst [vmem:[#allocation39_spill] sm:$0xff] %v11072_v9  ;;  %v11085_v13 = vpop.f32.mrb[68].mxu0  ;;  %v15564_v9 = vrot.slane %v11050_v18, 4  ;;  %v11114_v51 = vsel %vm3824_vm2, %v15936_v19, %v4484_v59  ;;  %v11134_v19 = vpop.permute.xlu0 %6549 }
 0x218   :  { %6799 = vrot.lane.b32.xlu0 %v15928_v57, %s7723_s28  ;;  %v11083_v20 = vpop.f32.mrb[74].mxu1  ;;  %v11090_v57 = vsel %vm3564_vm3, %v4161_v3, %v15932_v16  ;;  %v1904_v15 = vpop.f32.mrb[69].mxu0  ;;  %v15935_v3 = vpack.i.bf16 %v10919_v62, %v10914_v44  ;;  %v15939_v44 = vpack.i.bf16 %v10879_v28, %v10906_v40  ;;  %15941 = vst [vmem:[#allocation43_spill] sm:$0xff] %v11134_v19 }
 0x219   :  { %v1422_v43 = vpop.f32.mrb[75].mxu1 }
 0x21a   :  { %6784 = vrot.lane.b32.xlu1 %v15931_v0, %s7722_s1  ;;  %v11098_v41 = vpop.permute.xlu1 %6539  ;;  %v6828_v0 = vpack.i.bf16 %v11090_v57, %v11066_v35  ;;  %v15937_v43 = vrot.slane %v10879_v28, 4  ;;  %v15938_v57 = vrot.slane %v10857_v52, 4 }
 0x21b   :  { %15934 = vst [vmem:[#allocation41_spill] sm:$0xff] %v11098_v41  ;;  %v11109_v46 = vpop.f32.mrb[70].mxu0 }
 0x21c   :  { %6804 = vrot.lane.b32.xlu0 %v15933_v34, %s7723_s28  ;;  %v11107_v16 = vpop.f32.mrb[76].mxu1  ;;  %v11119_v35 = vsel %vm3824_vm2, %v4484_v59, %v15937_v43  ;;  %v11124_v34 = vsel %vm3824_vm2, %v15938_v57, %v4007_v10  ;;  %v1909_v45 = vpop.f32.mrb[71].mxu0  ;;  %v2843_v59 = vrot.slane %v10857_v52, 1  ;;  %v15942_v43 = vpack.i.bf16 %v10949_v21, %v10937_v23 }
 0x21d   :  { %v1427_v62 = vpop.f32.mrb[77].mxu1  ;;  %v2845_v21 = vrot.slane %v11046_v6, 1 }
 0x21e   :  { %6789 = vrot.lane.b32.xlu1 %v15935_v3, %s7720_s9  ;;  %v11130_v15 = vpop.permute.xlu1 %6544  ;;  %v1386_v3 = vadd.f32 %v10551_v42, %v10843_v39  ;;  %v4010_v39 = vsel %vm3824_vm2, %v4007_v10, %v15564_v9  ;;  %v15943_v62 = vpack.i.bf16 %v10957_v27, %v10952_v32  ;;  %v1878_v10 = vadd.f32 %v10551_v42, %v10928_v49 }
 0x21f   :  { %15940 = vst [vmem:[#allocation42_spill] sm:$0xff] %v11130_v15  ;;  %v11143_v40 = vpop.f32.mrb[72].mxu0  ;;  %v15946_v32 = vpack.i.bf16 %v10986_v55, %v10976_v2  ;;  %v15948_v49 = vpack.i.bf16 %v11007_v26, %v11002_v11  ;;  %v1883_v55 = vadd.f32 %v10551_v42, %v10967_v48  ;;  %v15950_v11 = vpack.i.bf16 %v10857_v52, %v10802_v22  ;;  %v16165_v38 = vld [vmem:[#allocation43_spill] sm:$0xff] }
 0x220   :  { %6819 = vrot.lane.b32.xlu0 %v15939_v44, %s7720_s9  ;;  %v11141_v57 = vpop.f32.mrb[78].mxu1  ;;  %v6833_v44 = vpack.i.bf16 %v11119_v35, %v11114_v51  ;;  %v1914_v15 = vpop.f32.mrb[73].mxu0  ;;  %v11158_v41 = vmax.f32 %v1386_v3, 0.0  ;;  %v1888_v35 = vadd.f32 %v10551_v42, %v10995_v14  ;;  %v6878_v3 = vpack.i.bf16 %v4010_v39, %v11124_v34 }
 0x221   :  { %v1432_v45 = vpop.f32.mrb[79].mxu1  ;;  %v11160_v51 = vpop.permute.xlu0 %6564  ;;  %v1391_v34 = vadd.f32 %v10551_v42, %v10885_v63  ;;  %v11189_v39 = vmax.f32 %v1878_v10, 0.0  ;;  %v2846_v48 = vsel %vm2659_vm1, %v2843_v59, %v2845_v21  ;;  %v15951_v63 = vpack.i.bf16 %v11038_v31, %v11033_v8 }
 0x222   :  { %6794 = vrot.lane.b32.xlu1 %v15942_v43, %s7724_s13  ;;  %v11154_v23 = vpop.permute.xlu1 %6554  ;;  %v2847_v43 = vrot.slane %v11050_v18, 1  ;;  %15945 = vst [vmem:[#allocation45_spill] sm:$0xff] %v11160_v51  ;;  %v15957_v51 = vrot.slane %v10857_v52, 3 }
 0x223   :  { %15944 = vst [vmem:[#allocation44_spill] sm:$0xff] %v11154_v23  ;;  %v11172_v15 = vpop.f32.mrb[74].mxu0  ;;  %v11216_v23 = vmax.f32 %v1391_v34, 0.0 }
 0x224   :  { %6824 = vrot.lane.b32.xlu0 %v15943_v62, %s7722_s1  ;;  %v11170_v27 = vpop.f32.mrb[80].mxu1  ;;  %v15947_v62 = vrot.slane %v10802_v22, 1  ;;  %v1919_v9 = vpop.f32.mrb[75].mxu0  ;;  %v3684_v22 = vrot.slane %v11046_v6, 3 }
 0x225   :  { %v1437_v14 = vpop.f32.mrb[81].mxu1 }
 0x226   :  { %6809 = vrot.lane.b32.xlu1 %v15946_v32, %s7724_s13  ;;  %v2844_v45 = vsel %vm2659_vm1, %v15947_v62, %v2843_v59  ;;  %v11184_v2 = vpop.permute.xlu1 %6559  ;;  %v11191_v62 = vmax.f32 %v1888_v35, 0.0  ;;  %v11207_v14 = vmax.f32 %v1883_v55, 0.0  ;;  %v11214_v59 = vpop.permute.xlu0 %6574  ;;  %v15954_v55 = vrot.slane %v11158_v41, 1 }
 0x227   :  { %15949 = vst [vmem:[#allocation46_spill] sm:$0xff] %v11184_v2  ;;  %v11199_v9 = vpop.f32.mrb[76].mxu0  ;;  %v3688_v2 = vrot.slane %v11158_v41, 3  ;;  %15953 = vst [vmem:[#allocation48_spill] sm:$0xff] %v11214_v59  ;;  %v3685_v19 = vsel %vm3564_vm3, %v15957_v51, %v3684_v22 }
 0x228   :  { %6839 = vrot.lane.b32.xlu0 %v15948_v49, %s7723_s28  ;;  %v11197_v26 = vpop.f32.mrb[82].mxu1  ;;  %v2848_v49 = vsel %vm2659_vm1, %v2845_v21, %v2847_v43  ;;  %v1924_v35 = vpop.f32.mrb[77].mxu0  ;;  %v6843_v21 = vpack.i.bf16 %v2846_v48, %v2844_v45  ;;  %v15955_v45 = vpack.i.bf16 %v11050_v18, %v11046_v6 }
 0x229   :  { %v1442_v10 = vpop.f32.mrb[83].mxu1  ;;  %v6898_v35 = vpack.i.bf16 %v11191_v62, %v11207_v14 }
 0x22a   :  { %6814 = vrot.lane.b32.xlu1 %v15950_v11, %s7722_s1  ;;  %v11209_v32 = vpop.permute.xlu1 %6569  ;;  %v3686_v11 = vrot.slane %v11050_v18, 3  ;;  %v6858_v10 = vpack.i.bf16 %v11189_v39, %v10959_v29 }
 0x22b   :  { %15952 = vst [vmem:[#allocation47_spill] sm:$0xff] %v11209_v32  ;;  %v11221_v31 = vpop.f32.mrb[78].mxu0 }
 0x22c   :  { %6849 = vrot.lane.b32.xlu0 %v15951_v63, %s7724_s13  ;;  %v11219_v8 = vpop.f32.mrb[84].mxu1  ;;  %v2850_v63 = vsel %vm2659_vm1, %v2847_v43, %v15954_v55  ;;  %v1929_v34 = vpop.f32.mrb[79].mxu0  ;;  %v3687_v6 = vsel %vm3564_vm3, %v3684_v22, %v3686_v11  ;;  %v15961_v22 = vrot.slane %v11216_v23, 3 }
 0x22d   :  { %v6883_v32 = vpack.i.bf16 %v2850_v63, %v2848_v49  ;;  %v11250_v34 = vpop.permute.xlu0 %6589  ;;  %v6863_v51 = vpack.i.bf16 %v3687_v6, %v3685_v19  ;;  %v1893_v19 = vadd.f32 %v10551_v42, %v11028_v60  ;;  %v15970_v60 = vrot.slane %v11216_v23, 4 }
 0x22e   :  { %6829 = vrot.lane.b32.xlu1 %v6828_v0, %s7720_s9  ;;  %v1447_v0 = vpop.f32.mrb[85].mxu1  ;;  %v11234_v48 = vpop.permute.xlu1 %6579  ;;  %15959 = vst [vmem:[#allocation51_spill] sm:$0xff] %v11250_v34 }
 0x22f   :  { %15956 = vst [vmem:[#allocation49_spill] sm:$0xff] %v11234_v48  ;;  %v11240_v55 = vpop.f32.mrb[80].mxu0 }
 0x230   :  { %6854 = vrot.lane.b32.xlu0 %v15955_v45, %s7722_s1  ;;  %v11238_v43 = vpop.f32.mrb[86].mxu1  ;;  %v3689_v45 = vsel %vm3564_vm3, %v3686_v11, %v3688_v2  ;;  %v1934_v63 = vpop.f32.mrb[81].mxu0  ;;  %v3691_v11 = vsel %vm3564_vm3, %v3688_v2, %v15961_v22  ;;  %v15965_v22 = vrot.slane %v10879_v28, 3 }
 0x231   :  { %v1452_v0 = vpop.f32.mrb[87].mxu1  ;;  %v6903_v6 = vpack.i.bf16 %v3691_v11, %v3689_v45  ;;  %v11288_v11 = vmax.f32 %v1893_v19, 0.0  ;;  %v3263_v19 = vrot.slane %v11207_v14, 1 }
 0x232   :  { %6834 = vrot.lane.b32.xlu1 %v6833_v44, %s7724_s13  ;;  %v11248_v49 = vpop.permute.xlu1 %6584  ;;  %v4165_v44 = vrot.slane %v10959_v29, 3 }
 0x233   :  { %15958 = vst [vmem:[#allocation50_spill] sm:$0xff] %v11248_v49  ;;  %v11256_v52 = vpop.f32.mrb[82].mxu0  ;;  %v4011_v49 = vrot.slane %v11158_v41, 4 }
 0x234   :  { %6879 = vrot.lane.b32.xlu0 %v6878_v3, %s7723_s28  ;;  %v11254_v59 = vpop.f32.mrb[88].mxu1  ;;  %v1939_v63 = vpop.f32.mrb[83].mxu0 }
 0x235   :  { %15960 = vst [vmem:[#allocation52_spill] sm:$0xff] %v11254_v59  ;;  %v1457_v3 = vpop.f32.mrb[89].mxu1  ;;  %v4488_v59 = vrot.slane %v10959_v29, 4 }
 0x236   :  { %6844 = vrot.lane.b32.xlu1 %v6843_v21, %s7723_s28  ;;  %v11262_v0 = vpop.permute.xlu1 %6594  ;;  %v11266_v21 = vpop.permute.xlu0 %6609  ;;  %v4166_v3 = vsel %vm3564_vm3, %v15965_v22, %v4165_v44 }
 0x237   :  { %15962 = vst [vmem:[#allocation53_spill] sm:$0xff] %v11262_v0  ;;  %15963 = vst [vmem:[#allocation54_spill] sm:$0xff] %v11266_v21  ;;  %v15967_v0 = vrot.slane %v11189_v39, 3 }
 0x238   :  { %6884 = vrot.lane.b32.xlu0 %v6883_v32, %s7723_s28  ;;  %v11272_v2 = vpop.f32.mrb[90].mxu1  ;;  %v11274_v32 = vpop.f32.mrb[84].mxu0 }
 0x239   :  { %15964 = vst [vmem:[#allocation55_spill] sm:$0xff] %v11272_v2  ;;  %v1462_v63 = vpop.f32.mrb[91].mxu1  ;;  %v1944_v48 = vpop.f32.mrb[85].mxu0  ;;  %v4168_v45 = vsel %vm3564_vm3, %v4165_v44, %v15967_v0  ;;  %v4014_v2 = vsel %vm3824_vm2, %v4011_v49, %v15970_v60  ;;  %v15974_v60 = vrot.slane %v11189_v39, 4 }
 0x23a   :  { %6859 = vrot.lane.b32.xlu1 %v6858_v10, %s7720_s9  ;;  %v11280_v21 = vpop.permute.xlu1 %6599  ;;  %v3265_v10 = vrot.slane %v11191_v62, 1  ;;  %v6868_v48 = vpack.i.bf16 %v4168_v45, %v4166_v3  ;;  %v15969_v63 = vrot.slane %v11050_v18, 4 }
 0x23b   :  { %15966 = vst [vmem:[#allocation56_spill] sm:$0xff] %v11280_v21 }
 0x23c   :  { %6899 = vrot.lane.b32.xlu0 %v6898_v35, %s7720_s9  ;;  %v11291_v22 = vpop.f32.mrb[92].mxu1  ;;  %v11293_v35 = vpop.f32.mrb[86].mxu0  ;;  %v4012_v21 = vsel %vm3824_vm2, %v15969_v63, %v4011_v49  ;;  %v15973_v49 = vrot.slane %v10879_v28, 4  ;;  %v4491_v63 = vsel %vm3824_vm2, %v4488_v59, %v15974_v60  ;;  %v1396_v28 = vadd.f32 %v10551_v42, %v10926_v50 }
 0x23d   :  { %15968 = vst [vmem:[#allocation57_spill] sm:$0xff] %v11291_v22  ;;  %v1467_v44 = vpop.f32.mrb[93].mxu1  ;;  %v1949_v0 = vpop.f32.mrb[87].mxu0  ;;  %v6918_v34 = vpack.i.bf16 %v4014_v2, %v4012_v21  ;;  %v1401_v21 = vadd.f32 %v10551_v42, %v10965_v25 }
 0x23e   :  { %6864 = vrot.lane.b32.xlu1 %v6863_v51, %s7722_s1  ;;  %v11305_v22 = vpop.permute.xlu0 %6619  ;;  %v3266_v44 = vsel %vm2659_vm1, %v3263_v19, %v3265_v10  ;;  %v11340_v50 = vmax.f32 %v1396_v28, 0.0 }
 0x23f   :  { %v11303_v51 = vpop.permute.xlu1 %6604  ;;  %15972 = vst [vmem:[#allocation59_spill] sm:$0xff] %v11305_v22  ;;  %v11311_v45 = vpop.f32.mrb[88].mxu0 }
 0x240   :  { %6904 = vrot.lane.b32.xlu0 %v6903_v6, %s7722_s1  ;;  %15971 = vst [vmem:[#allocation58_spill] sm:$0xff] %v11303_v51  ;;  %v11309_v18 = vpop.f32.mrb[94].mxu1  ;;  %v4489_v6 = vsel %vm3824_vm2, %v15973_v49, %v4488_v59  ;;  %v3261_v49 = vrot.slane %v11189_v39, 1  ;;  %v15977_v59 = vrot.slane %v11288_v11, 1 }
 0x241   :  { %v1472_v2 = vpop.f32.mrb[95].mxu1  ;;  %v6873_v51 = vpack.i.bf16 %v4491_v63, %v4489_v6  ;;  %v1406_v63 = vadd.f32 %v10551_v42, %v10993_v47 }
 0x242   :  { %6869 = vrot.lane.b32.xlu1 %v6868_v48, %s7720_s9  ;;  %v1954_v48 = vpop.f32.mrb[89].mxu0  ;;  %v11327_v3 = vpop.permute.xlu0 %6639  ;;  %v3268_v60 = vsel %vm2659_vm1, %v3265_v10, %v15977_v59  ;;  %v15980_v10 = vrot.slane %v10959_v29, 1 }
 0x243   :  { %v11323_v0 = vpop.permute.xlu1 %6614  ;;  %15976 = vst [vmem:[#allocation61_spill] sm:$0xff] %v11327_v3  ;;  %v11333_v25 = vpop.f32.mrb[90].mxu0  ;;  %v6928_v3 = vpack.i.bf16 %v3268_v60, %v3266_v44 }
 0x244   :  { %6919 = vrot.lane.b32.xlu0 %v6918_v34, %s7723_s28  ;;  %15975 = vst [vmem:[#allocation60_spill] sm:$0xff] %v11323_v0  ;;  %v1475_v22 = vpop.f32.mrb[96].mxu1  ;;  %15978 = vst [vmem:[#allocation62_spill] sm:$0xff] %v11333_v25  ;;  %v11335_v34 = vmax.f32 %v1401_v21, 0.0  ;;  %v1959_v48 = vpop.f32.mrb[91].mxu0  ;;  %v3262_v59 = vsel %vm2659_vm1, %v15980_v10, %v3261_v49  ;;  %v4015_v10 = vrot.slane %v11340_v50, 4 }
 0x245   :  { %v1477_v2 = vpop.f32.mrb[97].mxu1  ;;  %v1476_v6 = vadd.f32 %v10551_v42, %v1475_v22 }
 0x246   :  { %6874 = vrot.lane.b32.xlu1 %v6873_v51, %s7724_s13  ;;  %v3264_v51 = vsel %vm2659_vm1, %v3261_v49, %v3263_v19  ;;  %v6933_v28 = vpack.i.bf16 %v11335_v34, %v11340_v50  ;;  %v11359_v48 = vpop.permute.xlu0 %6644 }
 0x247   :  { %v11338_v0 = vpop.permute.xlu1 %6624  ;;  %v11348_v25 = vpop.f32.mrb[92].mxu0  ;;  %v11354_v22 = vmax.f32 %v1476_v6, 0.0  ;;  %v6888_v2 = vpack.i.bf16 %v3264_v51, %v3262_v59  ;;  %15984 = vst [vmem:[#allocation67_spill] sm:$0xff] %v11359_v48  ;;  %v4169_v59 = vrot.slane %v11207_v14, 3  ;;  %v2855_v48 = vrot.slane %v11335_v34, 1 }
 0x248   :  { %15979 = vst [vmem:[#allocation63_spill] sm:$0xff] %v11338_v0  ;;  %v1480_v21 = vpop.f32.mrb[98].mxu1  ;;  %15981 = vst [vmem:[#allocation64_spill] sm:$0xff] %v11348_v25  ;;  %6929 = vrot.lane.b32.xlu0 %v6928_v3, %s7724_s13  ;;  %v1964_v60 = vpop.f32.mrb[93].mxu0  ;;  %v11362_v0 = vmax.f32 %v1406_v63, 0.0  ;;  %v1908_v6 = vadd.f32 %v10551_v42, %v11109_v46  ;;  %v1411_v25 = vadd.f32 %v10551_v42, %v11026_v12  ;;  %v15994_v12 = vrot.slane %v11191_v62, 3 }
 0x249   :  { %v1482_v44 = vpop.f32.mrb[99].mxu1  ;;  %15982 = vst [vmem:[#allocation65_spill] sm:$0xff] %v11354_v22  ;;  %v1481_v47 = vadd.f32 %v10551_v42, %v1480_v21  ;;  %v15586_v63 = vrot.slane %v11354_v22, 3  ;;  %v15585_v60 = vrot.slane %v11354_v22, 4  ;;  %v6893_v21 = vpack.i.bf16 %v11216_v23, %v11158_v41 }
 0x24a   :  { %6889 = vrot.lane.b32.xlu1 %v6888_v2, %s7724_s13  ;;  %v15993_v22 = vrot.slane %v11189_v39, 3 }
 0x24b   :  { %v11357_v29 = vpop.permute.xlu1 %6629  ;;  %v1517_v19 = vmax.f32 %v1481_v47, 0.0  ;;  %v11365_v3 = vpop.f32.mrb[94].mxu0 }
 0x24c   :  { %15983 = vst [vmem:[#allocation66_spill] sm:$0xff] %v11357_v29  ;;  %v11367_v49 = vpop.f32.mrb[100].mxu1  ;;  %6934 = vrot.lane.b32.xlu0 %v6933_v28, %s7722_s1  ;;  %v1969_v51 = vpop.f32.mrb[95].mxu0  ;;  %v2853_v28 = vrot.slane %v11340_v50, 1 }
 0x24d   :  { %15985 = vst [vmem:[#allocation68_spill] sm:$0xff] %v11367_v49  ;;  %v2297_v44 = vpop.f32.mrb[101].mxu1  ;;  %v3726_v2 = vrot.slane %v1517_v19, 3  ;;  %v4049_v47 = vrot.slane %v1517_v19, 4 }
 0x24e   :  { %v15989_v44 = vrot.slane %v11216_v23, 4  ;;  %6894 = vrot.lane.b32.xlu1 %v6893_v21, %s7722_s1  ;;  %v11419_v21 = vmax.f32 %v1908_v6, 0.0 }
 0x24f   :  { %v11375_v29 = vpop.permute.xlu1 %6634  ;;  %v11386_v51 = vsel %vm3564_vm3, %v15586_v63, %v3726_v2  ;;  %v11391_v19 = vsel %vm3824_vm2, %v15585_v60, %v4049_v47  ;;  %v11396_v46 = vpop.f32.mrb[96].mxu0  ;;  %v1903_v2 = vadd.f32 %v10551_v42, %v11085_v13  ;;  %v15992_v47 = vrot.slane %v11335_v34, 4 }
 0x250   :  { %15986 = vst [vmem:[#allocation69_spill] sm:$0xff] %v11375_v29  ;;  %15987 = vst [vmem:[#allocation70_spill] sm:$0xff] %v11386_v51  ;;  %v4016_v29 = vsel %vm3824_vm2, %v15989_v44, %v4015_v10  ;;  %v11398_v49 = vpop.f32.mrb[102].mxu1  ;;  %v1974_v63 = vpop.f32.mrb[97].mxu0 }
 0x251   :  { %15988 = vst [vmem:[#allocation71_spill] sm:$0xff] %v11391_v19  ;;  %15990 = vst [vmem:[#allocation72_spill] sm:$0xff] %v11396_v46  ;;  %v4018_v60 = vsel %vm3824_vm2, %v4015_v10, %v15992_v47  ;;  %v2302_v44 = vpop.f32.mrb[103].mxu1  ;;  %v4492_v19 = vrot.slane %v11207_v14, 4  ;;  %v4172_v46 = vsel %vm3564_vm3, %v4169_v59, %v15994_v12  ;;  %v11421_v10 = vpop.permute.xlu0 %6659  ;;  %v2856_v14 = vsel %vm2659_vm1, %v2853_v28, %v2855_v48 }
 0x252   :  { %15991 = vst [vmem:[#allocation73_spill] sm:$0xff] %v11398_v49  ;;  %v6958_v51 = vpack.i.bf16 %v4018_v60, %v4016_v29  ;;  %v4170_v49 = vsel %vm3564_vm3, %v15993_v22, %v4169_v59  ;;  %15996 = vst [vmem:[#allocation75_spill] sm:$0xff] %v11421_v10  ;;  %v15997_v29 = vrot.slane %v11362_v0, 1  ;;  %v11432_v47 = vmax.f32 %v1411_v25, 0.0 }
 0x253   :  { %v11416_v42 = vpop.permute.xlu1 %6649  ;;  %v6908_v63 = vpack.i.bf16 %v4172_v46, %v4170_v49  ;;  %v11428_v60 = vpop.f32.mrb[98].mxu0  ;;  %v11434_v44 = vmax.f32 %v1903_v2, 0.0  ;;  %v16007_v10 = vrot.slane %v11158_v41, 1 }
 0x254   :  { %15995 = vst [vmem:[#allocation74_spill] sm:$0xff] %v11416_v42  ;;  %6959 = vrot.lane.b32.xlu0 %v6958_v51, %s7723_s28  ;;  %v2858_v22 = vsel %vm2659_vm1, %v2855_v48, %v15997_v29  ;;  %15998 = vst [vmem:[#allocation76_spill] sm:$0xff] %v11428_v60  ;;  %v11430_v59 = vpop.f32.mrb[104].mxu1  ;;  %v1979_v6 = vpop.f32.mrb[99].mxu0  ;;  %v16001_v51 = vrot.slane %v11189_v39, 4  ;;  %v16002_v48 = vrot.slane %v11191_v62, 4 }
 0x255   :  { %15999 = vst [vmem:[#allocation77_spill] sm:$0xff] %v11430_v59  ;;  %6909 = vrot.lane.b32.xlu1 %v6908_v63, %s7720_s9  ;;  %v2307_v49 = vpop.f32.mrb[105].mxu1  ;;  %v6963_v46 = vpack.i.bf16 %v2858_v22, %v2856_v14  ;;  %v6978_v25 = vpack.i.bf16 %v11419_v21, %v11434_v44  ;;  %v2851_v63 = vrot.slane %v11216_v23, 1  ;;  %v11453_v14 = vld [vmem:[%s15451_s2] ss:$0 sm:$0xff]  ;;  %v3694_v42 = vrot.slane %v11335_v34, 3 }
 0x256   :  { %v4493_v13 = vsel %vm3824_vm2, %v16001_v51, %v4492_v19  ;;  %v4495_v29 = vsel %vm3824_vm2, %v4492_v19, %v16002_v48  ;;  %v1898_v39 = vadd.f32 %v11453_v14, %v11059_v4  ;;  %v3696_v19 = vrot.slane %v11362_v0, 3 }
 0x257   :  { %v11437_v12 = vpop.permute.xlu1 %6654  ;;  %v11447_v2 = vpop.permute.xlu0 %6669  ;;  %v6913_v51 = vpack.i.bf16 %v4495_v29, %v4493_v13  ;;  %v4019_v4 = vrot.slane %v11362_v0, 4  ;;  %v2852_v13 = vsel %vm2659_vm1, %v16007_v10, %v2851_v63  ;;  %v2854_v29 = vsel %vm2659_vm1, %v2851_v63, %v2853_v28 }
 0x258   :  { %16000 = vst [vmem:[#allocation78_spill] sm:$0xff] %v11437_v12  ;;  %16003 = vst [vmem:[#allocation79_spill] sm:$0xff] %v11447_v2  ;;  %6964 = vrot.lane.b32.xlu0 %v6963_v46, %s7723_s28  ;;  %v1982_v22 = vpop.f32.mrb[100].mxu0  ;;  %v11458_v6 = vpop.f32.mrb[106].mxu1  ;;  %v11469_v46 = vmax.f32 %v1898_v39, 0.0  ;;  %v6923_v49 = vpack.i.bf16 %v2854_v29, %v2852_v13  ;;  %v1913_v41 = vadd.f32 %v11453_v14, %v11143_v40 }
 0x259   :  { %16004 = vst [vmem:[#allocation80_spill] sm:$0xff] %v11458_v6  ;;  %v1984_v48 = vpop.f32.mrb[101].mxu0  ;;  %v2312_v2 = vpop.f32.mrb[107].mxu1  ;;  %6914 = vrot.lane.b32.xlu1 %v6913_v51, %s7724_s13  ;;  %v3697_v51 = vsel %vm3564_vm3, %v3694_v42, %v3696_v19  ;;  %v1983_v28 = vadd.f32 %v11453_v14, %v1982_v22 }
 0x25b   :  { %v1987_v2 = vpop.f32.mrb[102].mxu0  ;;  %v11501_v29 = vmax.f32 %v1983_v28, 0.0 }
 0x25c   :  { %v11462_v12 = vpop.permute.xlu1 %6664  ;;  %6979 = vrot.lane.b32.xlu0 %v6978_v25, %s7720_s9  ;;  %v11476_v48 = vpop.f32.mrb[108].mxu1  ;;  %v15597_v25 = vrot.slane %v11432_v47, 4 }
 0x25d   :  { %16005 = vst [vmem:[#allocation81_spill] sm:$0xff] %v11462_v12  ;;  %v1989_v39 = vpop.f32.mrb[103].mxu0  ;;  %v2317_v6 = vpop.f32.mrb[109].mxu1  ;;  %6924 = vrot.lane.b32.xlu1 %v6923_v49, %s7723_s28  ;;  %16012 = vst [vmem:[#allocation85_spill] sm:$0xff] %v11501_v29  ;;  %v11507_v49 = vadd.f32 %v11453_v14, %v1987_v2  ;;  %v3273_v2 = vrot.slane %v11419_v21, 1 }
 0x25e   :  { %v11466_v60 = vpop.permute.xlu0 %6674  ;;  %v16011_v6 = vrot.slane %v11335_v34, 4  ;;  %v4022_v22 = vsel %vm3824_vm2, %v4019_v4, %v15597_v25  ;;  %v3692_v39 = vrot.slane %v11340_v50, 3  ;;  %v15604_v25 = vrot.slane %v11501_v29, 3 }
 0x25f   :  { %16006 = vst [vmem:[#allocation82_spill] sm:$0xff] %v11466_v60  ;;  %v16008_v60 = vrot.slane %v11432_v47, 3  ;;  %16013 = vst [vmem:[#allocation86_spill] sm:$0xff] %v11507_v49 }
 0x260   :  { %v11485_v59 = vpop.permute.xlu1 %6684  ;;  %v11497_v13 = vpop.f32.mrb[110].mxu1 }
 0x261   :  { %v3699_v12 = vsel %vm3564_vm3, %v3696_v19, %v16008_v60  ;;  %16009 = vst [vmem:[#allocation83_spill] sm:$0xff] %v11485_v59  ;;  %v6938_v60 = vpack.i.bf16 %v11469_v46, %v11288_v11  ;;  %v4020_v19 = vsel %vm3824_vm2, %v16011_v6, %v4019_v4  ;;  %v2322_v40 = vpop.f32.mrb[111].mxu1  ;;  %v1421_v6 = vadd.f32 %v11453_v14, %v11083_v20 }
 0x262   :  { %v6983_v10 = vpack.i.bf16 %v3699_v12, %v3697_v51  ;;  %v11489_v63 = vpop.permute.xlu0 %6679  ;;  %v11499_v12 = vmax.f32 %v1913_v41, 0.0  ;;  %v15598_v41 = vmax.f32 %v11507_v49, 0.0  ;;  %v4173_v20 = vrot.slane %v11288_v11, 3 }
 0x263   :  { %16010 = vst [vmem:[#allocation84_spill] sm:$0xff] %v11489_v63  ;;  %6939 = vrot.lane.b32.xlu1 %v6938_v60, %s7720_s9 }
 0x264   :  { %6984 = vrot.lane.b32.xlu0 %v6983_v10, %s7722_s1  ;;  %v11509_v51 = vpop.permute.xlu1 %6699  ;;  %v6998_v10 = vpack.i.bf16 %v4022_v22, %v4020_v19  ;;  %v11516_v28 = vpop.f32.mrb[112].mxu1  ;;  %v4211_v50 = vrot.slane %v15598_v41, 3  ;;  %v1416_v19 = vadd.f32 %v11453_v14, %v11057_v58  ;;  %v11545_v58 = vmax.f32 %v1421_v6, 0.0 }
 0x265   :  { %16014 = vst [vmem:[#allocation87_spill] sm:$0xff] %v11509_v51  ;;  %16016 = vst [vmem:[#allocation89_spill] sm:$0xff] %v11516_v28  ;;  %v2327_v4 = vpop.f32.mrb[113].mxu1  ;;  %v3695_v28 = vsel %vm3564_vm3, %v3692_v39, %v3694_v42  ;;  %v16022_v63 = vrot.slane %v11499_v12, 1  ;;  %v1426_v6 = vadd.f32 %v11453_v14, %v11107_v16 }
 0x266   :  { %v11512_v34 = vpop.permute.xlu0 %6689  ;;  %v3271_v4 = vrot.slane %v11434_v44, 1  ;;  %v11537_v40 = vsel %vm3564_vm3, %v15604_v25, %v4211_v50 }
 0x267   :  { %16015 = vst [vmem:[#allocation88_spill] sm:$0xff] %v11512_v34  ;;  %16019 = vst [vmem:[#allocation92_spill] sm:$0xff] %v11537_v40  ;;  %v3276_v50 = vsel %vm2659_vm1, %v3273_v2, %v16022_v63 }
 0x268   :  { %6999 = vrot.lane.b32.xlu0 %v6998_v10, %s7723_s28  ;;  %v11526_v60 = vpop.permute.xlu1 %6704  ;;  %v16020_v10 = vrot.slane %v11216_v23, 3  ;;  %v11542_v34 = vpop.f32.mrb[114].mxu1  ;;  %v3274_v51 = vsel %vm2659_vm1, %v3271_v4, %v3273_v2  ;;  %v11554_v23 = vmax.f32 %v1416_v19, 0.0 }
 0x269   :  { %16017 = vst [vmem:[#allocation90_spill] sm:$0xff] %v11526_v60  ;;  %16021 = vst [vmem:[#allocation93_spill] sm:$0xff] %v11542_v34  ;;  %v7008_v40 = vpack.i.bf16 %v3276_v50, %v3274_v51  ;;  %v4496_v60 = vrot.slane %v11288_v11, 4  ;;  %v16027_v51 = vrot.slane %v11469_v46, 3 }
 0x26a   :  { %v11530_v22 = vpop.permute.xlu0 %6694  ;;  %v3693_v41 = vsel %vm3564_vm3, %v16020_v10, %v3692_v39  ;;  %v7013_v16 = vpack.i.bf16 %v11545_v58, %v11554_v23  ;;  %v4023_v50 = vrot.slane %v11554_v23, 4 }
 0x26b   :  { %16018 = vst [vmem:[#allocation91_spill] sm:$0xff] %v11530_v22  ;;  %v2332_v22 = vpop.f32.mrb[115].mxu1  ;;  %v6943_v10 = vpack.i.bf16 %v3695_v28, %v3693_v41  ;;  %v4176_v41 = vsel %vm3564_vm3, %v4173_v20, %v16027_v51  ;;  %v16032_v51 = vrot.slane %v11469_v46, 4 }
 0x26c   :  { %v11552_v25 = vpop.permute.xlu1 %6709  ;;  %v16025_v22 = vrot.slane %v11191_v62, 3  ;;  %v11563_v39 = vpop.f32.mrb[116].mxu1  ;;  %7009 = vrot.lane.b32.xlu0 %v7008_v40, %s7724_s13 }
 0x26d   :  { %16023 = vst [vmem:[#allocation94_spill] sm:$0xff] %v11552_v25  ;;  %16026 = vst [vmem:[#allocation96_spill] sm:$0xff] %v11563_v39  ;;  %6944 = vrot.lane.b32.xlu1 %v6943_v10, %s7722_s1  ;;  %v2337_v28 = vpop.f32.mrb[117].mxu1  ;;  %v11580_v10 = vmax.f32 %v1426_v6, 0.0  ;;  %v3566_v6 = vrot.slane %v9954_v30, 3 }
 0x26e   :  { %v11556_v34 = vpop.permute.xlu0 %6719  ;;  %v4174_v42 = vsel %vm3564_vm3, %v16025_v22, %v4173_v20  ;;  %v16031_v20 = vrot.slane %v11191_v62, 4  ;;  %v16033_v22 = vld [vmem:[#allocation9_spill] sm:$0xff]  ;;  %v1928_v62 = vadd.f32 %v11453_v14, %v11221_v31 }
 0x26f   :  { %16024 = vst [vmem:[#allocation95_spill] sm:$0xff] %v11556_v34  ;;  %v6948_v2 = vpack.i.bf16 %v4176_v41, %v4174_v42  ;;  %v4499_v41 = vsel %vm3824_vm2, %v4496_v60, %v16032_v51  ;;  %v3568_v34 = vrot.slane %v10016_v36, 3  ;;  %v16096_v36 = vrot.slane %v10181_v37, 3 }
 0x270   :  { %v11574_v19 = vpop.permute.xlu1 %6714  ;;  %v11582_v40 = vpop.f32.mrb[118].mxu1  ;;  %7014 = vrot.lane.b32.xlu0 %v7013_v16, %s7722_s1  ;;  %v4497_v42 = vsel %vm3824_vm2, %v16031_v20, %v4496_v60  ;;  %v16035_v20 = vrot.slane %v11432_v47, 4  ;;  %v16036_v60 = vrot.slane %v11545_v58, 4 }
 0x271   :  { %16028 = vst [vmem:[#allocation97_spill] sm:$0xff] %v11574_v19  ;;  %16030 = vst [vmem:[#allocation99_spill] sm:$0xff] %v11582_v40  ;;  %6949 = vrot.lane.b32.xlu1 %v6948_v2, %s7720_s9  ;;  %v2342_v28 = vpop.f32.mrb[119].mxu1  ;;  %v3565_v19 = vrot.slane %v16033_v22, 3  ;;  %v2863_v40 = vrot.slane %v11545_v58, 1  ;;  %v6953_v16 = vpack.i.bf16 %v4499_v41, %v4497_v42  ;;  %v3570_v42 = vrot.slane %v10060_v56, 3 }
 0x272   :  { %v11578_v63 = vpop.permute.xlu0 %6724  ;;  %v4024_v39 = vsel %vm3824_vm2, %v16035_v20, %v4023_v50  ;;  %v4026_v51 = vsel %vm3824_vm2, %v4023_v50, %v16036_v60  ;;  %v1923_v20 = vadd.f32 %v11453_v14, %v11199_v9  ;;  %v3572_v60 = vrot.slane %v10077_v7, 3 }
 0x273   :  { %16029 = vst [vmem:[#allocation98_spill] sm:$0xff] %v11578_v63  ;;  %v3269_v63 = vrot.slane %v11469_v46, 1  ;;  %v7038_v49 = vpack.i.bf16 %v4026_v51, %v4024_v39  ;;  %v11621_v25 = vsel %vm3564_vm3, %v3565_v19, %v3566_v6  ;;  %v3574_v9 = vrot.slane %v10062_v24, 3 }
 0x274   :  { %v11596_v2 = vpop.permute.xlu1 %6729  ;;  %v11612_v31 = vpop.f32.mrb[120].mxu1  ;;  %16039 = vst [vmem:[#allocation102_spill] sm:$0xff] %v11621_v25  ;;  %v4177_v24 = vrot.slane %v11434_v44, 3  ;;  %v4027_v7 = vrot.slane %v11580_v10, 4  ;;  %v16069_v25 = vrot.slane %v11469_v46, 4 }
 0x275   :  { %16034 = vst [vmem:[#allocation9_spill] sm:$0xff] %v11596_v2  ;;  %v1431_v2 = vadd.f32 %v11453_v14, %v11141_v57  ;;  %16038 = vst [vmem:[#allocation101_spill] sm:$0xff] %v11612_v31  ;;  %6954 = vrot.lane.b32.xlu1 %v6953_v16, %s7724_s13  ;;  %v2347_v50 = vpop.f32.mrb[121].mxu1  ;;  %7039 = vrot.lane.b32.xlu0 %v7038_v49, %s7723_s28  ;;  %v16040_v57 = vrot.slane %v11288_v11, 1  ;;  %v3272_v51 = vsel %vm2659_vm1, %v3269_v63, %v3271_v4 }
 0x276   :  { %v11606_v28 = vpop.permute.xlu0 %6739  ;;  %v11631_v31 = vmax.f32 %v1928_v62, 0.0  ;;  %v16042_v50 = vrot.slane %v11554_v23, 1  ;;  %v16045_v4 = vrot.slane %v11580_v10, 1 }
 0x277   :  { %16037 = vst [vmem:[#allocation100_spill] sm:$0xff] %v11606_v28  ;;  %v3270_v39 = vsel %vm2659_vm1, %v16040_v57, %v3269_v63  ;;  %v11639_v11 = vmax.f32 %v1431_v2, 0.0  ;;  %v11642_v57 = vsel %vm3564_vm3, %v3566_v6, %v3568_v34  ;;  %v3704_v6 = vrot.slane %v11580_v10, 3 }
 0x278   :  { %v11628_v41 = vpop.permute.xlu1 %6734  ;;  %v6968_v16 = vpack.i.bf16 %v3272_v51, %v3270_v39  ;;  %v2864_v19 = vsel %vm2659_vm1, %v16042_v50, %v2863_v40  ;;  %16044 = vst [vmem:[#allocation105_spill] sm:$0xff] %v11642_v57  ;;  %v2866_v63 = vsel %vm2659_vm1, %v2863_v40, %v16045_v4  ;;  %v11647_v62 = vpop.f32.mrb[122].mxu1  ;;  %v11650_v51 = vmax.f32 %v1923_v20, 0.0  ;;  %v16050_v20 = vld [vmem:[#allocation20_spill] sm:$0xff] }
 0x279   :  { %16041 = vst [vmem:[#allocation103_spill] sm:$0xff] %v11628_v41  ;;  %16046 = vst [vmem:[#allocation106_spill] sm:$0xff] %v11647_v62  ;;  %v11653_v50 = vsel %vm3564_vm3, %v3568_v34, %v3570_v42  ;;  %v7043_v2 = vpack.i.bf16 %v2866_v63, %v2864_v19  ;;  %v2352_v49 = vpop.f32.mrb[123].mxu1  ;;  %v11660_v40 = vsel %vm3564_vm3, %v3570_v42, %v3572_v60  ;;  %v16053_v63 = vld [vmem:[#allocation10_spill] sm:$0xff]  ;;  %v16054_v39 = vrot.slane %v10168_v5, 3  ;;  %v16057_v62 = vld [vmem:[#allocation15_spill] sm:$0xff] }
 0x27a   :  { %v11636_v28 = vpop.permute.xlu0 %6744  ;;  %16047 = vst [vmem:[#allocation107_spill] sm:$0xff] %v11653_v50  ;;  %6969 = vrot.lane.b32.xlu1 %v6968_v16, %s7724_s13  ;;  %16048 = vst [vmem:[#allocation108_spill] sm:$0xff] %v11660_v40  ;;  %v6973_v34 = vpack.i.bf16 %v11432_v47, %v11362_v0  ;;  %v7058_v16 = vpack.i.bf16 %v11631_v31, %v11650_v51  ;;  %v11671_v19 = vsel %vm3564_vm3, %v3572_v60, %v3574_v9 }
 0x27b   :  { %16043 = vst [vmem:[#allocation104_spill] sm:$0xff] %v11636_v28  ;;  %7044 = vrot.lane.b32.xlu0 %v7043_v2, %s7723_s28  ;;  %16051 = vst [vmem:[#allocation110_spill] sm:$0xff] %v11671_v19  ;;  %v11681_v2 = vsel %vm3564_vm3, %v3574_v9, %v16054_v39  ;;  %v1933_v42 = vadd.f32 %v11453_v14, %v11240_v55  ;;  %v4500_v41 = vrot.slane %v11434_v44, 4  ;;  %v16058_v9 = vrot.slane %v11469_v46, 3  ;;  %v16061_v19 = vld [vmem:[#allocation2_spill] sm:$0xff] }
 0x27c   :  { %v11662_v4 = vpop.permute.xlu1 %6749  ;;  %16055 = vst [vmem:[#allocation112_spill] sm:$0xff] %v11681_v2  ;;  %v16059_v28 = vrot.slane %v11419_v21, 3  ;;  %v16064_v50 = vrot.slane %v11545_v58, 3  ;;  %v1918_v46 = vadd.f32 %v11453_v14, %v11172_v15  ;;  %v1436_v40 = vadd.f32 %v11453_v14, %v11170_v27  ;;  %v16085_v27 = vld [vmem:[#allocation33_spill] sm:$0xff] }
 0x27d   :  { %16049 = vst [vmem:[#allocation109_spill] sm:$0xff] %v11662_v4  ;;  %v11683_v4 = vpop.f32.mrb[124].mxu1  ;;  %v4178_v39 = vsel %vm3564_vm3, %v16058_v9, %v4177_v24 }
 0x27e   :  { %v11673_v49 = vpop.permute.xlu0 %6759  ;;  %16056 = vst [vmem:[#allocation113_spill] sm:$0xff] %v11683_v4  ;;  %6974 = vrot.lane.b32.xlu1 %v6973_v34, %s7722_s1  ;;  %v4180_v60 = vsel %vm3564_vm3, %v4177_v24, %v16059_v28  ;;  %v16062_v34 = vld [vmem:[#allocation18_spill] sm:$0xff]  ;;  %v3705_v24 = vsel %vm3564_vm3, %v16064_v50, %v3704_v6  ;;  %v16065_v28 = vrot.slane %v11639_v11, 3  ;;  %v16076_v50 = vrot.slane %v11639_v11, 4 }
 0x27f   :  { %16052 = vst [vmem:[#allocation111_spill] sm:$0xff] %v11673_v49  ;;  %v2357_v49 = vpop.f32.mrb[125].mxu1  ;;  %7059 = vrot.lane.b32.xlu0 %v7058_v16, %s7720_s9  ;;  %v6988_v44 = vpack.i.bf16 %v4180_v60, %v4178_v39  ;;  %v11719_v39 = vmax.f32 %v1933_v42, 0.0  ;;  %v16072_v42 = vld [vmem:[#allocation21_spill] sm:$0xff]  ;;  %v16080_v16 = vld [vmem:[#allocation35_spill] sm:$0xff]  ;;  %v11796_v29 = vmax.f32 %v1436_v40, 0.0 }
 0x280   :  { %v11699_v4 = vpop.permute.xlu1 %6754  ;;  %v3707_v2 = vsel %vm3564_vm3, %v3704_v6, %v16065_v28  ;;  %v11715_v55 = vpop.f32.mrb[126].mxu1  ;;  %v4501_v6 = vsel %vm3824_vm2, %v16069_v25, %v4500_v41  ;;  %v16070_v28 = vrot.slane %v11419_v21, 4  ;;  %v1441_v25 = vadd.f32 %v11453_v14, %v11197_v26 }
 0x281   :  { %16060 = vst [vmem:[#allocation114_spill] sm:$0xff] %v11699_v4  ;;  %16066 = vst [vmem:[#allocation116_spill] sm:$0xff] %v11715_v55  ;;  %v2362_v9 = vpop.f32.mrb[127].mxu1  ;;  %v16100_v40 = vrot.slane %v10172_v1, 3 }
 0x282   :  { %v11705_v56 = vpop.permute.xlu0 %6769  ;;  %6989 = vrot.lane.b32.xlu1 %v6988_v44, %s7720_s9  ;;  %v4503_v49 = vsel %vm3824_vm2, %v4500_v41, %v16070_v28  ;;  %v16075_v41 = vrot.slane %v11545_v58, 4  ;;  %v4030_v44 = vsel %vm3824_vm2, %v4027_v7, %v16076_v50 }
 0x283   :  { %16063 = vst [vmem:[#allocation115_spill] sm:$0xff] %v11705_v56  ;;  %v7063_v56 = vpack.i.bf16 %v3707_v2, %v3705_v24  ;;  %v2859_v2 = vrot.slane %v11432_v47, 1  ;;  %v6993_v9 = vpack.i.bf16 %v4503_v49, %v4501_v6  ;;  %v3281_v6 = vrot.slane %v11631_v31, 1 }
 0x284   :  { %v11730_v55 = vpop.permute.xlu1 %6764  ;;  %v4028_v28 = vsel %vm3824_vm2, %v16075_v41, %v4027_v7  ;;  %v11748_v60 = vpop.f32.mrb[128].mxu1  ;;  %v1446_v7 = vadd.f32 %v11453_v14, %v11219_v8  ;;  %v11772_v41 = vmax.f32 %v1918_v46, 0.0  ;;  %v11774_v8 = vmax.f32 %v1441_v25, 0.0 }
 0x285   :  { %16071 = vst [vmem:[#allocation117_spill] sm:$0xff] %v11730_v55  ;;  %7064 = vrot.lane.b32.xlu0 %v7063_v56, %s7722_s1  ;;  %16077 = vst [vmem:[#allocation119_spill] sm:$0xff] %v11748_v60  ;;  %v16078_v56 = vld [vmem:[#allocation14_spill] sm:$0xff]  ;;  %v7078_v15 = vpack.i.bf16 %v4030_v44, %v4028_v28  ;;  %v2367_v26 = vpop.f32.mrb[129].mxu1  ;;  %v16083_v44 = vrot.slane %v11362_v0, 1  ;;  %v16087_v60 = vrot.slane %v16053_v63, 3 }
 0x286   :  { %v11736_v24 = vpop.permute.xlu0 %6774  ;;  %v3590_v49 = vrot.slane %v16078_v56, 3  ;;  %6994 = vrot.lane.b32.xlu1 %v6993_v9, %s7724_s13  ;;  %v16082_v56 = vld [vmem:[#allocation17_spill] sm:$0xff]  ;;  %v16088_v9 = vrot.slane %v10168_v5, 3  ;;  %v16090_v0 = vld [vmem:[#allocation26_spill] sm:$0xff]  ;;  %v16092_v46 = vrot.slane %v11650_v51, 1  ;;  %v16093_v55 = vrot.slane %v11719_v39, 1 }
 0x287   :  { %16074 = vst [vmem:[#allocation118_spill] sm:$0xff] %v11736_v24  ;;  %v16079_v24 = vld [vmem:[#allocation12_spill] sm:$0xff]  ;;  %v3878_v4 = vrot.slane %v16082_v56, 4  ;;  %v2860_v28 = vsel %vm2659_vm1, %v16083_v44, %v2859_v2  ;;  %v16091_v44 = vrot.slane %v11554_v23, 1  ;;  %v3700_v5 = vrot.slane %v11554_v23, 3 }
 0x288   :  { %v11760_v50 = vpop.permute.xlu1 %6779  ;;  %v3282_v25 = vsel %vm2659_vm1, %v16092_v46, %v3281_v6  ;;  %v16097_v46 = vrot.slane %v16053_v63, 3  ;;  %v2871_v23 = vrot.slane %v11774_v8, 1 }
 0x289   :  { %16081 = vst [vmem:[#allocation120_spill] sm:$0xff] %v11760_v50  ;;  %7079 = vrot.lane.b32.xlu0 %v7078_v15, %s7723_s28  ;;  %v11776_v50 = vpop.f32.mrb[130].mxu1  ;;  %v11783_v15 = vsel %vm3564_vm3, %v16088_v9, %v16087_v60  ;;  %v11798_v60 = vmax.f32 %v1446_v7, 0.0  ;;  %v16103_v7 = vld [vmem:[#allocation25_spill] sm:$0xff] }
 0x28a   :  { %v11769_v26 = vpop.permute.xlu0 %6799  ;;  %16086 = vst [vmem:[#allocation122_spill] sm:$0xff] %v11776_v50  ;;  %16089 = vst [vmem:[#allocation123_spill] sm:$0xff] %v11783_v15  ;;  %v3284_v50 = vsel %vm2659_vm1, %v3281_v6, %v16093_v55  ;;  %v2372_v57 = vpop.f32.mrb[131].mxu1  ;;  %v16095_v15 = vld [vmem:[#allocation29_spill] sm:$0xff]  ;;  %v11808_v59 = vsel %vm3564_vm3, %v16097_v46, %v16096_v36  ;;  %v16101_v55 = vmov %v16096_v36  ;;  %v7093_v36 = vpack.i.bf16 %v11774_v8, %v11796_v29  ;;  %v16104_v46 = vld [vmem:[#allocation34_spill] sm:$0xff] }
 0x28b   :  { %16084 = vst [vmem:[#allocation121_spill] sm:$0xff] %v11769_v26  ;;  %v2862_v26 = vsel %vm2659_vm1, %v2859_v2, %v16091_v44  ;;  %v7088_v44 = vpack.i.bf16 %v3284_v50, %v3282_v25  ;;  %16098 = vst [vmem:[#allocation125_spill] sm:$0xff] %v11808_v59  ;;  %v11817_v6 = vsel %vm3564_vm3, %v16101_v55, %v16100_v40  ;;  %v16105_v55 = vrot.slane %v10305_v53, 3  ;;  %v16184_v59 = vld [vmem:[#allocation55_spill] sm:$0xff] }
 0x28c   :  { %v7003_v9 = vpack.i.bf16 %v2862_v26, %v2860_v28  ;;  %v11800_v56 = vpop.permute.xlu1 %6784  ;;  %16102 = vst [vmem:[#allocation127_spill] sm:$0xff] %v11817_v6  ;;  %v7018_v26 = vpack.i.bf16 %v11772_v41, %v11499_v12  ;;  %v11826_v25 = vpop.f32.mrb[132].mxu1  ;;  %v16106_v28 = vrot.slane %v10172_v1, 3  ;;  %v16108_v50 = vrot.slane %v10291_v33, 3 }
 0x28d   :  { %16094 = vst [vmem:[#allocation124_spill] sm:$0xff] %v11800_v56  ;;  %7089 = vrot.lane.b32.xlu0 %v7088_v44, %s7724_s13  ;;  %v2377_v40 = vpop.f32.mrb[133].mxu1  ;;  %v16109_v6 = vmov %v16105_v55  ;;  %v16112_v1 = vrot.slane %v16072_v42, 3  ;;  %v1948_v53 = vadd.f32 %v11453_v14, %v11293_v35  ;;  %v16118_v44 = vrot.slane %v16080_v16, 3 }
 0x28e   :  { %v11810_v57 = vpop.permute.xlu0 %6804  ;;  %7004 = vrot.lane.b32.xlu1 %v7003_v9, %s7723_s28  ;;  %v11836_v9 = vsel %vm3564_vm3, %v16106_v28, %v16105_v55  ;;  %v16113_v28 = vmov %v16108_v50  ;;  %v16120_v33 = vrot.slane %v10012_v54, 3  ;;  %v4181_v35 = vrot.slane %v11499_v12, 3 }
 0x28f   :  { %16099 = vst [vmem:[#allocation126_spill] sm:$0xff] %v11810_v57  ;;  %16107 = vst [vmem:[#allocation128_spill] sm:$0xff] %v11836_v9  ;;  %v11843_v57 = vsel %vm3564_vm3, %v16109_v6, %v16108_v50  ;;  %v11855_v55 = vsel %vm3564_vm3, %v16113_v28, %v16112_v1  ;;  %v16116_v50 = vmov %v16112_v1  ;;  %v16121_v1 = vrot.slane %v10018_v61, 3 }
 0x290   :  { %16110 = vst [vmem:[#allocation129_spill] sm:$0xff] %v11843_v57  ;;  %v11848_v40 = vpop.permute.xlu1 %6789  ;;  %16114 = vst [vmem:[#allocation131_spill] sm:$0xff] %v11855_v55  ;;  %v11864_v2 = vsel %vm3564_vm3, %v16116_v50, %v3590_v49  ;;  %v11869_v57 = vsel %vm3564_vm3, %v3590_v49, %v16118_v44  ;;  %v1943_v50 = vadd.f32 %v11453_v14, %v11274_v32  ;;  %v16123_v49 = vrot.slane %v16061_v19, 3 }
 0x291   :  { %16111 = vst [vmem:[#allocation130_spill] sm:$0xff] %v11848_v40  ;;  %16117 = vst [vmem:[#allocation133_spill] sm:$0xff] %v11864_v2  ;;  %v11876_v28 = vsel %vm3564_vm3, %v16121_v1, %v16120_v33  ;;  %v11883_v2 = vpop.f32.mrb[134].mxu1  ;;  %v16124_v44 = vrot.slane %v16057_v62, 3  ;;  %7094 = vrot.lane.b32.xlu0 %v7093_v36, %s7722_s1  ;;  %v16126_v1 = vrot.slane %v11432_v47, 3  ;;  %v16128_v42 = vrot.slane %v16090_v0, 4 }
 0x292   :  { %v11859_v6 = vpop.permute.xlu0 %6819  ;;  %16119 = vst [vmem:[#allocation134_spill] sm:$0xff] %v11869_v57  ;;  %16122 = vst [vmem:[#allocation135_spill] sm:$0xff] %v11876_v28  ;;  %7019 = vrot.lane.b32.xlu1 %v7018_v26, %s7720_s9  ;;  %v2382_v32 = vpop.f32.mrb[135].mxu1  ;;  %v16127_v26 = vrot.slane %v16079_v24, 4  ;;  %v16129_v36 = vrot.slane %v11545_v58, 3  ;;  %v1461_v63 = vadd.f32 %v11453_v14, %v16184_v59 }
 0x293   :  { %16115 = vst [vmem:[#allocation132_spill] sm:$0xff] %v11859_v6  ;;  %v11890_v57 = vsel %vm3564_vm3, %v16124_v44, %v16123_v49  ;;  %v3701_v55 = vsel %vm3564_vm3, %v16126_v1, %v3700_v5  ;;  %v11905_v9 = vsel %vm3824_vm2, %v3878_v4, %v16128_v42  ;;  %v1938_v49 = vadd.f32 %v11453_v14, %v11256_v52 }
 0x294   :  { %16125 = vst [vmem:[#allocation136_spill] sm:$0xff] %v11890_v57  ;;  %v11900_v28 = vsel %vm3824_vm2, %v16127_v26, %v3878_v4  ;;  %v3703_v47 = vsel %vm3564_vm3, %v3700_v5, %v16129_v36  ;;  %v16130_v44 = vrot.slane %v11796_v29, 1  ;;  %v16131_v32 = vrot.slane %v11798_v60, 1  ;;  %v11918_v33 = vpop.permute.xlu1 %6794 }
 0x295   :  { %16132 = vst [vmem:[#allocation137_spill] sm:$0xff] %v11918_v33  ;;  %v11920_v57 = vmax.f32 %v1948_v53, 0.0  ;;  %v7023_v4 = vpack.i.bf16 %v3703_v47, %v3701_v55  ;;  %v16134_v52 = vrot.slane %v16062_v34, 3  ;;  %v16135_v5 = vrot.slane %v16061_v19, 3  ;;  %v16229_v19 = vld [vmem:[#allocation77_spill] sm:$0xff] }
 0x296   :  { %v2872_v1 = vsel %vm2659_vm1, %v16130_v44, %v2871_v23  ;;  %v2874_v26 = vsel %vm2659_vm1, %v2871_v23, %v16131_v32  ;;  %v11922_v6 = vpop.permute.xlu0 %6824  ;;  %v11931_v36 = vmax.f32 %v1943_v50, 0.0  ;;  %v16137_v44 = vrot.slane %v11419_v21, 3  ;;  %v11936_v32 = vpop.f32.mrb[136].mxu1 }
 0x297   :  { %v7123_v42 = vpack.i.bf16 %v2874_v26, %v2872_v1  ;;  %16133 = vst [vmem:[#allocation138_spill] sm:$0xff] %v11922_v6  ;;  %v11929_v58 = vsel %vm3564_vm3, %v16135_v5, %v16134_v52  ;;  %v16138_v55 = vrot.slane %v16050_v20, 3  ;;  %v16139_v47 = vrot.slane %v10012_v54, 3  ;;  %7024 = vrot.lane.b32.xlu1 %v7023_v4, %s7722_s1  ;;  %v2387_v5 = vpop.f32.mrb[137].mxu1 }
 0x298   :  { %16136 = vst [vmem:[#allocation139_spill] sm:$0xff] %v11929_v58  ;;  %v4182_v23 = vsel %vm3564_vm3, %v16137_v44, %v4181_v35  ;;  %v4504_v26 = vrot.slane %v11499_v12, 4  ;;  %v16141_v50 = vrot.slane %v11772_v41, 3  ;;  %v16142_v44 = vrot.slane %v10018_v61, 3  ;;  %v11997_v54 = vpop.f32.mrb[138].mxu1 }
 0x299   :  { %v11945_v1 = vsel %vm3564_vm3, %v16139_v47, %v16138_v55  ;;  %7124 = vrot.lane.b32.xlu0 %v7123_v42, %s7723_s28  ;;  %v16143_v53 = vrot.slane %v16095_v15, 3  ;;  %v16145_v55 = vrot.slane %v16085_v27, 3  ;;  %v16146_v47 = vrot.slane %v16080_v16, 3 }
 0x29a   :  { %16140 = vst [vmem:[#allocation140_spill] sm:$0xff] %v11945_v1  ;;  %v4184_v52 = vsel %vm3564_vm3, %v4181_v35, %v16141_v50  ;;  %v11968_v1 = vmax.f32 %v1938_v49, 0.0  ;;  %v11970_v50 = vpop.permute.xlu1 %6809  ;;  %v16149_v5 = vrot.slane %v16057_v62, 3  ;;  %v16150_v61 = vrot.slane %v16050_v20, 3  ;;  %v11984_v49 = vpop.permute.xlu0 %6839  ;;  %v16157_v62 = vld [vmem:[#allocation37_spill] sm:$0xff] }
 0x29b   :  { %v11958_v58 = vsel %vm3564_vm3, %v16143_v53, %v16142_v44  ;;  %v11965_v4 = vsel %vm3564_vm3, %v16146_v47, %v16145_v55  ;;  %v7028_v35 = vpack.i.bf16 %v4184_v52, %v4182_v23  ;;  %16148 = vst [vmem:[#allocation143_spill] sm:$0xff] %v11970_v50  ;;  %v1451_v55 = vadd.f32 %v11453_v14, %v11238_v43 }
 0x29c   :  { %16144 = vst [vmem:[#allocation141_spill] sm:$0xff] %v11958_v58  ;;  %16147 = vst [vmem:[#allocation142_spill] sm:$0xff] %v11965_v4  ;;  %v11977_v53 = vsel %vm3564_vm3, %v16150_v61, %v16149_v5  ;;  %v7138_v47 = vpack.i.bf16 %v11920_v57, %v11931_v36  ;;  %v16153_v23 = vrot.slane %v16095_v15, 3  ;;  %v16154_v52 = vrot.slane %v16085_v27, 3 }
 0x29d   :  { %16151 = vst [vmem:[#allocation144_spill] sm:$0xff] %v11977_v53  ;;  %16152 = vst [vmem:[#allocation145_spill] sm:$0xff] %v11984_v49  ;;  %v4193_v44 = vrot.slane %v11931_v36, 3  ;;  %7029 = vrot.lane.b32.xlu1 %v7028_v35, %s7720_s9  ;;  %v2392_v53 = vpop.f32.mrb[139].mxu1  ;;  %v3277_v43 = vrot.slane %v11772_v41, 1  ;;  %v15649_v16 = vrot.slane %v11968_v1, 3  ;;  %v2306_v34 = vadd.f32 %v11453_v14, %v16229_v19 }
 0x29e   :  { %v11991_v42 = vsel %vm3564_vm3, %v16154_v52, %v16153_v23  ;;  %7139 = vrot.lane.b32.xlu0 %v7138_v47, %s7720_s9  ;;  %v16158_v23 = vrot.slane %v11419_v21, 4  ;;  %v16160_v20 = vrot.slane %v11772_v41, 4  ;;  %v12013_v58 = vpop.permute.xlu1 %6814  ;;  %v12017_v21 = vmax.f32 %v1451_v55, 0.0  ;;  %v12019_v53 = vpop.permute.xlu0 %6849  ;;  %v16164_v47 = vld [vmem:[#allocation39_spill] sm:$0xff] }
 0x29f   :  { %16155 = vst [vmem:[#allocation146_spill] sm:$0xff] %v11991_v42  ;;  %16161 = vst [vmem:[#allocation37_spill] sm:$0xff] %v12013_v58  ;;  %v4516_v5 = vrot.slane %v11931_v36, 4  ;;  %v4194_v27 = vsel %vm3564_vm3, %v15649_v16, %v4193_v44  ;;  %v12029_v35 = vpop.f32.mrb[140].mxu1  ;;  %v4035_v49 = vrot.slane %v11798_v60, 4  ;;  %v15668_v50 = vrot.slane %v11774_v8, 4 }
 0x2a0   :  { %v4505_v52 = vsel %vm3824_vm2, %v16158_v23, %v4504_v26  ;;  %v4507_v4 = vsel %vm3824_vm2, %v4504_v26, %v16160_v20  ;;  %16162 = vst [vmem:[#allocation147_spill] sm:$0xff] %v12019_v53  ;;  %v16163_v20 = vrot.slane %v11920_v57, 3  ;;  %v2397_v61 = vpop.f32.mrb[141].mxu1  ;;  %v16166_v53 = vrot.slane %v11499_v12, 1 }
 0x2a1   :  { %v7033_v23 = vpack.i.bf16 %v4507_v4, %v4505_v52  ;;  %v16169_v52 = vld [vmem:[#allocation41_spill] sm:$0xff]  ;;  %v12057_v4 = vpop.f32.mrb[142].mxu1  ;;  %v16178_v33 = vrot.slane %v12017_v21, 3 }
 0x2a2   :  { %v4196_v26 = vsel %vm3564_vm3, %v4193_v44, %v16163_v20  ;;  %v3278_v44 = vsel %vm2659_vm1, %v16166_v53, %v3277_v43  ;;  %v16167_v20 = vrot.slane %v11650_v51, 1  ;;  %v12043_v58 = vpop.permute.xlu1 %6829  ;;  %v2402_v15 = vpop.f32.mrb[143].mxu1 }
 0x2a3   :  { %7034 = vrot.lane.b32.xlu1 %v7033_v23, %s7724_s13  ;;  %v7143_v42 = vpack.i.bf16 %v4196_v26, %v4194_v27  ;;  %16168 = vst [vmem:[#allocation39_spill] sm:$0xff] %v12043_v58  ;;  %v12049_v26 = vpop.permute.xlu0 %6854  ;;  %v3712_v27 = vrot.slane %v11798_v60, 3  ;;  %v7053_v58 = vpack.i.bf16 %v11639_v11, %v11580_v10 }
 0x2a4   :  { %v3280_v55 = vsel %vm2659_vm1, %v3277_v43, %v16167_v20  ;;  %16170 = vst [vmem:[#allocation43_spill] sm:$0xff] %v12049_v26  ;;  %v16172_v43 = vrot.slane %v11968_v1, 4 }
 0x2a5   :  { %7144 = vrot.lane.b32.xlu0 %v7143_v42, %s7720_s9  ;;  %v7048_v61 = vpack.i.bf16 %v3280_v55, %v3278_v44  ;;  %v1953_v42 = vadd.f32 %v11453_v14, %v11311_v45  ;;  %v16174_v55 = vrot.slane %v11920_v57, 4  ;;  %v3715_v15 = vsel %vm3564_vm3, %v3712_v27, %v16178_v33  ;;  %v16181_v45 = vld [vmem:[#allocation46_spill] sm:$0xff] }
 0x2a6   :  { %v4517_v20 = vsel %vm3824_vm2, %v16172_v43, %v4516_v5  ;;  %v12071_v26 = vpop.permute.xlu1 %6834  ;;  %v12086_v43 = vpop.f32.mrb[144].mxu1  ;;  %v16180_v33 = vrot.slane %v11774_v8, 3 }
 0x2a7   :  { %7049 = vrot.lane.b32.xlu1 %v7048_v61, %s7724_s13  ;;  %v4519_v44 = vsel %vm3824_vm2, %v4516_v5, %v16174_v55  ;;  %16176 = vst [vmem:[#allocation41_spill] sm:$0xff] %v12071_v26  ;;  %v12079_v5 = vpop.permute.xlu0 %6879  ;;  %v12090_v61 = vmax.f32 %v1953_v42, 0.0  ;;  %v2407_v55 = vpop.f32.mrb[145].mxu1  ;;  %v4508_v42 = vrot.slane %v11650_v51, 4 }
 0x2a8   :  { %v7148_v53 = vpack.i.bf16 %v4519_v44, %v4517_v20  ;;  %16179 = vst [vmem:[#allocation148_spill] sm:$0xff] %v12079_v5  ;;  %v4185_v44 = vrot.slane %v11650_v51, 3  ;;  %v3713_v20 = vsel %vm3564_vm3, %v16180_v33, %v3712_v27  ;;  %v16186_v55 = vld [vmem:[#allocation57_spill] sm:$0xff]  ;;  %v3289_v5 = vrot.slane %v11920_v57, 1  ;;  %v12118_v16 = vpop.f32.mrb[146].mxu1 }
 0x2a9   :  { %v7153_v6 = vpack.i.bf16 %v3715_v15, %v3713_v20  ;;  %v1466_v33 = vadd.f32 %v11453_v14, %v16186_v55  ;;  %v16187_v15 = vrot.slane %v11772_v41, 3  ;;  %v16188_v51 = vrot.slane %v11631_v31, 3 }
 0x2aa   :  { %7149 = vrot.lane.b32.xlu0 %v7148_v53, %s7724_s13  ;;  %v12099_v40 = vpop.permute.xlu1 %6844  ;;  %v4036_v55 = vsel %vm3824_vm2, %v15668_v50, %v4035_v49  ;;  %v16192_v50 = vrot.slane %v11772_v41, 4 }
 0x2ab   :  { %7054 = vrot.lane.b32.xlu1 %v7053_v58, %s7722_s1  ;;  %16183 = vst [vmem:[#allocation46_spill] sm:$0xff] %v12099_v40  ;;  %v12106_v27 = vpop.permute.xlu0 %6884  ;;  %v4186_v20 = vsel %vm3564_vm3, %v16187_v15, %v4185_v44  ;;  %v4188_v26 = vsel %vm3564_vm3, %v4185_v44, %v16188_v51  ;;  %v2412_v40 = vpop.f32.mrb[147].mxu1  ;;  %v15671_v44 = vrot.slane %v11931_v36, 1  ;;  %v12145_v15 = vmax.f32 %v1466_v33, 0.0 }
 0x2ac   :  { %16185 = vst [vmem:[#allocation55_spill] sm:$0xff] %v12106_v27  ;;  %v7068_v58 = vpack.i.bf16 %v4188_v26, %v4186_v20  ;;  %v16189_v27 = vrot.slane %v12017_v21, 4  ;;  %v16191_v20 = vld [vmem:[#allocation52_spill] sm:$0xff]  ;;  %v4509_v40 = vsel %vm3824_vm2, %v16192_v50, %v4508_v42  ;;  %v12151_v41 = vpop.f32.mrb[148].mxu1  ;;  %v1471_v50 = vadd.f32 %v11453_v14, %v11309_v18 }
 0x2ad   :  { %v1456_v59 = vadd.f32 %v11453_v14, %v16191_v20  ;;  %16196 = vst [vmem:[#allocation149_spill] sm:$0xff] %v12151_v41 }
 0x2ae   :  { %7154 = vrot.lane.b32.xlu0 %v7153_v6, %s7722_s1  ;;  %v4038_v6 = vsel %vm3824_vm2, %v4035_v49, %v16189_v27  ;;  %v12130_v56 = vpop.permute.xlu1 %6859  ;;  %v16193_v49 = vrot.slane %v11631_v31, 4 }
 0x2af   :  { %v7158_v51 = vpack.i.bf16 %v4038_v6, %v4036_v55  ;;  %16190 = vst [vmem:[#allocation57_spill] sm:$0xff] %v12130_v56  ;;  %7069 = vrot.lane.b32.xlu1 %v7068_v58, %s7720_s9  ;;  %v12142_v37 = vpop.permute.xlu0 %6899  ;;  %v3290_v58 = vsel %vm2659_vm1, %v15671_v44, %v3289_v5  ;;  %v2417_v6 = vpop.f32.mrb[149].mxu1  ;;  %v12168_v55 = vmax.f32 %v1456_v59, 0.0 }
 0x2b0   :  { %v4511_v27 = vsel %vm3824_vm2, %v4508_v42, %v16193_v49  ;;  %16194 = vst [vmem:[#allocation52_spill] sm:$0xff] %v12142_v37  ;;  %v12155_v42 = vmax.f32 %v1461_v63, 0.0  ;;  %v16198_v49 = vrot.slane %v12090_v61, 1  ;;  %v16204_v37 = vrot.slane %v11580_v10, 1  ;;  %v12182_v59 = vpop.f32.mrb[150].mxu1  ;;  %v16222_v6 = vld [vmem:[#allocation62_spill] sm:$0xff] }
 0x2b1   :  { %v7073_v26 = vpack.i.bf16 %v4511_v27, %v4509_v40  ;;  %16205 = vst [vmem:[#allocation152_spill] sm:$0xff] %v12182_v59  ;;  %v16206_v27 = vrot.slane %v11796_v29, 1  ;;  %v2422_v56 = vpop.f32.mrb[151].mxu1  ;;  %v12318_v59 = vmax.f32 %v2306_v34, 0.0  ;;  %v16248_v34 = vrot.slane %v11774_v8, 3 }
 0x2b2   :  { %7159 = vrot.lane.b32.xlu0 %v7158_v51, %s7723_s28  ;;  %v3292_v33 = vsel %vm2659_vm1, %v3289_v5, %v16198_v49  ;;  %v12163_v53 = vpop.permute.xlu1 %6864  ;;  %v1968_v49 = vadd.f32 %v11453_v14, %v11365_v3  ;;  %v7173_v40 = vpack.i.bf16 %v12155_v42, %v12168_v55 }
 0x2b3   :  { %v7168_v44 = vpack.i.bf16 %v3292_v33, %v3290_v58  ;;  %16200 = vst [vmem:[#allocation150_spill] sm:$0xff] %v12163_v53  ;;  %7074 = vrot.lane.b32.xlu1 %v7073_v26, %s7724_s13  ;;  %v12171_v5 = vpop.permute.xlu0 %6904  ;;  %v16203_v33 = vrot.slane %v11639_v11, 1  ;;  %v2879_v26 = vrot.slane %v12155_v42, 1  ;;  %v16210_v53 = vld [vmem:[#allocation64_spill] sm:$0xff]  ;;  %v16215_v58 = vrot.slane %v12168_v55, 1 }
 0x2b4   :  { %16201 = vst [vmem:[#allocation151_spill] sm:$0xff] %v12171_v5  ;;  %v1963_v20 = vadd.f32 %v11453_v14, %v16210_v53  ;;  %v12215_v5 = vpop.f32.mrb[152].mxu1  ;;  %v16241_v53 = vld [vmem:[#allocation80_spill] sm:$0xff] }
 0x2b5   :  { %v2868_v51 = vsel %vm2659_vm1, %v16204_v37, %v16203_v33  ;;  %16213 = vst [vmem:[#allocation64_spill] sm:$0xff] %v12215_v5 }
 0x2b6   :  { %7169 = vrot.lane.b32.xlu0 %v7168_v44, %s7724_s13  ;;  %v16207_v44 = vmov %v16203_v33  ;;  %v12198_v18 = vpop.permute.xlu1 %6869 }
 0x2b7   :  { %v2870_v63 = vsel %vm2659_vm1, %v16207_v44, %v16206_v27  ;;  %16209 = vst [vmem:[#allocation153_spill] sm:$0xff] %v12198_v18  ;;  %v16211_v27 = vld [vmem:[#allocation72_spill] sm:$0xff]  ;;  %v12220_v44 = vmax.f32 %v1968_v49, 0.0  ;;  %v2427_v18 = vpop.f32.mrb[153].mxu1  ;;  %v12232_v49 = vmax.f32 %v1963_v20, 0.0  ;;  %v16225_v20 = vrot.slane %v11968_v1, 3 }
 0x2b8   :  { %v7083_v33 = vpack.i.bf16 %v2870_v63, %v2868_v51  ;;  %v1973_v56 = vadd.f32 %v11453_v14, %v16211_v27  ;;  %v7098_v51 = vpack.i.bf16 %v11968_v1, %v11719_v39  ;;  %v16212_v63 = vrot.slane %v12145_v15, 1 }
 0x2b9   :  { %v12218_v27 = vmax.f32 %v1471_v50, 0.0 }
 0x2ba   :  { %7084 = vrot.lane.b32.xlu1 %v7083_v33, %s7723_s28  ;;  %7174 = vrot.lane.b32.xlu0 %v7173_v40, %s7722_s1  ;;  %v2882_v37 = vsel %vm2659_vm1, %v2879_v26, %v16212_v63  ;;  %v2880_v33 = vsel %vm2659_vm1, %v16215_v58, %v2879_v26  ;;  %v12225_v40 = vpop.permute.xlu0 %6919  ;;  %v12234_v12 = vmax.f32 %v1973_v56, 0.0  ;;  %v16221_v56 = vld [vmem:[#allocation61_spill] sm:$0xff]  ;;  %v3297_v63 = vrot.slane %v12220_v44, 1 }
 0x2bb   :  { %16216 = vst [vmem:[#allocation72_spill] sm:$0xff] %v12225_v40  ;;  %v7188_v24 = vpack.i.bf16 %v2882_v37, %v2880_v33  ;;  %v12242_v37 = vpop.permute.xlu1 %6874  ;;  %v12244_v33 = vpop.f32.mrb[154].mxu1  ;;  %v6642_v3 = vunpack.i.h.bf16 %v16221_v56  ;;  %v6641_v50 = vunpack.i.l.bf16 %v16221_v56  ;;  %v16224_v58 = vrot.slane %v11631_v31, 3 }
 0x2bc   :  { %16219 = vst [vmem:[#allocation154_spill] sm:$0xff] %v12242_v37  ;;  %16220 = vst [vmem:[#allocation155_spill] sm:$0xff] %v12244_v33  ;;  %v2432_v26 = vpop.f32.mrb[155].mxu1  ;;  %v16250_v33 = vld [vmem:[#allocation75_spill] sm:$0xff] }
 0x2bd   :  { %v4795_v40 = vsel %vm4793_vm4, %v16033_v22, %v6642_v3  ;;  %v16238_v3 = vld [vmem:[#allocation68_spill] sm:$0xff] }
 0x2be   :  { %7099 = vrot.lane.b32.xlu1 %v7098_v51, %s7720_s9  ;;  %7189 = vrot.lane.b32.xlu0 %v7188_v24, %s7723_s28  ;;  %v1958_v51 = vadd.f32 %v11453_v14, %v16222_v6  ;;  %v16223_v24 = vrot.slane %v11719_v39, 3  ;;  %v7203_v6 = vpack.i.bf16 %v12220_v44, %v12232_v49  ;;  %v12267_v23 = vpop.permute.xlu0 %6929 }
 0x2bf   :  { %16227 = vst [vmem:[#allocation61_spill] sm:$0xff] %v12267_v23 }
 0x2c0   :  { %v4190_v37 = vsel %vm3564_vm3, %v16224_v58, %v16223_v24  ;;  %v16226_v18 = vmov %v16223_v24  ;;  %v16228_v58 = vld [vmem:[#allocation73_spill] sm:$0xff] }
 0x2c1   :  { %v4192_v56 = vsel %vm3564_vm3, %v16226_v18, %v16225_v20  ;;  %v2301_v24 = vadd.f32 %v11453_v14, %v16228_v58  ;;  %v16230_v18 = vrot.slane %v11719_v39, 4  ;;  %v16231_v20 = vrot.slane %v11631_v31, 4 }
 0x2c2   :  { %v7103_v10 = vpack.i.bf16 %v4192_v56, %v4190_v37  ;;  %v12279_v37 = vpop.f32.mrb[156].mxu1  ;;  %7204 = vrot.lane.b32.xlu0 %v7203_v6, %s7720_s9  ;;  %v16233_v58 = vrot.slane %v11968_v1, 4  ;;  %v16235_v31 = vrot.slane %v12232_v49, 1  ;;  %v16236_v56 = vld [vmem:[#allocation7_spill] sm:$0xff] }
 0x2c3   :  { %v4513_v26 = vsel %vm3824_vm2, %v16231_v20, %v16230_v18  ;;  %16232 = vst [vmem:[#allocation62_spill] sm:$0xff] %v12279_v37  ;;  %v16234_v14 = vmov %v16230_v18  ;;  %v2437_v20 = vpop.f32.mrb[157].mxu1  ;;  %v16237_v23 = vmax.f32 %v16236_v56, 0.0  ;;  %v12307_v37 = vmax.f32 %v1958_v51, 0.0 }
 0x2c4   :  { %7104 = vrot.lane.b32.xlu1 %v7103_v10, %s7720_s9  ;;  %v4515_v19 = vsel %vm3824_vm2, %v16234_v14, %v16233_v58  ;;  %v3298_v18 = vsel %vm2659_vm1, %v16235_v31, %v3297_v63  ;;  %v12301_v10 = vld [vmem:[%s15451_s2] ss:$0 sm:$0xff]  ;;  %v12305_v14 = vpop.permute.xlu1 %6889  ;;  %v12316_v5 = vmax.f32 %v2301_v24, 0.0  ;;  %v12322_v51 = vpop.f32.mrb[158].mxu1  ;;  %v16251_v20 = vunpack.i.l.bf16 %v11048_v17  ;;  %v16252_v31 = vld [vmem:[#allocation65_spill] sm:$0xff] }
 0x2c5   :  { %v4794_v22 = vsel %vm4793_vm4, %v16237_v23, %v6641_v50  ;;  %v2296_v6 = vadd.f32 %v12301_v10, %v16238_v3  ;;  %v7108_v58 = vpack.i.bf16 %v4515_v19, %v4513_v26  ;;  %16239 = vst [vmem:[#allocation73_spill] sm:$0xff] %v12305_v14  ;;  %v2311_v56 = vadd.f32 %v12301_v10, %v16241_v53  ;;  %v12320_v19 = vpop.permute.xlu0 %6934 }
 0x2c6   :  { %v16242_v23 = vrot.slane %v12234_v12, 1  ;;  %16243 = vst [vmem:[#allocation77_spill] sm:$0xff] %v12320_v19  ;;  %16244 = vst [vmem:[#allocation7_spill] sm:$0xff] %v12322_v51  ;;  %v16246_v53 = vrot.slane %v11796_v29, 3  ;;  %v6661_v19 = vunpack.i.l.bf16 %v16250_v33  ;;  %v4827_v14 = vsel %vm4826_vm5, %v4794_v22, %v16251_v20 }
 0x2c7   :  { %v12345_v41 = vmax.f32 %v2311_v56, 0.0  ;;  %v16258_v56 = vld [vmem:[#allocation76_spill] sm:$0xff] }
 0x2c8   :  { %v3300_v50 = vsel %vm2659_vm1, %v3297_v63, %v16242_v23  ;;  %7109 = vrot.lane.b32.xlu1 %v7108_v58, %s7724_s13  ;;  %v16247_v63 = vrot.slane %v11639_v11, 3  ;;  %v2464_v58 = vmax.f32 %v2296_v6, 0.0 }
 0x2c9   :  { %v7213_v26 = vpack.i.bf16 %v3300_v50, %v3298_v18  ;;  %v16249_v18 = vmov %v16246_v53  ;;  %v2442_v50 = vpop.f32.mrb[159].mxu1 }
 0x2ca   :  { %v3709_v24 = vsel %vm3564_vm3, %v16247_v63, %v16246_v53  ;;  %v3711_v23 = vsel %vm3564_vm3, %v16249_v18, %v16248_v34  ;;  %v6662_v63 = vunpack.i.h.bf16 %v16250_v33  ;;  %v12347_v34 = vpop.permute.xlu1 %6894  ;;  %v3403_v50 = vrot.slane %v12316_v5, 1  ;;  %v12353_v20 = vpop.f32.mrb[160].mxu1 }
 0x2cb   :  { %7214 = vrot.lane.b32.xlu0 %v7213_v26, %s7724_s13  ;;  %v7113_v3 = vpack.i.bf16 %v3711_v23, %v3709_v24  ;;  %16253 = vst [vmem:[#allocation68_spill] sm:$0xff] %v12347_v34  ;;  %v7228_v6 = vpack.i.bf16 %v12316_v5, %v2464_v58  ;;  %16254 = vst [vmem:[#allocation80_spill] sm:$0xff] %v12353_v20  ;;  %v2447_v51 = vpop.f32.mrb[161].mxu1  ;;  %v16256_v18 = vunpack.i.h.bf16 %v11048_v17  ;;  %v3402_v20 = vrot.slane %v2464_v58, 1  ;;  %v12368_v26 = vpop.permute.xlu0 %6959 }
 0x2cc   :  { %v12365_v34 = vsel %vm4859_vm6, %v4827_v14, %v6661_v19  ;;  %16257 = vst [vmem:[#allocation75_spill] sm:$0xff] %v12368_v26  ;;  %v1978_v51 = vadd.f32 %v12301_v10, %v16258_v56  ;;  %v16261_v14 = vrot.slane %v11639_v11, 4  ;;  %v16262_v58 = vrot.slane %v11774_v8, 4  ;;  %v12391_v24 = vpop.f32.mrb[162].mxu1 }
 0x2cd   :  { %7114 = vrot.lane.b32.xlu1 %v7113_v3, %s7722_s1  ;;  %v4828_v22 = vsel %vm4826_vm5, %v4795_v40, %v16256_v18  ;;  %v4311_v3 = vrot.slane %v12318_v59, 3  ;;  %v16260_v40 = vrot.slane %v11796_v29, 4  ;;  %v2452_v8 = vpop.f32.mrb[163].mxu1  ;;  %v16268_v26 = vrot.slane %v11968_v1, 1 }
 0x2ce   :  { %v4861_v33 = vsel %vm4859_vm6, %v4828_v22, %v6662_v63  ;;  %v12375_v53 = vpop.permute.xlu1 %6909  ;;  %v3404_v22 = vsel %vm2659_vm1, %v3402_v20, %v3403_v50  ;;  %v4310_v20 = vrot.slane %v12316_v5, 3  ;;  %v16270_v8 = vrot.slane %v11931_v36, 1 }
 0x2cf   :  { %7229 = vrot.lane.b32.xlu0 %v7228_v6, %s7725_s21  ;;  %16259 = vst [vmem:[#allocation65_spill] sm:$0xff] %v12375_v53  ;;  %v4032_v19 = vsel %vm3824_vm2, %v16261_v14, %v16260_v40  ;;  %v16263_v18 = vmov %v16260_v40  ;;  %v16264_v6 = vrot.slane %v12318_v59, 1  ;;  %v12399_v23 = vpop.permute.xlu0 %6964  ;;  %v16271_v40 = vmov %v16268_v26 }
 0x2d0   :  { %v4034_v63 = vsel %vm3824_vm2, %v16263_v18, %v16262_v58  ;;  %16267 = vst [vmem:[#allocation76_spill] sm:$0xff] %v12399_v23  ;;  %v16272_v11 = vrot.slane %v12345_v41, 3  ;;  %v12421_v58 = vpop.f32.mrb[164].mxu1  ;;  %v4632_v1 = vrot.slane %v12316_v5, 4 }
 0x2d1   :  { %v3406_v56 = vsel %vm2659_vm1, %v3403_v50, %v16264_v6  ;;  %v7118_v14 = vpack.i.bf16 %v4034_v63, %v4032_v19  ;;  %v12401_v50 = vmax.f32 %v1978_v51, 0.0  ;;  %v4633_v6 = vrot.slane %v12318_v59, 4 }
 0x2d2   :  { %v7233_v18 = vpack.i.bf16 %v3406_v56, %v3404_v22  ;;  %v16269_v19 = vrot.slane %v11719_v39, 1  ;;  %v3288_v22 = vsel %vm2659_vm1, %v16271_v40, %v16270_v8  ;;  %v4314_v39 = vsel %vm3564_vm3, %v4311_v3, %v16272_v11  ;;  %v2457_v8 = vpop.f32.mrb[165].mxu1  ;;  %v16277_v56 = vld [vmem:[#allocation81_spill] sm:$0xff] }
 0x2d3   :  { %7119 = vrot.lane.b32.xlu1 %v7118_v14, %s7723_s28  ;;  %v4312_v14 = vsel %vm3564_vm3, %v4310_v20, %v4311_v3  ;;  %v12432_v11 = vpop.permute.xlu0 %6979  ;;  %v6666_v5 = vunpack.i.l.bf16 %v16277_v56  ;;  %v16278_v20 = vrot.slane %v12345_v41, 4 }
 0x2d4   :  { %v3286_v63 = vsel %vm2659_vm1, %v16269_v19, %v16268_v26  ;;  %7234 = vrot.lane.b32.xlu0 %v7233_v18, %s7726_s22  ;;  %v7243_v40 = vpack.i.bf16 %v4314_v39, %v4312_v14  ;;  %v12426_v19 = vpop.permute.xlu1 %6914  ;;  %v2316_v14 = vadd.f32 %v12301_v10, %v11476_v48  ;;  %v4634_v39 = vsel %vm3824_vm2, %v4632_v1, %v4633_v6  ;;  %v12448_v18 = vpop.f32.mrb[166].mxu1 }
 0x2d5   :  { %v7128_v51 = vpack.i.bf16 %v3288_v22, %v3286_v63  ;;  %16273 = vst [vmem:[#allocation156_spill] sm:$0xff] %v12426_v19  ;;  %v16275_v22 = vld [vmem:[#allocation79_spill] sm:$0xff]  ;;  %v6667_v26 = vunpack.i.h.bf16 %v16277_v56  ;;  %v4636_v36 = vsel %vm3824_vm2, %v4633_v6, %v16278_v20  ;;  %16279 = vst [vmem:[#allocation81_spill] sm:$0xff] %v12448_v18  ;;  %v7133_v56 = vpack.i.bf16 %v12017_v21, %v11798_v60  ;;  %v2462_v8 = vpop.f32.mrb[167].mxu1  ;;  %v16293_v19 = vld [vmem:[#allocation102_spill] sm:$0xff] }
 0x2d6   :  { %v6672_v29 = vunpack.i.h.bf16 %v16275_v22  ;;  %v6671_v3 = vunpack.i.l.bf16 %v16275_v22  ;;  %16276 = vst [vmem:[#allocation79_spill] sm:$0xff] %v12432_v11  ;;  %v2321_v22 = vadd.f32 %v12301_v10, %v11497_v13  ;;  %v7248_v20 = vpack.i.bf16 %v4636_v36, %v4634_v39 }
 0x2d7   :  { %7129 = vrot.lane.b32.xlu1 %v7128_v51, %s7724_s13  ;;  %v16280_v51 = vld [vmem:[#allocation82_spill] sm:$0xff]  ;;  %v4796_v48 = vsel %vm4793_vm4, %v9954_v30, %v6666_v5  ;;  %v12465_v63 = vmax.f32 %v2316_v14, 0.0  ;;  %v16284_v8 = vrot.slane %v12168_v55, 1  ;;  %v16285_v13 = vrot.slane %v12017_v21, 1 }
 0x2d8   :  { %7244 = vrot.lane.b32.xlu0 %v7243_v40, %s7725_s21  ;;  %v6677_v53 = vunpack.i.h.bf16 %v16280_v51  ;;  %v6676_v1 = vunpack.i.l.bf16 %v16280_v51  ;;  %v12458_v40 = vsel %vm497_vm0, %v12365_v34, %v6671_v3  ;;  %v12461_v6 = vsel %vm497_vm0, %v4861_v33, %v6672_v29  ;;  %v16283_v51 = vld [vmem:[#allocation83_spill] sm:$0xff]  ;;  %v12474_v3 = vpop.permute.xlu1 %6924  ;;  %v12476_v33 = vpop.permute.xlu0 %6984  ;;  %v16288_v29 = vld [vmem:[#allocation13_spill] sm:$0xff] }
 0x2d9   :  { %16281 = vst [vmem:[#allocation82_spill] sm:$0xff] %v12458_v40  ;;  %16282 = vst [vmem:[#allocation157_spill] sm:$0xff] %v12461_v6  ;;  %v6686_v17 = vunpack.i.l.bf16 %v16283_v51  ;;  %v2878_v34 = vsel %vm2659_vm1, %v16285_v13, %v16284_v8  ;;  %v4797_v36 = vsel %vm4793_vm4, %v16288_v29, %v6667_v26  ;;  %v6687_v30 = vunpack.i.h.bf16 %v16283_v51 }
 0x2da   :  { %16286 = vst [vmem:[#allocation83_spill] sm:$0xff] %v12474_v3  ;;  %16287 = vst [vmem:[#allocation158_spill] sm:$0xff] %v12476_v33  ;;  %v12481_v5 = vmax.f32 %v2321_v22, 0.0  ;;  %v16289_v14 = vmov %v16285_v13  ;;  %v16290_v39 = vrot.slane %v11798_v60, 1  ;;  %v16291_v13 = vld [vmem:[#allocation85_spill] sm:$0xff]  ;;  %v5023_v26 = vsel %vm4793_vm4, %v16293_v19, %v6676_v1  ;;  %v16299_v1 = vld [vmem:[#allocation84_spill] sm:$0xff] }
 0x2db   :  { %7134 = vrot.lane.b32.xlu1 %v7133_v56, %s7722_s1  ;;  %v16292_v3 = vld [vmem:[#allocation105_spill] sm:$0xff]  ;;  %v16297_v60 = vunpack.i.l.bf16 %v16164_v47  ;;  %v16310_v8 = vrot.slane %v12307_v37, 3  ;;  %v16325_v40 = vrot.slane %v12307_v37, 1 }
 0x2dc   :  { %7249 = vrot.lane.b32.xlu0 %v7248_v20, %s7726_s22  ;;  %v2876_v56 = vsel %vm2659_vm1, %v16290_v39, %v16289_v14  ;;  %v5024_v33 = vsel %vm4793_vm4, %v16292_v3, %v6677_v53  ;;  %v16294_v20 = vld [vmem:[#allocation86_spill] sm:$0xff]  ;;  %v4315_v39 = vrot.slane %v12465_v63, 3  ;;  %v16298_v53 = vunpack.i.h.bf16 %v16164_v47  ;;  %v16306_v22 = vld [vmem:[#allocation89_spill] sm:$0xff] }
 0x2dd   :  { %v7163_v29 = vpack.i.bf16 %v2878_v34, %v2876_v56  ;;  %v16295_v11 = vmax.f32 %v16294_v20, 0.0  ;;  %v4829_v14 = vsel %vm4826_vm5, %v4796_v48, %v16297_v60  ;;  %v6682_v34 = vunpack.i.h.bf16 %v16299_v1 }
 0x2de   :  { %v4830_v3 = vsel %vm4826_vm5, %v4797_v36, %v16298_v53  ;;  %v4862_v19 = vsel %vm4859_vm6, %v4829_v14, %v6686_v17  ;;  %v16300_v48 = vpack.i.bf16 %v11905_v9, %v11900_v28  ;;  %v7273_v47 = vpack.i.bf16 %v12481_v5, %v12465_v63  ;;  %v12528_v53 = vpop.permute.xlu1 %6939  ;;  %v12530_v9 = vpop.permute.xlu0 %6999 }
 0x2df   :  { %v12498_v23 = vrot.slane %v16295_v11, 4  ;;  %7164 = vrot.lane.b32.xlu1 %v7163_v29, %s7723_s28  ;;  %v4863_v56 = vsel %vm4859_vm6, %v4830_v3, %v6687_v30  ;;  %v6681_v11 = vunpack.i.l.bf16 %v16299_v1  ;;  %v16301_v36 = vunpack.i.l.bf16 %v16157_v62  ;;  %16303 = vst [vmem:[#allocation85_spill] sm:$0xff] %v12528_v53  ;;  %16304 = vst [vmem:[#allocation105_spill] sm:$0xff] %v12530_v9  ;;  %v16305_v3 = vld [vmem:[#allocation87_spill] sm:$0xff] }
 0x2e0   :  { %7269 = vrot.lane.b32.xlu0 %v16300_v48, %s7721_s25  ;;  %v16302_v30 = vunpack.i.h.bf16 %v16157_v62  ;;  %v7178_v14 = vpack.i.bf16 %v12307_v37, %v12090_v61  ;;  %v4637_v28 = vrot.slane %v12465_v63, 4  ;;  %v6702_v1 = vunpack.i.h.bf16 %v16305_v3 }
 0x2e1   :  { %16296 = vst [vmem:[#allocation13_spill] sm:$0xff] %v12498_v23  ;;  %v5055_v29 = vsel %vm4826_vm5, %v5023_v26, %v16301_v36  ;;  %v6701_v48 = vunpack.i.l.bf16 %v16305_v3  ;;  %v2326_v26 = vadd.f32 %v12301_v10, %v16306_v22  ;;  %v16307_v36 = vld [vmem:[#allocation90_spill] sm:$0xff]  ;;  %v16312_v3 = vrot.slane %v12345_v41, 3 }
 0x2e2   :  { %v5056_v60 = vsel %vm4826_vm5, %v5024_v33, %v16302_v30  ;;  %v6707_v62 = vunpack.i.h.bf16 %v16307_v36  ;;  %v16308_v33 = vrot.slane %v12090_v61, 3  ;;  %v16309_v30 = vrot.slane %v11920_v57, 3 }
 0x2e3   :  { %7179 = vrot.lane.b32.xlu1 %v7178_v14, %s7720_s9  ;;  %v4316_v22 = vsel %vm3564_vm3, %v16312_v3, %v4315_v39  ;;  %v5087_v9 = vsel %vm4859_vm6, %v5055_v29, %v6681_v11  ;;  %v6706_v14 = vunpack.i.l.bf16 %v16307_v36  ;;  %v16313_v23 = vrot.slane %v12481_v5, 3 }
 0x2e4   :  { %v4198_v51 = vsel %vm3564_vm3, %v16309_v30, %v16308_v33  ;;  %v16311_v17 = vmov %v16308_v33  ;;  %7274 = vrot.lane.b32.xlu0 %v7273_v47, %s7725_s21  ;;  %v5088_v30 = vsel %vm4859_vm6, %v5056_v60, %v6682_v34  ;;  %v12563_v11 = vsel %vm497_vm0, %v4862_v19, %v6701_v48  ;;  %v16318_v34 = vld [vmem:[#allocation108_spill] sm:$0xff]  ;;  %v16319_v60 = vld [vmem:[#allocation91_spill] sm:$0xff]  ;;  %v12579_v19 = vpop.permute.xlu0 %7009 }
 0x2e5   :  { %v4200_v20 = vsel %vm3564_vm3, %v16311_v17, %v16310_v8  ;;  %v4318_v33 = vsel %vm3564_vm3, %v4315_v39, %v16313_v23  ;;  %16315 = vst [vmem:[#allocation102_spill] sm:$0xff] %v12563_v11  ;;  %v12566_v29 = vsel %vm497_vm0, %v4863_v56, %v6702_v1  ;;  %v3411_v23 = vrot.slane %v12481_v5, 1  ;;  %16321 = vst [vmem:[#allocation87_spill] sm:$0xff] %v12579_v19  ;;  %v16322_v56 = vld [vmem:[#allocation107_spill] sm:$0xff] }
 0x2e6   :  { %v7183_v53 = vpack.i.bf16 %v4200_v20, %v4198_v51  ;;  %v7278_v17 = vpack.i.bf16 %v4318_v33, %v4316_v22  ;;  %16316 = vst [vmem:[#allocation86_spill] sm:$0xff] %v12566_v29  ;;  %v16317_v51 = vld [vmem:[#allocation93_spill] sm:$0xff]  ;;  %v12571_v39 = vmax.f32 %v2326_v26, 0.0  ;;  %v5026_v47 = vsel %vm4793_vm4, %v16318_v34, %v6707_v62  ;;  %v12577_v22 = vpop.permute.xlu1 %6944  ;;  %v16323_v33 = vld [vmem:[#allocation94_spill] sm:$0xff]  ;;  %v16324_v62 = vld [vmem:[#allocation95_spill] sm:$0xff] }
 0x2e7   :  { %v2331_v20 = vadd.f32 %v12301_v10, %v16317_v51  ;;  %v6697_v36 = vunpack.i.h.bf16 %v16319_v60  ;;  %16320 = vst [vmem:[#allocation84_spill] sm:$0xff] %v12577_v22  ;;  %v5025_v1 = vsel %vm4793_vm4, %v16322_v56, %v6706_v14  ;;  %v6696_v48 = vunpack.i.l.bf16 %v16319_v60 }
 0x2e8   :  { %7184 = vrot.lane.b32.xlu1 %v7183_v53, %s7720_s9  ;;  %v6712_v51 = vunpack.i.h.bf16 %v16323_v33  ;;  %v6711_v26 = vunpack.i.l.bf16 %v16323_v33  ;;  %7279 = vrot.lane.b32.xlu0 %v7278_v17, %s7725_s21  ;;  %v6722_v34 = vunpack.i.h.bf16 %v16324_v62  ;;  %v16326_v53 = vrot.slane %v12090_v61, 1  ;;  %v12612_v18 = vpop.permute.xlu0 %7014 }
 0x2e9   :  { %v16327_v3 = vrot.slane %v12232_v49, 1  ;;  %v16328_v14 = vmov %v16325_v40  ;;  %v16329_v56 = vrot.slane %v12345_v41, 4  ;;  %v12601_v19 = vmax.f32 %v2331_v20, 0.0  ;;  %16332 = vst [vmem:[#allocation90_spill] sm:$0xff] %v12612_v18  ;;  %v16333_v20 = vld [vmem:[#allocation3_spill] sm:$0xff] }
 0x2ea   :  { %v3294_v8 = vsel %vm2659_vm1, %v16326_v53, %v16325_v40  ;;  %v6721_v17 = vunpack.i.l.bf16 %v16324_v62  ;;  %v16330_v29 = vrot.slane %v12481_v5, 4  ;;  %v4319_v53 = vrot.slane %v12571_v39, 3  ;;  %v16334_v62 = vld [vmem:[#allocation24_spill] sm:$0xff] }
 0x2eb   :  { %v3296_v60 = vsel %vm2659_vm1, %v16328_v14, %v16327_v3  ;;  %v4638_v33 = vsel %vm3824_vm2, %v16329_v56, %v4637_v28  ;;  %v4641_v6 = vrot.slane %v12571_v39, 4  ;;  %v12610_v14 = vpop.permute.xlu1 %6949  ;;  %v4799_v56 = vsel %vm4793_vm4, %v16333_v20, %v6697_v36 }
 0x2ec   :  { %v7193_v22 = vpack.i.bf16 %v3296_v60, %v3294_v8  ;;  %v4640_v11 = vsel %vm3824_vm2, %v4637_v28, %v16330_v29  ;;  %16331 = vst [vmem:[#allocation89_spill] sm:$0xff] %v12610_v14  ;;  %v4798_v8 = vsel %vm4793_vm4, %v16334_v62, %v6696_v48  ;;  %v16335_v60 = vunpack.i.h.bf16 %v16169_v52  ;;  %v16336_v29 = vld [vmem:[#allocation96_spill] sm:$0xff] }
 0x2ed   :  { %v7283_v3 = vpack.i.bf16 %v4640_v11, %v4638_v33  ;;  %v2336_v40 = vadd.f32 %v12301_v10, %v16336_v29  ;;  %v12625_v11 = vsel %vm497_vm0, %v5087_v9, %v6711_v26  ;;  %v12628_v33 = vsel %vm497_vm0, %v5088_v30, %v6712_v51 }
 0x2ee   :  { %v5058_v28 = vsel %vm4826_vm5, %v5026_v47, %v16335_v60  ;;  %7194 = vrot.lane.b32.xlu1 %v7193_v22, %s7724_s13  ;;  %16337 = vst [vmem:[#allocation93_spill] sm:$0xff] %v12628_v33  ;;  %v16338_v36 = vunpack.i.l.bf16 %v16169_v52  ;;  %v16339_v22 = vld [vmem:[#allocation98_spill] sm:$0xff]  ;;  %v7198_v30 = vpack.i.bf16 %v12218_v27, %v12145_v15  ;;  %v16340_v52 = vld [vmem:[#allocation99_spill] sm:$0xff]  ;;  %v16341_v26 = vrot.slane %v12465_v63, 1 }
 0x2ef   :  { %v12634_v48 = vsel %vm4859_vm6, %v5058_v28, %v6722_v34  ;;  %7284 = vrot.lane.b32.xlu0 %v7283_v3, %s7726_s22  ;;  %v6727_v9 = vunpack.i.h.bf16 %v16339_v22  ;;  %v6726_v51 = vunpack.i.l.bf16 %v16339_v22  ;;  %v16342_v3 = vrot.slane %v12571_v39, 1  ;;  %v12660_v22 = vpop.permute.xlu0 %7039  ;;  %v16374_v33 = vld [vmem:[#allocation106_spill] sm:$0xff] }
 0x2f0   :  { %v5057_v20 = vsel %vm4826_vm5, %v5025_v1, %v16338_v36  ;;  %v2341_v1 = vadd.f32 %v12301_v10, %v16340_v52  ;;  %v3412_v34 = vsel %vm2659_vm1, %v16341_v26, %v3411_v23  ;;  %v12657_v36 = vmax.f32 %v2336_v40, 0.0  ;;  %16344 = vst [vmem:[#allocation91_spill] sm:$0xff] %v12660_v22 }
 0x2f1   :  { %v12639_v62 = vsel %vm4859_vm6, %v5057_v20, %v6721_v17  ;;  %v3414_v60 = vsel %vm2659_vm1, %v3411_v23, %v16342_v3  ;;  %v12653_v17 = vpop.permute.xlu1 %6954  ;;  %v16346_v18 = vrot.slane %v12218_v27, 1  ;;  %v16347_v23 = vrot.slane %v12145_v15, 1 }
 0x2f2   :  { %16343 = vst [vmem:[#allocation108_spill] sm:$0xff] %v12653_v17  ;;  %7199 = vrot.lane.b32.xlu1 %v7198_v30, %s7722_s1  ;;  %v7288_v20 = vpack.i.bf16 %v3414_v60, %v3412_v34  ;;  %v16348_v28 = vrot.slane %v16252_v31, 1  ;;  %v16350_v30 = vunpack.i.l.bf16 %v16165_v38  ;;  %v16351_v60 = vunpack.i.h.bf16 %v16165_v38 }
 0x2f3   :  { %v2884_v3 = vsel %vm2659_vm1, %v16347_v23, %v16346_v18  ;;  %v16349_v40 = vmov %v16346_v18  ;;  %v16352_v22 = vrot.slane %v12481_v5, 3 }
 0x2f4   :  { %v2886_v29 = vsel %vm2659_vm1, %v16349_v40, %v16348_v28  ;;  %v4831_v34 = vsel %vm4826_vm5, %v4798_v8, %v16350_v30  ;;  %v4832_v47 = vsel %vm4826_vm5, %v4799_v56, %v16351_v60  ;;  %7289 = vrot.lane.b32.xlu0 %v7288_v20, %s7726_s22  ;;  %v12686_v28 = vmax.f32 %v2341_v1, 0.0  ;;  %v12705_v60 = vpop.permute.xlu0 %7044 }
 0x2f5   :  { %v7208_v26 = vpack.i.bf16 %v2886_v29, %v2884_v3  ;;  %v4320_v18 = vsel %vm3564_vm3, %v16352_v22, %v4319_v53  ;;  %v4864_v23 = vsel %vm4859_vm6, %v4831_v34, %v6726_v51  ;;  %v4865_v17 = vsel %vm4859_vm6, %v4832_v47, %v6727_v9  ;;  %v12691_v38 = vpop.permute.xlu1 %6969  ;;  %v16356_v47 = vld [vmem:[#allocation100_spill] sm:$0xff]  ;;  %16359 = vst [vmem:[#allocation94_spill] sm:$0xff] %v12705_v60  ;;  %v16360_v3 = vld [vmem:[#allocation101_spill] sm:$0xff] }
 0x2f6   :  { %v16353_v40 = vrot.slane %v12601_v19, 3  ;;  %16354 = vst [vmem:[#allocation107_spill] sm:$0xff] %v12691_v38  ;;  %v6741_v9 = vunpack.i.l.bf16 %v16356_v47  ;;  %v16357_v1 = vrot.slane %v12481_v5, 4  ;;  %v6742_v29 = vunpack.i.h.bf16 %v16356_v47 }
 0x2f7   :  { %7209 = vrot.lane.b32.xlu1 %v7208_v26, %s7723_s28  ;;  %v7218_v26 = vpack.i.bf16 %v12401_v50, %v12234_v12  ;;  %v16364_v47 = vrot.slane %v12234_v12, 1 }
 0x2f8   :  { %v4322_v8 = vsel %vm3564_vm3, %v4319_v53, %v16353_v40  ;;  %v4642_v30 = vsel %vm3824_vm2, %v16357_v1, %v4641_v6  ;;  %v16358_v53 = vrot.slane %v12601_v19, 4  ;;  %v16362_v40 = vld [vmem:[#allocation104_spill] sm:$0xff]  ;;  %v12745_v14 = vpop.permute.xlu0 %7059 }
 0x2f9   :  { %v7298_v22 = vpack.i.bf16 %v4322_v8, %v4320_v18  ;;  %v6747_v56 = vunpack.i.h.bf16 %v16362_v40  ;;  %v16368_v8 = vrot.slane %v12307_v37, 3  ;;  %v6746_v38 = vunpack.i.l.bf16 %v16362_v40  ;;  %16372 = vst [vmem:[#allocation24_spill] sm:$0xff] %v12745_v14 }
 0x2fa   :  { %v4644_v34 = vsel %vm3824_vm2, %v4641_v6, %v16358_v53  ;;  %v2346_v6 = vadd.f32 %v12301_v10, %v16360_v3  ;;  %v12717_v53 = vpop.permute.xlu1 %6974  ;;  %v16367_v3 = vrot.slane %v12232_v49, 3  ;;  %v7238_v40 = vpack.i.bf16 %v12345_v41, %v12318_v59 }
 0x2fb   :  { %7299 = vrot.lane.b32.xlu0 %v7298_v22, %s7725_s21  ;;  %v7303_v18 = vpack.i.bf16 %v4644_v34, %v4642_v30  ;;  %16361 = vst [vmem:[#allocation95_spill] sm:$0xff] %v12717_v53  ;;  %7219 = vrot.lane.b32.xlu1 %v7218_v26, %s7720_s9  ;;  %v16363_v22 = vrot.slane %v12401_v50, 1  ;;  %v16365_v34 = vrot.slane %v16291_v13, 1  ;;  %v12737_v26 = vsel %vm497_vm0, %v4864_v23, %v6741_v9 }
 0x2fc   :  { %v4202_v51 = vsel %vm3564_vm3, %v16368_v8, %v16367_v3  ;;  %16369 = vst [vmem:[#allocation3_spill] sm:$0xff] %v12737_v26  ;;  %v2351_v8 = vadd.f32 %v12301_v10, %v16374_v33  ;;  %v12752_v9 = vmax.f32 %v2346_v6, 0.0  ;;  %v16382_v6 = vld [vmem:[#allocation113_spill] sm:$0xff] }
 0x2fd   :  { %v3302_v30 = vsel %vm2659_vm1, %v16364_v47, %v16363_v22  ;;  %v16366_v5 = vmov %v16363_v22  ;;  %v16370_v22 = vrot.slane %v12220_v44, 3  ;;  %v16371_v47 = vmov %v16367_v3 }
 0x2fe   :  { %v3304_v1 = vsel %vm2659_vm1, %v16366_v5, %v16365_v34  ;;  %v16373_v5 = vld [vmem:[#allocation103_spill] sm:$0xff]  ;;  %v2356_v14 = vadd.f32 %v12301_v10, %v16382_v6 }
 0x2ff   :  { %v7223_v53 = vpack.i.bf16 %v3304_v1, %v3302_v30  ;;  %v4204_v60 = vsel %vm3564_vm3, %v16371_v47, %v16370_v22  ;;  %v6737_v34 = vunpack.i.h.bf16 %v16373_v5  ;;  %v6736_v20 = vunpack.i.l.bf16 %v16373_v5  ;;  %7304 = vrot.lane.b32.xlu0 %v7303_v18, %s7726_s22  ;;  %v12766_v5 = vpop.permute.xlu1 %6989  ;;  %v16388_v6 = vld [vmem:[#allocation111_spill] sm:$0xff] }
 0x300   :  { %v7318_v23 = vpack.i.bf16 %v4204_v60, %v4202_v51  ;;  %v16375_v1 = vrot.slane %v12232_v49, 4  ;;  %v16376_v30 = vrot.slane %v12307_v37, 4  ;;  %v16377_v22 = vrot.slane %v12220_v44, 4  ;;  %16379 = vst [vmem:[#allocation96_spill] sm:$0xff] %v12766_v5  ;;  %v16381_v60 = vld [vmem:[#allocation112_spill] sm:$0xff]  ;;  %v16384_v49 = vld [vmem:[#allocation109_spill] sm:$0xff] }
 0x301   :  { %v12769_v51 = vsel %vm497_vm0, %v4865_v17, %v6742_v29  ;;  %v5028_v18 = vsel %vm4793_vm4, %v16381_v60, %v6747_v56  ;;  %7224 = vrot.lane.b32.xlu1 %v7223_v53, %s7724_s13  ;;  %v6752_v52 = vunpack.i.h.bf16 %v16384_v49  ;;  %v16386_v17 = vrot.slane %v12318_v59, 1  ;;  %v12785_v56 = vpop.permute.xlu0 %7064 }
 0x302   :  { %v4525_v3 = vsel %vm3824_vm2, %v16376_v30, %v16375_v1  ;;  %v16378_v47 = vmov %v16375_v1  ;;  %16380 = vst [vmem:[#allocation98_spill] sm:$0xff] %v12769_v51  ;;  %v16383_v30 = vld [vmem:[#allocation110_spill] sm:$0xff]  ;;  %16387 = vst [vmem:[#allocation99_spill] sm:$0xff] %v12785_v56  ;;  %v12787_v60 = vmax.f32 %v2351_v8, 0.0  ;;  %v6762_v53 = vunpack.i.h.bf16 %v16388_v6  ;;  %v16393_v8 = vld [vmem:[#allocation19_spill] sm:$0xff] }
 0x303   :  { %v4527_v33 = vsel %vm3824_vm2, %v16378_v47, %v16377_v22  ;;  %v5027_v26 = vsel %vm4793_vm4, %v16383_v30, %v6746_v38  ;;  %v6751_v22 = vunpack.i.l.bf16 %v16384_v49  ;;  %v16385_v47 = vrot.slane %v12345_v41, 1  ;;  %7319 = vrot.lane.b32.xlu0 %v7318_v23, %s7720_s9  ;;  %v16391_v49 = vld [vmem:[#allocation23_spill] sm:$0xff] }
 0x304   :  { %v7323_v1 = vpack.i.bf16 %v4527_v33, %v4525_v3  ;;  %v6761_v3 = vunpack.i.l.bf16 %v16388_v6  ;;  %v16389_v38 = vrot.slane %v12465_v63, 1  ;;  %v16395_v63 = vunpack.i.l.bf16 %v16181_v45 }
 0x305   :  { %v3408_v29 = vsel %vm2659_vm1, %v16386_v17, %v16385_v47  ;;  %v16390_v33 = vmov %v16385_v47  ;;  %v12800_v47 = vsel %vm4793_vm4, %v16391_v49, %v6737_v34  ;;  %v12804_v17 = vsel %vm4793_vm4, %v16393_v8, %v6736_v20  ;;  %7239 = vrot.lane.b32.xlu1 %v7238_v40, %s7725_s21  ;;  %v12832_v49 = vpop.permute.xlu0 %7079 }
 0x306   :  { %v3410_v30 = vsel %vm2659_vm1, %v16390_v33, %v16389_v38  ;;  %16392 = vst [vmem:[#allocation100_spill] sm:$0xff] %v12800_v47  ;;  %16394 = vst [vmem:[#allocation101_spill] sm:$0xff] %v12804_v17  ;;  %v5059_v41 = vsel %vm4826_vm5, %v5027_v26, %v16395_v63  ;;  %v12811_v38 = vmax.f32 %v2356_v14, 0.0  ;;  %v12814_v33 = vpop.permute.xlu1 %6994  ;;  %v12818_v34 = vsel %vm497_vm0, %v12639_v62, %v6751_v22  ;;  %v16406_v22 = vld [vmem:[#allocation119_spill] sm:$0xff] }
 0x307   :  { %v7253_v56 = vpack.i.bf16 %v3410_v30, %v3408_v29  ;;  %16396 = vst [vmem:[#allocation104_spill] sm:$0xff] %v12814_v33  ;;  %16397 = vst [vmem:[#allocation103_spill] sm:$0xff] %v12818_v34  ;;  %v12822_v20 = vsel %vm497_vm0, %v12634_v48, %v6752_v52  ;;  %v16399_v29 = vunpack.i.h.bf16 %v16181_v45  ;;  %v16400_v26 = vrot.slane %v12218_v27, 3  ;;  %v16405_v52 = vld [vmem:[#allocation116_spill] sm:$0xff]  ;;  %7324 = vrot.lane.b32.xlu0 %v7323_v1, %s7724_s13 }
 0x308   :  { %16398 = vst [vmem:[#allocation106_spill] sm:$0xff] %v12822_v20  ;;  %v16401_v14 = vrot.slane %v12145_v15, 3  ;;  %16402 = vst [vmem:[#allocation112_spill] sm:$0xff] %v12832_v49  ;;  %v12836_v62 = vsel %vm4859_vm6, %v5059_v41, %v6761_v3  ;;  %v2361_v45 = vadd.f32 %v12301_v10, %v16405_v52  ;;  %v2366_v63 = vadd.f32 %v12301_v10, %v16406_v22  ;;  %v16411_v52 = vld [vmem:[#allocation114_spill] sm:$0xff] }
 0x309   :  { %v5060_v30 = vsel %vm4826_vm5, %v5028_v18, %v16399_v29  ;;  %16403 = vst [vmem:[#allocation113_spill] sm:$0xff] %v12836_v62  ;;  %v16409_v41 = vrot.slane %v12307_v37, 4  ;;  %7254 = vrot.lane.b32.xlu1 %v7253_v56, %s7726_s22  ;;  %v16413_v37 = vrot.slane %v11920_v57, 4  ;;  %v53_v56 = vld [vmem:[%s15452_s3] sm:$0xff] }
 0x30a   :  { %v3723_v40 = vsel %vm3564_vm3, %v16401_v14, %v16400_v26  ;;  %v12839_v48 = vsel %vm4859_vm6, %v5060_v30, %v6762_v53  ;;  %v16407_v29 = vmov %v16401_v14  ;;  %v16408_v26 = vrot.slane %v12155_v42, 3  ;;  %v16419_v18 = vld [vmem:[#allocation122_spill] sm:$0xff] }
 0x30b   :  { %16404 = vst [vmem:[#allocation110_spill] sm:$0xff] %v12839_v48  ;;  %v16410_v53 = vrot.slane %v12090_v61, 4  ;;  %v16416_v61 = vrot.slane %v12155_v42, 3  ;;  %v12891_v8 = vmax.f32 %v2366_v63, 0.0  ;;  %v16423_v14 = vrot.slane %v12168_v55, 3 }
 0x30c   :  { %v3721_v3 = vsel %vm3564_vm3, %v16408_v26, %v16407_v29 }
 0x30d   :  { %v4523_v30 = vsel %vm3824_vm2, %v16410_v53, %v16409_v41  ;;  %v7328_v22 = vpack.i.bf16 %v3723_v40, %v3721_v3  ;;  %v16412_v29 = vmov %v16410_v53  ;;  %v16414_v41 = vrot.slane %v12218_v27, 4  ;;  %v54_v40 = vld [vmem:[%s15452_s3 + $0x8] sm:$0xff] }
 0x30e   :  { %v4521_v26 = vsel %vm3824_vm2, %v16413_v37, %v16412_v29  ;;  %v16415_v53 = vrot.slane %v12145_v15, 4  ;;  %v12879_v3 = vmax.f32 %v2361_v45, 0.0  ;;  %v16417_v29 = vrot.slane %v12168_v55, 3 }
 0x30f   :  { %7329 = vrot.lane.b32.xlu0 %v7328_v22, %s7722_s1  ;;  %v7258_v57 = vpack.i.bf16 %v4523_v30, %v4521_v26  ;;  %v2371_v45 = vadd.f32 %v12301_v10, %v16419_v18  ;;  %v2376_v22 = vadd.f32 %v12301_v10, %v11826_v25  ;;  %v16420_v30 = vrot.slane %v12145_v15, 4 }
 0x310   :  { %v4046_v1 = vsel %vm3824_vm2, %v16415_v53, %v16414_v41  ;;  %v3719_v37 = vsel %vm3564_vm3, %v16417_v29, %v16416_v61  ;;  %v7343_v41 = vpack.i.bf16 %v12686_v28, %v12657_v36  ;;  %v12889_v53 = vpop.permute.xlu1 %7004  ;;  %v16421_v26 = vrot.slane %v12155_v42, 4  ;;  %v12902_v61 = vpop.permute.xlu0 %7089 }
 0x311   :  { %16418 = vst [vmem:[#allocation109_spill] sm:$0xff] %v12889_v53  ;;  %16422 = vst [vmem:[#allocation111_spill] sm:$0xff] %v12902_v61  ;;  %v2381_v29 = vadd.f32 %v12301_v10, %v11883_v2  ;;  %7259 = vrot.lane.b32.xlu1 %v7258_v57, %s7724_s13  ;;  %v16424_v18 = vrot.slane %v12017_v21, 3  ;;  %v5911_v6 = vpack.c.bf16 %v54_v40, %v53_v56  ;;  %v16426_v2 = vrot.slane %v12601_v19, 3 }
 0x312   :  { %v4044_v23 = vsel %vm3824_vm2, %v16421_v26, %v16420_v30  ;;  %v2386_v15 = vadd.f32 %v12301_v10, %v11936_v32  ;;  %v7293_v30 = vpack.i.bf16 %v12601_v19, %v12571_v39  ;;  %v16425_v26 = vrot.slane %v12657_v36, 3 }
 0x313   :  { %v7338_v63 = vpack.i.bf16 %v4046_v1, %v4044_v23  ;;  %v3717_v25 = vsel %vm3564_vm3, %v16424_v18, %v16423_v14  ;;  %5912 = vmatpush1.bf16.msra.mxu0 %v5911_v6  ;;  %v16427_v14 = vrot.slane %v12686_v28, 3  ;;  %v16430_v57 = vrot.slane %v12601_v19, 1 }
 0x314   :  { %v7263_v59 = vpack.i.bf16 %v3719_v37, %v3717_v25  ;;  %v4324_v23 = vsel %vm3564_vm3, %v16426_v2, %v16425_v26  ;;  %v16428_v56 = vmov %v16425_v26  ;;  %v12928_v40 = vpop.permute.xlu1 %7019  ;;  %v16431_v37 = vrot.slane %v12571_v39, 1  ;;  %v55_v39 = vld [vmem:[%s15452_s3 + $0x10] sm:$0xff] }
 0x315   :  { %7339 = vrot.lane.b32.xlu0 %v7338_v63, %s7723_s28  ;;  %v4326_v32 = vsel %vm3564_vm3, %v16428_v56, %v16427_v14  ;;  %16429 = vst [vmem:[#allocation23_spill] sm:$0xff] %v12928_v40  ;;  %v16432_v25 = vrot.slane %v12657_v36, 1  ;;  %v16433_v26 = vmov %v16430_v57  ;;  %v12941_v2 = vmax.f32 %v2371_v45, 0.0  ;;  %v12943_v14 = vpop.permute.xlu0 %7094  ;;  %v59_v63 = vld [vmem:[%s15452_s3 + $0x30] sm:$0xff] }
 0x316   :  { %v3416_v18 = vsel %vm2659_vm1, %v16431_v37, %v16430_v57  ;;  %v7348_v1 = vpack.i.bf16 %v4326_v32, %v4324_v23  ;;  %16434 = vst [vmem:[#allocation19_spill] sm:$0xff] %v12943_v14  ;;  %v16435_v61 = vmov 0.0|0.0   ;;  %v56_v57 = vld [vmem:[%s15452_s3 + $0x18] sm:$0xff]  ;;  %v12952_v37 = vmax.f32 %v2376_v22, 0.0  ;;  %7264 = vrot.lane.b32.xlu1 %v7263_v59, %s7722_s1 }
 0x317   :  { %v3418_v6 = vsel %vm2659_vm1, %v16433_v26, %v16432_v25  ;;  %5913 = vmatprep.subr.bf16.mxu0 %v16435_v61  ;;  %v2391_v45 = vadd.f32 %v12301_v10, %v11997_v54  ;;  %v16436_v23 = vrot.slane %v12657_v36, 4  ;;  %v16437_v32 = vrot.slane %v12601_v19, 4 }
 0x318   :  { %v7308_v56 = vpack.i.bf16 %v3418_v6, %v3416_v18  ;;  %v16438_v25 = vrot.slane %v12686_v28, 4  ;;  %v12969_v14 = vmax.f32 %v2381_v29, 0.0  ;;  %v12972_v40 = vmax.f32 %v2386_v15, 0.0  ;;  %v58_v29 = vld [vmem:[%s15452_s3 + $0x28] sm:$0xff] }
 0x319   :  { %v4646_v18 = vsel %vm3824_vm2, %v16437_v32, %v16436_v23  ;;  %v16439_v26 = vmov %v16436_v23  ;;  %v2396_v19 = vadd.f32 %v12301_v10, %v12029_v35  ;;  %7344 = vrot.lane.b32.xlu0 %v7343_v41, %s7725_s21  ;;  %v5914_v23 = vpack.c.bf16 %v56_v57, %v55_v39  ;;  %v57_v32 = vld [vmem:[%s15452_s3 + $0x20] sm:$0xff]  ;;  %v12988_v35 = vpop.permute.xlu0 %7124 }
 0x31a   :  { %v4648_v6 = vsel %vm3824_vm2, %v16439_v26, %v16438_v25  ;;  %v12986_v26 = vpop.permute.xlu1 %7024  ;;  %16441 = vst [vmem:[#allocation119_spill] sm:$0xff] %v12988_v35  ;;  %v16442_v41 = vrot.slane %v12686_v28, 1  ;;  %v16443_v39 = vrot.slane %v12657_v36, 1  ;;  %v13000_v25 = vmax.f32 %v2391_v45, 0.0  ;;  %7294 = vrot.lane.b32.xlu1 %v7293_v30, %s7725_s21 }
 0x31b   :  { %v7353_v54 = vpack.i.bf16 %v4648_v6, %v4646_v18  ;;  %16440 = vst [vmem:[#allocation116_spill] sm:$0xff] %v12986_v26  ;;  %5915 = vmatpush1.bf16.msra.mxu0 %v5914_v23  ;;  %v16444_v36 = vrot.slane %v12752_v9, 1  ;;  %v5917_v6 = vpack.c.bf16 %v58_v29, %v57_v32  ;;  %v13014_v23 = vmax.f32 %v2396_v19, 0.0 }
 0x31c   :  { %v12995_v57 = vsel %vm2659_vm1, %v16443_v39, %v16442_v41  ;;  %5916 = vmatprep.subr.bf16.mxu0 %v16435_v61  ;;  %v16446_v45 = vrot.slane %v12168_v55, 4  ;;  %v2401_v32 = vadd.f32 %v12301_v10, %v12057_v4  ;;  %v16450_v29 = vrot.slane %v12017_v21, 4 }
 0x31d   :  { %v3422_v39 = vsel %vm2659_vm1, %v16442_v41, %v16444_v36  ;;  %7349 = vrot.lane.b32.xlu0 %v7348_v1, %s7725_s21  ;;  %v60_v36 = vld [vmem:[%s15452_s3 + $0x38] sm:$0xff]  ;;  %v16445_v41 = vrot.slane %v12155_v42, 4  ;;  %v13033_v18 = vpop.permute.xlu0 %7139  ;;  %v16453_v59 = vrot.slane %v12787_v60, 3  ;;  %v16472_v22 = vrot.slane %v12401_v50, 3 }
 0x31e   :  { %v7358_v1 = vpack.i.bf16 %v3422_v39, %v12995_v57  ;;  %v13031_v15 = vpop.permute.xlu1 %7029  ;;  %16448 = vst [vmem:[#allocation122_spill] sm:$0xff] %v13033_v18  ;;  %7309 = vrot.lane.b32.xlu1 %v7308_v56, %s7726_s22  ;;  %v16449_v42 = vmov %v16446_v45  ;;  %v16451_v57 = vrot.slane %v12752_v9, 3  ;;  %v16452_v39 = vrot.slane %v12686_v28, 3  ;;  %v16482_v18 = vld [vmem:[#allocation149_spill] sm:$0xff] }
 0x31f   :  { %v4042_v19 = vsel %vm3824_vm2, %v16446_v45, %v16445_v41  ;;  %16447 = vst [vmem:[#allocation114_spill] sm:$0xff] %v13031_v15  ;;  %v4040_v45 = vsel %vm3824_vm2, %v16450_v29, %v16449_v42  ;;  %5918 = vmatpush1.bf16.msra.mxu0 %v5917_v6  ;;  %v5920_v55 = vpack.c.bf16 %v60_v36, %v59_v63  ;;  %v16455_v42 = vrot.slane %v16104_v46, 4  ;;  %v62_v63 = vld [vmem:[%s15452_s3 + $0x48] sm:$0xff] }
 0x320   :  { %v4328_v41 = vsel %vm3564_vm3, %v16452_v39, %v16451_v57  ;;  %v16454_v30 = vmov %v16451_v57  ;;  %5919 = vmatprep.subr.bf16.mxu0 %v16435_v61  ;;  %v7313_v29 = vpack.i.bf16 %v4042_v19, %v4040_v45  ;;  %v16456_v57 = vrot.slane %v16103_v7, 4  ;;  %v16499_v15 = vld [vmem:[#allocation155_spill] sm:$0xff] }
 0x321   :  { %v4330_v4 = vsel %vm3564_vm3, %v16454_v30, %v16453_v59  ;;  %7354 = vrot.lane.b32.xlu0 %v7353_v54, %s7726_s22  ;;  %v61_v59 = vld [vmem:[%s15452_s3 + $0x40] sm:$0xff]  ;;  %v16458_v54 = vrot.slane %v12752_v9, 4  ;;  %v16459_v19 = vrot.slane %v12686_v28, 4  ;;  %v16462_v6 = vrot.slane %v12787_v60, 1 }
 0x322   :  { %v3885_v39 = vsel %vm3824_vm2, %v16456_v57, %v16455_v42  ;;  %v7368_v30 = vpack.i.bf16 %v4330_v4, %v4328_v41  ;;  %v13072_v36 = vpop.permute.xlu1 %7034  ;;  %v16460_v42 = vrot.slane %v12787_v60, 4  ;;  %v16463_v41 = vrot.slane %v12752_v9, 1  ;;  %7314 = vrot.lane.b32.xlu1 %v7313_v29, %s7723_s28 }
 0x323   :  { %16457 = vst [vmem:[#allocation159_spill] sm:$0xff] %v13072_v36  ;;  %v13079_v45 = vsel %vm3824_vm2, %v16459_v19, %v16458_v54  ;;  %v16461_v57 = vmov %v16458_v54  ;;  %v13095_v21 = vmax.f32 %v2401_v32, 0.0  ;;  %v2406_v28 = vadd.f32 %v12301_v10, %v12086_v43  ;;  %5921 = vmatpush1.bf16.msra.mxu0 %v5920_v55  ;;  %v13114_v43 = vpop.permute.xlu0 %7144 }
 0x324   :  { %v13086_v56 = vsel %vm3824_vm2, %v16461_v57, %v16460_v42  ;;  %v13093_v4 = vsel %vm2659_vm1, %v16463_v41, %v16462_v6  ;;  %v16464_v19 = vrot.slane %v12811_v38, 1  ;;  %v16465_v42 = vmov %v16462_v6  ;;  %16468 = vst [vmem:[#allocation160_spill] sm:$0xff] %v13114_v43  ;;  %5922 = vmatprep.subr.bf16.mxu0 %v16435_v61 }
 0x325   :  { %v7373_v54 = vpack.i.bf16 %v13086_v56, %v13079_v45  ;;  %v16466_v6 = vrot.slane %v16103_v7, 4  ;;  %v16467_v32 = vrot.slane %v16090_v0, 4  ;;  %v5923_v56 = vpack.c.bf16 %v62_v63, %v61_v59  ;;  %v63_v45 = vld [vmem:[%s15452_s3 + $0x50] sm:$0xff]  ;;  %7359 = vrot.lane.b32.xlu0 %v7358_v1, %s7726_s22 }
 0x326   :  { %v13107_v57 = vsel %vm2659_vm1, %v16465_v42, %v16464_v19  ;;  %v64_v19 = vld [vmem:[%s15452_s3 + $0x58] sm:$0xff]  ;;  %v13132_v63 = vpop.permute.xlu1 %7049  ;;  %v16475_v1 = vrot.slane %v12787_v60, 3  ;;  %v16512_v5 = vrot.slane %v12891_v8, 4  ;;  %v16513_v51 = vrot.slane %v12879_v3, 4 }
 0x327   :  { %v3883_v41 = vsel %vm3824_vm2, %v16467_v32, %v16466_v6  ;;  %v7378_v55 = vpack.i.bf16 %v13107_v57, %v13093_v4  ;;  %v2411_v32 = vadd.f32 %v12301_v10, %v12118_v16  ;;  %16469 = vst [vmem:[#allocation161_spill] sm:$0xff] %v13132_v63  ;;  %v16470_v4 = vrot.slane %v12234_v12, 3  ;;  %5924 = vmatpush1.bf16.msra.mxu0 %v5923_v56  ;;  %v16492_v63 = vld [vmem:[#allocation64_spill] sm:$0xff] }
 0x328   :  { %v7333_v59 = vpack.i.bf16 %v3885_v39, %v3883_v41  ;;  %v16471_v57 = vrot.slane %v12220_v44, 3  ;;  %v16474_v16 = vrot.slane %v12811_v38, 3  ;;  %v16476_v41 = vrot.slane %v12879_v3, 3  ;;  %5925 = vmatprep.subr.bf16.mxu0 %v16435_v61 }
 0x329   :  { %v16473_v42 = vmov %v16470_v4  ;;  %v16480_v56 = vrot.slane %v12401_v50, 4  ;;  %7369 = vrot.lane.b32.xlu0 %v7368_v30, %s7725_s21  ;;  %v13223_v36 = vmax.f32 %v2411_v32, 0.0  ;;  %v68_v30 = vld [vmem:[%s15452_s3 + $0x78] sm:$0xff]  ;;  %v16491_v32 = vrot.slane %v12811_v38, 1 }
 0x32a   :  { %v13139_v29 = vsel %vm3564_vm3, %v16471_v57, %v16470_v4  ;;  %v13146_v6 = vsel %vm3564_vm3, %v16473_v42, %v16472_v22  ;;  %v13153_v39 = vsel %vm3564_vm3, %v16475_v1, %v16474_v16  ;;  %v16477_v43 = vmov %v16474_v16  ;;  %7334 = vrot.lane.b32.xlu1 %v7333_v59, %s7721_s25  ;;  %v66_v1 = vld [vmem:[%s15452_s3 + $0x68] sm:$0xff] }
 0x32b   :  { %v13160_v4 = vsel %vm3564_vm3, %v16477_v43, %v16476_v41  ;;  %v13162_v57 = vmax.f32 %v2406_v28, 0.0  ;;  %v5926_v42 = vpack.c.bf16 %v64_v19, %v63_v45  ;;  %v16478_v43 = vrot.slane %v12234_v12, 4  ;;  %v65_v41 = vld [vmem:[%s15452_s3 + $0x60] sm:$0xff]  ;;  %v13216_v12 = vpop.permute.xlu1 %7054 }
 0x32c   :  { %v16479_v28 = vrot.slane %v12220_v44, 4  ;;  %v2416_v44 = vadd.f32 %v12301_v10, %v16482_v18  ;;  %v16486_v16 = vrot.slane %v12879_v3, 4  ;;  %v13345_v0 = vsel %vm3824_vm2, %v16513_v51, %v16512_v5 }
 0x32d   :  { %v16481_v45 = vmov %v16478_v43  ;;  %5927 = vmatpush1.bf16.msra.mxu0 %v5926_v42  ;;  %7374 = vrot.lane.b32.xlu0 %v7373_v54, %s7726_s22  ;;  %v16550_v48 = vrot.slane %v12952_v37, 3 }
 0x32e   :  { %v13177_v59 = vsel %vm3824_vm2, %v16479_v28, %v16478_v43  ;;  %v13184_v19 = vsel %vm3824_vm2, %v16481_v45, %v16480_v56  ;;  %v13195_v43 = vpop.permute.xlu0 %7149  ;;  %v16484_v28 = vrot.slane %v12811_v38, 4  ;;  %v16485_v56 = vrot.slane %v12787_v60, 4  ;;  %5928 = vmatprep.subr.bf16.mxu0 %v16435_v61 }
 0x32f   :  { %16483 = vst [vmem:[#allocation149_spill] sm:$0xff] %v13195_v43  ;;  %v16488_v43 = vld [vmem:[#allocation152_spill] sm:$0xff]  ;;  %v13266_v49 = vmax.f32 %v2416_v44, 0.0 }
 0x330   :  { %v13204_v45 = vsel %vm3824_vm2, %v16485_v56, %v16484_v28  ;;  %v16487_v22 = vmov %v16484_v28  ;;  %v2421_v35 = vadd.f32 %v12301_v10, %v16488_v43  ;;  %v67_v43 = vld [vmem:[%s15452_s3 + $0x70] sm:$0xff]  ;;  %v16490_v28 = vrot.slane %v12879_v3, 1 }
 0x331   :  { %v13211_v18 = vsel %vm3824_vm2, %v16487_v22, %v16486_v16  ;;  %v16489_v22 = vpack.i.bf16 %v12787_v60, %v12752_v9  ;;  %v5929_v16 = vpack.c.bf16 %v66_v1, %v65_v41  ;;  %v2426_v9 = vadd.f32 %v12301_v10, %v16492_v63 }
 0x332   :  { %v13240_v56 = vsel %vm2659_vm1, %v16491_v32, %v16490_v28  ;;  %v16493_v60 = vrot.slane %v12891_v8, 1  ;;  %v16494_v42 = vmov %v16490_v28  ;;  %v16495_v41 = vrot.slane %v12941_v2, 1 }
 0x333   :  { %7364 = vrot.lane.b32.xlu1 %v16489_v22, %s7725_s21  ;;  %v16497_v28 = vrot.slane %v12952_v37, 1  ;;  %v5932_v44 = vpack.c.bf16 %v68_v30, %v67_v43  ;;  %5930 = vmatpush1.bf16.msra.mxu0 %v5929_v16  ;;  %v16505_v30 = vrot.slane %v16252_v31, 3  ;;  %v16506_v43 = vrot.slane %v12218_v27, 3 }
 0x334   :  { %v13250_v1 = vsel %vm2659_vm1, %v16494_v42, %v16493_v60  ;;  %v16496_v22 = vmov %v16493_v60  ;;  %v16498_v63 = vmov %v16495_v41  ;;  %v2431_v60 = vadd.f32 %v12301_v10, %v16499_v15  ;;  %v13271_v42 = vpop.permute.xlu0 %7154  ;;  %5931 = vmatprep.subr.bf16.mxu0 %v16435_v61 }
 0x335   :  { %v13257_v53 = vsel %vm2659_vm1, %v16496_v22, %v16495_v41  ;;  %v13264_v32 = vsel %vm2659_vm1, %v16498_v63, %v16497_v28  ;;  %16500 = vst [vmem:[#allocation152_spill] sm:$0xff] %v13271_v42  ;;  %v13279_v63 = vmax.f32 %v2421_v35, 0.0  ;;  %v16501_v10 = vrot.slane %v12891_v8, 3  ;;  %v13327_v41 = vld [vmem:[%s15451_s2] ss:$0 sm:$0xff] }
 0x336   :  { %v16502_v15 = vrot.slane %v12879_v3, 3  ;;  %v16503_v22 = vrot.slane %v12941_v2, 3  ;;  %v13305_v28 = vmax.f32 %v2426_v9, 0.0  ;;  %v13322_v33 = vmax.f32 %v2431_v60, 0.0  ;;  %v16509_v42 = vld [vmem:[#allocation62_spill] sm:$0xff] }
 0x337   :  { %7379 = vrot.lane.b32.xlu1 %v7378_v55, %s7726_s22  ;;  %v16504_v26 = vmov %v16501_v10  ;;  %v13302_v55 = vsel %vm3564_vm3, %v16506_v43, %v16505_v30  ;;  %v16508_v30 = vld [vmem:[#allocation70_spill] sm:$0xff]  ;;  %5933 = vmatpush1.bf16.msra.mxu0 %v5932_v44  ;;  %v16515_v16 = vrot.slane %v12941_v2, 4  ;;  %v16516_v9 = vmov %v16512_v5 }
 0x338   :  { %v13288_v54 = vsel %vm3564_vm3, %v16502_v15, %v16501_v10  ;;  %v13295_v35 = vsel %vm3564_vm3, %v16504_v26, %v16503_v22  ;;  %v13307_v10 = vpop.permute.xlu1 %7069  ;;  %v69_v26 = vld [vmem:[%s15452_s3 + $0x80] sm:$0xff]  ;;  %v70_v22 = vld [vmem:[%s15452_s3 + $0x88] sm:$0xff]  ;;  %v16510_v15 = vpack.i.bf16 %v12879_v3, %v12811_v38  ;;  %v13335_v43 = vpop.permute.xlu0 %7159  ;;  %5934 = vmatprep.subr.bf16.mxu0 %v16435_v61  ;;  %v16520_v5 = vpack.i.bf16 %v13160_v4, %v13153_v39 }
 0x339   :  { %16507 = vst [vmem:[#allocation64_spill] sm:$0xff] %v13307_v10  ;;  %v2436_v10 = vadd.f32 %v13327_v41, %v16509_v42  ;;  %16511 = vst [vmem:[#allocation155_spill] sm:$0xff] %v13335_v43  ;;  %v5935_v60 = vpack.c.bf16 %v70_v22, %v69_v26  ;;  %v13358_v3 = vsel %vm3824_vm2, %v16516_v9, %v16515_v16  ;;  %v16518_v16 = vrot.slane %v16252_v31, 4  ;;  %v16522_v31 = vld [vmem:[#allocation71_spill] sm:$0xff] }
 0x33a   :  { %7394 = vrot.lane.b32.xlu0 %v16510_v15, %s7725_s21  ;;  %v16514_v15 = vpack.i.bf16 %v13146_v6, %v13139_v29  ;;  %v71_v29 = vld [vmem:[%s15452_s3 + $0x90] sm:$0xff]  ;;  %v72_v6 = vld [vmem:[%s15452_s3 + $0x98] sm:$0xff]  ;;  %v16519_v26 = vrot.slane %v12218_v27, 4  ;;  %v7057_v27 = vunpack.i.h.bf16 %v13216_v12  ;;  %v16528_v43 = vrot.slane %v16291_v13, 3  ;;  %v16530_v4 = vld [vmem:[#allocation7_spill] sm:$0xff] }
 0x33b   :  { %v13382_v51 = vmax.f32 %v2436_v10, 0.0  ;;  %5936 = vmatpush1.bf16.msra.mxu0 %v5935_v60  ;;  %v5938_v44 = vpack.c.bf16 %v72_v6, %v71_v29  ;;  %v16531_v60 = vld [vmem:[#allocation92_spill] sm:$0xff]  ;;  %v16533_v6 = vrot.slane %v12972_v40, 1 }
 0x33c   :  { %7384 = vrot.lane.b32.xlu1 %v16514_v15, %s7720_s9  ;;  %v13362_v42 = vpop.permute.xlu1 %7074  ;;  %v13378_v22 = vsel %vm3824_vm2, %v16519_v26, %v16518_v16  ;;  %v13388_v38 = vpop.permute.xlu0 %7169  ;;  %v7056_v16 = vunpack.i.l.bf16 %v13216_v12  ;;  %v16523_v26 = vld [vmem:[#allocation31_spill] sm:$0xff]  ;;  %v16525_v15 = vrot.slane %v16104_v46, 4  ;;  %v16527_v12 = vld [vmem:[#allocation30_spill] sm:$0xff]  ;;  %5937 = vmatprep.subr.bf16.mxu0 %v16435_v61 }
 0x33d   :  { %16517 = vst [vmem:[#allocation70_spill] sm:$0xff] %v13362_v42  ;;  %16521 = vst [vmem:[#allocation62_spill] sm:$0xff] %v13388_v38  ;;  %v16524_v9 = vrot.slane %v16523_v26, 4  ;;  %v2441_v42 = vadd.f32 %v13327_v41, %v16530_v4  ;;  %v16536_v26 = vrot.slane %v13014_v23, 1  ;;  %v16538_v4 = vld [vmem:[#allocation80_spill] sm:$0xff] }
 0x33e   :  { %7399 = vrot.lane.b32.xlu0 %v16520_v5, %s7725_s21  ;;  %v16526_v5 = vpack.i.bf16 %v13184_v19, %v13177_v59  ;;  %v73_v59 = vld [vmem:[%s15452_s3 + $0xa0] sm:$0xff]  ;;  %v74_v19 = vld [vmem:[%s15452_s3 + $0xa8] sm:$0xff] }
 0x33f   :  { %v13399_v10 = vsel %vm3824_vm2, %v16525_v15, %v16524_v9  ;;  %v16529_v9 = vrot.slane %v12401_v50, 3  ;;  %5939 = vmatpush1.bf16.msra.mxu0 %v5938_v44 }
 0x340   :  { %7389 = vrot.lane.b32.xlu1 %v16526_v5, %s7724_s13  ;;  %v7085_v39 = vpop.permute.xlu1 %7084  ;;  %v13441_v38 = vpop.permute.xlu0 %7174  ;;  %5940 = vmatprep.subr.bf16.mxu0 %v16435_v61 }
 0x341   :  { %v13415_v15 = vsel %vm3564_vm3, %v16529_v9, %v16528_v43  ;;  %v16532_v43 = vrot.slane %v13000_v25, 1  ;;  %v16534_v9 = vpack.i.bf16 %v13211_v18, %v13204_v45  ;;  %16535 = vst [vmem:[#allocation71_spill] sm:$0xff] %v13441_v38  ;;  %v2446_v45 = vadd.f32 %v13327_v41, %v16538_v4  ;;  %v16539_v18 = vld [vmem:[#allocation18_spill] sm:$0xff] }
 0x342   :  { %v16540_v38 = vld [vmem:[#allocation2_spill] sm:$0xff]  ;;  %v7086_v7 = vunpack.i.l.bf16 %v7085_v39  ;;  %v16543_v4 = vrot.slane %v12941_v2, 3 }
 0x343   :  { %v13434_v5 = vsel %vm2659_vm1, %v16533_v6, %v16532_v43  ;;  %7404 = vrot.lane.b32.xlu0 %v16534_v9, %s7726_s22  ;;  %v16537_v29 = vmov %v16532_v43  ;;  %v4817_v9 = vsel %vm4793_vm4, %v16539_v18, %v7057_v27  ;;  %v4816_v62 = vsel %vm4793_vm4, %v16540_v38, %v7056_v16  ;;  %v75_v6 = vld [vmem:[%s15452_s3 + $0xb0] sm:$0xff]  ;;  %v76_v27 = vld [vmem:[%s15452_s3 + $0xb8] sm:$0xff] }
 0x344   :  { %v13448_v20 = vsel %vm2659_vm1, %v16537_v29, %v16536_v26  ;;  %v16541_v26 = vpack.i.bf16 %v12941_v2, %v12891_v8  ;;  %v7087_v29 = vunpack.i.h.bf16 %v7085_v39  ;;  %v5941_v43 = vpack.c.bf16 %v74_v19, %v73_v59  ;;  %v16545_v38 = vld [vmem:[#allocation44_spill] sm:$0xff]  ;;  %v7100_v46 = vpop.permute.xlu1 %7099 }
 0x345   :  { %v16542_v16 = vrot.slane %v12952_v37, 3  ;;  %v13480_v39 = vmax.f32 %v2441_v42, 0.0  ;;  %v2451_v59 = vadd.f32 %v13327_v41, %v12391_v24  ;;  %v2456_v19 = vadd.f32 %v13327_v41, %v12421_v58  ;;  %v13497_v24 = vpop.permute.xlu0 %7189 }
 0x346   :  { %7414 = vrot.lane.b32.xlu1 %v16541_v26, %s7725_s21  ;;  %v16544_v26 = vpack.i.bf16 %v13250_v1, %v13240_v56  ;;  %v16547_v42 = vunpack.i.h.bf16 %v16545_v38  ;;  %16548 = vst [vmem:[#allocation30_spill] sm:$0xff] %v13497_v24  ;;  %v16549_v58 = vrot.slane %v12969_v14, 3  ;;  %v16551_v56 = vrot.slane %v13223_v36, 1  ;;  %5942 = vmatpush1.bf16.msra.mxu0 %v5941_v43  ;;  %v78_v43 = vld [vmem:[%s15452_s3 + $0xc8] sm:$0xff] }
 0x347   :  { %v13477_v8 = vsel %vm3564_vm3, %v16543_v4, %v16542_v16  ;;  %v16546_v16 = vunpack.i.l.bf16 %v16545_v38  ;;  %v16552_v1 = vrot.slane %v13162_v57, 1  ;;  %5943 = vmatprep.subr.bf16.mxu0 %v16435_v61 }
 0x348   :  { %7409 = vrot.lane.b32.xlu0 %v16544_v26, %s7726_s22  ;;  %v4850_v44 = vsel %vm4826_vm5, %v4817_v9, %v16547_v42  ;;  %v13504_v34 = vsel %vm3564_vm3, %v16550_v48, %v16549_v58  ;;  %v7102_v9 = vunpack.i.h.bf16 %v7100_v46  ;;  %v7101_v26 = vunpack.i.l.bf16 %v7100_v46 }
 0x349   :  { %v4849_v4 = vsel %vm4826_vm5, %v4816_v62, %v16546_v16  ;;  %v13511_v62 = vsel %vm2659_vm1, %v16552_v1, %v16551_v56  ;;  %v5944_v16 = vpack.c.bf16 %v76_v27, %v75_v6  ;;  %v13514_v42 = vmax.f32 %v2446_v45, 0.0 }
 0x34a   :  { %v4882_v38 = vsel %vm4859_vm6, %v4849_v4, %v7086_v7  ;;  %v4883_v24 = vsel %vm4859_vm6, %v4850_v44, %v7087_v29  ;;  %v16553_v48 = vpack.i.bf16 %v13264_v32, %v13257_v53  ;;  %v16554_v56 = vrot.slane %v13266_v49, 1  ;;  %v77_v32 = vld [vmem:[%s15452_s3 + $0xc0] sm:$0xff] }
 0x34b   :  { %v16555_v7 = vrot.slane %v13223_v36, 1  ;;  %v13530_v6 = vmax.f32 %v2451_v59, 0.0  ;;  %v13532_v45 = vmax.f32 %v2456_v19, 0.0  ;;  %v13535_v29 = vsel %vm497_vm0, %v4882_v38, %v7101_v26  ;;  %5945 = vmatpush1.bf16.msra.mxu0 %v5944_v16 }
 0x34c   :  { %7429 = vrot.lane.b32.xlu1 %v16553_v48, %s7726_s22  ;;  %16556 = vst [vmem:[#allocation7_spill] sm:$0xff] %v13535_v29  ;;  %v13538_v53 = vsel %vm497_vm0, %v4883_v24, %v7102_v9  ;;  %v16558_v27 = vpack.i.bf16 %v13295_v35, %v13288_v54  ;;  %v16559_v59 = vrot.slane %v12952_v37, 4  ;;  %v16560_v19 = vrot.slane %v12941_v2, 4  ;;  %v13575_v2 = vpop.permute.xlu1 %7104  ;;  %v13577_v48 = vpop.permute.xlu0 %7204  ;;  %5946 = vmatprep.subr.bf16.mxu0 %v16435_v61 }
 0x34d   :  { %v13528_v46 = vsel %vm2659_vm1, %v16555_v7, %v16554_v56  ;;  %16557 = vst [vmem:[#allocation92_spill] sm:$0xff] %v13538_v53  ;;  %v16561_v24 = vrot.slane %v12969_v14, 4  ;;  %v16563_v54 = vrot.slane %v13266_v49, 3  ;;  %v16564_v35 = vrot.slane %v13223_v36, 3  ;;  %16565 = vst [vmem:[#allocation80_spill] sm:$0xff] %v13575_v2 }
 0x34e   :  { %7419 = vrot.lane.b32.xlu0 %v16558_v27, %s7725_s21  ;;  %v13558_v4 = vsel %vm3824_vm2, %v16560_v19, %v16559_v59  ;;  %v16562_v1 = vmov %v16559_v59  ;;  %16566 = vst [vmem:[#allocation18_spill] sm:$0xff] %v13577_v48  ;;  %v16567_v7 = vrot.slane %v13279_v63, 3  ;;  %v16569_v19 = vrot.slane %v12969_v14, 1 }
 0x34f   :  { %v13565_v38 = vsel %vm3824_vm2, %v16562_v1, %v16561_v24  ;;  %v13572_v9 = vsel %vm3564_vm3, %v16564_v35, %v16563_v54  ;;  %v16568_v27 = vmov %v16563_v54  ;;  %v16570_v24 = vrot.slane %v12952_v37, 1 }
 0x350   :  { %v13586_v59 = vsel %vm3564_vm3, %v16568_v27, %v16567_v7  ;;  %v16571_v44 = vpack.i.bf16 %v16508_v30, %v13302_v55  ;;  %v5947_v7 = vpack.c.bf16 %v78_v43, %v77_v32  ;;  %v79_v27 = vld [vmem:[%s15452_s3 + $0xd0] sm:$0xff]  ;;  %v16572_v54 = vrot.slane %v12972_v40, 1  ;;  %v13671_v26 = vpop.permute.xlu0 %7214 }
 0x351   :  { %v13593_v1 = vsel %vm2659_vm1, %v16570_v24, %v16569_v19  ;;  %v80_v19 = vld [vmem:[%s15452_s3 + $0xd8] sm:$0xff]  ;;  %v16573_v55 = vrot.slane %v12969_v14, 1  ;;  %v16574_v16 = vrot.slane %v13266_v49, 4  ;;  %v16575_v32 = vrot.slane %v13223_v36, 4  ;;  %16585 = vst [vmem:[#allocation44_spill] sm:$0xff] %v13671_v26 }
 0x352   :  { %7434 = vrot.lane.b32.xlu1 %v16571_v44, %s7722_s1  ;;  %v16576_v44 = vrot.slane %v13279_v63, 4  ;;  %v16580_v56 = vrot.slane %v12972_v40, 3  ;;  %5948 = vmatpush1.bf16.msra.mxu0 %v5947_v7  ;;  %v16586_v48 = vrot.slane %v12972_v40, 4  ;;  %v16588_v7 = vrot.slane %v13000_v25, 4 }
 0x353   :  { %v13616_v30 = vsel %vm2659_vm1, %v16573_v55, %v16572_v54  ;;  %v13623_v43 = vsel %vm3824_vm2, %v16575_v32, %v16574_v16  ;;  %v16577_v58 = vmov %v16574_v16  ;;  %v16578_v16 = vpack.i.bf16 %v13358_v3, %v13345_v0  ;;  %v81_v32 = vld [vmem:[%s15452_s3 + $0xe0] sm:$0xff]  ;;  %5949 = vmatprep.subr.bf16.mxu0 %v16435_v61 }
 0x354   :  { %v13630_v24 = vsel %vm3824_vm2, %v16577_v58, %v16576_v44  ;;  %v82_v58 = vld [vmem:[%s15452_s3 + $0xe8] sm:$0xff]  ;;  %v13646_v44 = vpop.permute.xlu1 %7109  ;;  %v16581_v0 = vrot.slane %v12969_v14, 3  ;;  %v16583_v54 = vmov %v16580_v56  ;;  %v16584_v55 = vpack.i.bf16 %v16522_v31, %v13378_v22  ;;  %v7230_v2 = vpop.permute.xlu0 %7229 }
 0x355   :  { %7424 = vrot.lane.b32.xlu0 %v16578_v16, %s7726_s22  ;;  %16579 = vst [vmem:[#allocation2_spill] sm:$0xff] %v13646_v44  ;;  %v16582_v16 = vrot.slane %v13000_v25, 3  ;;  %v5950_v44 = vpack.c.bf16 %v80_v19, %v79_v27  ;;  %v16587_v22 = vrot.slane %v12969_v14, 4  ;;  %v16589_v27 = vmov %v16586_v48 }
 0x356   :  { %v13657_v3 = vsel %vm3564_vm3, %v16581_v0, %v16580_v56  ;;  %7444 = vrot.lane.b32.xlu1 %v16584_v55, %s7723_s28  ;;  %v13691_v19 = vsel %vm3824_vm2, %v16589_v27, %v16588_v7  ;;  %v16590_v55 = vpack.i.bf16 %v16527_v12, %v13399_v10  ;;  %v16594_v0 = vrot.slane %v13382_v51, 1 }
 0x357   :  { %v13664_v35 = vsel %vm3564_vm3, %v16583_v54, %v16582_v16  ;;  %v5953_v16 = vpack.c.bf16 %v82_v58, %v81_v32  ;;  %v13684_v31 = vsel %vm3824_vm2, %v16587_v22, %v16586_v48  ;;  %v16591_v58 = vrot.slane %v13322_v33, 1  ;;  %5951 = vmatpush1.bf16.msra.mxu0 %v5950_v44 }
 0x358   :  { %v16592_v48 = vrot.slane %v13305_v28, 1  ;;  %v7115_v12 = vpop.permute.xlu1 %7114  ;;  %v16597_v32 = vrot.slane %v13382_v51, 3  ;;  %v16598_v56 = vrot.slane %v13322_v33, 3  ;;  %v16604_v10 = vrot.slane %v13000_v25, 3  ;;  %5952 = vmatprep.subr.bf16.mxu0 %v16435_v61 }
 0x359   :  { %7439 = vrot.lane.b32.xlu0 %v16590_v55, %s7721_s25  ;;  %v16595_v7 = vmov %v16591_v58  ;;  %v16606_v26 = vpack.i.bf16 %v13000_v25, %v12972_v40  ;;  %v16608_v40 = vrot.slane %v13014_v23, 3  ;;  %v7231_v44 = vunpack.i.l.bf16 %v7230_v2 }
 0x35a   :  { %v13704_v22 = vsel %vm2659_vm1, %v16592_v48, %v16591_v58  ;;  %v13711_v27 = vsel %vm2659_vm1, %v16595_v7, %v16594_v0  ;;  %v13722_v58 = vsel %vm3564_vm3, %v16598_v56, %v16597_v32  ;;  %v16600_v48 = vrot.slane %v13480_v39, 3 }
 0x35b   :  { %16593 = vst [vmem:[#allocation162_spill] sm:$0xff] %v13704_v22  ;;  %16596 = vst [vmem:[#allocation163_spill] sm:$0xff] %v13711_v27  ;;  %v16601_v54 = vmov %v16597_v32  ;;  %v16603_v7 = vrot.slane %v13014_v23, 3  ;;  %7474 = vrot.lane.b32.xlu1 %v16606_v26, %s7725_s21  ;;  %v7117_v56 = vunpack.i.h.bf16 %v7115_v12  ;;  %v7116_v32 = vunpack.i.l.bf16 %v7115_v12  ;;  %v16616_v22 = vld [vmem:[#allocation4_spill] sm:$0xff]  ;;  %v16624_v27 = vld [vmem:[#allocation82_spill] sm:$0xff]  ;;  %5954 = vmatpush1.bf16.msra.mxu0 %v5953_v16 }
 0x35c   :  { %16599 = vst [vmem:[#allocation164_spill] sm:$0xff] %v13722_v58  ;;  %v13729_v0 = vsel %vm3564_vm3, %v16601_v54, %v16600_v48  ;;  %v83_v54 = vld [vmem:[%s15452_s3 + $0xf0] sm:$0xff]  ;;  %v84_v48 = vld [vmem:[%s15452_s3 + $0xf8] sm:$0xff]  ;;  %v16610_v53 = vrot.slane %v13382_v51, 4  ;;  %v16611_v29 = vrot.slane %v13322_v33, 4  ;;  %v16617_v12 = vrot.slane %v16616_v22, 3  ;;  %5955 = vmatprep.subr.bf16.mxu0 %v16435_v61 }
 0x35d   :  { %16602 = vst [vmem:[#allocation165_spill] sm:$0xff] %v13729_v0  ;;  %v13736_v55 = vsel %vm3564_vm3, %v16604_v10, %v16603_v7  ;;  %v16607_v7 = vrot.slane %v13095_v21, 3  ;;  %v16612_v58 = vld [vmem:[#allocation81_spill] sm:$0xff]  ;;  %v4925_v17 = vsel %vm4924_vm7, %v16624_v27, %v7231_v44 }
 0x35e   :  { %16605 = vst [vmem:[#allocation166_spill] sm:$0xff] %v13736_v55  ;;  %v13765_v10 = vsel %vm3824_vm2, %v16611_v29, %v16610_v53  ;;  %v13769_v0 = vadd.f32 %v13327_v41, %v16612_v58  ;;  %v16619_v29 = vmov %v16610_v53  ;;  %v16620_v41 = vrot.slane %v13014_v23, 4 }
 0x35f   :  { %v13755_v26 = vsel %vm3564_vm3, %v16608_v40, %v16607_v7  ;;  %v16613_v7 = vpack.i.bf16 %v16531_v60, %v13415_v15  ;;  %v16614_v40 = vld [vmem:[#allocation5_spill] sm:$0xff]  ;;  %v16621_v58 = vrot.slane %v13000_v25, 4  ;;  %v16622_v60 = vmov %v16617_v12 }
 0x360   :  { %16609 = vst [vmem:[#allocation167_spill] sm:$0xff] %v13755_v26  ;;  %v16615_v47 = vrot.slane %v16614_v40, 3  ;;  %v16618_v26 = vrot.slane %v13480_v39, 4  ;;  %v5956_v40 = vpack.c.bf16 %v84_v48, %v83_v54  ;;  %v16625_v25 = vpack.i.bf16 %v13448_v20, %v13434_v5 }
 0x361   :  { %7449 = vrot.lane.b32.xlu0 %v16613_v7, %s7720_s9  ;;  %v13792_v15 = vsel %vm3824_vm2, %v16621_v58, %v16620_v41  ;;  %v16623_v7 = vrot.slane %v16539_v18, 3  ;;  %v7120_v41 = vpop.permute.xlu1 %7119  ;;  %v16628_v20 = vrot.slane %v13095_v21, 1  ;;  %v16629_v5 = vrot.slane %v13014_v23, 1 }
 0x362   :  { %v3613_v55 = vsel %vm3564_vm3, %v16617_v12, %v16615_v47  ;;  %v13785_v53 = vsel %vm3824_vm2, %v16619_v29, %v16618_v26  ;;  %v7232_v29 = vunpack.i.h.bf16 %v7230_v2  ;;  %7489 = vrot.lane.b32.xlu1 %v16625_v25, %s7726_s22  ;;  %v16632_v48 = vpack.i.bf16 %v12969_v14, %v12952_v37  ;;  %v16633_v25 = vld [vmem:[#allocation45_spill] sm:$0xff]  ;;  %5957 = vmatpush1.bf16.msra.mxu0 %v5956_v40 }
 0x363   :  { %v3611_v47 = vsel %vm3564_vm3, %v16623_v7, %v16622_v60  ;;  %v5046_v12 = vsel %vm4793_vm4, %v3613_v55, %v7117_v56  ;;  %v16626_v55 = vrot.slane %v13095_v21, 4  ;;  %v16627_v56 = vrot.slane %v13014_v23, 4  ;;  %v7235_v60 = vpop.permute.xlu0 %7234 }
 0x364   :  { %v5045_v26 = vsel %vm4793_vm4, %v3611_v47, %v7116_v32  ;;  %v13824_v16 = vsel %vm2659_vm1, %v16629_v5, %v16628_v20  ;;  %v16630_v32 = vrot.slane %v13162_v57, 1  ;;  %v16631_v61 = vmov %v16628_v20 }
 0x365   :  { %v13815_v2 = vsel %vm3824_vm2, %v16627_v56, %v16626_v55  ;;  %7454 = vrot.lane.b32.xlu0 %v16632_v48, %s7725_s21  ;;  %v7122_v44 = vunpack.i.h.bf16 %v7120_v41  ;;  %v7121_v58 = vunpack.i.l.bf16 %v7120_v41  ;;  %v16634_v55 = vunpack.i.l.bf16 %v16633_v25 }
 0x366   :  { %v13831_v54 = vsel %vm2659_vm1, %v16631_v61, %v16630_v32  ;;  %v16635_v20 = vunpack.i.h.bf16 %v16633_v25  ;;  %v16636_v14 = vrot.slane %v13530_v6, 1  ;;  %v16637_v37 = vrot.slane %v13514_v42, 1 }
 0x367   :  { %v5077_v56 = vsel %vm4826_vm5, %v5045_v26, %v16634_v55  ;;  %v16638_v32 = vrot.slane %v13532_v45, 1  ;;  %v16647_v40 = vrot.slane %v13223_v36, 3 }
 0x368   :  { %v5078_v5 = vsel %vm4826_vm5, %v5046_v12, %v16635_v20  ;;  %v13852_v41 = vsel %vm2659_vm1, %v16637_v37, %v16636_v14  ;;  %v16639_v61 = vmov %v16636_v14  ;;  %v13862_v26 = vsel %vm4859_vm6, %v5077_v56, %v7121_v58  ;;  %v13874_v14 = vpop.permute.xlu1 %7129  ;;  %v16644_v37 = vld [vmem:[#allocation157_spill] sm:$0xff] }
 0x369   :  { %v13859_v48 = vsel %vm2659_vm1, %v16639_v61, %v16638_v32  ;;  %16640 = vst [vmem:[#allocation81_spill] sm:$0xff] %v13862_v26  ;;  %v13865_v25 = vsel %vm4859_vm6, %v5078_v5, %v7122_v44  ;;  %v16642_v12 = vpack.i.bf16 %v13223_v36, %v13162_v57  ;;  %v15760_v20 = vrot.slane %v13530_v6, 3  ;;  %16643 = vst [vmem:[#allocation45_spill] sm:$0xff] %v13874_v14 }
 0x36a   :  { %16641 = vst [vmem:[#allocation82_spill] sm:$0xff] %v13865_v25  ;;  %v4926_v58 = vsel %vm4924_vm7, %v16644_v37, %v7232_v29  ;;  %v16645_v44 = vrot.slane %v13162_v57, 3  ;;  %v16646_v56 = vrot.slane %v13095_v21, 3  ;;  %v7245_v29 = vpop.permute.xlu0 %7244  ;;  %v16650_v37 = vld [vmem:[#allocation88_spill] sm:$0xff]  ;;  %v16665_v25 = vld [vmem:[#allocation93_spill] sm:$0xff] }
 0x36b   :  { %7514 = vrot.lane.b32.xlu1 %v16642_v12, %s7725_s21  ;;  %v16649_v12 = vpack.i.bf16 %v13504_v34, %v13477_v8  ;;  %v16651_v55 = vunpack.i.l.bf16 %v16650_v37  ;;  %v7247_v27 = vunpack.i.h.bf16 %v7245_v29  ;;  %v7246_v34 = vunpack.i.l.bf16 %v7245_v29 }
 0x36c   :  { %v13883_v5 = vsel %vm3564_vm3, %v16646_v56, %v16645_v44  ;;  %v16648_v32 = vmov %v16645_v44  ;;  %v16652_v56 = vrot.slane %v13532_v45, 3  ;;  %v16653_v8 = vrot.slane %v13162_v57, 4 }
 0x36d   :  { %v13890_v61 = vsel %vm3564_vm3, %v16648_v32, %v16647_v40  ;;  %7459 = vrot.lane.b32.xlu0 %v16649_v12, %s7725_s21  ;;  %v4958_v47 = vsel %vm4957_vm8, %v4925_v17, %v16651_v55  ;;  %v15759_v32 = vrot.slane %v13530_v6, 4  ;;  %v16654_v12 = vrot.slane %v13095_v21, 4 }
 0x36e   :  { %v13906_v40 = vsel %vm3564_vm3, %v15760_v20, %v16652_v56  ;;  %v16655_v55 = vrot.slane %v13223_v36, 4  ;;  %v16656_v44 = vmov %v16653_v8  ;;  %v16657_v56 = vpack.i.bf16 %v13528_v46, %v13511_v62  ;;  %v7135_v46 = vpop.permute.xlu1 %7134  ;;  %v7250_v57 = vpop.permute.xlu0 %7249 }
 0x36f   :  { %v13914_v17 = vsel %vm3824_vm2, %v16654_v12, %v16653_v8  ;;  %v16658_v29 = vunpack.i.h.bf16 %v16650_v37  ;;  %v16659_v12 = vrot.slane %v13532_v45, 4  ;;  %v7236_v62 = vunpack.i.l.bf16 %v7235_v60 }
 0x370   :  { %v13921_v7 = vsel %vm3824_vm2, %v16656_v44, %v16655_v55  ;;  %7529 = vrot.lane.b32.xlu1 %v16657_v56, %s7726_s22  ;;  %v7237_v44 = vunpack.i.h.bf16 %v7235_v60  ;;  %v5151_v37 = vsel %vm4924_vm7, %v12625_v11, %v7246_v34  ;;  %v16661_v55 = vrot.slane %v16291_v13, 4 }
 0x371   :  { %v4959_v18 = vsel %vm4957_vm8, %v4926_v58, %v16658_v29  ;;  %v13937_v36 = vsel %vm3824_vm2, %v15759_v32, %v16659_v12  ;;  %v16660_v58 = vld [vmem:[#allocation13_spill] sm:$0xff]  ;;  %v16662_v29 = vpack.i.bf16 %v13565_v38, %v13558_v4  ;;  %v7137_v12 = vunpack.i.h.bf16 %v7135_v46 }
 0x372   :  { %v13947_v56 = vsel %vm3824_vm2, %v16661_v55, %v16660_v58  ;;  %v7136_v8 = vunpack.i.l.bf16 %v7135_v46  ;;  %v16663_v32 = vld [vmem:[#allocation97_spill] sm:$0xff]  ;;  %v5152_v11 = vsel %vm4924_vm7, %v16665_v25, %v7247_v27  ;;  %v7252_v34 = vunpack.i.h.bf16 %v7250_v57  ;;  %v16671_v27 = vld [vmem:[#allocation8_spill] sm:$0xff]  ;;  %v13997_v14 = vpop.permute.xlu0 %7269 }
 0x373   :  { %7464 = vrot.lane.b32.xlu0 %v16662_v29, %s7726_s22  ;;  %v16664_v60 = vunpack.i.l.bf16 %v16663_v32  ;;  %v7251_v26 = vunpack.i.l.bf16 %v7250_v57  ;;  %v16666_v58 = vrot.slane %v13279_v63, 1  ;;  %v16667_v55 = vrot.slane %v13266_v49, 1 }
 0x374   :  { %v16668_v4 = vrot.slane %v13305_v28, 1  ;;  %v4820_v25 = vsel %vm4793_vm4, %v16671_v27, %v7136_v8  ;;  %v16672_v57 = vpack.i.bf16 %v13586_v59, %v13572_v9  ;;  %v4991_v27 = vsel %vm4990_vm9, %v4958_v47, %v7236_v62 }
 0x375   :  { %v5183_v20 = vsel %vm4957_vm8, %v5151_v37, %v16664_v60  ;;  %v13963_v22 = vsel %vm2659_vm1, %v16667_v55, %v16666_v58  ;;  %v16669_v38 = vmov %v16666_v58  ;;  %v16670_v37 = vld [vmem:[#allocation12_spill] sm:$0xff]  ;;  %v16673_v58 = vrot.slane %v13305_v28, 3 }
 0x376   :  { %v13970_v46 = vsel %vm2659_vm1, %v16669_v38, %v16668_v4  ;;  %v4821_v29 = vsel %vm4793_vm4, %v16670_v37, %v7137_v12  ;;  %7539 = vrot.lane.b32.xlu1 %v16672_v57, %s7725_s21  ;;  %v16674_v55 = vrot.slane %v13279_v63, 3  ;;  %v2497_v12 = vmax.f32 %v13769_v0, 0.0  ;;  %v7165_v38 = vpop.permute.xlu1 %7164 }
 0x377   :  { %v5215_v8 = vsel %vm4990_vm9, %v5183_v20, %v7251_v26  ;;  %v4992_v9 = vsel %vm4990_vm9, %v4959_v18, %v7237_v44  ;;  %v16675_v59 = vpack.i.bf16 %v13616_v30, %v13593_v1  ;;  %v7167_v57 = vunpack.i.h.bf16 %v7165_v38  ;;  %v16679_v20 = vld [vmem:[#allocation53_spill] sm:$0xff] }
 0x378   :  { %v13987_v4 = vsel %vm3564_vm3, %v16674_v55, %v16673_v58  ;;  %v7166_v60 = vunpack.i.l.bf16 %v7165_v38  ;;  %5317 = vmatprep.mubr.f32.mxu0 %v5215_v8  ;;  %v16676_v58 = vunpack.i.h.bf16 %v16663_v32  ;;  %v16677_v26 = vrot.slane %v13322_v33, 3 }
 0x379   :  { %7469 = vrot.lane.b32.xlu0 %v16675_v59, %s7726_s22  ;;  %v16678_v47 = vrot.slane %v13305_v28, 3  ;;  %v16680_v44 = vunpack.i.l.bf16 %v16679_v20  ;;  %v16681_v30 = vunpack.i.h.bf16 %v16679_v20  ;;  %5318 = vmatmul.mubr.f32.vlgmr.msra.gmra.mrb[104].mxu0 %v4991_v27  ;;  %v4689_v55 = vrot.slane %v13514_v42, 4 }
 0x37a   :  { %v5184_v0 = vsel %vm4957_vm8, %v5152_v11, %v16676_v58  ;;  %v16684_v27 = vrot.slane %v13279_v63, 4  ;;  %v7180_v59 = vpop.permute.xlu1 %7179  ;;  %v16685_v58 = vrot.slane %v13322_v33, 4  ;;  %v16728_v11 = vld [vmem:[#allocation100_spill] sm:$0xff] }
 0x37b   :  { %v14007_v18 = vsel %vm3564_vm3, %v16678_v47, %v16677_v26  ;;  %v4853_v1 = vsel %vm4826_vm5, %v4820_v25, %v16680_v44  ;;  %v4854_v62 = vsel %vm4826_vm5, %v4821_v29, %v16681_v30  ;;  %v5216_v32 = vsel %vm4990_vm9, %v5184_v0, %v7252_v34 }
 0x37c   :  { %v4886_v38 = vsel %vm4859_vm6, %v4853_v1, %v7166_v60  ;;  %v4887_v8 = vsel %vm4859_vm6, %v4854_v62, %v7167_v57  ;;  %v16682_v25 = vpack.i.bf16 %v13630_v24, %v13623_v43  ;;  %5322 = vmatprep.mubr.f32.mxu0 %v5216_v32  ;;  %v16683_v29 = vrot.slane %v13305_v28, 4  ;;  %v14059_v32 = vpop.permute.xlu0 %7274  ;;  %v16713_v24 = vld [vmem:[#allocation120_spill] sm:$0xff] }
 0x37d   :  { %v16687_v43 = vrot.slane %v13480_v39, 1  ;;  %v16688_v0 = vrot.slane %v13382_v51, 1  ;;  %v16690_v47 = vrot.slane %v13514_v42, 1  ;;  %v16693_v1 = vpack.i.bf16 %v13664_v35, %v13657_v3  ;;  %5323 = vmatmul.mubr.f32.gmra.mrb[106].mxu0 %v4992_v9 }
 0x37e   :  { %7544 = vrot.lane.b32.xlu1 %v16682_v25, %s7726_s22  ;;  %v14030_v34 = vsel %vm3824_vm2, %v16684_v27, %v16683_v29  ;;  %v16686_v60 = vmov %v16683_v29  ;;  %v7182_v30 = vunpack.i.h.bf16 %v7180_v59  ;;  %v7181_v62 = vunpack.i.l.bf16 %v7180_v59 }
 0x37f   :  { %v14037_v57 = vsel %vm3824_vm2, %v16686_v60, %v16685_v58  ;;  %v14046_v26 = vsel %vm2659_vm1, %v16688_v0, %v16687_v43  ;;  %v16691_v20 = vmov %v16687_v43  ;;  %7479 = vrot.lane.b32.xlu0 %v16693_v1, %s7725_s21  ;;  %v4373_v27 = vrot.slane %v2497_v12, 3 }
 0x380   :  { %16689 = vst [vmem:[#allocation157_spill] sm:$0xff] %v14046_v26  ;;  %v14053_v44 = vsel %vm2659_vm1, %v16691_v20, %v16690_v47  ;;  %v4695_v58 = vrot.slane %v2497_v12, 4  ;;  %v16694_v60 = vrot.slane %v13514_v42, 3  ;;  %v16695_v43 = vrot.slane %v13480_v39, 3 }
 0x381   :  { %16692 = vst [vmem:[#allocation88_spill] sm:$0xff] %v14053_v44  ;;  %v16697_v3 = vrot.slane %v13530_v6, 3  ;;  %v14080_v47 = vsel %vm497_vm0, %v4886_v38, %v7181_v62  ;;  %v14083_v12 = vsel %vm497_vm0, %v4887_v8, %v7182_v30  ;;  %v16702_v9 = vpack.i.bf16 %v13322_v33, %v13305_v28  ;;  %v16705_v38 = vld [vmem:[#allocation117_spill] sm:$0xff] }
 0x382   :  { %v14070_v35 = vsel %vm3564_vm3, %v16695_v43, %v16694_v60  ;;  %v16698_v59 = vmov %v16694_v60  ;;  %16700 = vst [vmem:[#allocation93_spill] sm:$0xff] %v14080_v47  ;;  %16701 = vst [vmem:[#allocation12_spill] sm:$0xff] %v14083_v12  ;;  %v16703_v1 = vrot.slane %v13480_v39, 4  ;;  %v6756_v43 = vunpack.i.l.bf16 %v16411_v52 }
 0x383   :  { %16696 = vst [vmem:[#allocation13_spill] sm:$0xff] %v14070_v35  ;;  %v14077_v0 = vsel %vm3564_vm3, %v16698_v59, %v16697_v3  ;;  %7554 = vrot.lane.b32.xlu1 %v16702_v9, %s7725_s21  ;;  %v6766_v62 = vunpack.i.l.bf16 %v16705_v38  ;;  %v14098_v3 = vpop.permute.xlu1 %7184  ;;  %v16707_v8 = vrot.slane %v13530_v6, 4  ;;  %v16709_v33 = vrot.slane %v16291_v13, 4 }
 0x384   :  { %16699 = vst [vmem:[#allocation97_spill] sm:$0xff] %v14077_v0  ;;  %v14094_v60 = vsel %vm3824_vm2, %v16703_v1, %v4689_v55  ;;  %16706 = vst [vmem:[#allocation117_spill] sm:$0xff] %v14098_v3  ;;  %v16710_v28 = vrot.slane %v12401_v50, 4  ;;  %v6767_v9 = vunpack.i.h.bf16 %v16705_v38  ;;  %v16712_v1 = vld [vmem:[#allocation118_spill] sm:$0xff]  ;;  %v6782_v25 = vunpack.i.h.bf16 %v16713_v24  ;;  %v16718_v3 = vld [vmem:[#allocation47_spill] sm:$0xff] }
 0x385   :  { %16704 = vst [vmem:[#allocation53_spill] sm:$0xff] %v14094_v60  ;;  %v14103_v30 = vsel %vm3824_vm2, %v4689_v55, %v16707_v8  ;;  %v6777_v20 = vunpack.i.h.bf16 %v16712_v1  ;;  %v6776_v29 = vunpack.i.l.bf16 %v16712_v1  ;;  %v16714_v55 = vpack.i.bf16 %v13691_v19, %v13684_v31  ;;  %v14120_v8 = vpop.permute.xlu0 %7279  ;;  %v16717_v1 = vld [vmem:[#allocation115_spill] sm:$0xff]  ;;  %v16720_v31 = vld [vmem:[#allocation101_spill] sm:$0xff]  ;;  %v16749_v0 = vld [vmem:[#allocation138_spill] sm:$0xff] }
 0x386   :  { %16708 = vst [vmem:[#allocation168_spill] sm:$0xff] %v14103_v30  ;;  %v14110_v59 = vsel %vm3824_vm2, %v16710_v28, %v16709_v33  ;;  %v6781_v50 = vunpack.i.l.bf16 %v16713_v24  ;;  %v7281_v13 = vunpack.i.l.bf16 %v14120_v8  ;;  %v16715_v33 = vrot.slane %v13532_v45, 3  ;;  %v16722_v24 = vld [vmem:[#allocation163_spill] sm:$0xff] }
 0x387   :  { %16711 = vst [vmem:[#allocation169_spill] sm:$0xff] %v14110_v59  ;;  %7484 = vrot.lane.b32.xlu0 %v16714_v55, %s7726_s22  ;;  %v16719_v12 = vunpack.i.l.bf16 %v16718_v3  ;;  %v16721_v55 = vld [vmem:[#allocation124_spill] sm:$0xff]  ;;  %v16723_v59 = vld [vmem:[#allocation162_spill] sm:$0xff]  ;;  %v16725_v38 = vrot.slane %v13532_v45, 4 }
 0x388   :  { %v14129_v28 = vsel %vm3564_vm3, %v16715_v33, %v4373_v27  ;;  %v6787_v47 = vunpack.i.h.bf16 %v16721_v55  ;;  %v16724_v35 = vpack.i.bf16 %v16722_v24, %v16723_v59  ;;  %v16727_v33 = vunpack.i.h.bf16 %v16718_v3  ;;  %v16729_v59 = vld [vmem:[#allocation22_spill] sm:$0xff]  ;;  %v14162_v3 = vpop.permute.xlu1 %7194  ;;  %v16736_v24 = vld [vmem:[#allocation125_spill] sm:$0xff] }
 0x389   :  { %16716 = vst [vmem:[#allocation118_spill] sm:$0xff] %v14129_v28  ;;  %v4833_v19 = vsel %vm4826_vm5, %v16720_v31, %v16719_v12  ;;  %v14144_v60 = vsel %vm3824_vm2, %v16725_v38, %v4695_v58  ;;  %v6786_v31 = vunpack.i.l.bf16 %v16721_v55  ;;  %v16730_v45 = vld [vmem:[#allocation10_spill] sm:$0xff]  ;;  %v16731_v38 = vpack.i.bf16 %v13095_v21, %v13014_v23  ;;  %16732 = vst [vmem:[#allocation115_spill] sm:$0xff] %v14162_v3  ;;  %v14174_v55 = vpop.permute.xlu0 %7284 }
 0x38a   :  { %7569 = vrot.lane.b32.xlu1 %v16724_v35, %s7726_s22  ;;  %16726 = vst [vmem:[#allocation120_spill] sm:$0xff] %v14144_v60  ;;  %v4834_v28 = vsel %vm4826_vm5, %v16728_v11, %v16727_v33  ;;  %v4866_v12 = vsel %vm4859_vm6, %v4833_v19, %v6766_v62  ;;  %v4803_v35 = vsel %vm4793_vm4, %v16729_v59, %v6777_v20  ;;  %v16733_v11 = vld [vmem:[#allocation103_spill] sm:$0xff]  ;;  %v16735_v20 = vld [vmem:[#allocation121_spill] sm:$0xff]  ;;  %v16737_v21 = vld [vmem:[#allocation126_spill] sm:$0xff] }
 0x38b   :  { %v4867_v30 = vsel %vm4859_vm6, %v4834_v28, %v6767_v9  ;;  %v4802_v58 = vsel %vm4793_vm4, %v16730_v45, %v6776_v29  ;;  %7494 = vrot.lane.b32.xlu0 %v16731_v38, %s7725_s21  ;;  %v5153_v62 = vsel %vm4924_vm7, %v16733_v11, %v7281_v13  ;;  %v14167_v19 = vsel %vm497_vm0, %v4866_v12, %v6781_v50  ;;  %v16738_v50 = vld [vmem:[#allocation165_spill] sm:$0xff]  ;;  %v16739_v12 = vld [vmem:[#allocation164_spill] sm:$0xff]  ;;  %v16742_v38 = vld [vmem:[#allocation51_spill] sm:$0xff] }
 0x38c   :  { %v14170_v9 = vsel %vm497_vm0, %v4867_v30, %v6782_v25  ;;  %v5030_v23 = vsel %vm4793_vm4, %v16736_v24, %v6787_v47  ;;  %v6807_v33 = vunpack.i.h.bf16 %v16737_v21  ;;  %v6806_v59 = vunpack.i.l.bf16 %v16737_v21  ;;  %v16741_v30 = vld [vmem:[#allocation123_spill] sm:$0xff]  ;;  %v16744_v28 = vld [vmem:[#allocation130_spill] sm:$0xff]  ;;  %v16745_v29 = vld [vmem:[#allocation132_spill] sm:$0xff] }
 0x38d   :  { %16734 = vst [vmem:[#allocation47_spill] sm:$0xff] %v14170_v9  ;;  %v7286_v13 = vunpack.i.l.bf16 %v14174_v55  ;;  %v16740_v25 = vpack.i.bf16 %v16738_v50, %v16739_v12  ;;  %v5029_v45 = vsel %vm4793_vm4, %v16741_v30, %v6786_v31  ;;  %v16743_v11 = vunpack.i.l.bf16 %v16742_v38  ;;  %v16746_v50 = vld [vmem:[#allocation167_spill] sm:$0xff]  ;;  %v16747_v12 = vld [vmem:[#allocation166_spill] sm:$0xff]  ;;  %v7200_v31 = vpop.permute.xlu1 %7199 }
 0x38e   :  { %v6792_v47 = vunpack.i.h.bf16 %v16744_v28  ;;  %v5185_v24 = vsel %vm4957_vm8, %v5153_v62, %v6756_v43  ;;  %v6791_v21 = vunpack.i.l.bf16 %v16744_v28  ;;  %v6822_v3 = vunpack.i.h.bf16 %v16745_v29  ;;  %v16750_v62 = vld [vmem:[#allocation49_spill] sm:$0xff] }
 0x38f   :  { %7579 = vrot.lane.b32.xlu1 %v16740_v25, %s7725_s21  ;;  %v4835_v27 = vsel %vm4826_vm5, %v4802_v58, %v16743_v11  ;;  %v6821_v60 = vunpack.i.l.bf16 %v16745_v29  ;;  %v16748_v25 = vpack.i.bf16 %v16746_v50, %v16747_v12  ;;  %v5217_v30 = vsel %vm4990_vm9, %v5185_v24, %v7286_v13  ;;  %v14212_v24 = vpop.permute.xlu0 %7289 }
 0x390   :  { %v6827_v58 = vunpack.i.h.bf16 %v16749_v0  ;;  %v6826_v11 = vunpack.i.l.bf16 %v16749_v0  ;;  %v7202_v9 = vunpack.i.h.bf16 %v7200_v31  ;;  %v7201_v43 = vunpack.i.l.bf16 %v7200_v31  ;;  %5327 = vmatprep.mubr.f32.mxu0 %v5217_v30  ;;  %v16757_v30 = vld [vmem:[#allocation25_spill] sm:$0xff] }
 0x391   :  { %7499 = vrot.lane.b32.xlu0 %v16748_v25, %s7725_s21  ;;  %v16751_v28 = vunpack.i.l.bf16 %v16750_v62  ;;  %v16752_v29 = vunpack.i.h.bf16 %v16750_v62  ;;  %v16753_v50 = vunpack.i.h.bf16 %v16742_v38  ;;  %v4868_v13 = vsel %vm4859_vm6, %v4835_v27, %v6806_v59  ;;  %v16758_v27 = vld [vmem:[#allocation113_spill] sm:$0xff] }
 0x392   :  { %v16754_v0 = vpack.i.bf16 %v13785_v53, %v13765_v10  ;;  %v14229_v59 = vsel %vm497_vm0, %v16758_v27, %v6791_v21  ;;  %v14232_v62 = vsel %vm497_vm0, %v4868_v13, %v6821_v60  ;;  %v16759_v53 = vld [vmem:[#allocation137_spill] sm:$0xff] }
 0x393   :  { %v5061_v26 = vsel %vm4826_vm5, %v5029_v45, %v16751_v28  ;;  %v5062_v44 = vsel %vm4826_vm5, %v5030_v23, %v16752_v29  ;;  %v4836_v12 = vsel %vm4826_vm5, %v4803_v35, %v16753_v50  ;;  %v16755_v45 = vld [vmem:[#allocation110_spill] sm:$0xff]  ;;  %v4824_v35 = vsel %vm4793_vm4, %v16757_v30, %v7201_v43  ;;  %v16761_v28 = vld [vmem:[#allocation128_spill] sm:$0xff]  ;;  %v16762_v29 = vld [vmem:[#allocation127_spill] sm:$0xff]  ;;  %v14254_v27 = vpop.permute.xlu0 %7299 }
 0x394   :  { %7584 = vrot.lane.b32.xlu1 %v16754_v0, %s7726_s22  ;;  %v4869_v25 = vsel %vm4859_vm6, %v4836_v12, %v6807_v33  ;;  %v14221_v31 = vsel %vm497_vm0, %v16755_v45, %v6792_v47  ;;  %v16756_v23 = vld [vmem:[#allocation34_spill] sm:$0xff]  ;;  %v16760_v47 = vpack.i.bf16 %v13815_v2, %v13792_v15  ;;  %v5032_v43 = vsel %vm4793_vm4, %v16761_v28, %v6827_v58  ;;  %v16763_v12 = vld [vmem:[#allocation145_spill] sm:$0xff]  ;;  %v16764_v0 = vld [vmem:[#allocation63_spill] sm:$0xff] }
 0x395   :  { %v4825_v38 = vsel %vm4793_vm4, %v16756_v23, %v7202_v9  ;;  %v14235_v10 = vsel %vm497_vm0, %v4869_v25, %v6822_v3  ;;  %v7210_v9 = vpop.permute.xlu1 %7209  ;;  %v5031_v21 = vsel %vm4793_vm4, %v16762_v29, %v6826_v11  ;;  %v6842_v13 = vunpack.i.h.bf16 %v16763_v12 }
 0x396   :  { %7504 = vrot.lane.b32.xlu0 %v16760_v47, %s7726_s22  ;;  %v7212_v50 = vunpack.i.h.bf16 %v7210_v9  ;;  %v7211_v60 = vunpack.i.l.bf16 %v7210_v9  ;;  %v6841_v3 = vunpack.i.l.bf16 %v16763_v12  ;;  %v16765_v25 = vunpack.i.l.bf16 %v16764_v0  ;;  %v16768_v47 = vld [vmem:[#allocation143_spill] sm:$0xff]  ;;  %v16769_v12 = vld [vmem:[#allocation56_spill] sm:$0xff] }
 0x397   :  { %v16766_v15 = vunpack.i.h.bf16 %v16764_v0  ;;  %v16767_v58 = vpack.i.bf16 %v13530_v6, %v13514_v42  ;;  %v16770_v0 = vunpack.i.l.bf16 %v16769_v12  ;;  %v16772_v42 = vld [vmem:[#allocation37_spill] sm:$0xff]  ;;  %v14286_v33 = vpop.permute.xlu0 %7304 }
 0x398   :  { %v4857_v45 = vsel %vm4826_vm5, %v4824_v35, %v16765_v25  ;;  %v16771_v25 = vunpack.i.h.bf16 %v16769_v12  ;;  %v6816_v6 = vunpack.i.l.bf16 %v16772_v42 }
 0x399   :  { %v4858_v2 = vsel %vm4826_vm5, %v4825_v38, %v16766_v15  ;;  %7594 = vrot.lane.b32.xlu1 %v16767_v58, %s7725_s21  ;;  %v4890_v28 = vsel %vm4859_vm6, %v4857_v45, %v7211_v60  ;;  %v5063_v38 = vsel %vm4826_vm5, %v5031_v21, %v16770_v0  ;;  %v16773_v58 = vpack.i.bf16 %v13831_v54, %v13824_v16  ;;  %v7220_v60 = vpop.permute.xlu1 %7219  ;;  %v16774_v45 = vld [vmem:[#allocation39_spill] sm:$0xff] }
 0x39a   :  { %v4891_v29 = vsel %vm4859_vm6, %v4858_v2, %v7212_v50  ;;  %v5064_v15 = vsel %vm4826_vm5, %v5032_v43, %v16771_v25  ;;  %v6817_v50 = vunpack.i.h.bf16 %v16772_v42  ;;  %v6831_v2 = vunpack.i.l.bf16 %v16774_v45  ;;  %v16775_v43 = vld [vmem:[#allocation43_spill] sm:$0xff] }
 0x39b   :  { %7509 = vrot.lane.b32.xlu0 %v16773_v58, %s7726_s22  ;;  %v7222_v9 = vunpack.i.h.bf16 %v7220_v60  ;;  %v7221_v35 = vunpack.i.l.bf16 %v7220_v60  ;;  %v14279_v21 = vsel %vm4859_vm6, %v5063_v38, %v6841_v3  ;;  %v14282_v12 = vsel %vm4859_vm6, %v5064_v15, %v6842_v13  ;;  %v16777_v54 = vld [vmem:[#allocation147_spill] sm:$0xff]  ;;  %v16780_v38 = vld [vmem:[#allocation6_spill] sm:$0xff] }
 0x39c   :  { %v6857_v0 = vunpack.i.h.bf16 %v16775_v43  ;;  %v6856_v25 = vunpack.i.l.bf16 %v16775_v43  ;;  %v16776_v16 = vpack.i.bf16 %v13859_v48, %v13852_v41  ;;  %v6832_v58 = vunpack.i.h.bf16 %v16774_v45  ;;  %v16782_v48 = vld [vmem:[#allocation46_spill] sm:$0xff]  ;;  %v16788_v60 = vld [vmem:[#allocation27_spill] sm:$0xff] }
 0x39d   :  { %v14295_v3 = vsel %vm497_vm0, %v4890_v28, %v7221_v35  ;;  %v14298_v13 = vsel %vm497_vm0, %v4891_v29, %v7222_v9  ;;  %v4804_v15 = vsel %vm4793_vm4, %v16780_v38, %v6816_v6  ;;  %v16781_v43 = vunpack.i.l.bf16 %v16735_v20  ;;  %v14311_v28 = vpop.permute.xlu1 %7224  ;;  %v16785_v9 = vld [vmem:[#allocation28_spill] sm:$0xff] }
 0x39e   :  { %7609 = vrot.lane.b32.xlu1 %v16776_v16, %s7726_s22  ;;  %16778 = vst [vmem:[#allocation101_spill] sm:$0xff] %v14295_v3  ;;  %16779 = vst [vmem:[#allocation124_spill] sm:$0xff] %v14298_v13  ;;  %v6846_v16 = vunpack.i.l.bf16 %v16782_v48  ;;  %v16783_v45 = vpack.i.bf16 %v13890_v61, %v13883_v5  ;;  %v4805_v29 = vsel %vm4793_vm4, %v16785_v9, %v6817_v50  ;;  %v16786_v35 = vunpack.i.h.bf16 %v16735_v20  ;;  %v16789_v61 = vld [vmem:[#allocation55_spill] sm:$0xff]  ;;  %v14328_v50 = vpop.permute.xlu0 %7319  ;;  %v16790_v20 = vld [vmem:[#allocation41_spill] sm:$0xff] }
 0x39f   :  { %v5093_v41 = vsel %vm4859_vm6, %v5061_v26, %v16781_v43  ;;  %16784 = vst [vmem:[#allocation163_spill] sm:$0xff] %v14311_v28  ;;  %v6847_v26 = vunpack.i.h.bf16 %v16782_v48  ;;  %v16787_v43 = vld [vmem:[#allocation21_spill] sm:$0xff]  ;;  %v4806_v5 = vsel %vm4793_vm4, %v16788_v60, %v6856_v25  ;;  %v6886_v11 = vunpack.i.l.bf16 %v16789_v61  ;;  %v16793_v60 = vld [vmem:[#allocation148_spill] sm:$0xff] }
 0x3a0   :  { %7519 = vrot.lane.b32.xlu0 %v16783_v45, %s7725_s21  ;;  %v5094_v6 = vsel %vm4859_vm6, %v5062_v44, %v16786_v35  ;;  %v14319_v38 = vsel %vm497_vm0, %v5093_v41, %v6831_v2  ;;  %v4807_v42 = vsel %vm4793_vm4, %v16787_v43, %v6857_v0  ;;  %v6887_v45 = vunpack.i.h.bf16 %v16789_v61  ;;  %v16791_v0 = vld [vmem:[#allocation58_spill] sm:$0xff]  ;;  %v16796_v41 = vld [vmem:[#allocation59_spill] sm:$0xff] }
 0x3a1   :  { %v14333_v44 = vsel %vm497_vm0, %v5094_v6, %v6832_v58  ;;  %v16792_v48 = vunpack.i.l.bf16 %v16791_v0  ;;  %v16794_v35 = vunpack.i.h.bf16 %v16791_v0  ;;  %v16795_v58 = vpack.i.bf16 %v13921_v7, %v13914_v17  ;;  %v7240_v6 = vpop.permute.xlu1 %7239  ;;  %v16799_v7 = vld [vmem:[#allocation57_spill] sm:$0xff] }
 0x3a2   :  { %4435 = vrot.lane.b32.xlu1 %v13906_v40, %s7725_s21  ;;  %v7282_v40 = vunpack.i.h.bf16 %v14120_v8  ;;  %v16798_v0 = vunpack.i.h.bf16 %v16796_v41  ;;  %v6862_v17 = vunpack.i.h.bf16 %v16799_v7  ;;  %v7302_v3 = vunpack.i.h.bf16 %v14254_v27 }
 0x3a3   :  { %v4837_v25 = vsel %vm4826_vm5, %v4804_v15, %v16792_v48  ;;  %v4838_v43 = vsel %vm4826_vm5, %v4805_v29, %v16794_v35  ;;  %v16797_v15 = vunpack.i.l.bf16 %v16796_v41  ;;  %v7241_v35 = vunpack.i.l.bf16 %v7240_v6  ;;  %v16805_v41 = vld [vmem:[#allocation151_spill] sm:$0xff] }
 0x3a4   :  { %v4870_v61 = vsel %vm4859_vm6, %v4837_v25, %v6846_v16  ;;  %7524 = vrot.lane.b32.xlu0 %v16795_v58, %s7726_s22  ;;  %v4871_v2 = vsel %vm4859_vm6, %v4838_v43, %v6847_v26  ;;  %v4840_v29 = vsel %vm4826_vm5, %v4807_v42, %v16798_v0  ;;  %v6861_v25 = vunpack.i.l.bf16 %v16799_v7  ;;  %v14365_v26 = vpop.permute.xlu0 %7324  ;;  %v16801_v58 = vld [vmem:[#allocation102_spill] sm:$0xff] }
 0x3a5   :  { %v4839_v48 = vsel %vm4826_vm5, %v4806_v5, %v16797_v15  ;;  %v14361_v8 = vsel %vm4859_vm6, %v4840_v29, %v6887_v45  ;;  %v16800_v5 = vld [vmem:[#allocation52_spill] sm:$0xff]  ;;  %v7242_v43 = vunpack.i.h.bf16 %v7240_v6  ;;  %v16802_v15 = vld [vmem:[#allocation150_spill] sm:$0xff]  ;;  %v7301_v0 = vunpack.i.l.bf16 %v14254_v27 }
 0x3a6   :  { %v14358_v16 = vsel %vm4859_vm6, %v4839_v48, %v6886_v11  ;;  %4757 = vrot.lane.b32.xlu1 %v13937_v36, %s7726_s22  ;;  %v4927_v11 = vsel %vm4924_vm7, %v16801_v58, %v7241_v35  ;;  %v6867_v45 = vunpack.i.h.bf16 %v16802_v15  ;;  %v7287_v48 = vunpack.i.h.bf16 %v14174_v55  ;;  %v7255_v36 = vpop.permute.xlu1 %7254  ;;  %v16804_v7 = vld [vmem:[#allocation106_spill] sm:$0xff] }
 0x3a7   :  { %v16803_v29 = vpack.i.bf16 %v13279_v63, %v13266_v49  ;;  %v5154_v9 = vsel %vm4924_vm7, %v16804_v7, %v7282_v40  ;;  %v6866_v6 = vunpack.i.l.bf16 %v16802_v15  ;;  %v6907_v42 = vunpack.i.h.bf16 %v16805_v41  ;;  %v16806_v40 = vld [vmem:[#allocation9_spill] sm:$0xff] }
 0x3a8   :  { %v6906_v35 = vunpack.i.l.bf16 %v16805_v41  ;;  %v7256_v58 = vunpack.i.l.bf16 %v7255_v36  ;;  %v14386_v55 = vsel %vm497_vm0, %v4870_v61, %v6861_v25  ;;  %v14389_v13 = vsel %vm497_vm0, %v4871_v2, %v6862_v17  ;;  %v14392_v63 = vpop.permute.xlu0 %7329  ;;  %v16809_v2 = vld [vmem:[#allocation86_spill] sm:$0xff] }
 0x3a9   :  { %7534 = vrot.lane.b32.xlu0 %v16803_v29, %s7725_s21  ;;  %v7276_v49 = vunpack.i.l.bf16 %v14059_v32  ;;  %v16807_v15 = vunpack.i.l.bf16 %v16806_v40  ;;  %v7257_v7 = vunpack.i.h.bf16 %v7255_v36  ;;  %v16808_v61 = vunpack.i.h.bf16 %v16411_v52 }
 0x3aa   :  { %4598 = vrot.lane.b32.xlu1 %v13947_v56, %s7724_s13  ;;  %v4928_v17 = vsel %vm4924_vm7, %v16809_v2, %v7242_v43  ;;  %v7306_v28 = vunpack.i.l.bf16 %v14286_v33  ;;  %v16810_v56 = vpack.i.bf16 %v13970_v46, %v13963_v22  ;;  %v5155_v52 = vsel %vm4924_vm7, %v14229_v59, %v7301_v0  ;;  %v16815_v46 = vld [vmem:[#allocation153_spill] sm:$0xff] }
 0x3ab   :  { %v4960_v29 = vsel %vm4957_vm8, %v4927_v11, %v16807_v15  ;;  %v5186_v25 = vsel %vm4957_vm8, %v5154_v9, %v16808_v61  ;;  %v14411_v11 = vpop.permute.xlu1 %7259  ;;  %v16811_v9 = vld [vmem:[#allocation131_spill] sm:$0xff]  ;;  %v16813_v15 = vld [vmem:[#allocation134_spill] sm:$0xff]  ;;  %v16814_v61 = vld [vmem:[#allocation133_spill] sm:$0xff]  ;;  %v16817_v2 = vunpack.i.l.bf16 %v16759_v53 }
 0x3ac   :  { %v4993_v41 = vsel %vm4990_vm9, %v4960_v29, %v7256_v58  ;;  %v5218_v36 = vsel %vm4990_vm9, %v5186_v25, %v7287_v48  ;;  %v5034_v43 = vsel %vm4793_vm4, %v16811_v9, %v6867_v45  ;;  %v16812_v58 = vld [vmem:[#allocation129_spill] sm:$0xff]  ;;  %v5036_v29 = vsel %vm4793_vm4, %v16813_v15, %v6907_v42  ;;  %v14427_v59 = vpop.permute.xlu0 %7339 }
 0x3ad   :  { %7549 = vrot.lane.b32.xlu0 %v16810_v56, %s7726_s22  ;;  %5328 = vmatmul.mubr.f32.gmra.mrb[108].mxu0 %v4993_v41  ;;  %v5033_v27 = vsel %vm4793_vm4, %v16812_v58, %v6866_v6  ;;  %v5035_v22 = vsel %vm4793_vm4, %v16814_v61, %v6906_v35  ;;  %v6872_v41 = vunpack.i.h.bf16 %v16815_v46  ;;  %v6871_v48 = vunpack.i.l.bf16 %v16815_v46  ;;  %v16818_v56 = vld [vmem:[#allocation3_spill] sm:$0xff] }
 0x3ae   :  { %5332 = vmatprep.mubr.f32.mxu0 %v5218_v36  ;;  %v7277_v25 = vunpack.i.h.bf16 %v14059_v32  ;;  %v16816_v45 = vunpack.i.h.bf16 %v16806_v40  ;;  %v7291_v6 = vunpack.i.l.bf16 %v14212_v24  ;;  %v5187_v35 = vsel %vm4957_vm8, %v5155_v52, %v16817_v2  ;;  %v16820_v40 = vld [vmem:[#allocation17_spill] sm:$0xff] }
 0x3af   :  { %v4929_v36 = vsel %vm4924_vm7, %v16818_v56, %v7276_v49  ;;  %v7307_v9 = vunpack.i.h.bf16 %v14286_v33  ;;  %v16819_v32 = vpack.i.bf16 %v14007_v18, %v13987_v4  ;;  %v16822_v58 = vrot.slane %v16670_v37, 3  ;;  %v7265_v15 = vpop.permute.xlu1 %7264 }
 0x3b0   :  { %v4961_v0 = vsel %vm4957_vm8, %v4928_v17, %v16816_v45  ;;  %v16821_v17 = vrot.slane %v16820_v40, 3  ;;  %v5219_v52 = vsel %vm4990_vm9, %v5187_v35, %v7306_v28  ;;  %v5156_v49 = vsel %vm4924_vm7, %v14221_v31, %v7302_v3  ;;  %v16823_v45 = vld [vmem:[#allocation26_spill] sm:$0xff]  ;;  %v14460_v56 = vpop.permute.xlu0 %7344 }
 0x3b1   :  { %v4994_v42 = vsel %vm4990_vm9, %v4961_v0, %v7257_v7  ;;  %7559 = vrot.lane.b32.xlu0 %v16819_v32, %s7725_s21  ;;  %v7272_v33 = vunpack.i.h.bf16 %v13997_v14  ;;  %v7271_v61 = vunpack.i.l.bf16 %v13997_v14  ;;  %v7267_v46 = vunpack.i.h.bf16 %v7265_v15  ;;  %v16827_v3 = vld [vmem:[#allocation98_spill] sm:$0xff] }
 0x3b2   :  { %v3619_v7 = vsel %vm3564_vm3, %v16822_v58, %v16821_v17  ;;  %5333 = vmatmul.mubr.f32.gmra.mrb[110].mxu0 %v4994_v42  ;;  %v7266_v4 = vunpack.i.l.bf16 %v7265_v15  ;;  %v7292_v18 = vunpack.i.h.bf16 %v14212_v24  ;;  %v16824_v0 = vrot.slane %v16823_v45, 3  ;;  %v16829_v15 = vld [vmem:[#allocation72_spill] sm:$0xff] }
 0x3b3   :  { %5337 = vmatprep.mubr.f32.mxu0 %v5219_v52  ;;  %v16825_v2 = vmov %v16821_v17  ;;  %v16826_v28 = vunpack.i.l.bf16 %v16717_v1  ;;  %v4930_v14 = vsel %vm4924_vm7, %v16827_v3, %v7277_v25  ;;  %v16828_v17 = vunpack.i.h.bf16 %v16759_v53 }
 0x3b4   :  { %v3621_v42 = vsel %vm3564_vm3, %v16825_v2, %v16824_v0  ;;  %v5049_v32 = vsel %vm4793_vm4, %v3619_v7, %v7266_v4  ;;  %v6922_v52 = vunpack.i.h.bf16 %v16829_v15  ;;  %v16830_v0 = vpack.i.bf16 %v14037_v57, %v14030_v34  ;;  %v16833_v57 = vld [vmem:[#allocation60_spill] sm:$0xff] }
 0x3b5   :  { %v4962_v31 = vsel %vm4957_vm8, %v4929_v36, %v16826_v28  ;;  %v5050_v35 = vsel %vm4793_vm4, %v3621_v42, %v7267_v46  ;;  %v5188_v58 = vsel %vm4957_vm8, %v5156_v49, %v16828_v17  ;;  %v7295_v36 = vpop.permute.xlu1 %7294  ;;  %v5081_v46 = vsel %vm4826_vm5, %v5049_v32, %v7271_v61 }
 0x3b6   :  { %v4995_v24 = vsel %vm4990_vm9, %v4962_v31, %v7291_v6  ;;  %7564 = vrot.lane.b32.xlu0 %v16830_v0, %s7726_s22  ;;  %v5220_v25 = vsel %vm4990_vm9, %v5188_v58, %v7307_v9  ;;  %v5082_v7 = vsel %vm4826_vm5, %v5050_v35, %v7272_v33  ;;  %v16831_v6 = vunpack.i.l.bf16 %v16800_v5 }
 0x3b7   :  { %5338 = vmatmul.mubr.f32.gmra.mrb[112].mxu0 %v4995_v24  ;;  %v16832_v49 = vunpack.i.h.bf16 %v16800_v5  ;;  %v16834_v4 = vunpack.i.l.bf16 %v16833_v57  ;;  %v6921_v61 = vunpack.i.l.bf16 %v16829_v15  ;;  %v16835_v33 = vunpack.i.h.bf16 %v16833_v57  ;;  %v16841_v15 = vld [vmem:[#allocation154_spill] sm:$0xff] }
 0x3b8   :  { %v14485_v53 = vsel %vm497_vm0, %v14358_v16, %v16831_v6  ;;  %5342 = vmatprep.mubr.f32.mxu0 %v5220_v25  ;;  %v16836_v16 = vld [vmem:[#allocation66_spill] sm:$0xff]  ;;  %v7296_v28 = vunpack.i.l.bf16 %v7295_v36  ;;  %v16838_v31 = vunpack.i.h.bf16 %v16717_v1  ;;  %v14517_v58 = vsel %vm497_vm0, %v14279_v21, %v6871_v48 }
 0x3b9   :  { %v14491_v34 = vsel %vm497_vm0, %v14361_v8, %v16832_v49  ;;  %v14496_v9 = vsel %vm4826_vm5, %v5033_v27, %v16834_v4  ;;  %v14502_v2 = vsel %vm4826_vm5, %v5034_v43, %v16835_v33  ;;  %v16837_v42 = vunpack.i.l.bf16 %v16836_v16  ;;  %v7350_v8 = vpop.permute.xlu0 %7349 }
 0x3ba   :  { %v4963_v3 = vsel %vm4957_vm8, %v4930_v14, %v16838_v31  ;;  %v16839_v27 = vunpack.i.h.bf16 %v16836_v16  ;;  %v7352_v32 = vunpack.i.h.bf16 %v7350_v8  ;;  %v7351_v24 = vunpack.i.l.bf16 %v7350_v8  ;;  %v7310_v14 = vpop.permute.xlu1 %7309 }
 0x3bb   :  { %v5067_v5 = vsel %vm4826_vm5, %v5035_v22, %v16837_v42  ;;  %v4996_v17 = vsel %vm4990_vm9, %v4963_v3, %v7292_v18  ;;  %v6881_v43 = vunpack.i.l.bf16 %v16793_v60  ;;  %v14521_v22 = vsel %vm497_vm0, %v14282_v12, %v6872_v41  ;;  %v16845_v42 = vld [vmem:[#allocation157_spill] sm:$0xff] }
 0x3bc   :  { %v5068_v35 = vsel %vm4826_vm5, %v5036_v29, %v16839_v27  ;;  %v16840_v29 = vpack.i.bf16 %v13480_v39, %v13382_v51  ;;  %5343 = vmatmul.mubr.f32.gmra.mrb[114].mxu0 %v4996_v17  ;;  %v14531_v18 = vsel %vm4859_vm6, %v5067_v5, %v6921_v61  ;;  %v6877_v21 = vunpack.i.h.bf16 %v16841_v15 }
 0x3bd   :  { %v14524_v1 = vsel %vm4859_vm6, %v5068_v35, %v6922_v52  ;;  %v6876_v48 = vunpack.i.l.bf16 %v16841_v15  ;;  %v5157_v12 = vsel %vm4924_vm7, %v14319_v38, %v7351_v24  ;;  %v16842_v41 = vrot.slane %v16757_v30, 3  ;;  %v7355_v25 = vpop.permute.xlu0 %7354 }
 0x3be   :  { %7574 = vrot.lane.b32.xlu0 %v16840_v29, %s7725_s21  ;;  %v16843_v52 = vrot.slane %v16823_v45, 3  ;;  %v7297_v51 = vunpack.i.h.bf16 %v7295_v36  ;;  %v7311_v39 = vunpack.i.l.bf16 %v7310_v14  ;;  %v4931_v6 = vsel %vm4924_vm7, %v14167_v19, %v7296_v28  ;;  %v16844_v36 = vld [vmem:[#allocation88_spill] sm:$0xff]  ;;  %v7315_v8 = vpop.permute.xlu1 %7314  ;;  %v16850_v29 = vld [vmem:[#allocation47_spill] sm:$0xff] }
 0x3bf   :  { %v7322_v49 = vunpack.i.h.bf16 %v14328_v50  ;;  %v7357_v57 = vunpack.i.h.bf16 %v7355_v25  ;;  %v7356_v4 = vunpack.i.l.bf16 %v7355_v25  ;;  %v5158_v61 = vsel %vm4924_vm7, %v14333_v44, %v7352_v32 }
 0x3c0   :  { %v3623_v0 = vsel %vm3564_vm3, %v16843_v52, %v16842_v41  ;;  %v7321_v38 = vunpack.i.l.bf16 %v14328_v50  ;;  %v7332_v33 = vunpack.i.h.bf16 %v14392_v63  ;;  %v7331_v16 = vunpack.i.l.bf16 %v14392_v63 }
 0x3c1   :  { %v16846_v5 = vpack.i.bf16 %v16844_v36, %v16845_v42  ;;  %v16847_v19 = vunpack.i.l.bf16 %v16790_v20  ;;  %v7317_v31 = vunpack.i.h.bf16 %v7315_v8  ;;  %v7316_v3 = vunpack.i.l.bf16 %v7315_v8  ;;  %v14561_v63 = vpop.permute.xlu0 %7359  ;;  %v16854_v36 = vld [vmem:[#allocation97_spill] sm:$0xff] }
 0x3c2   :  { %v16848_v50 = vunpack.i.l.bf16 %v16768_v47  ;;  %v7312_v35 = vunpack.i.h.bf16 %v7310_v14  ;;  %v16849_v24 = vunpack.i.h.bf16 %v16790_v20  ;;  %v16851_v41 = vrot.slane %v16756_v23, 3 }
 0x3c3   :  { %7589 = vrot.lane.b32.xlu0 %v16846_v5, %s7726_s22  ;;  %v5189_v28 = vsel %vm4957_vm8, %v5157_v12, %v16847_v19  ;;  %v4932_v12 = vsel %vm4924_vm7, %v16850_v29, %v7297_v51  ;;  %v16852_v52 = vrot.slane %v16757_v30, 3  ;;  %v5113_v14 = vsel %vm4859_vm6, %v5081_v46, %v7316_v3  ;;  %v16855_v51 = vld [vmem:[#allocation13_spill] sm:$0xff]  ;;  %v7335_v30 = vpop.permute.xlu1 %7334 }
 0x3c4   :  { %v5221_v44 = vsel %vm4990_vm9, %v5189_v28, %v7356_v4  ;;  %v4964_v27 = vsel %vm4957_vm8, %v4931_v6, %v16848_v50  ;;  %v5190_v17 = vsel %vm4957_vm8, %v5158_v61, %v16849_v24  ;;  %v5114_v6 = vsel %vm4859_vm6, %v5082_v7, %v7317_v31  ;;  %v16853_v4 = vld [vmem:[#allocation77_spill] sm:$0xff]  ;;  %v16859_v24 = vld [vmem:[#allocation168_spill] sm:$0xff] }
 0x3c5   :  { %5347 = vmatprep.mubr.f32.mxu0 %v5221_v44  ;;  %v4997_v32 = vsel %vm4990_vm9, %v4964_v27, %v7311_v39  ;;  %v3625_v25 = vsel %vm3564_vm3, %v16852_v52, %v16851_v41  ;;  %v5222_v39 = vsel %vm4990_vm9, %v5190_v17, %v7357_v57  ;;  %v6937_v20 = vunpack.i.h.bf16 %v16853_v4  ;;  %v7370_v44 = vpop.permute.xlu0 %7369  ;;  %v16858_v27 = vld [vmem:[#allocation68_spill] sm:$0xff]  ;;  %v16860_v17 = vld [vmem:[#allocation53_spill] sm:$0xff] }
 0x3c6   :  { %5348 = vmatmul.mubr.f32.gmra.mrb[116].mxu0 %v4997_v32  ;;  %v5052_v61 = vsel %vm4793_vm4, %v3625_v25, %v7332_v33  ;;  %v16856_v42 = vpack.i.bf16 %v16854_v36, %v16855_v51  ;;  %v14584_v5 = vsel %vm497_vm0, %v5113_v14, %v7321_v38  ;;  %v14587_v46 = vsel %vm497_vm0, %v5114_v6, %v7322_v49  ;;  %v16862_v41 = vld [vmem:[#allocation61_spill] sm:$0xff] }
 0x3c7   :  { %5352 = vmatprep.mubr.f32.mxu0 %v5222_v39  ;;  %v5051_v7 = vsel %vm4793_vm4, %v3623_v0, %v7331_v16  ;;  %v7337_v57 = vunpack.i.h.bf16 %v7335_v30  ;;  %v7336_v8 = vunpack.i.l.bf16 %v7335_v30  ;;  %v16857_v19 = vunpack.i.h.bf16 %v16768_v47  ;;  %v14605_v29 = vpop.permute.xlu1 %7364  ;;  %v16863_v14 = vld [vmem:[#allocation73_spill] sm:$0xff] }
 0x3c8   :  { %7599 = vrot.lane.b32.xlu0 %v16856_v42, %s7725_s21  ;;  %v7342_v28 = vunpack.i.h.bf16 %v14427_v59  ;;  %v7341_v31 = vunpack.i.l.bf16 %v14427_v59  ;;  %v7346_v3 = vunpack.i.l.bf16 %v14460_v56  ;;  %v7372_v0 = vunpack.i.h.bf16 %v7370_v44 }
 0x3c9   :  { %v4965_v33 = vsel %vm4957_vm8, %v4932_v12, %v16857_v19  ;;  %v5083_v49 = vsel %vm4826_vm5, %v5051_v7, %v7336_v8  ;;  %v5084_v50 = vsel %vm4826_vm5, %v5052_v61, %v7337_v57  ;;  %v7371_v16 = vunpack.i.l.bf16 %v7370_v44  ;;  %v7375_v51 = vpop.permute.xlu0 %7374  ;;  %v16864_v19 = vld [vmem:[#allocation29_spill] sm:$0xff] }
 0x3ca   :  { %v4998_v38 = vsel %vm4990_vm9, %v4965_v33, %v7312_v35  ;;  %v6936_v47 = vunpack.i.l.bf16 %v16853_v4  ;;  %v6897_v32 = vunpack.i.h.bf16 %v16858_v27  ;;  %v16861_v59 = vpack.i.bf16 %v16859_v24, %v16860_v17  ;;  %v16865_v33 = vld [vmem:[#allocation33_spill] sm:$0xff]  ;;  %v16870_v24 = vld [vmem:[#allocation14_spill] sm:$0xff] }
 0x3cb   :  { %5353 = vmatmul.mubr.f32.gmra.mrb[118].mxu0 %v4998_v38  ;;  %v5115_v35 = vsel %vm4859_vm6, %v5083_v49, %v7341_v31  ;;  %v5116_v12 = vsel %vm4859_vm6, %v5084_v50, %v7342_v28  ;;  %v6932_v52 = vunpack.i.h.bf16 %v16862_v41  ;;  %v6931_v25 = vunpack.i.l.bf16 %v16862_v41  ;;  %v16867_v44 = vld [vmem:[#allocation169_spill] sm:$0xff] }
 0x3cc   :  { %7604 = vrot.lane.b32.xlu0 %v16861_v59, %s7726_s22  ;;  %v6892_v6 = vunpack.i.h.bf16 %v16863_v14  ;;  %v5159_v39 = vsel %vm4924_vm7, %v14517_v58, %v7371_v16  ;;  %v6891_v4 = vunpack.i.l.bf16 %v16863_v14  ;;  %v7347_v61 = vunpack.i.h.bf16 %v14460_v56  ;;  %v16866_v56 = vld [vmem:[#allocation35_spill] sm:$0xff] }
 0x3cd   :  { %v7361_v36 = vunpack.i.l.bf16 %v14561_v63  ;;  %v4933_v42 = vsel %vm4924_vm7, %v14232_v62, %v7346_v3  ;;  %v6896_v30 = vunpack.i.l.bf16 %v16858_v27  ;;  %v7377_v7 = vunpack.i.h.bf16 %v7375_v51  ;;  %v14632_v62 = vpop.permute.xlu1 %7379  ;;  %v16871_v59 = vld [vmem:[#allocation75_spill] sm:$0xff] }
 0x3ce   :  { %v7376_v57 = vunpack.i.l.bf16 %v7375_v51  ;;  %v5160_v8 = vsel %vm4924_vm7, %v14521_v22, %v7372_v0  ;;  %v4811_v58 = vsel %vm4793_vm4, %v16864_v19, %v6937_v20  ;;  %v4810_v28 = vsel %vm4793_vm4, %v16865_v33, %v6936_v47  ;;  %v16868_v22 = vld [vmem:[#allocation65_spill] sm:$0xff]  ;;  %v14644_v47 = vpop.permute.xlu0 %7394 }
 0x3cf   :  { %v14628_v31 = vsel %vm4793_vm4, %v16866_v56, %v6897_v32  ;;  %v5191_v3 = vsel %vm4957_vm8, %v5159_v39, %v6876_v48  ;;  %v6912_v38 = vunpack.i.h.bf16 %v16868_v22  ;;  %v6911_v20 = vunpack.i.l.bf16 %v16868_v22 }
 0x3d0   :  { %4596 = vrot.lane.b32.xlu0 %v16867_v44, %s7724_s13  ;;  %v5223_v49 = vsel %vm4990_vm9, %v5191_v3, %v7376_v57  ;;  %v16869_v50 = vunpack.i.l.bf16 %v16777_v54  ;;  %v7362_v16 = vunpack.i.h.bf16 %v14561_v63  ;;  %v5192_v48 = vsel %vm4957_vm8, %v5160_v8, %v6877_v21 }
 0x3d1   :  { %5357 = vmatprep.mubr.f32.mxu0 %v5223_v49  ;;  %v4934_v32 = vsel %vm4924_vm7, %v14235_v10, %v7347_v61  ;;  %v4808_v17 = vsel %vm4793_vm4, %v16870_v24, %v6896_v30  ;;  %v6962_v39 = vunpack.i.h.bf16 %v16871_v59  ;;  %v6961_v51 = vunpack.i.l.bf16 %v16871_v59  ;;  %v16873_v61 = vld [vmem:[#allocation76_spill] sm:$0xff]  ;;  %v16874_v30 = vld [vmem:[#allocation118_spill] sm:$0xff]  ;;  %v7385_v57 = vpop.permute.xlu1 %7384 }
 0x3d2   :  { %v4966_v0 = vsel %vm4957_vm8, %v4933_v42, %v16869_v50  ;;  %v5224_v63 = vsel %vm4990_vm9, %v5192_v48, %v7377_v7  ;;  %v5097_v15 = vsel %vm4859_vm6, %v14496_v9, %v6881_v43  ;;  %v16872_v21 = vunpack.i.h.bf16 %v16793_v60  ;;  %v7400_v3 = vpop.permute.xlu0 %7399  ;;  %v16881_v24 = vld [vmem:[#allocation156_spill] sm:$0xff] }
 0x3d3   :  { %v4999_v27 = vsel %vm4990_vm9, %v4966_v0, %v7361_v36  ;;  %v6967_v36 = vunpack.i.h.bf16 %v16873_v61  ;;  %v6966_v42 = vunpack.i.l.bf16 %v16873_v61  ;;  %v5129_v7 = vsel %vm497_vm0, %v5097_v15, %v6911_v20 }
 0x3d4   :  { %5358 = vmatmul.mubr.f32.gmra.mrb[120].mxu0 %v4999_v27  ;;  %v5098_v10 = vsel %vm4859_vm6, %v14502_v2, %v16872_v21  ;;  %4437 = vrot.lane.b32.xlu0 %v16874_v30, %s7725_s21  ;;  %v7387_v8 = vunpack.i.h.bf16 %v7385_v57  ;;  %v7386_v19 = vunpack.i.l.bf16 %v7385_v57  ;;  %v16875_v9 = vunpack.i.h.bf16 %v16777_v54  ;;  %v16876_v2 = vld [vmem:[#allocation67_spill] sm:$0xff] }
 0x3d5   :  { %5362 = vmatprep.mubr.f32.mxu0 %v5224_v63  ;;  %v5130_v43 = vsel %vm497_vm0, %v5098_v10, %v6912_v38  ;;  %v16877_v33 = vunpack.i.l.bf16 %v16876_v2  ;;  %v7366_v44 = vunpack.i.l.bf16 %v14605_v29  ;;  %v7402_v54 = vunpack.i.h.bf16 %v7400_v3  ;;  %v16879_v27 = vld [vmem:[#allocation79_spill] sm:$0xff] }
 0x3d6   :  { %v4967_v60 = vsel %vm4957_vm8, %v4934_v32, %v16875_v9  ;;  %v14680_v49 = vsel %vm497_vm0, %v5115_v35, %v7386_v19  ;;  %v14683_v20 = vsel %vm497_vm0, %v5116_v12, %v7387_v8  ;;  %v7401_v50 = vunpack.i.l.bf16 %v7400_v3  ;;  %v14693_v35 = vpop.permute.xlu1 %7389  ;;  %v7405_v30 = vpop.permute.xlu0 %7404 }
 0x3d7   :  { %v4843_v56 = vsel %vm4826_vm5, %v4810_v28, %v16877_v33  ;;  %v5000_v22 = vsel %vm4990_vm9, %v4967_v60, %v7362_v16  ;;  %v16878_v38 = vunpack.i.h.bf16 %v16876_v2  ;;  %v6982_v48 = vunpack.i.h.bf16 %v16879_v27  ;;  %v16880_v16 = vld [vmem:[#allocation120_spill] sm:$0xff]  ;;  %v16883_v2 = vld [vmem:[#allocation83_spill] sm:$0xff] }
 0x3d8   :  { %5363 = vmatmul.mubr.f32.gmra.mrb[122].mxu0 %v5000_v22  ;;  %v4876_v28 = vsel %vm4859_vm6, %v4843_v56, %v6966_v42  ;;  %v6981_v32 = vunpack.i.l.bf16 %v16879_v27  ;;  %4759 = vrot.lane.b32.xlu0 %v16880_v16, %s7726_s22  ;;  %v6917_v63 = vunpack.i.h.bf16 %v16881_v24  ;;  %v6916_v15 = vunpack.i.l.bf16 %v16881_v24 }
 0x3d9   :  { %v4844_v0 = vsel %vm4826_vm5, %v4811_v58, %v16878_v38  ;;  %v5161_v21 = vsel %vm4924_vm7, %v5129_v7, %v7401_v50  ;;  %v16882_v58 = vld [vmem:[#allocation158_spill] sm:$0xff]  ;;  %v7367_v61 = vunpack.i.h.bf16 %v14605_v29  ;;  %v7381_v42 = vunpack.i.l.bf16 %v14632_v62 }
 0x3da   :  { %v4877_v12 = vsel %vm4859_vm6, %v4844_v0, %v6967_v36  ;;  %v6987_v10 = vunpack.i.h.bf16 %v16882_v58  ;;  %v4935_v57 = vsel %vm4924_vm7, %v14386_v55, %v7366_v44  ;;  %v6986_v8 = vunpack.i.l.bf16 %v16882_v58  ;;  %v14713_v33 = vpop.permute.xlu1 %7414  ;;  %v16884_v44 = vld [vmem:[#allocation69_spill] sm:$0xff]  ;;  %v14725_v38 = vpop.permute.xlu0 %7409 }
 0x3db   :  { %v7407_v19 = vunpack.i.h.bf16 %v7405_v30  ;;  %v7406_v36 = vunpack.i.l.bf16 %v7405_v30  ;;  %v5162_v9 = vsel %vm4924_vm7, %v5130_v43, %v7402_v54  ;;  %v14707_v60 = vsel %vm497_vm0, %v4876_v28, %v6981_v32  ;;  %v16887_v32 = vld [vmem:[#allocation141_spill] sm:$0xff] }
 0x3dc   :  { %v14710_v7 = vsel %vm497_vm0, %v4877_v12, %v6982_v48  ;;  %v6927_v29 = vunpack.i.h.bf16 %v16883_v2  ;;  %v5193_v56 = vsel %vm4957_vm8, %v5161_v21, %v6916_v15  ;;  %v6926_v55 = vunpack.i.l.bf16 %v16883_v2  ;;  %v16886_v48 = vld [vmem:[#allocation135_spill] sm:$0xff]  ;;  %v16888_v12 = vld [vmem:[#allocation85_spill] sm:$0xff] }
 0x3dd   :  { %v16885_v3 = vunpack.i.l.bf16 %v16884_v44  ;;  %v5225_v43 = vsel %vm4990_vm9, %v5193_v56, %v7406_v36  ;;  %v4968_v54 = vsel %vm4957_vm8, %v4935_v57, %v6891_v4  ;;  %v7382_v50 = vunpack.i.h.bf16 %v14632_v62  ;;  %v16889_v15 = vld [vmem:[#allocation105_spill] sm:$0xff]  ;;  %v16892_v36 = vld [vmem:[#allocation78_spill] sm:$0xff] }
 0x3de   :  { %5367 = vmatprep.mubr.f32.mxu0 %v5225_v43  ;;  %v5001_v0 = vsel %vm4990_vm9, %v4968_v54, %v7381_v42  ;;  %v5194_v28 = vsel %vm4957_vm8, %v5162_v9, %v6917_v63  ;;  %v4936_v27 = vsel %vm4924_vm7, %v14389_v13, %v7367_v61  ;;  %v5039_v16 = vsel %vm4793_vm4, %v16887_v32, %v6986_v8  ;;  %v16890_v58 = vld [vmem:[#allocation89_spill] sm:$0xff]  ;;  %v14741_v13 = vpop.permute.xlu1 %7429 }
 0x3df   :  { %v4841_v22 = vsel %vm4826_vm5, %v4808_v17, %v16885_v3  ;;  %v5040_v17 = vsel %vm4793_vm4, %v16886_v48, %v6987_v10  ;;  %v6941_v4 = vunpack.i.l.bf16 %v16888_v12  ;;  %5368 = vmatmul.mubr.f32.gmra.mrb[124].mxu0 %v5001_v0  ;;  %v5226_v62 = vsel %vm4990_vm9, %v5194_v28, %v7407_v19  ;;  %v16895_v28 = vld [vmem:[#allocation84_spill] sm:$0xff] }
 0x3e0   :  { %v6942_v24 = vunpack.i.h.bf16 %v16888_v12  ;;  %v7002_v21 = vunpack.i.h.bf16 %v16889_v15  ;;  %v7001_v63 = vunpack.i.l.bf16 %v16889_v15  ;;  %v6951_v42 = vunpack.i.l.bf16 %v16890_v58  ;;  %5372 = vmatprep.mubr.f32.mxu0 %v5226_v62  ;;  %v16897_v15 = vld [vmem:[#allocation87_spill] sm:$0xff] }
 0x3e1   :  { %v16891_v10 = vunpack.i.h.bf16 %v16884_v44  ;;  %v4874_v30 = vsel %vm4859_vm6, %v4841_v22, %v6926_v55  ;;  %v6952_v57 = vunpack.i.h.bf16 %v16890_v58  ;;  %v4969_v8 = vsel %vm4957_vm8, %v4936_v27, %v6892_v6  ;;  %v7420_v44 = vpop.permute.xlu0 %7419 }
 0x3e2   :  { %v16893_v9 = vunpack.i.l.bf16 %v16892_v36  ;;  %v7396_v56 = vunpack.i.l.bf16 %v14644_v47  ;;  %v5002_v3 = vsel %vm4990_vm9, %v4969_v8, %v7382_v50  ;;  %v16894_v55 = vunpack.i.h.bf16 %v16892_v36  ;;  %v7435_v0 = vpop.permute.xlu1 %7434 }
 0x3e3   :  { %v4842_v61 = vsel %vm4826_vm5, %v14628_v31, %v16891_v10  ;;  %v14759_v31 = vsel %vm497_vm0, %v4874_v30, %v6941_v4  ;;  %v7422_v22 = vunpack.i.h.bf16 %v7420_v44  ;;  %v7421_v6 = vunpack.i.l.bf16 %v7420_v44  ;;  %5373 = vmatmul.mubr.f32.gmra.mrb[126].mxu0 %v5002_v3 }
 0x3e4   :  { %v4875_v19 = vsel %vm4859_vm6, %v4842_v61, %v6927_v29  ;;  %v5071_v2 = vsel %vm4826_vm5, %v5039_v16, %v16893_v9  ;;  %v5072_v14 = vsel %vm4826_vm5, %v5040_v17, %v16894_v55  ;;  %v5131_v50 = vsel %vm497_vm0, %v14531_v18, %v6951_v42  ;;  %v16896_v16 = vld [vmem:[#allocation108_spill] sm:$0xff]  ;;  %v16899_v55 = vld [vmem:[#allocation31_spill] sm:$0xff] }
 0x3e5   :  { %v14765_v29 = vsel %vm497_vm0, %v4875_v19, %v6942_v24  ;;  %v14768_v43 = vsel %vm4859_vm6, %v5071_v2, %v7001_v63  ;;  %v14771_v54 = vsel %vm4859_vm6, %v5072_v14, %v7002_v21  ;;  %v6947_v27 = vunpack.i.h.bf16 %v16895_v28  ;;  %v7425_v24 = vpop.permute.xlu0 %7424  ;;  %v16942_v21 = vld [vmem:[#allocation93_spill] sm:$0xff] }
 0x3e6   :  { %v6946_v48 = vunpack.i.l.bf16 %v16895_v28  ;;  %v5132_v17 = vsel %vm497_vm0, %v14524_v1, %v6952_v57  ;;  %v5163_v32 = vsel %vm4924_vm7, %v5131_v50, %v7421_v6  ;;  %v6956_v12 = vunpack.i.l.bf16 %v16896_v16  ;;  %v7445_v30 = vpop.permute.xlu1 %7444 }
 0x3e7   :  { %v7397_v4 = vunpack.i.h.bf16 %v14644_v47  ;;  %v7411_v62 = vunpack.i.l.bf16 %v14725_v38  ;;  %v4937_v18 = vsel %vm4924_vm7, %v14485_v53, %v7396_v56  ;;  %v7427_v63 = vunpack.i.h.bf16 %v7425_v24  ;;  %v16898_v47 = vld [vmem:[#allocation90_spill] sm:$0xff] }
 0x3e8   :  { %v7426_v58 = vunpack.i.l.bf16 %v7425_v24  ;;  %v5164_v42 = vsel %vm4924_vm7, %v5132_v17, %v7422_v22  ;;  %v6957_v1 = vunpack.i.h.bf16 %v16896_v16  ;;  %v7437_v10 = vunpack.i.h.bf16 %v7435_v0  ;;  %v16903_v17 = vld [vmem:[#allocation142_spill] sm:$0xff]  ;;  %v16904_v16 = vld [vmem:[#allocation32_spill] sm:$0xff] }
 0x3e9   :  { %v7436_v61 = vunpack.i.l.bf16 %v7435_v0  ;;  %v5195_v57 = vsel %vm4957_vm8, %v5163_v32, %v6956_v12  ;;  %v7017_v8 = vunpack.i.h.bf16 %v16898_v47  ;;  %v7016_v19 = vunpack.i.l.bf16 %v16898_v47  ;;  %v7440_v2 = vpop.permute.xlu0 %7439 }
 0x3ea   :  { %v5227_v36 = vsel %vm4990_vm9, %v5195_v57, %v7426_v58  ;;  %v4970_v53 = vsel %vm4957_vm8, %v4937_v18, %v6931_v25  ;;  %v7412_v9 = vunpack.i.h.bf16 %v14725_v38  ;;  %v5196_v44 = vsel %vm4957_vm8, %v5164_v42, %v6957_v1  ;;  %v16902_v38 = vld [vmem:[#allocation146_spill] sm:$0xff] }
 0x3eb   :  { %5377 = vmatprep.mubr.f32.mxu0 %v5227_v36  ;;  %v5003_v56 = vsel %vm4990_vm9, %v4970_v53, %v7411_v62  ;;  %v4938_v3 = vsel %vm4924_vm7, %v14491_v34, %v7397_v4  ;;  %v16900_v14 = vrot.slane %v16899_v55, 3  ;;  %v16901_v22 = vrot.slane %v16756_v23, 3  ;;  %v14813_v23 = vpop.permute.xlu1 %7474  ;;  %v16905_v4 = vld [vmem:[#allocation15_spill] sm:$0xff]  ;;  %v16908_v53 = vld [vmem:[#allocation74_spill] sm:$0xff] }
 0x3ec   :  { %v7442_v50 = vunpack.i.h.bf16 %v7440_v2  ;;  %v7441_v0 = vunpack.i.l.bf16 %v7440_v2  ;;  %5378 = vmatmul.mubr.f32.gmra.mrb[128].mxu0 %v5003_v56  ;;  %v5228_v25 = vsel %vm4990_vm9, %v5196_v44, %v7427_v63  ;;  %v5038_v28 = vsel %vm4793_vm4, %v16902_v38, %v6947_v27 }
 0x3ed   :  { %v3627_v6 = vsel %vm3564_vm3, %v16901_v22, %v16900_v14  ;;  %v5037_v32 = vsel %vm4793_vm4, %v16903_v17, %v6946_v48  ;;  %v5054_v34 = vsel %vm4793_vm4, %v16904_v16, %v7437_v10  ;;  %5382 = vmatprep.mubr.f32.mxu0 %v5228_v25  ;;  %v4815_v62 = vsel %vm4793_vm4, %v16905_v4, %v7017_v8  ;;  %v16906_v48 = vld [vmem:[#allocation20_spill] sm:$0xff]  ;;  %v7450_v1 = vpop.permute.xlu0 %7449 }
 0x3ee   :  { %v5053_v12 = vsel %vm4793_vm4, %v3627_v6, %v7436_v61  ;;  %v5086_v24 = vsel %vm4826_vm5, %v5054_v34, %v7442_v50  ;;  %v4971_v27 = vsel %vm4957_vm8, %v4938_v3, %v6932_v52  ;;  %v4814_v63 = vsel %vm4793_vm4, %v16906_v48, %v7016_v19  ;;  %v16907_v61 = vld [vmem:[#allocation94_spill] sm:$0xff]  ;;  %v16911_v3 = vld [vmem:[#allocation95_spill] sm:$0xff]  ;;  %v16913_v25 = vld [vmem:[#allocation40_spill] sm:$0xff] }
 0x3ef   :  { %v5085_v18 = vsel %vm4826_vm5, %v5053_v12, %v7441_v0  ;;  %v7447_v58 = vunpack.i.h.bf16 %v7445_v30  ;;  %v7446_v42 = vunpack.i.l.bf16 %v7445_v30  ;;  %v5004_v10 = vsel %vm4990_vm9, %v4971_v27, %v7412_v9  ;;  %v14831_v56 = vpop.permute.xlu1 %7489  ;;  %v16912_v6 = vld [vmem:[#allocation91_spill] sm:$0xff]  ;;  %v16917_v48 = vld [vmem:[#allocation24_spill] sm:$0xff] }
 0x3f0   :  { %v7047_v57 = vunpack.i.h.bf16 %v16907_v61  ;;  %v7046_v47 = vunpack.i.l.bf16 %v16907_v61  ;;  %v7452_v8 = vunpack.i.h.bf16 %v7450_v1  ;;  %v7451_v36 = vunpack.i.l.bf16 %v7450_v1  ;;  %5383 = vmatmul.mubr.f32.gmra.mrb[130].mxu0 %v5004_v10  ;;  %v16916_v34 = vld [vmem:[#allocation107_spill] sm:$0xff]  ;;  %v16944_v0 = vld [vmem:[#allocation64_spill] sm:$0xff] }
 0x3f1   :  { %v16909_v2 = vunpack.i.h.bf16 %v16908_v53  ;;  %v5117_v30 = vsel %vm4859_vm6, %v5085_v18, %v7446_v42  ;;  %v5118_v19 = vsel %vm4859_vm6, %v5086_v24, %v7447_v58  ;;  %v16910_v9 = vunpack.i.l.bf16 %v16908_v53  ;;  %v14853_v16 = vpop.permute.xlu0 %7454  ;;  %v16918_v42 = vld [vmem:[#allocation96_spill] sm:$0xff] }
 0x3f2   :  { %v6977_v55 = vunpack.i.h.bf16 %v16911_v3  ;;  %v14840_v14 = vsel %vm497_vm0, %v5117_v30, %v7451_v36  ;;  %v14843_v22 = vsel %vm497_vm0, %v5118_v19, %v7452_v8  ;;  %v16914_v38 = vunpack.i.l.bf16 %v16913_v25 }
 0x3f3   :  { %v5070_v41 = vsel %vm4826_vm5, %v5038_v28, %v16909_v2  ;;  %v5069_v44 = vsel %vm4826_vm5, %v5037_v32, %v16910_v9  ;;  %v16915_v17 = vunpack.i.h.bf16 %v16913_v25  ;;  %v6972_v12 = vunpack.i.h.bf16 %v16916_v34  ;;  %v7515_v10 = vpop.permute.xlu1 %7514 }
 0x3f4   :  { %v4847_v28 = vsel %vm4826_vm5, %v4814_v63, %v16914_v38  ;;  %v6971_v4 = vunpack.i.l.bf16 %v16916_v34  ;;  %v6976_v27 = vunpack.i.l.bf16 %v16911_v3  ;;  %v7062_v58 = vunpack.i.h.bf16 %v16917_v48  ;;  %v16921_v38 = vld [vmem:[#allocation7_spill] sm:$0xff] }
 0x3f5   :  { %v4848_v32 = vsel %vm4826_vm5, %v4815_v62, %v16915_v17  ;;  %v4880_v24 = vsel %vm4859_vm6, %v4847_v28, %v7046_v47  ;;  %v7061_v63 = vunpack.i.l.bf16 %v16917_v48  ;;  %v6991_v1 = vunpack.i.l.bf16 %v16918_v42  ;;  %v16919_v62 = vld [vmem:[#allocation11_spill] sm:$0xff]  ;;  %v16920_v47 = vld [vmem:[#allocation45_spill] sm:$0xff]  ;;  %v7460_v9 = vpop.permute.xlu0 %7459  ;;  %v16922_v28 = vld [vmem:[#allocation92_spill] sm:$0xff] }
 0x3f6   :  { %v4881_v18 = vsel %vm4859_vm6, %v4848_v32, %v7047_v57  ;;  %v14865_v61 = vsel %vm4793_vm4, %v16919_v62, %v6977_v55  ;;  %v6992_v8 = vunpack.i.h.bf16 %v16918_v42  ;;  %v7517_v36 = vunpack.i.h.bf16 %v7515_v10 }
 0x3f7   :  { %v7516_v53 = vunpack.i.l.bf16 %v7515_v10  ;;  %v5101_v57 = vsel %vm4859_vm6, %v5069_v44, %v6961_v51  ;;  %v7132_v2 = vunpack.i.h.bf16 %v16920_v47  ;;  %v7131_v30 = vunpack.i.l.bf16 %v16920_v47  ;;  %v14882_v44 = vpop.permute.xlu1 %7529  ;;  %v16923_v10 = vld [vmem:[#allocation16_spill] sm:$0xff] }
 0x3f8   :  { %v7416_v19 = vunpack.i.l.bf16 %v14713_v33  ;;  %v7462_v3 = vunpack.i.h.bf16 %v7460_v9  ;;  %v7461_v25 = vunpack.i.l.bf16 %v7460_v9  ;;  %v4948_v17 = vsel %vm4924_vm7, %v16922_v28, %v7517_v36  ;;  %v16924_v36 = vld [vmem:[#allocation99_spill] sm:$0xff]  ;;  %v16926_v28 = vld [vmem:[#allocation116_spill] sm:$0xff] }
 0x3f9   :  { %v4947_v55 = vsel %vm4924_vm7, %v16921_v38, %v7516_v53  ;;  %v5102_v32 = vsel %vm4859_vm6, %v5070_v41, %v6962_v39  ;;  %v5133_v51 = vsel %vm497_vm0, %v5101_v57, %v6991_v1  ;;  %v14888_v42 = vsel %vm4957_vm8, %v4948_v17, %v7132_v2  ;;  %v16925_v39 = vld [vmem:[#allocation104_spill] sm:$0xff] }
 0x3fa   :  { %v14885_v48 = vsel %vm4957_vm8, %v4947_v55, %v7131_v30  ;;  %v4812_v62 = vsel %vm4793_vm4, %v16923_v10, %v6976_v27  ;;  %v5134_v53 = vsel %vm497_vm0, %v5102_v32, %v6992_v8  ;;  %v7066_v47 = vunpack.i.l.bf16 %v16924_v36  ;;  %v7465_v30 = vpop.permute.xlu0 %7464 }
 0x3fb   :  { %v5165_v59 = vsel %vm4924_vm7, %v5133_v51, %v7461_v25  ;;  %v6996_v41 = vunpack.i.l.bf16 %v16925_v39  ;;  %v7417_v1 = vunpack.i.h.bf16 %v14713_v33  ;;  %v7431_v57 = vunpack.i.l.bf16 %v14741_v13  ;;  %v14907_v33 = vpop.permute.xlu1 %7539  ;;  %v16927_v51 = vld [vmem:[#allocation136_spill] sm:$0xff] }
 0x3fc   :  { %v4939_v2 = vsel %vm4924_vm7, %v14759_v31, %v7416_v19  ;;  %v7067_v9 = vunpack.i.h.bf16 %v16924_v36  ;;  %v7467_v38 = vunpack.i.h.bf16 %v7465_v30  ;;  %v7466_v27 = vunpack.i.l.bf16 %v7465_v30 }
 0x3fd   :  { %v5166_v8 = vsel %vm4924_vm7, %v5134_v53, %v7462_v3  ;;  %v14903_v55 = vsel %vm497_vm0, %v4880_v24, %v7061_v63  ;;  %v6997_v25 = vunpack.i.h.bf16 %v16925_v39  ;;  %v7026_v17 = vunpack.i.l.bf16 %v16926_v28  ;;  %v16928_v39 = vld [vmem:[#allocation139_spill] sm:$0xff] }
 0x3fe   :  { %v5197_v32 = vsel %vm4957_vm8, %v5165_v59, %v6996_v41  ;;  %v5043_v31 = vsel %vm4793_vm4, %v16927_v51, %v7066_v47  ;;  %v7027_v19 = vunpack.i.h.bf16 %v16926_v28  ;;  %v4972_v3 = vsel %vm4957_vm8, %v4939_v2, %v6971_v4  ;;  %v14916_v63 = vpop.permute.xlu0 %7469  ;;  %v16929_v4 = vld [vmem:[#allocation114_spill] sm:$0xff]  ;;  %v16930_v2 = vld [vmem:[#allocation112_spill] sm:$0xff]  ;;  %v16934_v28 = vld [vmem:[#allocation109_spill] sm:$0xff] }
 0x3ff   :  { %v5229_v10 = vsel %vm4990_vm9, %v5197_v32, %v7466_v27  ;;  %v7432_v24 = vunpack.i.h.bf16 %v14741_v13  ;;  %v5005_v53 = vsel %vm4990_vm9, %v4972_v3, %v7431_v57  ;;  %v5198_v36 = vsel %vm4957_vm8, %v5166_v8, %v6997_v25  ;;  %v16931_v8 = vld [vmem:[#allocation140_spill] sm:$0xff]  ;;  %v16941_v27 = vld [vmem:[#allocation115_spill] sm:$0xff] }
 0x400   :  { %5387 = vmatprep.mubr.f32.mxu0 %v5229_v10  ;;  %v4940_v59 = vsel %vm4924_vm7, %v14765_v29, %v7417_v1  ;;  %v14923_v47 = vsel %vm497_vm0, %v4881_v18, %v7062_v58  ;;  %v14927_v41 = vsel %vm4793_vm4, %v16928_v39, %v7067_v9  ;;  %v7031_v30 = vunpack.i.l.bf16 %v16929_v4  ;;  %v14936_v18 = vpop.permute.xlu1 %7544  ;;  %v16932_v58 = vld [vmem:[#allocation42_spill] sm:$0xff] }
 0x401   :  { %5388 = vmatmul.mubr.f32.gmra.mrb[132].mxu0 %v5005_v53  ;;  %v5230_v13 = vsel %vm4990_vm9, %v5198_v36, %v7467_v38  ;;  %v5041_v25 = vsel %vm4793_vm4, %v16931_v8, %v7026_v17  ;;  %v7032_v29 = vunpack.i.h.bf16 %v16929_v4  ;;  %v16933_v1 = vunpack.i.l.bf16 %v16932_v58  ;;  %v16935_v38 = vld [vmem:[#allocation36_spill] sm:$0xff] }
 0x402   :  { %5392 = vmatprep.mubr.f32.mxu0 %v5230_v13  ;;  %v16936_v51 = vunpack.i.l.bf16 %v16935_v38  ;;  %v4973_v17 = vsel %vm4957_vm8, %v4940_v59, %v6972_v12  ;;  %v7006_v3 = vunpack.i.l.bf16 %v16934_v28  ;;  %v16937_v53 = vld [vmem:[#allocation144_spill] sm:$0xff]  ;;  %v7456_v39 = vunpack.i.l.bf16 %v14853_v16  ;;  %v7480_v4 = vpop.permute.xlu0 %7479  ;;  %v16938_v13 = vld [vmem:[#allocation38_spill] sm:$0xff]  ;;  %v16940_v59 = vld [vmem:[#allocation159_spill] sm:$0xff] }
 0x403   :  { %v14941_v9 = vsel %vm4826_vm5, %v5043_v31, %v16933_v1  ;;  %v5042_v36 = vsel %vm4793_vm4, %v16937_v53, %v7027_v19  ;;  %v5006_v31 = vsel %vm4990_vm9, %v4973_v17, %v7432_v24  ;;  %v16939_v8 = vunpack.i.l.bf16 %v16938_v13 }
 0x404   :  { %v4845_v10 = vsel %vm4826_vm5, %v4812_v62, %v16936_v51  ;;  %v5135_v62 = vsel %vm497_vm0, %v14768_v43, %v7031_v30  ;;  %v7482_v34 = vunpack.i.h.bf16 %v7480_v4  ;;  %v7481_v51 = vunpack.i.l.bf16 %v7480_v4  ;;  %v7555_v24 = vpop.permute.xlu1 %7554 }
 0x405   :  { %v5073_v1 = vsel %vm4826_vm5, %v5041_v25, %v16939_v8  ;;  %5393 = vmatmul.mubr.f32.gmra.mrb[134].mxu0 %v5006_v31  ;;  %v5136_v12 = vsel %vm497_vm0, %v14771_v54, %v7032_v29  ;;  %v7037_v19 = vunpack.i.h.bf16 %v16940_v59  ;;  %v7036_v53 = vunpack.i.l.bf16 %v16940_v59 }
 0x406   :  { %v7197_v57 = vunpack.i.h.bf16 %v16941_v27  ;;  %v7196_v17 = vunpack.i.l.bf16 %v16941_v27  ;;  %v7557_v32 = vunpack.i.h.bf16 %v7555_v24  ;;  %v7556_v25 = vunpack.i.l.bf16 %v7555_v24  ;;  %v7485_v4 = vpop.permute.xlu0 %7484  ;;  %v16943_v27 = vld [vmem:[#allocation12_spill] sm:$0xff] }
 0x407   :  { %v5167_v8 = vsel %vm4924_vm7, %v5135_v62, %v7481_v51  ;;  %v7457_v43 = vunpack.i.h.bf16 %v14853_v16  ;;  %v7471_v30 = vunpack.i.l.bf16 %v14916_v63  ;;  %v4941_v54 = vsel %vm4924_vm7, %v14707_v60, %v7456_v39 }
 0x408   :  { %v5168_v29 = vsel %vm4924_vm7, %v5136_v12, %v7482_v34  ;;  %v7487_v31 = vunpack.i.h.bf16 %v7485_v4  ;;  %v7486_v59 = vunpack.i.l.bf16 %v7485_v4  ;;  %v4951_v50 = vsel %vm4924_vm7, %v16942_v21, %v7556_v25  ;;  %v14977_v51 = vpop.permute.xlu1 %7569 }
 0x409   :  { %v4952_v24 = vsel %vm4924_vm7, %v16943_v27, %v7557_v32  ;;  %v7071_v62 = vunpack.i.l.bf16 %v16944_v0  ;;  %v5199_v16 = vsel %vm4957_vm8, %v5167_v8, %v7036_v53  ;;  %v14981_v52 = vsel %vm4957_vm8, %v4951_v50, %v7196_v17 }
 0x40a   :  { %v14984_v60 = vsel %vm4957_vm8, %v4952_v24, %v7197_v57  ;;  %v16945_v39 = vunpack.i.h.bf16 %v16938_v13  ;;  %v7072_v21 = vunpack.i.h.bf16 %v16944_v0  ;;  %v5231_v32 = vsel %vm4990_vm9, %v5199_v16, %v7486_v59  ;;  %v14995_v8 = vpop.permute.xlu0 %7494 }
 0x40b   :  { %v16946_v12 = vunpack.i.l.bf16 %v16897_v15  ;;  %v7472_v53 = vunpack.i.h.bf16 %v14916_v63  ;;  %5397 = vmatprep.mubr.f32.mxu0 %v5231_v32  ;;  %v5200_v57 = vsel %vm4957_vm8, %v5168_v29, %v7037_v19  ;;  %v16947_v0 = vunpack.i.h.bf16 %v16935_v38  ;;  %v16952_v32 = vld [vmem:[#allocation70_spill] sm:$0xff] }
 0x40c   :  { %v5074_v34 = vsel %vm4826_vm5, %v5042_v36, %v16945_v39  ;;  %v4942_v36 = vsel %vm4924_vm7, %v14710_v7, %v7457_v43  ;;  %v4878_v17 = vsel %vm4859_vm6, %v4845_v10, %v7006_v3  ;;  %v16948_v4 = vunpack.i.l.bf16 %v16912_v6 }
 0x40d   :  { %v4974_v25 = vsel %vm4957_vm8, %v4941_v54, %v16946_v12  ;;  %v4846_v13 = vsel %vm4826_vm5, %v14865_v61, %v16947_v0  ;;  %v5232_v54 = vsel %vm4990_vm9, %v5200_v57, %v7487_v31  ;;  %v16950_v7 = vunpack.i.h.bf16 %v16912_v6  ;;  %v7580_v61 = vpop.permute.xlu1 %7579 }
 0x40e   :  { %v5007_v50 = vsel %vm4990_vm9, %v4974_v25, %v7471_v30  ;;  %v5105_v63 = vsel %vm4859_vm6, %v5073_v1, %v16948_v4  ;;  %v16949_v30 = vld [vmem:[#allocation23_spill] sm:$0xff]  ;;  %v7582_v3 = vunpack.i.h.bf16 %v7580_v61  ;;  %v7581_v29 = vunpack.i.l.bf16 %v7580_v61  ;;  %v7500_v16 = vpop.permute.xlu0 %7499 }
 0x40f   :  { %5398 = vmatmul.mubr.f32.gmra.mrb[136].mxu0 %v5007_v50  ;;  %v7022_v59 = vunpack.i.h.bf16 %v16949_v30  ;;  %v7021_v19 = vunpack.i.l.bf16 %v16949_v30  ;;  %v5106_v38 = vsel %vm4859_vm6, %v5074_v34, %v16950_v7  ;;  %v5137_v43 = vsel %vm497_vm0, %v5105_v63, %v7071_v62 }
 0x410   :  { %5402 = vmatprep.mubr.f32.mxu0 %v5232_v54  ;;  %v5138_v10 = vsel %vm497_vm0, %v5106_v38, %v7072_v21  ;;  %v16951_v1 = vunpack.i.h.bf16 %v16897_v15  ;;  %v7327_v27 = vunpack.i.h.bf16 %v14365_v26  ;;  %v7326_v24 = vunpack.i.l.bf16 %v14365_v26 }
 0x411   :  { %v7476_v6 = vunpack.i.l.bf16 %v14813_v23  ;;  %v7502_v62 = vunpack.i.h.bf16 %v7500_v16  ;;  %v7501_v34 = vunpack.i.l.bf16 %v7500_v16  ;;  %v5177_v21 = vsel %vm4924_vm7, %v14584_v5, %v7581_v29  ;;  %v15030_v50 = vpop.permute.xlu1 %7584  ;;  %v16956_v29 = vld [vmem:[#allocation19_spill] sm:$0xff] }
 0x412   :  { %v4975_v31 = vsel %vm4957_vm8, %v4942_v36, %v16951_v1  ;;  %v5178_v15 = vsel %vm4924_vm7, %v14587_v46, %v7582_v3  ;;  %v7077_v12 = vunpack.i.h.bf16 %v16952_v32  ;;  %v7076_v25 = vunpack.i.l.bf16 %v16952_v32  ;;  %v7505_v4 = vpop.permute.xlu0 %7504 }
 0x413   :  { %v5008_v39 = vsel %vm4990_vm9, %v4975_v31, %v7472_v53  ;;  %v15033_v26 = vsel %vm4957_vm8, %v5177_v21, %v7326_v24  ;;  %v15036_v53 = vsel %vm4957_vm8, %v5178_v15, %v7327_v27  ;;  %v4910_v57 = vsel %vm497_vm0, %v4878_v17, %v7021_v19  ;;  %v16954_v17 = vld [vmem:[#allocation161_spill] sm:$0xff]  ;;  %v16957_v31 = vld [vmem:[#allocation163_spill] sm:$0xff] }
 0x414   :  { %5403 = vmatmul.mubr.f32.gmra.mrb[138].mxu0 %v5008_v39  ;;  %v7477_v36 = vunpack.i.h.bf16 %v14813_v23  ;;  %v5169_v5 = vsel %vm4924_vm7, %v5137_v43, %v7501_v34  ;;  %v5170_v46 = vsel %vm4924_vm7, %v5138_v10, %v7502_v62  ;;  %v7491_v0 = vunpack.i.l.bf16 %v14831_v56  ;;  %v16958_v15 = vld [vmem:[#allocation101_spill] sm:$0xff] }
 0x415   :  { %v5201_v63 = vsel %vm4957_vm8, %v5169_v5, %v7076_v25  ;;  %v4943_v54 = vsel %vm4924_vm7, %v4910_v57, %v7476_v6  ;;  %v5202_v30 = vsel %vm4957_vm8, %v5170_v46, %v7077_v12  ;;  %v16953_v7 = vunpack.i.h.bf16 %v16934_v28  ;;  %v7595_v24 = vpop.permute.xlu1 %7594  ;;  %v16959_v12 = vld [vmem:[#allocation124_spill] sm:$0xff] }
 0x416   :  { %v7051_v19 = vunpack.i.l.bf16 %v16954_v17  ;;  %v7507_v23 = vunpack.i.h.bf16 %v7505_v4  ;;  %v7506_v61 = vunpack.i.l.bf16 %v7505_v4  ;;  %v16955_v43 = vunpack.i.h.bf16 %v16932_v58  ;;  %v15061_v62 = vpop.permute.xlu0 %7509  ;;  %v16960_v57 = vld [vmem:[#allocation80_spill] sm:$0xff] }
 0x417   :  { %v4879_v38 = vsel %vm4859_vm6, %v4846_v13, %v16953_v7  ;;  %v7096_v1 = vunpack.i.l.bf16 %v16956_v29  ;;  %v7227_v27 = vunpack.i.h.bf16 %v16957_v31  ;;  %v7597_v6 = vunpack.i.h.bf16 %v7595_v24 }
 0x418   :  { %v5076_v10 = vsel %vm4826_vm5, %v14927_v41, %v16955_v43  ;;  %v4911_v3 = vsel %vm497_vm0, %v4879_v38, %v7022_v59  ;;  %v7596_v28 = vunpack.i.l.bf16 %v7595_v24  ;;  %v5233_v13 = vsel %vm4990_vm9, %v5201_v63, %v7506_v61  ;;  %v16963_v38 = vld [vmem:[#allocation111_spill] sm:$0xff] }
 0x419   :  { %v4976_v16 = vsel %vm4957_vm8, %v4943_v54, %v7051_v19  ;;  %v7226_v39 = vunpack.i.l.bf16 %v16957_v31  ;;  %v7492_v58 = vunpack.i.h.bf16 %v14831_v56  ;;  %5407 = vmatprep.mubr.f32.mxu0 %v5233_v13  ;;  %v4944_v59 = vsel %vm4924_vm7, %v4911_v3, %v7477_v36  ;;  %v16964_v3 = vld [vmem:[#allocation4_spill] sm:$0xff]  ;;  %v16965_v31 = vld [vmem:[#allocation119_spill] sm:$0xff] }
 0x41a   :  { %v5009_v41 = vsel %vm4990_vm9, %v4976_v16, %v7491_v0  ;;  %v7052_v34 = vunpack.i.h.bf16 %v16954_v17  ;;  %v5234_v21 = vsel %vm4990_vm9, %v5202_v30, %v7507_v23  ;;  %v4955_v32 = vsel %vm4924_vm7, %v16958_v15, %v7596_v28  ;;  %v7520_v61 = vpop.permute.xlu0 %7519  ;;  %v16967_v16 = vld [vmem:[#allocation5_spill] sm:$0xff] }
 0x41b   :  { %5408 = vmatmul.mubr.f32.gmra.mrb[140].mxu0 %v5009_v41  ;;  %v4956_v25 = vsel %vm4924_vm7, %v16959_v12, %v7597_v6  ;;  %v7107_v56 = vunpack.i.h.bf16 %v16960_v57  ;;  %v7106_v5 = vunpack.i.l.bf16 %v16960_v57  ;;  %v15074_v46 = vsel %vm4957_vm8, %v4955_v32, %v7226_v39  ;;  %v16966_v6 = vld [vmem:[#allocation2_spill] sm:$0xff]  ;;  %v16968_v12 = vld [vmem:[#allocation48_spill] sm:$0xff] }
 0x41c   :  { %5412 = vmatprep.mubr.f32.mxu0 %v5234_v21  ;;  %v15077_v36 = vsel %vm4957_vm8, %v4956_v25, %v7227_v27  ;;  %v16961_v0 = vunpack.i.l.bf16 %v16930_v2  ;;  %v16962_v63 = vunpack.i.h.bf16 %v16930_v2  ;;  %v7097_v30 = vunpack.i.h.bf16 %v16956_v29 }
 0x41d   :  { %v4977_v7 = vsel %vm4957_vm8, %v4944_v59, %v7052_v34  ;;  %v7092_v17 = vunpack.i.h.bf16 %v16963_v38  ;;  %v7091_v19 = vunpack.i.l.bf16 %v16963_v38  ;;  %v7496_v23 = vunpack.i.l.bf16 %v14995_v8  ;;  %v16972_v38 = vld [vmem:[#allocation152_spill] sm:$0xff] }
 0x41e   :  { %v5107_v4 = vsel %vm4859_vm6, %v14941_v9, %v16961_v0  ;;  %v5108_v54 = vsel %vm4859_vm6, %v5076_v10, %v16962_v63  ;;  %v5010_v43 = vsel %vm4990_vm9, %v4977_v7, %v7492_v58  ;;  %v4818_v9 = vsel %vm4793_vm4, %v16964_v3, %v7096_v1  ;;  %v7525_v34 = vpop.permute.xlu0 %7524  ;;  %v16970_v63 = vld [vmem:[#allocation122_spill] sm:$0xff] }
 0x41f   :  { %v7126_v2 = vunpack.i.l.bf16 %v16965_v31  ;;  %v7522_v27 = vunpack.i.h.bf16 %v7520_v61  ;;  %v7521_v10 = vunpack.i.l.bf16 %v7520_v61  ;;  %5413 = vmatmul.mubr.f32.gmra.mrb[142].mxu0 %v5010_v43  ;;  %v5139_v29 = vsel %vm497_vm0, %v5107_v4, %v7106_v5 }
 0x420   :  { %v5140_v24 = vsel %vm497_vm0, %v5108_v54, %v7107_v56  ;;  %v7112_v28 = vunpack.i.h.bf16 %v16966_v6  ;;  %v7111_v13 = vunpack.i.l.bf16 %v16966_v6  ;;  %v15101_v39 = vsel %vm4793_vm4, %v16967_v16, %v7097_v30  ;;  %v16971_v30 = vld [vmem:[#allocation160_spill] sm:$0xff] }
 0x421   :  { %v7497_v58 = vunpack.i.h.bf16 %v14995_v8  ;;  %v5171_v1 = vsel %vm4924_vm7, %v5139_v29, %v7521_v10  ;;  %v5172_v41 = vsel %vm4924_vm7, %v5140_v24, %v7522_v27  ;;  %v7511_v59 = vunpack.i.l.bf16 %v15061_v62  ;;  %v16973_v10 = vld [vmem:[#allocation81_spill] sm:$0xff] }
 0x422   :  { %v5203_v21 = vsel %vm4957_vm8, %v5171_v1, %v7111_v13  ;;  %v4945_v15 = vsel %vm4924_vm7, %v14903_v55, %v7496_v23  ;;  %v5204_v32 = vsel %vm4957_vm8, %v5172_v41, %v7112_v28  ;;  %v16969_v25 = vunpack.i.l.bf16 %v16968_v12  ;;  %v16974_v13 = vld [vmem:[#allocation149_spill] sm:$0xff]  ;;  %v16975_v41 = vld [vmem:[#allocation8_spill] sm:$0xff] }
 0x423   :  { %v7541_v8 = vunpack.i.l.bf16 %v14907_v33  ;;  %v7527_v56 = vunpack.i.h.bf16 %v7525_v34  ;;  %v7526_v5 = vunpack.i.l.bf16 %v7525_v34  ;;  %v7127_v0 = vunpack.i.h.bf16 %v16965_v31  ;;  %v16988_v31 = vld [vmem:[#allocation71_spill] sm:$0xff] }
 0x424   :  { %v4851_v57 = vsel %vm4826_vm5, %v4818_v9, %v16969_v25  ;;  %v7141_v54 = vunpack.i.l.bf16 %v16970_v63  ;;  %v7146_v7 = vunpack.i.l.bf16 %v16971_v30  ;;  %v7157_v55 = vunpack.i.h.bf16 %v16972_v38  ;;  %v15124_v9 = vpop.permute.xlu0 %7534  ;;  %v16980_v25 = vld [vmem:[#allocation155_spill] sm:$0xff] }
 0x425   :  { %v4884_v4 = vsel %vm4859_vm6, %v4851_v57, %v7126_v2  ;;  %v7156_v23 = vunpack.i.l.bf16 %v16972_v38  ;;  %v5235_v61 = vsel %vm4990_vm9, %v5203_v21, %v7526_v5  ;;  %v4978_v43 = vsel %vm4957_vm8, %v4945_v15, %v7091_v19 }
 0x426   :  { %v7512_v3 = vunpack.i.h.bf16 %v15061_v62  ;;  %5417 = vmatprep.mubr.f32.mxu0 %v5235_v61  ;;  %v5011_v27 = vsel %vm4990_vm9, %v4978_v43, %v7511_v59  ;;  %v4946_v2 = vsel %vm4924_vm7, %v14923_v47, %v7497_v58  ;;  %v5141_v29 = vsel %vm497_vm0, %v16973_v10, %v7146_v7 }
 0x427   :  { %v7542_v24 = vunpack.i.h.bf16 %v14907_v33  ;;  %v7546_v6 = vunpack.i.l.bf16 %v14936_v18  ;;  %5418 = vmatmul.mubr.f32.gmra.mrb[144].mxu0 %v5011_v27  ;;  %v5236_v19 = vsel %vm4990_vm9, %v5204_v32, %v7527_v56  ;;  %v5173_v62 = vsel %vm4924_vm7, %v5141_v29, %v7541_v8  ;;  %v16982_v27 = vld [vmem:[#allocation117_spill] sm:$0xff]  ;;  %v16983_v29 = vld [vmem:[#allocation50_spill] sm:$0xff] }
 0x428   :  { %v7147_v28 = vunpack.i.h.bf16 %v16971_v30  ;;  %v7151_v1 = vunpack.i.l.bf16 %v16974_v13  ;;  %v16976_v59 = vrot.slane %v16975_v41, 3  ;;  %v16977_v47 = vrot.slane %v16967_v16, 3  ;;  %5422 = vmatprep.mubr.f32.mxu0 %v5236_v19  ;;  %v15152_v16 = vpop.permute.xlu0 %7549  ;;  %v16981_v30 = vld [vmem:[#allocation82_spill] sm:$0xff] }
 0x429   :  { %v16978_v34 = vrot.slane %v16670_v37, 3  ;;  %v7161_v57 = vunpack.i.l.bf16 %v16980_v25  ;;  %v4979_v8 = vsel %vm4957_vm8, %v4946_v2, %v7092_v17  ;;  %v7531_v56 = vunpack.i.l.bf16 %v14882_v44 }
 0x42a   :  { %v3615_v58 = vsel %vm3564_vm3, %v16977_v47, %v16976_v59  ;;  %v16979_v33 = vmov %v16976_v59  ;;  %v5012_v5 = vsel %vm4990_vm9, %v4979_v8, %v7512_v3  ;;  %v5205_v37 = vsel %vm4957_vm8, %v5173_v62, %v7151_v1 }
 0x42b   :  { %v3617_v21 = vsel %vm3564_vm3, %v16979_v33, %v16978_v34  ;;  %v5047_v32 = vsel %vm4793_vm4, %v3615_v58, %v7156_v23  ;;  %v5142_v7 = vsel %vm497_vm0, %v16981_v30, %v7147_v28  ;;  %v7162_v38 = vunpack.i.h.bf16 %v16980_v25  ;;  %5423 = vmatmul.mubr.f32.gmra.mrb[146].mxu0 %v5012_v5 }
 0x42c   :  { %v5048_v15 = vsel %vm4793_vm4, %v3617_v21, %v7157_v55  ;;  %v7547_v55 = vunpack.i.h.bf16 %v14936_v18  ;;  %v5237_v23 = vsel %vm4990_vm9, %v5205_v37, %v7546_v6  ;;  %v5174_v17 = vsel %vm4924_vm7, %v5142_v7, %v7542_v24  ;;  %v16987_v37 = vld [vmem:[#allocation62_spill] sm:$0xff] }
 0x42d   :  { %v7142_v61 = vunpack.i.h.bf16 %v16970_v63  ;;  %v7152_v43 = vunpack.i.h.bf16 %v16974_v13  ;;  %v7187_v3 = vunpack.i.h.bf16 %v16982_v27  ;;  %v7186_v2 = vunpack.i.l.bf16 %v16982_v27  ;;  %5427 = vmatprep.mubr.f32.mxu0 %v5237_v23  ;;  %v7560_v13 = vpop.permute.xlu0 %7559 }
 0x42e   :  { %v4916_v10 = vsel %vm497_vm0, %v4884_v4, %v7141_v54  ;;  %v16984_v19 = vunpack.i.l.bf16 %v16983_v29  ;;  %v16985_v62 = vunpack.i.h.bf16 %v16983_v29  ;;  %v7532_v24 = vunpack.i.h.bf16 %v14882_v44 }
 0x42f   :  { %v7536_v28 = vunpack.i.l.bf16 %v15124_v9  ;;  %v5013_v1 = vsel %vm4990_vm9, %v14885_v48, %v7531_v56  ;;  %v5206_v4 = vsel %vm4957_vm8, %v5174_v17, %v7152_v43  ;;  %v7562_v41 = vunpack.i.h.bf16 %v7560_v13 }
 0x430   :  { %v5079_v18 = vsel %vm4826_vm5, %v5047_v32, %v16984_v19  ;;  %v5080_v6 = vsel %vm4826_vm5, %v5048_v15, %v16985_v62  ;;  %v7561_v59 = vunpack.i.l.bf16 %v7560_v13  ;;  %5428 = vmatmul.mubr.f32.gmra.mrb[148].mxu0 %v5013_v1  ;;  %v5238_v47 = vsel %vm4990_vm9, %v5206_v4, %v7547_v55  ;;  %v16990_v1 = vld [vmem:[#allocation54_spill] sm:$0xff] }
 0x431   :  { %v5111_v63 = vsel %vm4859_vm6, %v5079_v18, %v7161_v57  ;;  %v5112_v54 = vsel %vm4859_vm6, %v5080_v6, %v7162_v38  ;;  %v7262_v34 = vunpack.i.h.bf16 %v14411_v11  ;;  %v7261_v33 = vunpack.i.l.bf16 %v14411_v11  ;;  %5432 = vmatprep.mubr.f32.mxu0 %v5238_v47  ;;  %v7565_v57 = vpop.permute.xlu0 %7564  ;;  %v16989_v6 = vld [vmem:[#allocation30_spill] sm:$0xff] }
 0x432   :  { %v5143_v58 = vsel %vm497_vm0, %v5111_v63, %v7186_v2  ;;  %v5144_v44 = vsel %vm497_vm0, %v5112_v54, %v7187_v3  ;;  %v7537_v48 = vunpack.i.h.bf16 %v15124_v9  ;;  %v5014_v21 = vsel %vm4990_vm9, %v14888_v42, %v7532_v24  ;;  %v16991_v54 = vld [vmem:[#allocation18_spill] sm:$0xff] }
 0x433   :  { %v5175_v15 = vsel %vm4924_vm7, %v5143_v58, %v7561_v59  ;;  %v5176_v32 = vsel %vm4924_vm7, %v5144_v44, %v7562_v41  ;;  %v7551_v25 = vunpack.i.l.bf16 %v15152_v16  ;;  %v4949_v56 = vsel %vm4924_vm7, %v4916_v10, %v7536_v28  ;;  %v15224_v28 = vpop.permute.xlu1 %7609 }
 0x434   :  { %v5207_v8 = vsel %vm4957_vm8, %v5175_v15, %v7261_v33  ;;  %v5208_v5 = vsel %vm4957_vm8, %v5176_v32, %v7262_v34  ;;  %v16986_v11 = vunpack.i.h.bf16 %v16968_v12  ;;  %v7171_v42 = vunpack.i.l.bf16 %v16987_v37  ;;  %5433 = vmatmul.mubr.f32.gmra.mrb[150].mxu0 %v5014_v21 }
 0x435   :  { %v7567_v30 = vunpack.i.h.bf16 %v7565_v57  ;;  %v7566_v7 = vunpack.i.l.bf16 %v7565_v57  ;;  %v7552_v12 = vunpack.i.h.bf16 %v15152_v16  ;;  %v15206_v43 = vpop.permute.xlu0 %7574  ;;  %v7172_v3 = vunpack.i.h.bf16 %v16987_v37 }
 0x436   :  { %v4852_v9 = vsel %vm4826_vm5, %v15101_v39, %v16986_v11  ;;  %v4982_v17 = vsel %vm4957_vm8, %v4949_v56, %v7171_v42  ;;  %v7176_v2 = vunpack.i.l.bf16 %v16988_v31  ;;  %v7177_v10 = vunpack.i.h.bf16 %v16988_v31 }
 0x437   :  { %v4885_v38 = vsel %vm4859_vm6, %v4852_v9, %v7127_v0  ;;  %v5239_v23 = vsel %vm4990_vm9, %v5207_v8, %v7566_v7  ;;  %v5015_v39 = vsel %vm4990_vm9, %v4982_v17, %v7551_v25  ;;  %v7586_v0 = vunpack.i.l.bf16 %v15030_v50  ;;  %v4436_v57 = vpop.permute.xlu1 %4435 }
 0x438   :  { %v4917_v55 = vsel %vm497_vm0, %v4885_v38, %v7142_v61  ;;  %5437 = vmatprep.mubr.f32.mxu0 %v5239_v23  ;;  %v5240_v61 = vsel %vm4990_vm9, %v5208_v5, %v7567_v30  ;;  %v7571_v29 = vunpack.i.l.bf16 %v14977_v51  ;;  %v4822_v62 = vsel %vm4793_vm4, %v16820_v40, %v7176_v2  ;;  %v16992_v30 = vld [vmem:[#allocation44_spill] sm:$0xff] }
 0x439   :  { %v4950_v27 = vsel %vm4924_vm7, %v4917_v55, %v7537_v48  ;;  %5438 = vmatmul.mubr.f32.gmra.mrb[152].mxu0 %v5015_v39  ;;  %v15217_v19 = vpop.permute.xlu0 %7589  ;;  %v7191_v24 = vunpack.i.l.bf16 %v16989_v6  ;;  %v7587_v63 = vunpack.i.h.bf16 %v15030_v50  ;;  %v5241_v13 = vsel %vm4990_vm9, %v15033_v26, %v7586_v0 }
 0x43a   :  { %5442 = vmatprep.mubr.f32.mxu0 %v5240_v61  ;;  %v4983_v16 = vsel %vm4957_vm8, %v4950_v27, %v7172_v3  ;;  %v6611_v4 = vunpack.i.l.bf16 %v16990_v1  ;;  %v7206_v41 = vunpack.i.l.bf16 %v16991_v54  ;;  %v6612_v59 = vunpack.i.h.bf16 %v16990_v1  ;;  %v15287_v1 = vld [vmem:[%s15453_s4] ss:$0 sm:$0xff] }
 0x43b   :  { %v5016_v18 = vsel %vm4990_vm9, %v4983_v16, %v7552_v12  ;;  %v4823_v40 = vsel %vm4793_vm4, %v16823_v45, %v7177_v10  ;;  %v7572_v47 = vunpack.i.h.bf16 %v14977_v51  ;;  %v7192_v50 = vunpack.i.h.bf16 %v16989_v6  ;;  %v4758_v31 = vpop.permute.xlu1 %4757 }
 0x43c   :  { %v4855_v58 = vsel %vm4826_vm5, %v4822_v62, %v6611_v4  ;;  %v7576_v44 = vunpack.i.l.bf16 %v15206_v43  ;;  %v5017_v26 = vsel %vm4990_vm9, %v14981_v52, %v7571_v29  ;;  %v5242_v45 = vsel %vm4990_vm9, %v15036_v53, %v7587_v63 }
 0x43d   :  { %5443 = vmatmul.mubr.f32.gmra.mrb[154].mxu0 %v5016_v18  ;;  %v7600_v34 = vpop.permute.xlu0 %7599  ;;  %v4888_v33 = vsel %vm4859_vm6, %v4855_v58, %v7191_v24  ;;  %v7207_v51 = vunpack.i.h.bf16 %v16991_v54  ;;  %v7392_v32 = vunpack.i.h.bf16 %v14693_v35  ;;  %v7391_v25 = vunpack.i.l.bf16 %v14693_v35 }
 0x43e   :  { %5447 = vmatprep.mubr.f32.mxu0 %v5241_v13  ;;  %v7602_v48 = vunpack.i.h.bf16 %v7600_v34  ;;  %v7601_v21 = vunpack.i.l.bf16 %v7600_v34  ;;  %v4920_v15 = vsel %vm497_vm0, %v4888_v33, %v7206_v41  ;;  %v7577_v52 = vunpack.i.h.bf16 %v15206_v43 }
 0x43f   :  { %v5018_v8 = vsel %vm4990_vm9, %v14984_v60, %v7572_v47  ;;  %v7591_v5 = vunpack.i.l.bf16 %v15217_v19  ;;  %v4953_v35 = vsel %vm4924_vm7, %v4920_v15, %v7576_v44  ;;  %v4856_v42 = vsel %vm4826_vm5, %v4823_v40, %v6612_v59  ;;  %v4599_v18 = vpop.permute.xlu1 %4598 }
 0x440   :  { %v5179_v56 = vsel %vm4924_vm7, %v14680_v49, %v7601_v21  ;;  %v5180_v53 = vsel %vm4924_vm7, %v14683_v20, %v7602_v48  ;;  %v7216_v7 = vunpack.i.l.bf16 %v16992_v30  ;;  %v4889_v49 = vsel %vm4859_vm6, %v4856_v42, %v7192_v50 }
 0x441   :  { %5448 = vmatmul.mubr.f32.gmra.mrb[156].mxu0 %v5017_v26  ;;  %v7605_v11 = vpop.permute.xlu0 %7604  ;;  %v5211_v9 = vsel %vm4957_vm8, %v5179_v56, %v7391_v25  ;;  %v5212_v37 = vsel %vm4957_vm8, %v5180_v53, %v7392_v32  ;;  %v4921_v20 = vsel %vm497_vm0, %v4889_v49, %v7207_v51  ;;  %v7592_v17 = vunpack.i.h.bf16 %v15217_v19 }
 0x442   :  { %5452 = vmatprep.mubr.f32.mxu0 %v5242_v45  ;;  %v7607_v60 = vunpack.i.h.bf16 %v7605_v11  ;;  %v7606_v38 = vunpack.i.l.bf16 %v7605_v11  ;;  %v4986_v23 = vsel %vm4957_vm8, %v4953_v35, %v7216_v7  ;;  %v4954_v39 = vsel %vm4924_vm7, %v4921_v20, %v7577_v52 }
 0x443   :  { %v5019_v43 = vsel %vm4990_vm9, %v4986_v23, %v7591_v5  ;;  %v7217_v27 = vunpack.i.h.bf16 %v16992_v30  ;;  %v5181_v3 = vsel %vm4924_vm7, %v14840_v14, %v4436_v57  ;;  %v7611_v10 = vunpack.i.l.bf16 %v15224_v28 }
 0x444   :  { %v5243_v55 = vsel %vm4990_vm9, %v5211_v9, %v7606_v38  ;;  %v5244_v2 = vsel %vm4990_vm9, %v5212_v37, %v7607_v60  ;;  %v7612_v62 = vunpack.i.h.bf16 %v15224_v28 }
 0x445   :  { %5453 = vmatmul.mubr.f32.gmra.mrb[158].mxu0 %v5018_v8  ;;  %v4597_v12 = vpop.permute.xlu0 %4596  ;;  %v4987_v61 = vsel %vm4957_vm8, %v4954_v39, %v7217_v27  ;;  %v5021_v24 = vsel %vm4990_vm9, %v15074_v46, %v7611_v10 }
 0x446   :  { %5457 = vmatprep.mubr.f32.mxu0 %v5243_v55  ;;  %v5213_v0 = vsel %vm4957_vm8, %v5181_v3, %v4597_v12  ;;  %v5020_v29 = vsel %vm4990_vm9, %v4987_v61, %v7592_v17 }
 0x447   :  { %v5245_v14 = vsel %vm4990_vm9, %v5213_v0, %v4758_v31 }
 0x449   :  { %5458 = vmatmul.mubr.f32.gmra.mrb[160].mxu0 %v5019_v43  ;;  %v4438_v16 = vpop.permute.xlu0 %4437 }
 0x44a   :  { %5462 = vmatprep.mubr.f32.mxu0 %v5244_v2  ;;  %v5182_v19 = vsel %vm4924_vm7, %v14843_v22, %v4438_v16  ;;  %v5022_v22 = vsel %vm4990_vm9, %v15077_v36, %v7612_v62 }
 0x44b   :  { %v5214_v63 = vsel %vm4957_vm8, %v5182_v19, %v4599_v18 }
 0x44c   :  { %v5319_v28 = vpop.f32.mrb[104].mxu0 }
 0x44d   :  { %5463 = vmatmul.mubr.f32.gmra.mrb[162].mxu0 %v5020_v29  ;;  %v4760_v6 = vpop.permute.xlu0 %4759  ;;  %v5320_v4 = vadd.f32 %v15287_v1, %v5319_v28  ;;  %v5321_v54 = vpop.f32.mrb[105].mxu0 }
 0x44e   :  { %5467 = vmatprep.mubr.f32.mxu0 %v5245_v14  ;;  %v5246_v13 = vsel %vm4990_vm9, %v5214_v63, %v4760_v6 }
 0x44f   :  { %v5478_v46 = vmax.f32 %v5320_v4, 0.0 }
 0x450   :  { %v5324_v41 = vpop.f32.mrb[106].mxu0 }
 0x451   :  { %5468 = vmatmul.mubr.f32.gmra.mrb[164].mxu0 %v5021_v24  ;;  %5510 = vst.msk [vmem:[%s15454_s5] sm:$0xff] %vm4826_vm5, %v5478_v46  ;;  %v5325_v59 = vadd.f32 %v15287_v1, %v5324_v41  ;;  %v5326_v36 = vpop.f32.mrb[107].mxu0 }
 0x452   :  { %5472 = vmatprep.mubr.f32.mxu0 %v5246_v13 }
 0x453   :  { %v5479_v40 = vmax.f32 %v5325_v59, 0.0 }
 0x455   :  { %5473 = vmatmul.mubr.f32.gmra.mrb[166].mxu0 %v5022_v22  ;;  %5511 = vst.msk [vmem:[%s15454_s5 + $0x8] sm:$0xff] %vm4826_vm5, %v5479_v40 }
 0x480   :  { %v5329_v47 = vpop.f32.mrb[108].mxu0 }
 0x481   :  { %v5330_v50 = vadd.f32 %v15287_v1, %v5329_v47  ;;  %v5331_v58 = vpop.f32.mrb[109].mxu0 }
 0x483   :  { %v5480_v44 = vmax.f32 %v5330_v50, 0.0 }
 0x485   :  { %v5334_v34 = vpop.f32.mrb[110].mxu0  ;;  %5512 = vst.msk [vmem:[%s15454_s5 + $0x10] sm:$0xff] %vm4826_vm5, %v5480_v44 }
 0x486   :  { %v5335_v26 = vadd.f32 %v15287_v1, %v5334_v34  ;;  %v5336_v33 = vpop.f32.mrb[111].mxu0 }
 0x488   :  { %v5481_v48 = vmax.f32 %v5335_v26, 0.0 }
 0x48a   :  { %v5339_v21 = vpop.f32.mrb[112].mxu0  ;;  %5513 = vst.msk [vmem:[%s15454_s5 + $0x18] sm:$0xff] %vm4826_vm5, %v5481_v48 }
 0x48b   :  { %v5340_v45 = vadd.f32 %v15287_v1, %v5339_v21  ;;  %v5341_v51 = vpop.f32.mrb[113].mxu0 }
 0x48d   :  { %v5482_v15 = vmax.f32 %v5340_v45, 0.0 }
 0x48f   :  { %v5344_v32 = vpop.f32.mrb[114].mxu0  ;;  %5514 = vst.msk [vmem:[%s15454_s5 + $0x20] sm:$0xff] %vm4826_vm5, %v5482_v15 }
 0x490   :  { %v5345_v25 = vadd.f32 %v15287_v1, %v5344_v32  ;;  %v5346_v57 = vpop.f32.mrb[115].mxu0 }
 0x492   :  { %v5483_v52 = vmax.f32 %v5345_v25, 0.0 }
 0x494   :  { %5515 = vst.msk [vmem:[%s15454_s5 + $0x28] sm:$0xff] %vm4826_vm5, %v5483_v52 }
 0x499   :  { %v5349_v8 = vpop.f32.mrb[116].mxu0 }
 0x49a   :  { %v5350_v56 = vadd.f32 %v15287_v1, %v5349_v8  ;;  %v5351_v53 = vpop.f32.mrb[117].mxu0 }
 0x49c   :  { %v5484_v5 = vmax.f32 %v5350_v56, 0.0 }
 0x49e   :  { %v5354_v11 = vpop.f32.mrb[118].mxu0  ;;  %5516 = vst.msk [vmem:[%s15454_s5 + $0x30] sm:$0xff] %vm4826_vm5, %v5484_v5 }
 0x49f   :  { %v5355_v9 = vadd.f32 %v15287_v1, %v5354_v11  ;;  %v5356_v35 = vpop.f32.mrb[119].mxu0 }
 0x4a1   :  { %v5485_v37 = vmax.f32 %v5355_v9, 0.0 }
 0x4a3   :  { %5517 = vst.msk [vmem:[%s15454_s5 + $0x38] sm:$0xff] %vm4826_vm5, %v5485_v37 }
 0x4a7   :  { %v5359_v42 = vpop.f32.mrb[120].mxu0 }
 0x4a8   :  { %v5360_v30 = vadd.f32 %v15287_v1, %v5359_v42  ;;  %v5361_v7 = vpop.f32.mrb[121].mxu0 }
 0x4aa   :  { %v5486_v60 = vmax.f32 %v5360_v30, 0.0 }
 0x4ab   :  { %v5364_v38 = vpop.f32.mrb[122].mxu0 }
 0x4ac   :  { %5518 = vst.msk [vmem:[%s15454_s5 + $0x40] sm:$0xff] %vm4826_vm5, %v5486_v60  ;;  %v5365_v49 = vadd.f32 %v15287_v1, %v5364_v38  ;;  %v5366_v20 = vpop.f32.mrb[123].mxu0 }
 0x4ae   :  { %v5487_v55 = vmax.f32 %v5365_v49, 0.0 }
 0x4b0   :  { %5519 = vst.msk [vmem:[%s15454_s5 + $0x48] sm:$0xff] %vm4826_vm5, %v5487_v55 }
 0x4b2   :  { %v5369_v23 = vpop.f32.mrb[124].mxu0 }
 0x4b3   :  { %v5370_v17 = vadd.f32 %v15287_v1, %v5369_v23  ;;  %v5371_v12 = vpop.f32.mrb[125].mxu0 }
 0x4b5   :  { %v5488_v43 = vmax.f32 %v5370_v17, 0.0 }
 0x4b6   :  { %v5374_v39 = vpop.f32.mrb[126].mxu0 }
 0x4b7   :  { %5520 = vst.msk [vmem:[%s15454_s5 + $0x50] sm:$0xff] %vm4826_vm5, %v5488_v43  ;;  %v5375_v27 = vadd.f32 %v15287_v1, %v5374_v39  ;;  %v5376_v3 = vpop.f32.mrb[127].mxu0 }
 0x4b9   :  { %v5489_v31 = vmax.f32 %v5375_v27, 0.0 }
 0x4bb   :  { %5521 = vst.msk [vmem:[%s15454_s5 + $0x58] sm:$0xff] %vm4826_vm5, %v5489_v31 }
 0x4bf   :  { %v5379_v2 = vpop.f32.mrb[128].mxu0 }
 0x4c0   :  { %v5380_v0 = vadd.f32 %v15287_v1, %v5379_v2  ;;  %v5381_v61 = vpop.f32.mrb[129].mxu0 }
 0x4c2   :  { %v5490_v10 = vmax.f32 %v5380_v0, 0.0 }
 0x4c3   :  { %v5384_v16 = vpop.f32.mrb[130].mxu0 }
 0x4c4   :  { %5522 = vst.msk [vmem:[%s15454_s5 + $0x60] sm:$0xff] %vm4826_vm5, %v5490_v10  ;;  %v5385_v29 = vadd.f32 %v15287_v1, %v5384_v16  ;;  %v5386_v19 = vpop.f32.mrb[131].mxu0 }
 0x4c6   :  { %v5491_v14 = vmax.f32 %v5385_v29, 0.0 }
 0x4c8   :  { %5523 = vst.msk [vmem:[%s15454_s5 + $0x68] sm:$0xff] %vm4826_vm5, %v5491_v14 }
 0x4d4   :  { %v5389_v18 = vpop.f32.mrb[132].mxu0 }
 0x4d5   :  { %v5390_v62 = vadd.f32 %v15287_v1, %v5389_v18  ;;  %v5391_v6 = vpop.f32.mrb[133].mxu0 }
 0x4d7   :  { %v5492_v24 = vmax.f32 %v5390_v62, 0.0 }
 0x4d8   :  { %v5394_v63 = vpop.f32.mrb[134].mxu0 }
 0x4d9   :  { %5524 = vst.msk [vmem:[%s15454_s5 + $0x70] sm:$0xff] %vm4826_vm5, %v5492_v24  ;;  %v5395_v13 = vadd.f32 %v15287_v1, %v5394_v63  ;;  %v5396_v22 = vpop.f32.mrb[135].mxu0 }
 0x4db   :  { %v5493_v28 = vmax.f32 %v5395_v13, 0.0 }
 0x4dd   :  { %5525 = vst.msk [vmem:[%s15454_s5 + $0x78] sm:$0xff] %vm4826_vm5, %v5493_v28 }
 0x4e2   :  { %v5399_v4 = vpop.f32.mrb[136].mxu0 }
 0x4e3   :  { %v5400_v54 = vadd.f32 %v15287_v1, %v5399_v4  ;;  %v5401_v46 = vpop.f32.mrb[137].mxu0 }
 0x4e5   :  { %v5494_v41 = vmax.f32 %v5400_v54, 0.0 }
 0x4e7   :  { %v5404_v59 = vpop.f32.mrb[138].mxu0  ;;  %5526 = vst.msk [vmem:[%s15454_s5 + $0x80] sm:$0xff] %vm4826_vm5, %v5494_v41 }
 0x4e8   :  { %v5405_v36 = vadd.f32 %v15287_v1, %v5404_v59  ;;  %v5406_v40 = vpop.f32.mrb[139].mxu0 }
 0x4ea   :  { %v5495_v47 = vmax.f32 %v5405_v36, 0.0 }
 0x4ec   :  { %5527 = vst.msk [vmem:[%s15454_s5 + $0x88] sm:$0xff] %vm4826_vm5, %v5495_v47 }
 0x4ee   :  { %v5409_v50 = vpop.f32.mrb[140].mxu0 }
 0x4ef   :  { %v5410_v58 = vadd.f32 %v15287_v1, %v5409_v50  ;;  %v5411_v44 = vpop.f32.mrb[141].mxu0 }
 0x4f1   :  { %v5496_v34 = vmax.f32 %v5410_v58, 0.0 }
 0x4f2   :  { %v5414_v26 = vpop.f32.mrb[142].mxu0 }
 0x4f3   :  { %5528 = vst.msk [vmem:[%s15454_s5 + $0x90] sm:$0xff] %vm4826_vm5, %v5496_v34  ;;  %v5415_v33 = vadd.f32 %v15287_v1, %v5414_v26  ;;  %v5416_v48 = vpop.f32.mrb[143].mxu0 }
 0x4f5   :  { %v5497_v21 = vmax.f32 %v5415_v33, 0.0 }
 0x4f7   :  { %5529 = vst.msk [vmem:[%s15454_s5 + $0x98] sm:$0xff] %vm4826_vm5, %v5497_v21 }
 0x4fa   :  { %v5419_v45 = vpop.f32.mrb[144].mxu0 }
 0x4fb   :  { %v5420_v51 = vadd.f32 %v15287_v1, %v5419_v45  ;;  %v5421_v15 = vpop.f32.mrb[145].mxu0 }
 0x4fd   :  { %v5498_v32 = vmax.f32 %v5420_v51, 0.0 }
 0x4fe   :  { %v5424_v25 = vpop.f32.mrb[146].mxu0 }
 0x4ff   :  { %5530 = vst.msk [vmem:[%s15454_s5 + $0xa0] sm:$0xff] %vm4826_vm5, %v5498_v32  ;;  %v5425_v57 = vadd.f32 %v15287_v1, %v5424_v25  ;;  %v5426_v52 = vpop.f32.mrb[147].mxu0 }
 0x501   :  { %v5499_v8 = vmax.f32 %v5425_v57, 0.0 }
 0x503   :  { %v5429_v56 = vpop.f32.mrb[148].mxu0  ;;  %5531 = vst.msk [vmem:[%s15454_s5 + $0xa8] sm:$0xff] %vm4826_vm5, %v5499_v8 }
 0x504   :  { %v5430_v53 = vadd.f32 %v15287_v1, %v5429_v56  ;;  %v5431_v5 = vpop.f32.mrb[149].mxu0 }
 0x506   :  { %v5500_v11 = vmax.f32 %v5430_v53, 0.0 }
 0x507   :  { %v5434_v9 = vpop.f32.mrb[150].mxu0 }
 0x508   :  { %5532 = vst.msk [vmem:[%s15454_s5 + $0xb0] sm:$0xff] %vm4826_vm5, %v5500_v11  ;;  %v5435_v35 = vadd.f32 %v15287_v1, %v5434_v9  ;;  %v5436_v37 = vpop.f32.mrb[151].mxu0 }
 0x50a   :  { %v5501_v42 = vmax.f32 %v5435_v35, 0.0 }
 0x50c   :  { %v5439_v30 = vpop.f32.mrb[152].mxu0  ;;  %5533 = vst.msk [vmem:[%s15454_s5 + $0xb8] sm:$0xff] %vm4826_vm5, %v5501_v42 }
 0x50d   :  { %v5440_v7 = vadd.f32 %v15287_v1, %v5439_v30  ;;  %v5441_v60 = vpop.f32.mrb[153].mxu0 }
 0x50f   :  { %v5502_v38 = vmax.f32 %v5440_v7, 0.0 }
 0x510   :  { %v5444_v49 = vpop.f32.mrb[154].mxu0 }
 0x511   :  { %5534 = vst.msk [vmem:[%s15454_s5 + $0xc0] sm:$0xff] %vm4826_vm5, %v5502_v38  ;;  %v5445_v20 = vadd.f32 %v15287_v1, %v5444_v49  ;;  %v5446_v55 = vpop.f32.mrb[155].mxu0 }
 0x513   :  { %v5503_v23 = vmax.f32 %v5445_v20, 0.0 }
 0x514   :  { %v5449_v17 = vpop.f32.mrb[156].mxu0 }
 0x515   :  { %5535 = vst.msk [vmem:[%s15454_s5 + $0xc8] sm:$0xff] %vm4826_vm5, %v5503_v23  ;;  %v5450_v12 = vadd.f32 %v15287_v1, %v5449_v17  ;;  %v5451_v43 = vpop.f32.mrb[157].mxu0 }
 0x517   :  { %v5504_v39 = vmax.f32 %v5450_v12, 0.0 }
 0x518   :  { %v5454_v27 = vpop.f32.mrb[158].mxu0 }
 0x519   :  { %5536 = vst.msk [vmem:[%s15454_s5 + $0xd0] sm:$0xff] %vm4826_vm5, %v5504_v39  ;;  %v5455_v3 = vadd.f32 %v15287_v1, %v5454_v27  ;;  %v5456_v31 = vpop.f32.mrb[159].mxu0 }
 0x51b   :  { %v5505_v2 = vmax.f32 %v5455_v3, 0.0 }
 0x51c   :  { %v5459_v0 = vpop.f32.mrb[160].mxu0 }
 0x51d   :  { %5537 = vst.msk [vmem:[%s15454_s5 + $0xd8] sm:$0xff] %vm4826_vm5, %v5505_v2  ;;  %v5460_v61 = vadd.f32 %v15287_v1, %v5459_v0  ;;  %v5461_v10 = vpop.f32.mrb[161].mxu0 }
 0x51f   :  { %v5506_v16 = vmax.f32 %v5460_v61, 0.0 }
 0x520   :  { %v5464_v29 = vpop.f32.mrb[162].mxu0 }
 0x521   :  { %5538 = vst.msk [vmem:[%s15454_s5 + $0xe0] sm:$0xff] %vm4826_vm5, %v5506_v16  ;;  %v5465_v19 = vadd.f32 %v15287_v1, %v5464_v29  ;;  %v5466_v14 = vpop.f32.mrb[163].mxu0 }
 0x523   :  { %v5507_v18 = vmax.f32 %v5465_v19, 0.0 }
 0x524   :  { %v5469_v62 = vpop.f32.mrb[164].mxu0 }
 0x525   :  { %5539 = vst.msk [vmem:[%s15454_s5 + $0xe8] sm:$0xff] %vm4826_vm5, %v5507_v18  ;;  %v5470_v6 = vadd.f32 %v15287_v1, %v5469_v62  ;;  %v5471_v24 = vpop.f32.mrb[165].mxu0 }
 0x527   :  { %v5508_v63 = vmax.f32 %v5470_v6, 0.0 }
 0x528   :  { %v5474_v13 = vpop.f32.mrb[166].mxu0 }
 0x529   :  { %5540 = vst.msk [vmem:[%s15454_s5 + $0xf0] sm:$0xff] %vm4826_vm5, %v5508_v63  ;;  %v5475_v22 = vadd.f32 %v15287_v1, %v5474_v13  ;;  %v5476_v28 = vpop.f32.mrb[167].mxu0 }
 0x52b   :  { %v5509_v4 = vmax.f32 %v5475_v22, 0.0 }
 0x52d   :  { %5541 = vst.msk [vmem:[%s15454_s5 + $0xf8] sm:$0xff] %vm4826_vm5, %v5509_v4 }

</bundles_post_ra>
